<compile_context>
chip_gen: v6e
topology: v6e:2x2x1
jax: 0.10.0
libtpu: 0.0.40
codegen_flags: <defaults>
</compile_context>

<pallas_src>
import functools

import jax
import jax.numpy as jnp
from jax.experimental import pallas as pl
from jax.experimental.pallas import tpu as pltpu


# ---------------------------------------------------------------------------
# Fused per-image kernel
# ---------------------------------------------------------------------------

def malaria_cnn_kernel(x_ref, w1_ref, b1_ref, w2_ref, b2_ref,
                       wfc1_ref, bfc1_ref, wfc2_ref, bfc2_ref,
                       o_ref,
                       x1pad_ref, t1_ref, y1pad_ref, t2_ref, h2_ref, feat_ref,
                       *, H, W):
    """Whole MalariaCNN forward for one image per grid step.

    x_ref:    (1, S, Cin) f32 image, rows in (y, x) raster order
    w1_ref:   (9*Cin, C1) bf16  conv1 weights (tap-major, ci-minor rows)
    w2_ref:   (9*C1, C2)  bf16  conv2 weights (tap-major, ci-minor rows)
    wfc1_ref: (P*C2, 128) bf16  fc1 weights pre-permuted to the feat order
    wfc2_ref: (128, NC)   bf16  fc2 weights
    biases:   (1, C) f32
    o_ref:    (1, 1, NC) f32 log-probabilities
    """
    S = H * W
    Hp, Wp = H // 2, W // 2
    Cin = x_ref.shape[-1]
    C1 = w1_ref.shape[1]
    C2 = w2_ref.shape[1]
    FW = Hp * C2                      # lanes per feat row (one row per px)
    pad = W + 1                       # flat-row zero padding above / below
    f32 = jnp.float32
    cdt = w2_ref.dtype                # bf16 MXU input dtype

    offs = [(dy, dx) for dy in (-1, 0, 1) for dx in (-1, 0, 1)]

    def build_taps(pad_ref, tap_ref, chans):
        """3x3 'same' taps from a flat-row zero-padded image, lane-banded."""
        # Zero only the pad rows; the interior was just overwritten.  (Do NOT
        # gate this on program_id: under megacore 'parallel' each core has
        # its own scratch and its own grid subset.)
        zeros = jnp.zeros((pad, chans), f32)
        pad_ref[pl.ds(0, pad), :] = zeros
        pad_ref[pl.ds(pad + S, pad), :] = zeros
        # dx wraps across image rows in the flat layout -> mask x boundaries
        # (dy boundaries are covered by the zero pad rows above/below).
        col = jax.lax.broadcasted_iota(jnp.int32, (S, chans), 0) % W
        not_left, not_right = col != 0, col != (W - 1)
        for t, (dy, dx) in enumerate(offs):
            tap = pad_ref[pl.ds(pad + dy * W + dx, S), :]
            if dx == -1:
                tap = jnp.where(not_left, tap, 0.0)
            elif dx == 1:
                tap = jnp.where(not_right, tap, 0.0)
            # Band store: cast fused into the store, bounds the live range.
            tap_ref[:, t * chans:(t + 1) * chans] = tap.astype(cdt)

    # ---- conv1 + ReLU: single K=9*Cin MXU matmul ---------------------------
    x1pad_ref[pl.ds(pad, S), :] = x_ref[0]
    build_taps(x1pad_ref, t1_ref, Cin)
    h1 = jnp.dot(t1_ref[...], w1_ref[...], preferred_element_type=f32)
    h1 = jnp.maximum(h1 + b1_ref[...], 0.0)                       # (S, C1) f32

    # ---- conv2 + ReLU: single K=9*C1 MXU matmul ----------------------------
    y1pad_ref[pl.ds(pad, S), :] = h1
    build_taps(y1pad_ref, t2_ref, C1)
    h2 = jnp.dot(t2_ref[...], w2_ref[...], preferred_element_type=f32)
    h2_ref[...] = jnp.maximum(h2 + b2_ref[...], 0.0)               # (S, C2) f32

    # ---- 2x2 stride-2 max-pool, stored straight into fc1 feature layout ----
    # feat[px, py*C2 + c] = pooled(py, px, c); wfc1 is pre-permuted to match,
    # so no transpose / reshape is needed before fc1.
    m1 = jnp.maximum(h2_ref[pl.ds(0, S // 2, stride=2), :],
                     h2_ref[pl.ds(1, S // 2, stride=2), :])        # rows (y, px)
    for py in range(Hp):
        top = m1[(2 * py) * Wp:(2 * py + 1) * Wp, :]
        bot = m1[(2 * py + 1) * Wp:(2 * py + 2) * Wp, :]
        feat_ref[:, py * C2:(py + 1) * C2] = jnp.maximum(top, bot).astype(cdt)

    # ---- fc1 + ReLU + dropout(identity) + fc2 + log_softmax ----------------
    # TODO(synk): nn.Dropout(0.5) is identity in eval/inference mode; omitted.
    h = jnp.zeros((1, wfc1_ref.shape[1]), f32)
    for px in range(Wp):
        h = h + jnp.dot(feat_ref[pl.ds(px, 1), :],
                        wfc1_ref[pl.ds(px * FW, FW), :],
                        preferred_element_type=f32)
    h = jnp.maximum(h + bfc1_ref[...], 0.0)                        # (1, 128)
    logits = jnp.dot(h.astype(cdt), wfc2_ref[...],
                     preferred_element_type=f32) + bfc2_ref[...]   # (1, NC)
    z = logits - jnp.max(logits, axis=-1, keepdims=True)
    lse = jnp.log(jnp.sum(jnp.exp(z), axis=-1, keepdims=True))
    o_ref[0] = (z - lse).astype(o_ref.dtype)


# ---------------------------------------------------------------------------
# pallas_call wrapper
# ---------------------------------------------------------------------------

def malaria_cnn_call(x_nsc, params, *, H, W):
    N, S, Cin = x_nsc.shape
    assert S == H * W and H % 2 == 0 and W % 2 == 0, (H, W, S)
    C1 = params["w1c"].shape[1]
    C2 = params["w2c"].shape[1]
    F1 = params["wfc1"].shape[1]
    NC = params["wfc2"].shape[1]
    Hp, Wp = H // 2, W // 2
    P = Hp * Wp
    const2 = lambda n: (0, 0)

    out = pl.pallas_call(
        functools.partial(malaria_cnn_kernel, H=H, W=W),
        out_shape=jax.ShapeDtypeStruct((N, 1, NC), jnp.float32),
        grid=(N,),
        in_specs=[
            pl.BlockSpec((1, S, Cin), lambda n: (n, 0, 0)),
            pl.BlockSpec((9 * Cin, C1), const2),
            pl.BlockSpec((1, C1), const2),
            pl.BlockSpec((9 * C1, C2), const2),
            pl.BlockSpec((1, C2), const2),
            pl.BlockSpec((P * C2, F1), const2),
            pl.BlockSpec((1, F1), const2),
            pl.BlockSpec((F1, NC), const2),
            pl.BlockSpec((1, NC), const2),
        ],
        out_specs=pl.BlockSpec((1, 1, NC), lambda n: (n, 0, 0)),
        scratch_shapes=[
            pltpu.VMEM((S + 2 * (W + 1), Cin), jnp.float32),   # padded input
            pltpu.VMEM((S, 9 * Cin), jnp.bfloat16),            # conv1 taps
            pltpu.VMEM((S + 2 * (W + 1), C1), jnp.float32),    # padded conv1 out
            pltpu.VMEM((S, 9 * C1), jnp.bfloat16),             # conv2 taps
            pltpu.VMEM((S, C2), jnp.float32),                  # conv2+ReLU out
            pltpu.VMEM((Wp, Hp * C2), jnp.bfloat16),           # pooled features
        ],
        compiler_params=pltpu.CompilerParams(
            dimension_semantics=("parallel",)),
    )(x_nsc, params["w1c"], params["b1c"], params["w2c"], params["b2c"],
      params["wfc1"], params["bfc1"], params["wfc2"], params["bfc2"])
    return out.reshape(N, NC)


# ---------------------------------------------------------------------------
# Parameter init / packing and forward
# ---------------------------------------------------------------------------

def init_params(key, num_classes=6, H=16, W=16):
    ks = jax.random.split(key, 8)
    Hp, Wp = H // 2, W // 2
    P, C2 = Hp * Wp, 64
    # PyTorch-shaped parameters (deterministic synthetic init).
    raw = {
        "conv1_w": jax.random.normal(ks[0], (32, 3, 3, 3), jnp.float32) * 0.10,
        "conv1_b": jax.random.normal(ks[1], (32,), jnp.float32) * 0.01,
        "conv2_w": jax.random.normal(ks[2], (64, 32, 3, 3), jnp.float32) * 0.05,
        "conv2_b": jax.random.normal(ks[3], (64,), jnp.float32) * 0.01,
        "fc1_w": jax.random.normal(ks[4], (128, C2 * P), jnp.float32) * 0.02,
        "fc1_b": jax.random.normal(ks[5], (128,), jnp.float32) * 0.01,
        "fc2_w": jax.random.normal(ks[6], (num_classes, 128), jnp.float32) * 0.05,
        "fc2_b": jax.random.normal(ks[7], (num_classes,), jnp.float32) * 0.01,
    }
    packed = {
        # (co,ci,kh,kw) -> (kh,kw,ci,co) -> (9*ci, co): row = tap*Cin + ci
        "w1c": raw["conv1_w"].transpose(2, 3, 1, 0).reshape(9 * 3, 32)
                              .astype(jnp.bfloat16),
        "b1c": raw["conv1_b"].reshape(1, 32),
        "w2c": raw["conv2_w"].transpose(2, 3, 1, 0).reshape(9 * 32, 64)
                              .astype(jnp.bfloat16),
        "b2c": raw["conv2_b"].reshape(1, 64),
        # fc1 rows permuted to the kernel's feature order:
        #   feat index = px*(Hp*C2) + py*C2 + c  <->  torch index = c*P + py*Wp + px
        "wfc1": raw["fc1_w"].reshape(128, C2, Hp, Wp).transpose(3, 2, 1, 0)
                             .reshape(Wp * Hp * C2, 128).astype(jnp.bfloat16),
        "bfc1": raw["fc1_b"].reshape(1, 128),
        "wfc2": raw["fc2_w"].T.astype(jnp.bfloat16),
        "bfc2": raw["fc2_b"].reshape(1, num_classes),
    }
    return raw, packed


@jax.jit
def malaria_cnn_forward(x_nchw, params):
    # NCHW -> (N, H*W, Cin) raster-order rows (cheap XLA transpose only; the
    # 9x conv1 tap expansion now happens inside the kernel in VMEM).
    N, Cin, H, W = x_nchw.shape
    x = jnp.transpose(x_nchw, (0, 2, 3, 1)).astype(jnp.float32)
    x = x.reshape(N, H * W, Cin)
    return malaria_cnn_call(x, params, H=H, W=W)


# ---------------------------------------------------------------------------
# Pure-JAX reference (independent path via lax.conv) for a sanity check
# ---------------------------------------------------------------------------

@jax.jit
def reference_forward(x_nchw, raw):
    x = x_nchw.astype(jnp.float32)

    def conv(inp, w, b):
        y = jax.lax.conv_general_dilated(
            inp, w, window_strides=(1, 1), padding=((1, 1), (1, 1)),
            dimension_numbers=("NCHW", "OIHW", "NCHW"))
        return jax.nn.relu(y + b[None, :, None, None])

    y = conv(x, raw["conv1_w"], raw["conv1_b"])
    y = conv(y, raw["conv2_w"], raw["conv2_b"])
    y = jax.lax.reduce_window(y, -jnp.inf, jax.lax.max,
                              (1, 1, 2, 2), (1, 1, 2, 2), "VALID")
    f = y.reshape(y.shape[0], -1)
    h = jax.nn.relu(f @ raw["fc1_w"].T + raw["fc1_b"])
    logits = h @ raw["fc2_w"].T + raw["fc2_b"]
    return jax.nn.log_softmax(logits, axis=-1)


if __name__ == "__main__":
    key = jax.random.PRNGKey(0)
    k_x, k_p = jax.random.split(key)

    N, C, H, W = 2, 3, 16, 16          # small shapes (see note at top)
    x = jax.random.normal(k_x, (N, C, H, W), jnp.float32)
    raw, params = init_params(k_p, num_classes=6, H=H, W=W)

    out = malaria_cnn_forward(x, params)
    out = jax.block_until_ready(out)

    assert out.shape == (N, 6), out.shape
    # log_softmax rows must exponentiate-sum to 1.
    row_sums = jnp.exp(out).sum(axis=1)
    assert bool(jnp.all(jnp.abs(row_sums - 1.0) < 1e-4)), row_sums

    # Cross-check against an independent f32 XLA reference (bf16 tolerance).
    ref = reference_forward(x, raw)
    max_err = float(jnp.max(jnp.abs(out - ref)))
    assert max_err < 5e-2, f"max |out - ref| = {max_err}"

    print("KERNEL_OK")
</pallas_src>

<mosaic_0001>
module attributes {stable_mosaic.version = 11 : i64} {
  func.func @malaria_cnn_kernel(%arg0: i32, %arg1: memref<1x256x3xf32, #tpu.memory_space<vmem>>, %arg2: memref<27x32xbf16, #tpu.memory_space<vmem>>, %arg3: memref<1x32xf32, #tpu.memory_space<vmem>>, %arg4: memref<288x64xbf16, #tpu.memory_space<vmem>>, %arg5: memref<1x64xf32, #tpu.memory_space<vmem>>, %arg6: memref<4096x128xbf16, #tpu.memory_space<vmem>>, %arg7: memref<1x128xf32, #tpu.memory_space<vmem>>, %arg8: memref<128x6xbf16, #tpu.memory_space<vmem>>, %arg9: memref<1x6xf32, #tpu.memory_space<vmem>>, %arg10: memref<1x1x6xf32, #tpu.memory_space<vmem>>, %arg11: memref<290x3xf32, #tpu.memory_space<vmem>>, %arg12: memref<256x27xbf16, #tpu.memory_space<vmem>>, %arg13: memref<290x32xf32, #tpu.memory_space<vmem>>, %arg14: memref<256x288xbf16, #tpu.memory_space<vmem>>, %arg15: memref<256x64xf32, #tpu.memory_space<vmem>>, %arg16: memref<8x512xbf16, #tpu.memory_space<vmem>>) attributes {dimension_semantics = [#tpu.dimension_semantics<parallel>], iteration_bounds = array<i64: 2>, scalar_prefetch = 0 : i64, scratch_operands = 6 : i64, tpu.core_type = #tpu.core_type<tc>, window_params = [{transform_indices = @transform_0, window_bounds = array<i64: 1, 256, 3>}, {pipeline_mode = #tpu.pipeline_mode<synchronous>, transform_indices = @transform_1, window_bounds = array<i64: 27, 32>}, {pipeline_mode = #tpu.pipeline_mode<synchronous>, transform_indices = @transform_2, window_bounds = array<i64: 1, 32>}, {pipeline_mode = #tpu.pipeline_mode<synchronous>, transform_indices = @transform_3, window_bounds = array<i64: 288, 64>}, {pipeline_mode = #tpu.pipeline_mode<synchronous>, transform_indices = @transform_4, window_bounds = array<i64: 1, 64>}, {pipeline_mode = #tpu.pipeline_mode<synchronous>, transform_indices = @transform_5, window_bounds = array<i64: 4096, 128>}, {pipeline_mode = #tpu.pipeline_mode<synchronous>, transform_indices = @transform_6, window_bounds = array<i64: 1, 128>}, {pipeline_mode = #tpu.pipeline_mode<synchronous>, transform_indices = @transform_7, window_bounds = array<i64: 128, 6>}, {pipeline_mode = #tpu.pipeline_mode<synchronous>, transform_indices = @transform_8, window_bounds = array<i64: 1, 6>}, {transform_indices = @transform_9, window_bounds = array<i64: 1, 1, 6>}]} {
    %c0 = arith.constant 0 : index
    %c0_0 = arith.constant 0 : index
    %c0_1 = arith.constant 0 : index
    %0 = vector.load %arg1[%c0, %c0_0, %c0_1] : memref<1x256x3xf32, #tpu.memory_space<vmem>>, vector<1x256x3xf32>
    %1 = vector.shape_cast %0 : vector<1x256x3xf32> to vector<256x3xf32>
    %c17 = arith.constant 17 : index
    %c0_2 = arith.constant 0 : index
    %2 = vector.load %arg11[%c17, %c0_2] : memref<290x3xf32, #tpu.memory_space<vmem>>, vector<256x3xf32>
    tpu.vector_store %arg11[%c17, %c0_2], %1 {strides = array<i32>} : memref<290x3xf32, #tpu.memory_space<vmem>>, vector<256x3xf32>,
    %cst = arith.constant 0.000000e+00 : f32
    %3 = vector.broadcast %cst : f32 to vector<17x3xf32>
    %c0_3 = arith.constant 0 : index
    %c0_4 = arith.constant 0 : index
    %4 = vector.load %arg11[%c0_3, %c0_4] : memref<290x3xf32, #tpu.memory_space<vmem>>, vector<17x3xf32>
    tpu.vector_store %arg11[%c0_3, %c0_4], %3 {strides = array<i32>} : memref<290x3xf32, #tpu.memory_space<vmem>>, vector<17x3xf32>,
    %c273 = arith.constant 273 : index
    %c0_5 = arith.constant 0 : index
    %5 = vector.load %arg11[%c273, %c0_5] : memref<290x3xf32, #tpu.memory_space<vmem>>, vector<17x3xf32>
    tpu.vector_store %arg11[%c273, %c0_5], %3 {strides = array<i32>} : memref<290x3xf32, #tpu.memory_space<vmem>>, vector<17x3xf32>,
    %6 = tpu.iota {dimensions = array<i32: 0>} : vector<256x3xi32>
    %c16_i32 = arith.constant 16 : i32
    %c0_i32 = arith.constant 0 : i32
    %7 = arith.cmpi eq, %c16_i32, %c0_i32 : i32
    %c1_i32 = arith.constant 1 : i32
    %8 = arith.select %7, %c1_i32, %c16_i32 : i32
    %9 = vector.broadcast %8 : i32 to vector<256x3xi32>
    %10 = arith.remsi %6, %9 : vector<256x3xi32>
    %c0_i32_6 = arith.constant 0 : i32
    %11 = vector.broadcast %c0_i32_6 : i32 to vector<256x3xi32>
    %12 = arith.cmpi ne, %10, %11 : vector<256x3xi32>
    %c0_i32_7 = arith.constant 0 : i32
    %13 = vector.broadcast %c0_i32_7 : i32 to vector<256x3xi32>
    %14 = arith.cmpi slt, %10, %13 : vector<256x3xi32>
    %c0_i32_8 = arith.constant 0 : i32
    %15 = arith.cmpi slt, %8, %c0_i32_8 : i32
    %16 = vector.broadcast %15 : i1 to vector<256x3xi1>
    %17 = vector.broadcast %16 : vector<256x3xi1> to vector<256x3xi1>
    %18 = arith.xori %14, %17 : vector<256x3xi1>
    %19 = arith.andi %18, %12 : vector<256x3xi1>
    %20 = vector.broadcast %8 : i32 to vector<256x3xi32>
    %21 = arith.addi %10, %20 : vector<256x3xi32>
    %22 = arith.select %19, %21, %10 : vector<256x3xi1>, vector<256x3xi32>
    %c0_i32_9 = arith.constant 0 : i32
    %23 = vector.broadcast %c0_i32_9 : i32 to vector<256x3xi32>
    %24 = arith.cmpi ne, %22, %23 : vector<256x3xi32>
    %c15_i32 = arith.constant 15 : i32
    %25 = vector.broadcast %c15_i32 : i32 to vector<256x3xi32>
    %26 = arith.cmpi ne, %22, %25 : vector<256x3xi32>
    %c0_10 = arith.constant 0 : index
    %c0_11 = arith.constant 0 : index
    %27 = vector.load %arg11[%c0_10, %c0_11] : memref<290x3xf32, #tpu.memory_space<vmem>>, vector<256x3xf32>
    %cst_12 = arith.constant 0.000000e+00 : f32
    %28 = vector.broadcast %cst_12 : f32 to vector<256x3xf32>
    %29 = arith.select %24, %27, %28 : vector<256x3xi1>, vector<256x3xf32>
    %30 = arith.truncf %29 : vector<256x3xf32> to vector<256x3xbf16>
    %c0_13 = arith.constant 0 : index
    %c0_14 = arith.constant 0 : index
    %31 = vector.load %arg12[%c0_13, %c0_14] : memref<256x27xbf16, #tpu.memory_space<vmem>>, vector<256x3xbf16>
    tpu.vector_store %arg12[%c0_13, %c0_14], %30 {strides = array<i32>} : memref<256x27xbf16, #tpu.memory_space<vmem>>, vector<256x3xbf16>,
    %c1 = arith.constant 1 : index
    %c0_15 = arith.constant 0 : index
    %32 = vector.load %arg11[%c1, %c0_15] : memref<290x3xf32, #tpu.memory_space<vmem>>, vector<256x3xf32>
    %33 = arith.truncf %32 : vector<256x3xf32> to vector<256x3xbf16>
    %c0_16 = arith.constant 0 : index
    %c3 = arith.constant 3 : index
    %34 = vector.load %arg12[%c0_16, %c3] : memref<256x27xbf16, #tpu.memory_space<vmem>>, vector<256x3xbf16>
    tpu.vector_store %arg12[%c0_16, %c3], %33 {strides = array<i32>} : memref<256x27xbf16, #tpu.memory_space<vmem>>, vector<256x3xbf16>,
    %c2 = arith.constant 2 : index
    %c0_17 = arith.constant 0 : index
    %35 = vector.load %arg11[%c2, %c0_17] : memref<290x3xf32, #tpu.memory_space<vmem>>, vector<256x3xf32>
    %cst_18 = arith.constant 0.000000e+00 : f32
    %36 = vector.broadcast %cst_18 : f32 to vector<256x3xf32>
    %37 = arith.select %26, %35, %36 : vector<256x3xi1>, vector<256x3xf32>
    %38 = arith.truncf %37 : vector<256x3xf32> to vector<256x3xbf16>
    %c0_19 = arith.constant 0 : index
    %c6 = arith.constant 6 : index
    %39 = vector.load %arg12[%c0_19, %c6] : memref<256x27xbf16, #tpu.memory_space<vmem>>, vector<256x3xbf16>
    tpu.vector_store %arg12[%c0_19, %c6], %38 {strides = array<i32>} : memref<256x27xbf16, #tpu.memory_space<vmem>>, vector<256x3xbf16>,
    %c16 = arith.constant 16 : index
    %c0_20 = arith.constant 0 : index
    %40 = vector.load %arg11[%c16, %c0_20] : memref<290x3xf32, #tpu.memory_space<vmem>>, vector<256x3xf32>
    %cst_21 = arith.constant 0.000000e+00 : f32
    %41 = vector.broadcast %cst_21 : f32 to vector<256x3xf32>
    %42 = arith.select %24, %40, %41 : vector<256x3xi1>, vector<256x3xf32>
    %43 = arith.truncf %42 : vector<256x3xf32> to vector<256x3xbf16>
    %c0_22 = arith.constant 0 : index
    %c9 = arith.constant 9 : index
    %44 = vector.load %arg12[%c0_22, %c9] : memref<256x27xbf16, #tpu.memory_space<vmem>>, vector<256x3xbf16>
    tpu.vector_store %arg12[%c0_22, %c9], %43 {strides = array<i32>} : memref<256x27xbf16, #tpu.memory_space<vmem>>, vector<256x3xbf16>,
    %c17_23 = arith.constant 17 : index
    %c0_24 = arith.constant 0 : index
    %45 = vector.load %arg11[%c17_23, %c0_24] : memref<290x3xf32, #tpu.memory_space<vmem>>, vector<256x3xf32>
    %46 = arith.truncf %45 : vector<256x3xf32> to vector<256x3xbf16>
    %c0_25 = arith.constant 0 : index
    %c12 = arith.constant 12 : index
    %47 = vector.load %arg12[%c0_25, %c12] : memref<256x27xbf16, #tpu.memory_space<vmem>>, vector<256x3xbf16>
    tpu.vector_store %arg12[%c0_25, %c12], %46 {strides = array<i32>} : memref<256x27xbf16, #tpu.memory_space<vmem>>, vector<256x3xbf16>,
    %c18 = arith.constant 18 : index
    %c0_26 = arith.constant 0 : index
    %48 = vector.load %arg11[%c18, %c0_26] : memref<290x3xf32, #tpu.memory_space<vmem>>, vector<256x3xf32>
    %cst_27 = arith.constant 0.000000e+00 : f32
    %49 = vector.broadcast %cst_27 : f32 to vector<256x3xf32>
    %50 = arith.select %26, %48, %49 : vector<256x3xi1>, vector<256x3xf32>
    %51 = arith.truncf %50 : vector<256x3xf32> to vector<256x3xbf16>
    %c0_28 = arith.constant 0 : index
    %c15 = arith.constant 15 : index
    %52 = vector.load %arg12[%c0_28, %c15] : memref<256x27xbf16, #tpu.memory_space<vmem>>, vector<256x3xbf16>
    tpu.vector_store %arg12[%c0_28, %c15], %51 {strides = array<i32>} : memref<256x27xbf16, #tpu.memory_space<vmem>>, vector<256x3xbf16>,
    %c32 = arith.constant 32 : index
    %c0_29 = arith.constant 0 : index
    %53 = vector.load %arg11[%c32, %c0_29] : memref<290x3xf32, #tpu.memory_space<vmem>>, vector<256x3xf32>
    %cst_30 = arith.constant 0.000000e+00 : f32
    %54 = vector.broadcast %cst_30 : f32 to vector<256x3xf32>
    %55 = arith.select %24, %53, %54 : vector<256x3xi1>, vector<256x3xf32>
    %56 = arith.truncf %55 : vector<256x3xf32> to vector<256x3xbf16>
    %c0_31 = arith.constant 0 : index
    %c18_32 = arith.constant 18 : index
    %57 = vector.load %arg12[%c0_31, %c18_32] : memref<256x27xbf16, #tpu.memory_space<vmem>>, vector<256x3xbf16>
    tpu.vector_store %arg12[%c0_31, %c18_32], %56 {strides = array<i32>} : memref<256x27xbf16, #tpu.memory_space<vmem>>, vector<256x3xbf16>,
    %c33 = arith.constant 33 : index
    %c0_33 = arith.constant 0 : index
    %58 = vector.load %arg11[%c33, %c0_33] : memref<290x3xf32, #tpu.memory_space<vmem>>, vector<256x3xf32>
    %59 = arith.truncf %58 : vector<256x3xf32> to vector<256x3xbf16>
    %c0_34 = arith.constant 0 : index
    %c21 = arith.constant 21 : index
    %60 = vector.load %arg12[%c0_34, %c21] : memref<256x27xbf16, #tpu.memory_space<vmem>>, vector<256x3xbf16>
    tpu.vector_store %arg12[%c0_34, %c21], %59 {strides = array<i32>} : memref<256x27xbf16, #tpu.memory_space<vmem>>, vector<256x3xbf16>,
    %c34 = arith.constant 34 : index
    %c0_35 = arith.constant 0 : index
    %61 = vector.load %arg11[%c34, %c0_35] : memref<290x3xf32, #tpu.memory_space<vmem>>, vector<256x3xf32>
    %cst_36 = arith.constant 0.000000e+00 : f32
    %62 = vector.broadcast %cst_36 : f32 to vector<256x3xf32>
    %63 = arith.select %26, %61, %62 : vector<256x3xi1>, vector<256x3xf32>
    %64 = arith.truncf %63 : vector<256x3xf32> to vector<256x3xbf16>
    %c0_37 = arith.constant 0 : index
    %c24 = arith.constant 24 : index
    %65 = vector.load %arg12[%c0_37, %c24] : memref<256x27xbf16, #tpu.memory_space<vmem>>, vector<256x3xbf16>
    tpu.vector_store %arg12[%c0_37, %c24], %64 {strides = array<i32>} : memref<256x27xbf16, #tpu.memory_space<vmem>>, vector<256x3xbf16>,
    %c0_38 = arith.constant 0 : index
    %c0_39 = arith.constant 0 : index
    %66 = vector.load %arg12[%c0_38, %c0_39] : memref<256x27xbf16, #tpu.memory_space<vmem>>, vector<256x27xbf16>
    %c0_40 = arith.constant 0 : index
    %c0_41 = arith.constant 0 : index
    %67 = vector.load %arg2[%c0_40, %c0_41] : memref<27x32xbf16, #tpu.memory_space<vmem>>, vector<27x32xbf16>
    %cst_42 = arith.constant dense<0.000000e+00> : vector<256x32xf32>
    %68 = tpu.matmul %66, %67, %cst_42 {dimension_numbers = #tpu.dot_dimension_numbers<[1], [0], [0], [1], [0, 0, 1, 1], [], []>} : vector<256x27xbf16>, vector<27x32xbf16>, vector<256x32xf32> -> vector<256x32xf32>
    %c0_43 = arith.constant 0 : index
    %c0_44 = arith.constant 0 : index
    %69 = vector.load %arg3[%c0_43, %c0_44] : memref<1x32xf32, #tpu.memory_space<vmem>>, vector<1x32xf32>
    %70 = vector.broadcast %69 : vector<1x32xf32> to vector<256x32xf32>
    %71 = arith.addf %68, %70 : vector<256x32xf32>
    %cst_45 = arith.constant 0.000000e+00 : f32
    %72 = vector.broadcast %cst_45 : f32 to vector<256x32xf32>
    %73 = arith.maximumf %71, %72 : vector<256x32xf32>
    %c17_46 = arith.constant 17 : index
    %c0_47 = arith.constant 0 : index
    %74 = vector.load %arg13[%c17_46, %c0_47] : memref<290x32xf32, #tpu.memory_space<vmem>>, vector<256x32xf32>
    tpu.vector_store %arg13[%c17_46, %c0_47], %73 {strides = array<i32>} : memref<290x32xf32, #tpu.memory_space<vmem>>, vector<256x32xf32>,
    %cst_48 = arith.constant 0.000000e+00 : f32
    %75 = vector.broadcast %cst_48 : f32 to vector<17x32xf32>
    %c0_49 = arith.constant 0 : index
    %c0_50 = arith.constant 0 : index
    %76 = vector.load %arg13[%c0_49, %c0_50] : memref<290x32xf32, #tpu.memory_space<vmem>>, vector<17x32xf32>
    tpu.vector_store %arg13[%c0_49, %c0_50], %75 {strides = array<i32>} : memref<290x32xf32, #tpu.memory_space<vmem>>, vector<17x32xf32>,
    %c273_51 = arith.constant 273 : index
    %c0_52 = arith.constant 0 : index
    %77 = vector.load %arg13[%c273_51, %c0_52] : memref<290x32xf32, #tpu.memory_space<vmem>>, vector<17x32xf32>
    tpu.vector_store %arg13[%c273_51, %c0_52], %75 {strides = array<i32>} : memref<290x32xf32, #tpu.memory_space<vmem>>, vector<17x32xf32>,
    %78 = tpu.iota {dimensions = array<i32: 0>} : vector<256x32xi32>
    %c16_i32_53 = arith.constant 16 : i32
    %c0_i32_54 = arith.constant 0 : i32
    %79 = arith.cmpi eq, %c16_i32_53, %c0_i32_54 : i32
    %c1_i32_55 = arith.constant 1 : i32
    %80 = arith.select %79, %c1_i32_55, %c16_i32_53 : i32
    %81 = vector.broadcast %80 : i32 to vector<256x32xi32>
    %82 = arith.remsi %78, %81 : vector<256x32xi32>
    %c0_i32_56 = arith.constant 0 : i32
    %83 = vector.broadcast %c0_i32_56 : i32 to vector<256x32xi32>
    %84 = arith.cmpi ne, %82, %83 : vector<256x32xi32>
    %c0_i32_57 = arith.constant 0 : i32
    %85 = vector.broadcast %c0_i32_57 : i32 to vector<256x32xi32>
    %86 = arith.cmpi slt, %82, %85 : vector<256x32xi32>
    %c0_i32_58 = arith.constant 0 : i32
    %87 = arith.cmpi slt, %80, %c0_i32_58 : i32
    %88 = vector.broadcast %87 : i1 to vector<256x32xi1>
    %89 = vector.broadcast %88 : vector<256x32xi1> to vector<256x32xi1>
    %90 = arith.xori %86, %89 : vector<256x32xi1>
    %91 = arith.andi %90, %84 : vector<256x32xi1>
    %92 = vector.broadcast %80 : i32 to vector<256x32xi32>
    %93 = arith.addi %82, %92 : vector<256x32xi32>
    %94 = arith.select %91, %93, %82 : vector<256x32xi1>, vector<256x32xi32>
    %c0_i32_59 = arith.constant 0 : i32
    %95 = vector.broadcast %c0_i32_59 : i32 to vector<256x32xi32>
    %96 = arith.cmpi ne, %94, %95 : vector<256x32xi32>
    %c15_i32_60 = arith.constant 15 : i32
    %97 = vector.broadcast %c15_i32_60 : i32 to vector<256x32xi32>
    %98 = arith.cmpi ne, %94, %97 : vector<256x32xi32>
    %c0_61 = arith.constant 0 : index
    %c0_62 = arith.constant 0 : index
    %99 = vector.load %arg13[%c0_61, %c0_62] : memref<290x32xf32, #tpu.memory_space<vmem>>, vector<256x32xf32>
    %cst_63 = arith.constant 0.000000e+00 : f32
    %100 = vector.broadcast %cst_63 : f32 to vector<256x32xf32>
    %101 = arith.select %96, %99, %100 : vector<256x32xi1>, vector<256x32xf32>
    %102 = arith.truncf %101 : vector<256x32xf32> to vector<256x32xbf16>
    %c0_64 = arith.constant 0 : index
    %c0_65 = arith.constant 0 : index
    %103 = vector.load %arg14[%c0_64, %c0_65] : memref<256x288xbf16, #tpu.memory_space<vmem>>, vector<256x32xbf16>
    tpu.vector_store %arg14[%c0_64, %c0_65], %102 {strides = array<i32>} : memref<256x288xbf16, #tpu.memory_space<vmem>>, vector<256x32xbf16>,
    %c1_66 = arith.constant 1 : index
    %c0_67 = arith.constant 0 : index
    %104 = vector.load %arg13[%c1_66, %c0_67] : memref<290x32xf32, #tpu.memory_space<vmem>>, vector<256x32xf32>
    %105 = arith.truncf %104 : vector<256x32xf32> to vector<256x32xbf16>
    %c0_68 = arith.constant 0 : index
    %c32_69 = arith.constant 32 : index
    %106 = vector.load %arg14[%c0_68, %c32_69] : memref<256x288xbf16, #tpu.memory_space<vmem>>, vector<256x32xbf16>
    tpu.vector_store %arg14[%c0_68, %c32_69], %105 {strides = array<i32>} : memref<256x288xbf16, #tpu.memory_space<vmem>>, vector<256x32xbf16>,
    %c2_70 = arith.constant 2 : index
    %c0_71 = arith.constant 0 : index
    %107 = vector.load %arg13[%c2_70, %c0_71] : memref<290x32xf32, #tpu.memory_space<vmem>>, vector<256x32xf32>
    %cst_72 = arith.constant 0.000000e+00 : f32
    %108 = vector.broadcast %cst_72 : f32 to vector<256x32xf32>
    %109 = arith.select %98, %107, %108 : vector<256x32xi1>, vector<256x32xf32>
    %110 = arith.truncf %109 : vector<256x32xf32> to vector<256x32xbf16>
    %c0_73 = arith.constant 0 : index
    %c64 = arith.constant 64 : index
    %111 = vector.load %arg14[%c0_73, %c64] : memref<256x288xbf16, #tpu.memory_space<vmem>>, vector<256x32xbf16>
    tpu.vector_store %arg14[%c0_73, %c64], %110 {strides = array<i32>} : memref<256x288xbf16, #tpu.memory_space<vmem>>, vector<256x32xbf16>,
    %c16_74 = arith.constant 16 : index
    %c0_75 = arith.constant 0 : index
    %112 = vector.load %arg13[%c16_74, %c0_75] : memref<290x32xf32, #tpu.memory_space<vmem>>, vector<256x32xf32>
    %cst_76 = arith.constant 0.000000e+00 : f32
    %113 = vector.broadcast %cst_76 : f32 to vector<256x32xf32>
    %114 = arith.select %96, %112, %113 : vector<256x32xi1>, vector<256x32xf32>
    %115 = arith.truncf %114 : vector<256x32xf32> to vector<256x32xbf16>
    %c0_77 = arith.constant 0 : index
    %c96 = arith.constant 96 : index
    %116 = vector.load %arg14[%c0_77, %c96] : memref<256x288xbf16, #tpu.memory_space<vmem>>, vector<256x32xbf16>
    tpu.vector_store %arg14[%c0_77, %c96], %115 {strides = array<i32>} : memref<256x288xbf16, #tpu.memory_space<vmem>>, vector<256x32xbf16>,
    %c17_78 = arith.constant 17 : index
    %c0_79 = arith.constant 0 : index
    %117 = vector.load %arg13[%c17_78, %c0_79] : memref<290x32xf32, #tpu.memory_space<vmem>>, vector<256x32xf32>
    %118 = arith.truncf %117 : vector<256x32xf32> to vector<256x32xbf16>
    %c0_80 = arith.constant 0 : index
    %c128 = arith.constant 128 : index
    %119 = vector.load %arg14[%c0_80, %c128] : memref<256x288xbf16, #tpu.memory_space<vmem>>, vector<256x32xbf16>
    tpu.vector_store %arg14[%c0_80, %c128], %118 {strides = array<i32>} : memref<256x288xbf16, #tpu.memory_space<vmem>>, vector<256x32xbf16>,
    %c18_81 = arith.constant 18 : index
    %c0_82 = arith.constant 0 : index
    %120 = vector.load %arg13[%c18_81, %c0_82] : memref<290x32xf32, #tpu.memory_space<vmem>>, vector<256x32xf32>
    %cst_83 = arith.constant 0.000000e+00 : f32
    %121 = vector.broadcast %cst_83 : f32 to vector<256x32xf32>
    %122 = arith.select %98, %120, %121 : vector<256x32xi1>, vector<256x32xf32>
    %123 = arith.truncf %122 : vector<256x32xf32> to vector<256x32xbf16>
    %c0_84 = arith.constant 0 : index
    %c160 = arith.constant 160 : index
    %124 = vector.load %arg14[%c0_84, %c160] : memref<256x288xbf16, #tpu.memory_space<vmem>>, vector<256x32xbf16>
    tpu.vector_store %arg14[%c0_84, %c160], %123 {strides = array<i32>} : memref<256x288xbf16, #tpu.memory_space<vmem>>, vector<256x32xbf16>,
    %c32_85 = arith.constant 32 : index
    %c0_86 = arith.constant 0 : index
    %125 = vector.load %arg13[%c32_85, %c0_86] : memref<290x32xf32, #tpu.memory_space<vmem>>, vector<256x32xf32>
    %cst_87 = arith.constant 0.000000e+00 : f32
    %126 = vector.broadcast %cst_87 : f32 to vector<256x32xf32>
    %127 = arith.select %96, %125, %126 : vector<256x32xi1>, vector<256x32xf32>
    %128 = arith.truncf %127 : vector<256x32xf32> to vector<256x32xbf16>
    %c0_88 = arith.constant 0 : index
    %c192 = arith.constant 192 : index
    %129 = vector.load %arg14[%c0_88, %c192] : memref<256x288xbf16, #tpu.memory_space<vmem>>, vector<256x32xbf16>
    tpu.vector_store %arg14[%c0_88, %c192], %128 {strides = array<i32>} : memref<256x288xbf16, #tpu.memory_space<vmem>>, vector<256x32xbf16>,
    %c33_89 = arith.constant 33 : index
    %c0_90 = arith.constant 0 : index
    %130 = vector.load %arg13[%c33_89, %c0_90] : memref<290x32xf32, #tpu.memory_space<vmem>>, vector<256x32xf32>
    %131 = arith.truncf %130 : vector<256x32xf32> to vector<256x32xbf16>
    %c0_91 = arith.constant 0 : index
    %c224 = arith.constant 224 : index
    %132 = vector.load %arg14[%c0_91, %c224] : memref<256x288xbf16, #tpu.memory_space<vmem>>, vector<256x32xbf16>
    tpu.vector_store %arg14[%c0_91, %c224], %131 {strides = array<i32>} : memref<256x288xbf16, #tpu.memory_space<vmem>>, vector<256x32xbf16>,
    %c34_92 = arith.constant 34 : index
    %c0_93 = arith.constant 0 : index
    %133 = vector.load %arg13[%c34_92, %c0_93] : memref<290x32xf32, #tpu.memory_space<vmem>>, vector<256x32xf32>
    %cst_94 = arith.constant 0.000000e+00 : f32
    %134 = vector.broadcast %cst_94 : f32 to vector<256x32xf32>
    %135 = arith.select %98, %133, %134 : vector<256x32xi1>, vector<256x32xf32>
    %136 = arith.truncf %135 : vector<256x32xf32> to vector<256x32xbf16>
    %c0_95 = arith.constant 0 : index
    %c256 = arith.constant 256 : index
    %137 = vector.load %arg14[%c0_95, %c256] : memref<256x288xbf16, #tpu.memory_space<vmem>>, vector<256x32xbf16>
    tpu.vector_store %arg14[%c0_95, %c256], %136 {strides = array<i32>} : memref<256x288xbf16, #tpu.memory_space<vmem>>, vector<256x32xbf16>,
    %c0_96 = arith.constant 0 : index
    %c0_97 = arith.constant 0 : index
    %138 = vector.load %arg14[%c0_96, %c0_97] : memref<256x288xbf16, #tpu.memory_space<vmem>>, vector<256x288xbf16>
    %c0_98 = arith.constant 0 : index
    %c0_99 = arith.constant 0 : index
    %139 = vector.load %arg4[%c0_98, %c0_99] : memref<288x64xbf16, #tpu.memory_space<vmem>>, vector<288x64xbf16>
    %cst_100 = arith.constant dense<0.000000e+00> : vector<256x64xf32>
    %140 = tpu.matmul %138, %139, %cst_100 {dimension_numbers = #tpu.dot_dimension_numbers<[1], [0], [0], [1], [0, 0, 1, 1], [], []>} : vector<256x288xbf16>, vector<288x64xbf16>, vector<256x64xf32> -> vector<256x64xf32>
    %c0_101 = arith.constant 0 : index
    %c0_102 = arith.constant 0 : index
    %141 = vector.load %arg5[%c0_101, %c0_102] : memref<1x64xf32, #tpu.memory_space<vmem>>, vector<1x64xf32>
    %142 = vector.broadcast %141 : vector<1x64xf32> to vector<256x64xf32>
    %143 = arith.addf %140, %142 : vector<256x64xf32>
    %cst_103 = arith.constant 0.000000e+00 : f32
    %144 = vector.broadcast %cst_103 : f32 to vector<256x64xf32>
    %145 = arith.maximumf %143, %144 : vector<256x64xf32>
    %c0_104 = arith.constant 0 : index
    %c0_105 = arith.constant 0 : index
    %146 = vector.load %arg15[%c0_104, %c0_105] : memref<256x64xf32, #tpu.memory_space<vmem>>, vector<256x64xf32>
    tpu.vector_store %arg15[%c0_104, %c0_105], %145 {strides = array<i32>} : memref<256x64xf32, #tpu.memory_space<vmem>>, vector<256x64xf32>,
    %c0_106 = arith.constant 0 : index
    %c0_107 = arith.constant 0 : index
    %147 = tpu.strided_load %arg15[%c0_106, %c0_107] {strides = array<i32: 2, 1>} : memref<256x64xf32, #tpu.memory_space<vmem>>, vector<128x64xf32>
    %c1_108 = arith.constant 1 : index
    %c0_109 = arith.constant 0 : index
    %148 = tpu.strided_load %arg15[%c1_108, %c0_109] {strides = array<i32: 2, 1>} : memref<256x64xf32, #tpu.memory_space<vmem>>, vector<128x64xf32>
    %149 = arith.maximumf %147, %148 : vector<128x64xf32>
    %150 = vector.extract_strided_slice %149 {offsets = [0, 0], sizes = [8, 64], strides = [1, 1]} : vector<128x64xf32> to vector<8x64xf32>
    %151 = vector.extract_strided_slice %149 {offsets = [8, 0], sizes = [8, 64], strides = [1, 1]} : vector<128x64xf32> to vector<8x64xf32>
    %152 = arith.maximumf %150, %151 : vector<8x64xf32>
    %153 = arith.truncf %152 : vector<8x64xf32> to vector<8x64xbf16>
    %c0_110 = arith.constant 0 : index
    %c0_111 = arith.constant 0 : index
    %154 = vector.load %arg16[%c0_110, %c0_111] : memref<8x512xbf16, #tpu.memory_space<vmem>>, vector<8x64xbf16>
    tpu.vector_store %arg16[%c0_110, %c0_111], %153 {strides = array<i32>} : memref<8x512xbf16, #tpu.memory_space<vmem>>, vector<8x64xbf16>,
    %155 = vector.extract_strided_slice %149 {offsets = [16, 0], sizes = [8, 64], strides = [1, 1]} : vector<128x64xf32> to vector<8x64xf32>
    %156 = vector.extract_strided_slice %149 {offsets = [24, 0], sizes = [8, 64], strides = [1, 1]} : vector<128x64xf32> to vector<8x64xf32>
    %157 = arith.maximumf %155, %156 : vector<8x64xf32>
    %158 = arith.truncf %157 : vector<8x64xf32> to vector<8x64xbf16>
    %c0_112 = arith.constant 0 : index
    %c64_113 = arith.constant 64 : index
    %159 = vector.load %arg16[%c0_112, %c64_113] : memref<8x512xbf16, #tpu.memory_space<vmem>>, vector<8x64xbf16>
    tpu.vector_store %arg16[%c0_112, %c64_113], %158 {strides = array<i32>} : memref<8x512xbf16, #tpu.memory_space<vmem>>, vector<8x64xbf16>,
    %160 = vector.extract_strided_slice %149 {offsets = [32, 0], sizes = [8, 64], strides = [1, 1]} : vector<128x64xf32> to vector<8x64xf32>
    %161 = vector.extract_strided_slice %149 {offsets = [40, 0], sizes = [8, 64], strides = [1, 1]} : vector<128x64xf32> to vector<8x64xf32>
    %162 = arith.maximumf %160, %161 : vector<8x64xf32>
    %163 = arith.truncf %162 : vector<8x64xf32> to vector<8x64xbf16>
    %c0_114 = arith.constant 0 : index
    %c128_115 = arith.constant 128 : index
    %164 = vector.load %arg16[%c0_114, %c128_115] : memref<8x512xbf16, #tpu.memory_space<vmem>>, vector<8x64xbf16>
    tpu.vector_store %arg16[%c0_114, %c128_115], %163 {strides = array<i32>} : memref<8x512xbf16, #tpu.memory_space<vmem>>, vector<8x64xbf16>,
    %165 = vector.extract_strided_slice %149 {offsets = [48, 0], sizes = [8, 64], strides = [1, 1]} : vector<128x64xf32> to vector<8x64xf32>
    %166 = vector.extract_strided_slice %149 {offsets = [56, 0], sizes = [8, 64], strides = [1, 1]} : vector<128x64xf32> to vector<8x64xf32>
    %167 = arith.maximumf %165, %166 : vector<8x64xf32>
    %168 = arith.truncf %167 : vector<8x64xf32> to vector<8x64xbf16>
    %c0_116 = arith.constant 0 : index
    %c192_117 = arith.constant 192 : index
    %169 = vector.load %arg16[%c0_116, %c192_117] : memref<8x512xbf16, #tpu.memory_space<vmem>>, vector<8x64xbf16>
    tpu.vector_store %arg16[%c0_116, %c192_117], %168 {strides = array<i32>} : memref<8x512xbf16, #tpu.memory_space<vmem>>, vector<8x64xbf16>,
    %170 = vector.extract_strided_slice %149 {offsets = [64, 0], sizes = [8, 64], strides = [1, 1]} : vector<128x64xf32> to vector<8x64xf32>
    %171 = vector.extract_strided_slice %149 {offsets = [72, 0], sizes = [8, 64], strides = [1, 1]} : vector<128x64xf32> to vector<8x64xf32>
    %172 = arith.maximumf %170, %171 : vector<8x64xf32>
    %173 = arith.truncf %172 : vector<8x64xf32> to vector<8x64xbf16>
    %c0_118 = arith.constant 0 : index
    %c256_119 = arith.constant 256 : index
    %174 = vector.load %arg16[%c0_118, %c256_119] : memref<8x512xbf16, #tpu.memory_space<vmem>>, vector<8x64xbf16>
    tpu.vector_store %arg16[%c0_118, %c256_119], %173 {strides = array<i32>} : memref<8x512xbf16, #tpu.memory_space<vmem>>, vector<8x64xbf16>,
    %175 = vector.extract_strided_slice %149 {offsets = [80, 0], sizes = [8, 64], strides = [1, 1]} : vector<128x64xf32> to vector<8x64xf32>
    %176 = vector.extract_strided_slice %149 {offsets = [88, 0], sizes = [8, 64], strides = [1, 1]} : vector<128x64xf32> to vector<8x64xf32>
    %177 = arith.maximumf %175, %176 : vector<8x64xf32>
    %178 = arith.truncf %177 : vector<8x64xf32> to vector<8x64xbf16>
    %c0_120 = arith.constant 0 : index
    %c320 = arith.constant 320 : index
    %179 = vector.load %arg16[%c0_120, %c320] : memref<8x512xbf16, #tpu.memory_space<vmem>>, vector<8x64xbf16>
    tpu.vector_store %arg16[%c0_120, %c320], %178 {strides = array<i32>} : memref<8x512xbf16, #tpu.memory_space<vmem>>, vector<8x64xbf16>,
    %180 = vector.extract_strided_slice %149 {offsets = [96, 0], sizes = [8, 64], strides = [1, 1]} : vector<128x64xf32> to vector<8x64xf32>
    %181 = vector.extract_strided_slice %149 {offsets = [104, 0], sizes = [8, 64], strides = [1, 1]} : vector<128x64xf32> to vector<8x64xf32>
    %182 = arith.maximumf %180, %181 : vector<8x64xf32>
    %183 = arith.truncf %182 : vector<8x64xf32> to vector<8x64xbf16>
    %c0_121 = arith.constant 0 : index
    %c384 = arith.constant 384 : index
    %184 = vector.load %arg16[%c0_121, %c384] : memref<8x512xbf16, #tpu.memory_space<vmem>>, vector<8x64xbf16>
    tpu.vector_store %arg16[%c0_121, %c384], %183 {strides = array<i32>} : memref<8x512xbf16, #tpu.memory_space<vmem>>, vector<8x64xbf16>,
    %185 = vector.extract_strided_slice %149 {offsets = [112, 0], sizes = [8, 64], strides = [1, 1]} : vector<128x64xf32> to vector<8x64xf32>
    %186 = vector.extract_strided_slice %149 {offsets = [120, 0], sizes = [8, 64], strides = [1, 1]} : vector<128x64xf32> to vector<8x64xf32>
    %187 = arith.maximumf %185, %186 : vector<8x64xf32>
    %188 = arith.truncf %187 : vector<8x64xf32> to vector<8x64xbf16>
    %c0_122 = arith.constant 0 : index
    %c448 = arith.constant 448 : index
    %189 = vector.load %arg16[%c0_122, %c448] : memref<8x512xbf16, #tpu.memory_space<vmem>>, vector<8x64xbf16>
    tpu.vector_store %arg16[%c0_122, %c448], %188 {strides = array<i32>} : memref<8x512xbf16, #tpu.memory_space<vmem>>, vector<8x64xbf16>,
    %cst_123 = arith.constant 0.000000e+00 : f32
    %190 = vector.broadcast %cst_123 : f32 to vector<1x128xf32>
    %c0_124 = arith.constant 0 : index
    %c0_125 = arith.constant 0 : index
    %191 = vector.load %arg16[%c0_124, %c0_125] : memref<8x512xbf16, #tpu.memory_space<vmem>>, vector<1x512xbf16>
    %c0_126 = arith.constant 0 : index
    %c0_127 = arith.constant 0 : index
    %192 = vector.load %arg6[%c0_126, %c0_127] : memref<4096x128xbf16, #tpu.memory_space<vmem>>, vector<512x128xbf16>
    %cst_128 = arith.constant dense<0.000000e+00> : vector<1x128xf32>
    %193 = tpu.matmul %191, %192, %cst_128 {dimension_numbers = #tpu.dot_dimension_numbers<[1], [0], [0], [1], [0, 0, 1, 1], [], []>} : vector<1x512xbf16>, vector<512x128xbf16>, vector<1x128xf32> -> vector<1x128xf32>
    %194 = arith.addf %190, %193 : vector<1x128xf32>
    %c1_129 = arith.constant 1 : index
    %c0_130 = arith.constant 0 : index
    %195 = vector.load %arg16[%c1_129, %c0_130] : memref<8x512xbf16, #tpu.memory_space<vmem>>, vector<1x512xbf16>
    %c512 = arith.constant 512 : index
    %c0_131 = arith.constant 0 : index
    %196 = vector.load %arg6[%c512, %c0_131] : memref<4096x128xbf16, #tpu.memory_space<vmem>>, vector<512x128xbf16>
    %cst_132 = arith.constant dense<0.000000e+00> : vector<1x128xf32>
    %197 = tpu.matmul %195, %196, %cst_132 {dimension_numbers = #tpu.dot_dimension_numbers<[1], [0], [0], [1], [0, 0, 1, 1], [], []>} : vector<1x512xbf16>, vector<512x128xbf16>, vector<1x128xf32> -> vector<1x128xf32>
    %198 = arith.addf %194, %197 : vector<1x128xf32>
    %c2_133 = arith.constant 2 : index
    %c0_134 = arith.constant 0 : index
    %199 = vector.load %arg16[%c2_133, %c0_134] : memref<8x512xbf16, #tpu.memory_space<vmem>>, vector<1x512xbf16>
    %c1024 = arith.constant 1024 : index
    %c0_135 = arith.constant 0 : index
    %200 = vector.load %arg6[%c1024, %c0_135] : memref<4096x128xbf16, #tpu.memory_space<vmem>>, vector<512x128xbf16>
    %cst_136 = arith.constant dense<0.000000e+00> : vector<1x128xf32>
    %201 = tpu.matmul %199, %200, %cst_136 {dimension_numbers = #tpu.dot_dimension_numbers<[1], [0], [0], [1], [0, 0, 1, 1], [], []>} : vector<1x512xbf16>, vector<512x128xbf16>, vector<1x128xf32> -> vector<1x128xf32>
    %202 = arith.addf %198, %201 : vector<1x128xf32>
    %c3_137 = arith.constant 3 : index
    %c0_138 = arith.constant 0 : index
    %203 = vector.load %arg16[%c3_137, %c0_138] : memref<8x512xbf16, #tpu.memory_space<vmem>>, vector<1x512xbf16>
    %c1536 = arith.constant 1536 : index
    %c0_139 = arith.constant 0 : index
    %204 = vector.load %arg6[%c1536, %c0_139] : memref<4096x128xbf16, #tpu.memory_space<vmem>>, vector<512x128xbf16>
    %cst_140 = arith.constant dense<0.000000e+00> : vector<1x128xf32>
    %205 = tpu.matmul %203, %204, %cst_140 {dimension_numbers = #tpu.dot_dimension_numbers<[1], [0], [0], [1], [0, 0, 1, 1], [], []>} : vector<1x512xbf16>, vector<512x128xbf16>, vector<1x128xf32> -> vector<1x128xf32>
    %206 = arith.addf %202, %205 : vector<1x128xf32>
    %c4 = arith.constant 4 : index
    %c0_141 = arith.constant 0 : index
    %207 = vector.load %arg16[%c4, %c0_141] : memref<8x512xbf16, #tpu.memory_space<vmem>>, vector<1x512xbf16>
    %c2048 = arith.constant 2048 : index
    %c0_142 = arith.constant 0 : index
    %208 = vector.load %arg6[%c2048, %c0_142] : memref<4096x128xbf16, #tpu.memory_space<vmem>>, vector<512x128xbf16>
    %cst_143 = arith.constant dense<0.000000e+00> : vector<1x128xf32>
    %209 = tpu.matmul %207, %208, %cst_143 {dimension_numbers = #tpu.dot_dimension_numbers<[1], [0], [0], [1], [0, 0, 1, 1], [], []>} : vector<1x512xbf16>, vector<512x128xbf16>, vector<1x128xf32> -> vector<1x128xf32>
    %210 = arith.addf %206, %209 : vector<1x128xf32>
    %c5 = arith.constant 5 : index
    %c0_144 = arith.constant 0 : index
    %211 = vector.load %arg16[%c5, %c0_144] : memref<8x512xbf16, #tpu.memory_space<vmem>>, vector<1x512xbf16>
    %c2560 = arith.constant 2560 : index
    %c0_145 = arith.constant 0 : index
    %212 = vector.load %arg6[%c2560, %c0_145] : memref<4096x128xbf16, #tpu.memory_space<vmem>>, vector<512x128xbf16>
    %cst_146 = arith.constant dense<0.000000e+00> : vector<1x128xf32>
    %213 = tpu.matmul %211, %212, %cst_146 {dimension_numbers = #tpu.dot_dimension_numbers<[1], [0], [0], [1], [0, 0, 1, 1], [], []>} : vector<1x512xbf16>, vector<512x128xbf16>, vector<1x128xf32> -> vector<1x128xf32>
    %214 = arith.addf %210, %213 : vector<1x128xf32>
    %c6_147 = arith.constant 6 : index
    %c0_148 = arith.constant 0 : index
    %215 = vector.load %arg16[%c6_147, %c0_148] : memref<8x512xbf16, #tpu.memory_space<vmem>>, vector<1x512xbf16>
    %c3072 = arith.constant 3072 : index
    %c0_149 = arith.constant 0 : index
    %216 = vector.load %arg6[%c3072, %c0_149] : memref<4096x128xbf16, #tpu.memory_space<vmem>>, vector<512x128xbf16>
    %cst_150 = arith.constant dense<0.000000e+00> : vector<1x128xf32>
    %217 = tpu.matmul %215, %216, %cst_150 {dimension_numbers = #tpu.dot_dimension_numbers<[1], [0], [0], [1], [0, 0, 1, 1], [], []>} : vector<1x512xbf16>, vector<512x128xbf16>, vector<1x128xf32> -> vector<1x128xf32>
    %218 = arith.addf %214, %217 : vector<1x128xf32>
    %c7 = arith.constant 7 : index
    %c0_151 = arith.constant 0 : index
    %219 = vector.load %arg16[%c7, %c0_151] : memref<8x512xbf16, #tpu.memory_space<vmem>>, vector<1x512xbf16>
    %c3584 = arith.constant 3584 : index
    %c0_152 = arith.constant 0 : index
    %220 = vector.load %arg6[%c3584, %c0_152] : memref<4096x128xbf16, #tpu.memory_space<vmem>>, vector<512x128xbf16>
    %cst_153 = arith.constant dense<0.000000e+00> : vector<1x128xf32>
    %221 = tpu.matmul %219, %220, %cst_153 {dimension_numbers = #tpu.dot_dimension_numbers<[1], [0], [0], [1], [0, 0, 1, 1], [], []>} : vector<1x512xbf16>, vector<512x128xbf16>, vector<1x128xf32> -> vector<1x128xf32>
    %222 = arith.addf %218, %221 : vector<1x128xf32>
    %c0_154 = arith.constant 0 : index
    %c0_155 = arith.constant 0 : index
    %223 = vector.load %arg7[%c0_154, %c0_155] : memref<1x128xf32, #tpu.memory_space<vmem>>, vector<1x128xf32>
    %224 = arith.addf %222, %223 : vector<1x128xf32>
    %cst_156 = arith.constant 0.000000e+00 : f32
    %225 = vector.broadcast %cst_156 : f32 to vector<1x128xf32>
    %226 = arith.maximumf %224, %225 : vector<1x128xf32>
    %227 = arith.truncf %226 : vector<1x128xf32> to vector<1x128xbf16>
    %c0_157 = arith.constant 0 : index
    %c0_158 = arith.constant 0 : index
    %228 = vector.load %arg8[%c0_157, %c0_158] : memref<128x6xbf16, #tpu.memory_space<vmem>>, vector<128x6xbf16>
    %cst_159 = arith.constant dense<0.000000e+00> : vector<1x6xf32>
    %229 = tpu.matmul %227, %228, %cst_159 {dimension_numbers = #tpu.dot_dimension_numbers<[1], [0], [0], [1], [0, 0, 1, 1], [], []>} : vector<1x128xbf16>, vector<128x6xbf16>, vector<1x6xf32> -> vector<1x6xf32>
    %c0_160 = arith.constant 0 : index
    %c0_161 = arith.constant 0 : index
    %230 = vector.load %arg9[%c0_160, %c0_161] : memref<1x6xf32, #tpu.memory_space<vmem>>, vector<1x6xf32>
    %231 = arith.addf %229, %230 : vector<1x6xf32>
    %cst_162 = arith.constant dense<0xFF800000> : vector<1xf32>
    %232 = vector.multi_reduction <maximumf>, %231, %cst_162 [1] : vector<1x6xf32> to vector<1xf32>
    %233 = vector.shape_cast %232 : vector<1xf32> to vector<1x1xf32>
    %234 = vector.broadcast %233 : vector<1x1xf32> to vector<1x6xf32>
    %235 = arith.subf %231, %234 : vector<1x6xf32>
    %236 = math.exp %235 : vector<1x6xf32>
    %cst_163 = arith.constant dense<0.000000e+00> : vector<1xf32>
    %237 = vector.multi_reduction <add>, %236, %cst_163 [1] : vector<1x6xf32> to vector<1xf32>
    %238 = vector.shape_cast %237 : vector<1xf32> to vector<1x1xf32>
    %239 = math.log %238 : vector<1x1xf32>
    %240 = vector.broadcast %239 : vector<1x1xf32> to vector<1x6xf32>
    %241 = arith.subf %235, %240 : vector<1x6xf32>
    %c0_164 = arith.constant 0 : index
    %c0_165 = arith.constant 0 : index
    %c0_166 = arith.constant 0 : index
    %242 = vector.load %arg10[%c0_164, %c0_165, %c0_166] : memref<1x1x6xf32, #tpu.memory_space<vmem>>, vector<1x1x6xf32>
    %243 = vector.shape_cast %242 : vector<1x1x6xf32> to vector<1x6xf32>
    %244 = vector.shape_cast %241 : vector<1x6xf32> to vector<1x1x6xf32>
    tpu.vector_store %arg10[%c0_164, %c0_165, %c0_166], %244 {strides = array<i32>} : memref<1x1x6xf32, #tpu.memory_space<vmem>>, vector<1x1x6xf32>,
    return
  }
  func.func @transform_0(%arg0: i32) -> (i32, i32, i32) {
    %c0_i32 = arith.constant 0 : i32
    %c0_i32_0 = arith.constant 0 : i32
    %c0_i32_1 = arith.constant 0 : i32
    return %arg0, %c0_i32, %c0_i32_0 : i32, i32, i32
  }
  func.func @transform_1(%arg0: i32) -> (i32, i32) {
    %c0_i32 = arith.constant 0 : i32
    %c0_i32_0 = arith.constant 0 : i32
    %c0_i32_1 = arith.constant 0 : i32
    return %c0_i32, %c0_i32_0 : i32, i32
  }
  func.func @transform_2(%arg0: i32) -> (i32, i32) {
    %c0_i32 = arith.constant 0 : i32
    %c0_i32_0 = arith.constant 0 : i32
    %c0_i32_1 = arith.constant 0 : i32
    return %c0_i32, %c0_i32_0 : i32, i32
  }
  func.func @transform_3(%arg0: i32) -> (i32, i32) {
    %c0_i32 = arith.constant 0 : i32
    %c0_i32_0 = arith.constant 0 : i32
    %c0_i32_1 = arith.constant 0 : i32
    return %c0_i32, %c0_i32_0 : i32, i32
  }
  func.func @transform_4(%arg0: i32) -> (i32, i32) {
    %c0_i32 = arith.constant 0 : i32
    %c0_i32_0 = arith.constant 0 : i32
    %c0_i32_1 = arith.constant 0 : i32
    return %c0_i32, %c0_i32_0 : i32, i32
  }
  func.func @transform_5(%arg0: i32) -> (i32, i32) {
    %c0_i32 = arith.constant 0 : i32
    %c0_i32_0 = arith.constant 0 : i32
    %c0_i32_1 = arith.constant 0 : i32
    return %c0_i32, %c0_i32_0 : i32, i32
  }
  func.func @transform_6(%arg0: i32) -> (i32, i32) {
    %c0_i32 = arith.constant 0 : i32
    %c0_i32_0 = arith.constant 0 : i32
    %c0_i32_1 = arith.constant 0 : i32
    return %c0_i32, %c0_i32_0 : i32, i32
  }
  func.func @transform_7(%arg0: i32) -> (i32, i32) {
    %c0_i32 = arith.constant 0 : i32
    %c0_i32_0 = arith.constant 0 : i32
    %c0_i32_1 = arith.constant 0 : i32
    return %c0_i32, %c0_i32_0 : i32, i32
  }
  func.func @transform_8(%arg0: i32) -> (i32, i32) {
    %c0_i32 = arith.constant 0 : i32
    %c0_i32_0 = arith.constant 0 : i32
    %c0_i32_1 = arith.constant 0 : i32
    return %c0_i32, %c0_i32_0 : i32, i32
  }
  func.func @transform_9(%arg0: i32) -> (i32, i32, i32) {
    %c0_i32 = arith.constant 0 : i32
    %c0_i32_0 = arith.constant 0 : i32
    %c0_i32_1 = arith.constant 0 : i32
    return %arg0, %c0_i32, %c0_i32_0 : i32, i32, i32
  }
}

</mosaic_0001>

<bundles_post_ra>
// kernel: malaria_cnn_forward.1
= control target key start
LH: loop header
LB: loop body
LE: loop exit
PB: predicated region body
PF: predicated region fallthrough
CT: control target
= control target key end

     0   :  { %14 = vsyncpa [#allocation9], 0  ;;  %s15830_s0 = inlined_call_operand.vmem [shape: f32[2,256,3], index: 0, kind: input, shape index: {}]   ;;  %s15831_s1 = inlined_call_operand.vmem [shape: bf16[27,32], index: 1, kind: input, shape index: {}]   ;;  %s15832_s2 = inlined_call_operand.vmem [shape: f32[1,32], index: 2, kind: input, shape index: {}]   ;;  %s15833_s3 = inlined_call_operand.vmem [shape: bf16[288,64], index: 3, kind: input, shape index: {}]   ;;  %s15834_s4 = inlined_call_operand.vmem [shape: f32[1,64], index: 4, kind: input, shape index: {}]   ;;  %s15835_s5 = inlined_call_operand.hbm [shape: bf16[4096,128], index: 5, kind: input, shape index: {}]   ;;  %s15836_s6 = inlined_call_operand.vmem [shape: f32[1,128], index: 6, kind: input, shape index: {}]   ;;  %s15837_s7 = inlined_call_operand.vmem [shape: bf16[128,6], index: 7, kind: input, shape index: {}]   ;;  %s15838_s8 = inlined_call_operand.vmem [shape: f32[1,6], index: 8, kind: input, shape index: {}]   ;;  %s15839_s9 = inlined_call_operand.hbm [shape: f32[2,1,6], index: 9, kind: output, shape index: {}]  }
   0x1   :  { %15 = vsyncpa [#allocation10], 0 }
   0x2   :  { %17 = vsyncpa [#allocation10 + $0x1], 0  ;;  %s12910_s30 = smov 0   ;;  %s12912_s10 = smov 0  }
   0x3   :  { %s12914_s11 = smov 0   ;;  %s12916_s12 = smov 0  }
   0x4 LB: > { %s12931_s13 = sadd.s32 4294967295, %s12840_s12   ;;  %s10139_s14 = sadd.s32 4294967294, %s12840_s12   ;;  %s12840_s12 = sphi %s12916_s12, %s16430_s12   ;;  %s12836_s11 = sphi %s12914_s11, %s16429_s11   ;;  %s12832_s10 = sphi %s12912_s10, %s16428_s10   ;;  %s12828_s30 = sphi %s12910_s30, %s16427_s30  }
   0x5   : > { %s12935_s15 = sadd.s32 1, %s12840_s12   ;;  %s224_s16 = sadd.s32 1, %s12836_s11 }
   0x6   : > { %s221_s17 = ssub.s32 %s12840_s12, %s12935_s15  ;;  %p234_p0 = scmp.ne.s32.totalorder %s12836_s11, %s12832_s10 }
   0x7   : > { %p222_p1 = scmp.eq.s32.totalorder %s221_s17, 0  ;;  %p235_p2 = scmp.eq.s32.totalorder %s12931_s13, 1 }
   0x8   : > { %p240_p3 = scmp.ne.s32.totalorder %s12832_s10, %s12828_s30  ;;  %p241_p4 = scmp.eq.s32.totalorder %s10139_s14, 1 }
   0x9   : > { %s12946_s18 = scalar_select %p222_p1, %s12836_s11, %s224_s16  }
   0xa   : > { %p12948_p5 = por %p235_p2, %p234_p0  ;;  %p12952_p6 = por %p241_p4, %p240_p3 }
   0xb   : > { %p10140_p7 = scmp.ge.s32.totalorder %s12840_s12, 1  ;;  %p248_p8 = scmp.lt.s32.totalorder %s12840_s12, 3 }
   0xc   : > { %s15908_s20 = scalar_select %p12952_p6, 1, 0 }
   0xd   : > { %p12324_p9 = scmp.eq.s32.totalorder %s12931_s13, 0  ;;  %p12959_p10 = pnand %p10140_p7, %p248_p8 }
   0xe   : > { %s12842_s22 = smov [#allocation8]  }
   0xf   : > { %s272_s23 = sshll.u32 %s12842_s22, 4  ;;  %p12316_p11 = pneg %p12959_p10  ;;  %s273_s23 = int_to_ptr.vmem [resolvable:$true] %s272_s23 }
  0x10   : > { %s12761_s24 = scalar_lea.vmem %s273_s23, 32768  ;;  %p12769_p3 = scmp.lt.s32.totalorder %s273_s23, %s273_s23 }
  0x11   : > { %p12317_p12 = pnand %p12324_p9, %p12316_p11  ;;  %p12762_p0 = scmp.ne.s32.totalorder %s273_s23, %s12761_s24 }
  0x12   : > { %p12770_p4 = scmp.lt.s32.totalorder %s12761_s24, %s12761_s24 }
  0x13   : > { %p12752_p13 = pneg %p12317_p12 }
  0x14   : > { %p12771_p6 = por %p12770_p4, %p12769_p3 }
  0x15   : > { %p12764_p1 = pnand %p12762_p0, %p12752_p13 }
  0x17   : > { %p12765_p2 = pneg %p12764_p1 }
  0x19   : > { %p12772_p7 = pnand %p12771_p6, %p12765_p2 }
  0x1b   : > { %12775 = shalt.err (!%p12772_p7)
}
  0x1c   : > { %s12843_s25 = smov 64   ;;  %s12844_s26 = smov 4  }
  0x1d   : > { %12319 = dma.hbm_to_vmem [thread:$0]  (!%p12317_p12), %s15835_s5, 32768, %s273_s23, [#allocation9], %s12843_s25, %s12843_s25, %s12844_s26  }
  0x1e   : > { %305 = sbr.rel (%p12959_p10) target bundleno = 2384 (0x950), region = 56 }
  0x23   : > { %12819 = dma.done.wait (%p12324_p9), [#allocation9], 32768  }
  0x24   : > { %12821 = vsyncadd (%p12324_p9), [#allocation9], 4294934528  ;;  %vm15848_vm0 = vcmask 23552   ;;  %vm413_vm1 = vcmask 16384   ;;  %v418_v0 = vlaneseq  ;;  %v15894_v1 = vmov 0.0   ;;  %p340_p6 = scmp.lt.s32.totalorder %s12931_s13, 1 }
  0x25   : > { %411 = vst.msk [vmem:[#allocation2] sm:$0xff] %vm15848_vm0, %v15894_v1  ;;  %412 = vst.msk [vmem:[#allocation2 + $0x8] sm:$0xff] %vm15848_vm0, %v15894_v1  ;;  %s12846_s22 = smov 3   ;;  %v15910_v17 = vmov 0  ;;  %vm15840_vm3 = vcmask 19456   ;;  %s12847_s23 = smov 6  }
  0x26   : > { %415 = vst.msk [vmem:[#allocation2 + $0x111] sm:$0xff] %vm15848_vm0, %v15894_v1  ;;  %416 = vst.msk [vmem:[#allocation2 + $0x119] sm:$0xff] %vm15848_vm0, %v15894_v1  ;;  %s341_s29 = scalar_select %p340_p6, %s12931_s13, 1  ;;  %v12988_v2 = vshrl.u32 %v418_v0, 7  ;;  %v15914_v48 = vmov 0  ;;  %vm3523_vm9 = vcmask 1044480  }
  0x27   : > { %414 = vst.msk [vmem:[#allocation2 + $0x10] sm:$0x1] %vm413_vm1, %v15894_v1  ;;  %417 = vst.msk [vmem:[#allocation2 + $0x121] sm:$0x1] %vm413_vm1, %v15894_v1  ;;  %s12848_s24 = smov 9   ;;  %s12849_s25 = smov 12  }
  0x28   : > { %s11128_s14 = sshll.u32 %s341_s29, 8  ;;  %v455_v5 = vand.u32 15, %v12988_v2  ;;  %v420_v18 = vadd.s32 8, %v12988_v2  ;;  %v421_v23 = vadd.s32 16, %v12988_v2  ;;  %v422_v35 = vadd.s32 24, %v12988_v2  ;;  %s12850_s26 = smov 15  }
  0x29   : > { %s12993_s21 = scalar_lea.vmem %s15830_s0, %s11128_s14  ;;  %s12851_s27 = smov 18   ;;  %vm3524_vm10 = vcmask 1045504   ;;  %vm15841_vm13 = vcmask 44056   ;;  %vm15842_vm1 = vcmask 68656  }
  0x2a   : > { %v346_v3 = vld [vmem:[%s12993_s21] sm:$0xff]  ;;  %v347_v4 = vld [vmem:[%s12993_s21 + $0x8] sm:$0xff]  ;;  %v348_v6 = vld [vmem:[%s12993_s21 + $0x10] sm:$0xff]  ;;  %vm13012_vm2 = vcmp.ne.s32.totalorder %v455_v5, 0  ;;  %v462_v34 = vand.u32 15, %v420_v18  ;;  %v469_v38 = vand.u32 15, %v421_v23 }
  0x2b   : > { %379 = vst.msk [vmem:[#allocation2 + $0x11] sm:$0xff] %vm15848_vm0, %v346_v3  ;;  %380 = vst.msk [vmem:[#allocation2 + $0x19] sm:$0xff] %vm15848_vm0, %v347_v4  ;;  %v349_v10 = vld [vmem:[%s12993_s21 + $0x18] sm:$0xff]  ;;  %v350_v11 = vld [vmem:[%s12993_s21 + $0x20] sm:$0xff]  ;;  %v15911_v17 = vsel %vm13012_vm2, 4294967295, %v15910_v17  ;;  %v476_v47 = vand.u32 15, %v422_v35 }
  0x2c   : > { %v1124_v7 = vld [vmem:[#allocation2 + $0x1] sm:$0xff]  ;;  %381 = vst.msk [vmem:[#allocation2 + $0x21] sm:$0xff] %vm15848_vm0, %v348_v6  ;;  %382 = vst.msk [vmem:[#allocation2 + $0x29] sm:$0xff] %vm15848_vm0, %v349_v10  ;;  %v352_v13 = vld [vmem:[%s12993_s21 + $0x30] sm:$0xff]  ;;  %vm13038_vm4 = vcmp.ne.s32.totalorder %v462_v34, 15  ;;  %vm13042_vm5 = vcmp.ne.s32.totalorder %v469_v38, 0 }
  0x2d   : > { %v11161_v9 = vpack.c.bf16 %v1124_v7, %v1124_v7  ;;  %v351_v12 = vld [vmem:[%s12993_s21 + $0x28] sm:$0xff]  ;;  %383 = vst.msk [vmem:[#allocation2 + $0x31] sm:$0xff] %vm15848_vm0, %v350_v11  ;;  %v353_v14 = vld [vmem:[%s12993_s21 + $0x38] sm:$0xff]  ;;  %v354_v15 = vld [vmem:[%s12993_s21 + $0x40] sm:$0xff]  ;;  %v15915_v48 = vsel %vm13042_vm5, 4294967295, %v15914_v48  ;;  %vm13059_vm6 = vcmp.ne.s32.totalorder %v476_v47, 15 }
  0x2e   : > { %v1125_v8 = vld [vmem:[#allocation2 + $0x9] sm:$0xff]  ;;  %384 = vst.msk [vmem:[#allocation2 + $0x39] sm:$0xff] %vm15848_vm0, %v351_v12  ;;  %385 = vst.msk [vmem:[#allocation2 + $0x41] sm:$0xff] %vm15848_vm0, %v352_v13  ;;  %v899_v19 = vld [vmem:[#allocation2] sm:$0xff]  ;;  %s12852_s28 = smov 21   ;;  %v12853_v38 = vmov 65535  }
  0x2f   : > { %1252 = vrot.lane.b32.xlu0 %v11161_v9, %s12846_s22  ;;  %v11162_v16 = vpack.c.bf16 %v1125_v8, %v1125_v8  ;;  %386 = vst.msk [vmem:[#allocation2 + $0x49] sm:$0xff] %vm15848_vm0, %v353_v14  ;;  %387 = vst.msk [vmem:[#allocation2 + $0x51] sm:$0xff] %vm15848_vm0, %v354_v15  ;;  %v355_v20 = vld [vmem:[%s12993_s21 + $0x48] sm:$0xff]  ;;  %v931_v24 = vsel %vm13012_vm2, %v899_v19, 0.0  ;;  %v356_v26 = vld [vmem:[%s12993_s21 + $0x50] sm:$0xff]  ;;  %s12854_s16 = smov 24  }
  0x30   : > { %v900_v21 = vld [vmem:[#allocation2 + $0x8] sm:$0xff]  ;;  %388 = vst.msk [vmem:[#allocation2 + $0x59] sm:$0xff] %vm15848_vm0, %v355_v20  ;;  %v11129_v27 = vpack.c.bf16 %v931_v24, %v931_v24  ;;  %389 = vst.msk [vmem:[#allocation2 + $0x61] sm:$0xff] %vm15848_vm0, %v356_v26  ;;  %v357_v63 = vld [vmem:[%s12993_s21 + $0x58] sm:$0xff]  ;;  %v423_v20 = vadd.s32 32, %v12988_v2  ;;  %s12855_s14 = smov 32  }
  0x31   : > { %v1381_v22 = vld [vmem:[#allocation2 + $0x2] sm:$0xff]  ;;  %v11130_v25 = vpack.c.bf16 %v900_v21, %v900_v21  ;;  %390 = vst.msk [vmem:[#allocation2 + $0x69] sm:$0xff] %vm15848_vm0, %v357_v63  ;;  %v360_v47 = vld [vmem:[%s12993_s21 + $0x70] sm:$0xff]  ;;  %s12859_s29 = smov [#allocation11]  }
  0x32   : > { %v1126_v28 = vld [vmem:[#allocation2 + $0x11] sm:$0xff]  ;;  %v11193_v29 = vpack.c.bf16 %v1381_v22, %v1381_v22  ;;  %v1127_v30 = vld [vmem:[#allocation2 + $0x19] sm:$0xff]  ;;  %1092 = vst.msk [vmem:[#allocation3] sm:$0xf] %vm15840_vm3, %v11129_v27  ;;  %v425_v22 = vadd.s32 48, %v12988_v2  ;;  %v483_v26 = vand.u32 15, %v423_v20 }
  0x33   : > { %1093 = vst.msk [vmem:[#allocation3 + $0x4] sm:$0xf] %vm15840_vm3, %v11130_v25  ;;  %1254 = vrot.lane.b32.xlu0 %v11162_v16, %s12846_s22  ;;  %v11163_v31 = vpack.c.bf16 %v1126_v28, %v1126_v28  ;;  %v1383_v32 = vld [vmem:[#allocation2 + $0x12] sm:$0xff]  ;;  %v1673_v39 = vld [vmem:[#allocation2 + $0x28] sm:$0xff]  ;;  %v11164_v40 = vpack.c.bf16 %v1127_v30, %v1127_v30  ;;  %v13046_v49 = vld [vmem:[#allocation2 + $0x20] sm:$0xff] }
  0x34   : > { %v1671_v33 = vld [vmem:[#allocation2 + $0x18] sm:$0xff]  ;;  %v1670_v37 = vld [vmem:[#allocation2 + $0x10] sm:$0xff]  ;;  %v11195_v41 = vpack.c.bf16 %v1383_v32, %v1383_v32  ;;  %v13033_v42 = vpack.c.bf16 %v1673_v39, %v1673_v39  ;;  %v1704_v54 = vsel %vm13042_vm5, %v13046_v49, 0.0  ;;  %v1961_v5 = vld [vmem:[#allocation2 + $0x21] sm:$0xff]  ;;  %v2537_v13 = vsel %vm13012_vm2, %v13046_v49, 0.0  ;;  %393 = vst.msk [vmem:[#allocation2 + $0x81] sm:$0xff] %vm15848_vm0, %v360_v47 }
  0x35   : > { %v11226_v36 = vpack.c.bf16 %v1671_v33, %v1671_v33  ;;  %1256 = vrot.lane.b32.xlu1 %v11163_v31, %s12846_s22  ;;  %v2508_v43 = vld [vmem:[#allocation2 + $0x38] sm:$0xff]  ;;  %v1702_v44 = vsel %vm13012_vm2, %v1670_v37, 0.0  ;;  %v1382_v46 = vld [vmem:[#allocation2 + $0xa] sm:$0xff]  ;;  %v11227_v60 = vpack.c.bf16 %v1704_v54, %v1704_v54  ;;  %v933_v62 = vsel %vm13042_vm5, %v1670_v37, 0.0  ;;  %v2218_v8 = vld [vmem:[#allocation2 + $0x22] sm:$0xff] }
  0x36   : > { %1097 = vst.msk [vmem:[#allocation3 + $0x14] sm:$0xf] %vm15840_vm3, %v13033_v42  ;;  %v13051_v50 = vpack.c.bf16 %v2508_v43, %v2508_v43  ;;  %v11225_v51 = vpack.c.bf16 %v1702_v44, %v1702_v44  ;;  %v1414_v52 = vsel %vm13038_vm4, %v1382_v46, 0.0  ;;  %v1677_v53 = vld [vmem:[#allocation2 + $0x48] sm:$0xff]  ;;  %v1384_v56 = vld [vmem:[#allocation2 + $0x1a] sm:$0xff]  ;;  %v11131_v4 = vpack.c.bf16 %v933_v62, %v933_v62  ;;  %v13107_v15 = vld [vmem:[#allocation2 + $0x30] sm:$0xff] }
  0x37   : > { %1541 = vrot.lane.b32.xlu0 %v11193_v29, %s12847_s23  ;;  %1095 = vst.msk [vmem:[#allocation3 + $0xc] sm:$0xf] %vm15840_vm3, %v11226_v36  ;;  %v2512_v57 = vld [vmem:[#allocation2 + $0x58] sm:$0xff]  ;;  %v11194_v58 = vpack.c.bf16 %v1414_v52, %v1414_v52  ;;  %v13066_v59 = vpack.c.bf16 %v1677_v53, %v1677_v53  ;;  %v1416_v61 = vsel %vm13059_vm6, %v1384_v56, 0.0  ;;  %v13086_v6 = vpack.c.bf16 %v1961_v5, %v1961_v5  ;;  %v1962_v7 = vld [vmem:[#allocation2 + $0x29] sm:$0xff]  ;;  %v358_v10 = vld [vmem:[%s12993_s21 + $0x60] sm:$0xff] }
  0x38   : > { %1099 = vst.msk [vmem:[#allocation3 + $0x1c] sm:$0xf] %vm15840_vm3, %v13051_v50  ;;  %v13077_v0 = vpack.c.bf16 %v2512_v57, %v2512_v57  ;;  %v11196_v3 = vpack.c.bf16 %v1416_v61, %v1416_v61  ;;  %1094 = vst.msk [vmem:[#allocation3 + $0x8] sm:$0xf] %vm15840_vm3, %v11131_v4  ;;  %v13093_v9 = vpack.c.bf16 %v1962_v7, %v1962_v7  ;;  %v2249_v12 = vsel %vm13038_vm4, %v1384_v56, 0.0  ;;  %v13105_v14 = vld [vmem:[#allocation2 + $0x2a] sm:$0xff] }
  0x39   : > { %1258 = vrot.lane.b32.xlu1 %v11164_v40, %s12846_s22  ;;  %1101 = vst.msk [vmem:[#allocation3 + $0x24] sm:$0xf] %vm15840_vm3, %v13066_v59  ;;  %v13097_v11 = vpack.c.bf16 %v2218_v8, %v2218_v8  ;;  %v11290_v16 = vpack.c.bf16 %v2249_v12, %v2249_v12  ;;  %v11321_v18 = vpack.c.bf16 %v2537_v13, %v2537_v13  ;;  %v2251_v19 = vsel %vm13059_vm6, %v13105_v14, 0.0  ;;  %v359_v25 = vld [vmem:[%s12993_s21 + $0x68] sm:$0xff]  ;;  %v2796_v28 = vld [vmem:[#allocation2 + $0x31] sm:$0xff]  ;;  %v2797_v34 = vld [vmem:[#allocation2 + $0x39] sm:$0xff] }
  0x3a   : > { %1103 = vst.msk [vmem:[#allocation3 + $0x2c] sm:$0xf] %vm15840_vm3, %v13077_v0  ;;  %v2539_v21 = vsel %vm13042_vm5, %v13107_v15, 0.0  ;;  %v11292_v23 = vpack.c.bf16 %v2251_v19, %v2251_v19  ;;  %v497_v27 = vand.u32 15, %v425_v22  ;;  %v13131_v29 = vpack.c.bf16 %v2796_v28, %v2796_v28  ;;  %v12376_v37 = vld [vmem:[%s15831_s1 + $0x8] sm:$0x3f]  }
  0x3b   : > { %1545 = vrot.lane.b32.xlu0 %v11195_v41, %s12847_s23  ;;  %391 = vst.msk [vmem:[#allocation2 + $0x71] sm:$0xff] %vm15848_vm0, %v358_v10  ;;  %v11323_v24 = vpack.c.bf16 %v2539_v21, %v2539_v21  ;;  %392 = vst.msk [vmem:[#allocation2 + $0x79] sm:$0xff] %vm15848_vm0, %v359_v25  ;;  %vm13133_vm7 = vcmp.ne.s32.totalorder %v483_v26, 0  ;;  %v3525_v39 = vsel %vm3523_vm9, 4294967295, %v12853_v38  ;;  %v11356_v44 = vpack.c.bf16 %v2797_v34, %v2797_v34  ;;  %v3054_v53 = vld [vmem:[#allocation2 + $0x3a] sm:$0xff]  ;;  %v13233_v22 = vld [vmem:[#allocation2 + $0x4a] sm:$0xff] }
  0x3c   : > { %vm13137_vm8 = vcmp.ne.s32.totalorder %v497_v27, 0  ;;  %v935_v35 = vsel %vm13133_vm7, %v13046_v49, 0.0  ;;  %v424_v52 = vadd.s32 40, %v12988_v2  ;;  %v12377_v54 = vld [vmem:[%s15831_s1] sm:$0xff]   ;;  %v426_v56 = vadd.s32 56, %v12988_v2  ;;  %v361_v13 = vld [vmem:[%s12993_s21 + $0x78] sm:$0xff] }
  0x3d   : > { %1832 = vrot.lane.b32.xlu1 %v11226_v36, %s12848_s24  ;;  %v11133_v36 = vpack.c.bf16 %v935_v35, %v935_v35  ;;  %v937_v43 = vsel %vm13137_vm8, %v13107_v15, 0.0  ;;  %v15922_v62 = vmov 0  ;;  %v1706_v4 = vsel %vm13133_vm7, %v13107_v15, 0.0  ;;  %394 = vst.msk [vmem:[#allocation2 + $0x89] sm:$0xff] %vm15848_vm0, %v361_v13  ;;  %v362_v20 = vld [vmem:[%s12993_s21 + $0x80] sm:$0xff] }
  0x3e   : > { %v11135_v46 = vpack.c.bf16 %v937_v43, %v937_v43  ;;  %v504_v63 = vand.u32 15, %v426_v56  ;;  %v15924_v5 = vmov 0  ;;  %v11229_v8 = vpack.c.bf16 %v1706_v4, %v1706_v4  ;;  %395 = vst.msk [vmem:[#allocation2 + $0x91] sm:$0xff] %vm15848_vm0, %v362_v20 }
  0x3f   : > { %1830 = vrot.lane.b32.xlu0 %v11225_v51, %s12848_s24  ;;  %1096 = vst.msk [vmem:[#allocation3 + $0x10] sm:$0xf] %vm15840_vm3, %v11133_v36  ;;  %v3084_v51 = vsel %vm13038_vm4, %v13105_v14, 0.0  ;;  %v363_v36 = vld [vmem:[%s12993_s21 + $0x88] sm:$0xff]  ;;  %v15928_v47 = vmov 0  ;;  %vm15843_vm9 = vcmask 93256  }
  0x40   : > { %1098 = vst.msk [vmem:[#allocation3 + $0x18] sm:$0xf] %vm15840_vm3, %v11135_v46  ;;  %v11386_v57 = vpack.c.bf16 %v3084_v51, %v3084_v51  ;;  %vm13198_vm12 = vcmp.ne.s32.totalorder %v504_v63, 15  ;;  %v2801_v46 = vld [vmem:[#allocation2 + $0x59] sm:$0xff]  ;;  %v428_v63 = vadd.s32 72, %v12988_v2  ;;  %v15930_v13 = vmov 0 }
  0x41   : > { %1543 = vrot.lane.b32.xlu1 %v11194_v58, %s12847_s23  ;;  %v3086_v58 = vsel %vm13059_vm6, %v3054_v53, 0.0  ;;  %v15925_v5 = vsel %vm13198_vm12, 4294967295, %v15924_v5  ;;  %v2255_v27 = vsel %vm13198_vm12, %v13233_v22, 0.0  ;;  %396 = vst.msk [vmem:[#allocation2 + $0x99] sm:$0xff] %vm15848_vm0, %v363_v36  ;;  %v13292_v56 = vpack.c.bf16 %v2801_v46, %v2801_v46  ;;  %v365_v36 = vld [vmem:[%s12993_s21 + $0x98] sm:$0xff] }
  0x42   : > { %v2516_v30 = vld [vmem:[#allocation2 + $0x78] sm:$0xff]  ;;  %v11388_v61 = vpack.c.bf16 %v3086_v58, %v3086_v58  ;;  %v11296_v34 = vpack.c.bf16 %v2255_v27, %v2255_v27  ;;  %v364_v58 = vld [vmem:[%s12993_s21 + $0x90] sm:$0xff]  ;;  %v1680_v27 = vld [vmem:[#allocation2 + $0x60] sm:$0xff]  ;;  %398 = vst.msk [vmem:[#allocation2 + $0xa9] sm:$0xff] %vm15848_vm0, %v365_v36  ;;  %v15934_v36 = vmov 0  ;;  %vm15994_vm2 = vcmask 220160  }
  0x43   : > { %1834 = vrot.lane.b32.xlu0 %v11227_v60, %s12848_s24  ;;  %v13141_v33 = vpack.c.bf16 %v2516_v30, %v2516_v30  ;;  %v490_v60 = vand.u32 15, %v424_v52  ;;  %v429_v30 = vadd.s32 80, %v12988_v2  ;;  %397 = vst.msk [vmem:[#allocation2 + $0xa1] sm:$0xff] %vm15848_vm0, %v364_v58 }
  0x45   : > { %1547 = vrot.lane.b32.xlu1 %v11196_v3, %s12847_s23  ;;  %1107 = vst.msk [vmem:[#allocation3 + $0x3c] sm:$0xf] %vm15840_vm3, %v13141_v33  ;;  %vm13181_vm11 = vcmp.ne.s32.totalorder %v490_v60, 15  ;;  %v525_v38 = vand.u32 15, %v429_v30 }
  0x46   : > { %v15923_v62 = vsel %vm13181_vm11, 4294967295, %v15922_v62  ;;  %v1418_v3 = vsel %vm13181_vm11, %v13105_v14, 0.0  ;;  %v1965_v14 = vld [vmem:[#allocation2 + $0x41] sm:$0xff]  ;;  %v2253_v21 = vsel %vm13181_vm11, %v3054_v53, 0.0 }
  0x47   : > { %2087 = vrot.lane.b32.xlu0 %v11163_v31, %s12849_s25  ;;  %v11198_v7 = vpack.c.bf16 %v1418_v3, %v1418_v3  ;;  %v13218_v15 = vpack.c.bf16 %v1965_v14, %v1965_v14  ;;  %v11294_v25 = vpack.c.bf16 %v2253_v21, %v2253_v21  ;;  %vm13270_vm15 = vcmp.ne.s32.totalorder %v525_v38, 0  ;;  %v14610_v31 = vld [vmem:[%s15832_s2] ss:$0 sm:$0xff] }
  0x48   : > { %v15929_v47 = vsel %vm13270_vm15, 4294967295, %v15928_v47 }
  0x49   : > { %1836 = vrot.lane.b32.xlu1 %v13033_v42, %s12848_s24 }
  0x4b   : > { %2091 = vrot.lane.b32.xlu0 %v13086_v6, %s12849_s25 }
  0x4d   : > { %2089 = vrot.lane.b32.xlu1 %v11164_v40, %s12849_s25  ;;  %v3053_v40 = vld [vmem:[#allocation2 + $0x32] sm:$0xff] }
  0x4e   : > { %v11387_v49 = vpack.c.bf16 %v3053_v40, %v3053_v40 }
  0x4f   : > { %2376 = vrot.lane.b32.xlu0 %v11195_v41, %s12850_s26  ;;  %v3526_v41 = vsel %vm3524_vm10, %v3525_v39, 0  ;;  %v2800_v39 = vld [vmem:[#allocation2 + $0x51] sm:$0xff] }
  0x50   : > { %v13262_v40 = vpack.c.bf16 %v2800_v39, %v2800_v39  ;;  %v1681_v39 = vld [vmem:[#allocation2 + $0x68] sm:$0xff] }
  0x51   : > { %2093 = vrot.lane.b32.xlu1 %v13093_v9, %s12849_s25 }
  0x53   : > { %2380 = vrot.lane.b32.xlu0 %v13097_v11, %s12850_s26 }
  0x55   : > { %2378 = vrot.lane.b32.xlu1 %v11290_v16, %s12850_s26  ;;  %v1966_v16 = vld [vmem:[#allocation2 + $0x49] sm:$0xff] }
  0x56   : > { %v13225_v19 = vpack.c.bf16 %v1966_v16, %v1966_v16 }
  0x57   : > { %2665 = vrot.lane.b32.xlu0 %v11321_v18, %s12851_s27  ;;  %v2222_v18 = vld [vmem:[#allocation2 + $0x42] sm:$0xff] }
  0x59   : > { %2382 = vrot.lane.b32.xlu1 %v11292_v23, %s12850_s26 }
  0x5b   : > { %2669 = vrot.lane.b32.xlu0 %v11323_v24, %s12851_s27  ;;  %v13238_v24 = vld [vmem:[#allocation2 + $0x50] sm:$0xff] }
  0x5c   : > { %v2543_v28 = vsel %vm13137_vm8, %v13238_v24, 0.0 }
  0x5d   : > { %2667 = vrot.lane.b32.xlu1 %v13033_v42, %s12851_s27  ;;  %v3528_v42 = vand.u32 %v12376_v37, %v3526_v41  ;;  %v11327_v35 = vpack.c.bf16 %v2543_v28, %v2543_v28  ;;  %v2520_v41 = vld [vmem:[#allocation2 + $0x98] sm:$0xff] }
  0x5e   : > { %v13268_v43 = vpack.c.bf16 %v2520_v41, %v2520_v41  ;;  %v1969_v41 = vld [vmem:[#allocation2 + $0x61] sm:$0xff] }
  0x5f   : > { %2922 = vrot.lane.b32.xlu0 %v13086_v6, %s12852_s28  ;;  %12218 = vmatprep.subr.bf16.mxu0 %v3528_v42 }
  0x60   : > { %12219 = vmatpush3.bf16.msra.mxu0 %v3528_v42  ;;  %1111 = vst.msk [vmem:[#allocation3 + $0x4c] sm:$0xf] %vm15840_vm3, %v13268_v43 }
  0x61   : > { %2671 = vrot.lane.b32.xlu1 %v13051_v50, %s12851_s27  ;;  %12220 = vmatprep.subr.bf16.mxu0 %v12377_v54 }
  0x63   : > { %2926 = vrot.lane.b32.xlu0 %v13131_v29, %s12852_s28 }
  0x64   : > { %12221 = vmatpush3.bf16.msra.mxu0 %v12377_v54  ;;  %v941_v54 = vsel %vm13270_vm15, %v13238_v24, 0.0 }
  0x65   : > { %2924 = vrot.lane.b32.xlu1 %v13093_v9, %s12852_s28 }
  0x67   : > { %3211 = vrot.lane.b32.xlu0 %v13097_v11, %s12854_s16 }
  0x69   : > { %2928 = vrot.lane.b32.xlu1 %v11356_v44, %s12852_s28 }
  0x6b   : > { %3215 = vrot.lane.b32.xlu0 %v11387_v49, %s12854_s16 }
  0x6d   : > { %3213 = vrot.lane.b32.xlu1 %v11386_v57, %s12854_s16  ;;  %v11139_v57 = vpack.c.bf16 %v941_v54, %v941_v54  ;;  %v1970_v54 = vld [vmem:[#allocation2 + $0x69] sm:$0xff] }
  0x6e   : > { %v13386_v58 = vpack.c.bf16 %v1970_v54, %v1970_v54  ;;  %v912_v54 = vld [vmem:[#allocation2 + $0x68] sm:$0xff] }
  0x6f   : > { %1260 = vrot.lane.b32.xlu0 %v13086_v6, %s12846_s22  ;;  %v1676_v6 = vld [vmem:[#allocation2 + $0x40] sm:$0xff]  ;;  %1102 = vst.msk [vmem:[#allocation3 + $0x28] sm:$0xf] %vm15840_vm3, %v11139_v57 }
  0x70   : > { %v1708_v10 = vsel %vm13137_vm8, %v1676_v6, 0.0  ;;  %v2541_v23 = vsel %vm13133_vm7, %v1676_v6, 0.0 }
  0x71   : > { %3217 = vrot.lane.b32.xlu1 %v11388_v61, %s12854_s16  ;;  %v11231_v12 = vpack.c.bf16 %v1708_v10, %v1708_v10  ;;  %v11325_v26 = vpack.c.bf16 %v2541_v23, %v2541_v23  ;;  %v3088_v61 = vsel %vm13181_vm11, %v13233_v22, 0.0  ;;  %vm15947_vm11 = vcmask 68656  }
  0x73   : > { %1264 = vrot.lane.b32.xlu0 %v13131_v29, %s12846_s22 }
  0x75   : > { %1262 = vrot.lane.b32.xlu1 %v13093_v9, %s12846_s22  ;;  %v1420_v9 = vsel %vm13198_vm12, %v3054_v53, 0.0  ;;  %v13284_v53 = vld [vmem:[#allocation2 + $0x5a] sm:$0xff] }
  0x76   : > { %v3090_v4 = vsel %vm13198_vm12, %v13284_v53, 0.0  ;;  %vm15942_vm12 = vcmask 44056  }
  0x77   : > { %1549 = vrot.lane.b32.xlu0 %v13097_v11, %s12847_s23  ;;  %v11200_v11 = vpack.c.bf16 %v1420_v9, %v1420_v9  ;;  %v430_v9 = vadd.s32 88, %v12988_v2 }
  0x79   : > { %1266 = vrot.lane.b32.xlu1 %v11356_v44, %s12846_s22  ;;  %v532_v14 = vand.u32 15, %v430_v9 }
  0x7b   : > { %1553 = vrot.lane.b32.xlu0 %v11387_v49, %s12847_s23 }
  0x7d   : > { %1551 = vrot.lane.b32.xlu1 %v11198_v7, %s12847_s23  ;;  %v11390_v7 = vpack.c.bf16 %v3088_v61, %v3088_v61  ;;  %v366_v61 = vld [vmem:[%s12993_s21 + $0xa0] sm:$0xff] }
  0x7e   : > { %399 = vst.msk [vmem:[#allocation2 + $0xb1] sm:$0xff] %vm15848_vm0, %v366_v61  ;;  %v368_v61 = vld [vmem:[%s12993_s21 + $0xb0] sm:$0xff] }
  0x7f   : > { %1838 = vrot.lane.b32.xlu0 %v11229_v8, %s12848_s24  ;;  %v518_v8 = vand.u32 15, %v428_v63 }
  0x81   : > { %1555 = vrot.lane.b32.xlu1 %v11200_v11, %s12847_s23  ;;  %vm13320_vm10 = vcmp.ne.s32.totalorder %v518_v8, 15 }
  0x82   : > { %v15931_v13 = vsel %vm13320_vm10, 4294967295, %v15930_v13 }
  0x83   : > { %1842 = vrot.lane.b32.xlu0 %v11231_v12, %s12848_s24  ;;  %v11392_v12 = vpack.c.bf16 %v3090_v4, %v3090_v4  ;;  %v13396_v4 = vld [vmem:[#allocation2 + $0x6a] sm:$0xff] }
  0x85   : > { %1840 = vrot.lane.b32.xlu1 %v13051_v50, %s12848_s24  ;;  %v13229_v50 = vpack.c.bf16 %v2222_v18, %v2222_v18 }
  0x87   : > { %2095 = vrot.lane.b32.xlu0 %v13131_v29, %s12849_s25  ;;  %v427_v29 = vadd.s32 64, %v12988_v2 }
  0x89   : > { %1844 = vrot.lane.b32.xlu1 %v13066_v59, %s12848_s24  ;;  %v511_v37 = vand.u32 15, %v427_v29  ;;  %v1712_v29 = vsel %vm13270_vm15, %v1680_v27, 0.0 }
  0x8b   : > { %2099 = vrot.lane.b32.xlu0 %v13218_v15, %s12849_s25  ;;  %vm13264_vm14 = vcmp.ne.s32.totalorder %v511_v37, 0 }
  0x8d   : > { %2097 = vrot.lane.b32.xlu1 %v11356_v44, %s12849_s25 }
  0x8f   : > { %2384 = vrot.lane.b32.xlu0 %v11387_v49, %s12850_s26  ;;  %v3057_v49 = vld [vmem:[#allocation2 + $0x52] sm:$0xff] }
  0x90   : > { %v13297_v60 = vpack.c.bf16 %v3057_v49, %v3057_v49  ;;  %v13374_v49 = vpack.c.bf16 %v1969_v41, %v1969_v41 }
  0x91   : > { %2101 = vrot.lane.b32.xlu1 %v13225_v19, %s12849_s25 }
  0x93   : > { %2388 = vrot.lane.b32.xlu0 %v13229_v50, %s12850_s26 }
  0x95   : > { %2386 = vrot.lane.b32.xlu1 %v11294_v25, %s12850_s26  ;;  %v1710_v25 = vsel %vm13264_vm14, %v13238_v24, 0.0 }
  0x97   : > { %2673 = vrot.lane.b32.xlu0 %v11325_v26, %s12851_s27  ;;  %v15932_v26 = vmov 0 }
  0x99   : > { %2390 = vrot.lane.b32.xlu1 %v11296_v34, %s12850_s26 }
  0x9b   : > { %2677 = vrot.lane.b32.xlu0 %v11327_v35, %s12851_s27  ;;  %v11235_v35 = vpack.c.bf16 %v1712_v29, %v1712_v29 }
  0x9d   : > { %2675 = vrot.lane.b32.xlu1 %v13066_v59, %s12851_s27  ;;  %v939_v59 = vsel %vm13264_vm14, %v1676_v6, 0.0 }
  0x9e   : > { %v11137_v51 = vpack.c.bf16 %v939_v59, %v939_v59  ;;  %v13370_v59 = vpack.c.bf16 %v1681_v39, %v1681_v39  ;;  %v15937_v39 = vmov 0 }
  0x9f   : > { %2930 = vrot.lane.b32.xlu0 %v13218_v15, %s12852_s28 }
  0xa0   : > { %1100 = vst.msk [vmem:[#allocation3 + $0x20] sm:$0xf] %vm15840_vm3, %v11137_v51  ;;  %vm15844_vm3 = vcmask 117856  }
  0xa1   : > { %v1253_v44 = vpop.permute.xlu0 %1252  ;;  %2679 = vrot.lane.b32.xlu1 %v13077_v0, %s12851_s27 }
  0xa2   : > { %1349 = vst.msk [vmem:[#allocation3] sm:$0xf] %vm15841_vm13, %v1253_v44 }
  0xa3   : > { %2934 = vrot.lane.b32.xlu0 %v13262_v40, %s12852_s28 }
  0xa5   : > { %v1255_v52 = vpop.permute.xlu0 %1254  ;;  %2932 = vrot.lane.b32.xlu1 %v13225_v19, %s12852_s28 }
  0xa6   : > { %1350 = vst.msk [vmem:[#allocation3 + $0x4] sm:$0xf] %vm15841_vm13, %v1255_v52 }
  0xa7   : > { %3219 = vrot.lane.b32.xlu0 %v13229_v50, %s12854_s16  ;;  %v1257_v3 = vpop.permute.xlu1 %1256 }
  0xa8   : > { %1351 = vst.msk [vmem:[#allocation3 + $0x8] sm:$0xf] %vm15841_vm13, %v1257_v3  ;;  %v2257_v3 = vsel %vm13320_vm10, %v13284_v53, 0.0 }
  0xa9   : > { %v1542_v6 = vpop.permute.xlu0 %1541  ;;  %2936 = vrot.lane.b32.xlu1 %v13292_v56, %s12852_s28 }
  0xaa   : > { %1638 = vst.msk [vmem:[#allocation3] sm:$0xf] %vm15842_vm1, %v1542_v6 }
  0xab   : > { %3223 = vrot.lane.b32.xlu0 %v13297_v60, %s12854_s16  ;;  %v1259_v10 = vpop.permute.xlu1 %1258 }
  0xac   : > { %1352 = vst.msk [vmem:[#allocation3 + $0xc] sm:$0xf] %vm15841_vm13, %v1259_v10  ;;  %vm13341_vm13 = vcmp.ne.s32.totalorder %v532_v14, 15  ;;  %v433_v14 = vadd.s32 112, %v12988_v2 }
  0xad   : > { %v1546_v11 = vpop.permute.xlu0 %1545  ;;  %3221 = vrot.lane.b32.xlu1 %v11390_v7, %s12854_s16  ;;  %v15933_v26 = vsel %vm13341_vm13, 4294967295, %v15932_v26  ;;  %v1424_v24 = vsel %vm13341_vm13, %v13284_v53, 0.0  ;;  %v13401_v7 = vld [vmem:[#allocation2 + $0x70] sm:$0xff]  ;;  %v2259_v9 = vsel %vm13341_vm13, %v13396_v4, 0.0 }
  0xae   : > { %1640 = vst.msk [vmem:[#allocation3 + $0x8] sm:$0xf] %vm15842_vm1, %v1546_v11  ;;  %v11204_v34 = vpack.c.bf16 %v1424_v24, %v1424_v24  ;;  %v2547_v10 = vsel %vm13270_vm15, %v13401_v7, 0.0 }
  0xaf   : > { %1268 = vrot.lane.b32.xlu0 %v13218_v15, %s12846_s22  ;;  %v1833_v16 = vpop.permute.xlu1 %1832  ;;  %v1422_v15 = vsel %vm13320_vm10, %v13233_v22, 0.0  ;;  %v11233_v22 = vpack.c.bf16 %v1710_v25, %v1710_v25  ;;  %v553_v25 = vand.u32 15, %v433_v14 }
  0xb1   : > { %v1831_v18 = vpop.permute.xlu0 %1830  ;;  %3225 = vrot.lane.b32.xlu1 %v11392_v12, %s12854_s16  ;;  %v431_v12 = vadd.s32 96, %v12988_v2 }
  0xb2   : > { %1927 = vst.msk [vmem:[#allocation3] sm:$0xf] %vm15843_vm9, %v1831_v18  ;;  %v11300_v18 = vpack.c.bf16 %v2259_v9, %v2259_v9 }
  0xb3   : > { %1272 = vrot.lane.b32.xlu0 %v13262_v40, %s12846_s22  ;;  %v1544_v20 = vpop.permute.xlu1 %1543 }
  0xb4   : > { %1639 = vst.msk [vmem:[#allocation3 + $0x4] sm:$0xf] %vm15842_vm1, %v1544_v20  ;;  %v11331_v20 = vpack.c.bf16 %v2547_v10, %v2547_v10 }
  0xb5   : > { %v1835_v21 = vpop.permute.xlu0 %1834  ;;  %1928 = vst.msk [vmem:[#allocation3 + $0x4] sm:$0xf] %vm15843_vm9, %v1833_v16  ;;  %1270 = vrot.lane.b32.xlu1 %v13225_v19, %s12846_s22 }
  0xb6   : > { %1929 = vst.msk [vmem:[#allocation3 + $0x8] sm:$0xf] %vm15843_vm9, %v1835_v21  ;;  %v367_v21 = vld [vmem:[%s12993_s21 + $0xa8] sm:$0xff] }
  0xb7   : > { %1557 = vrot.lane.b32.xlu0 %v13229_v50, %s12847_s23  ;;  %v1548_v23 = vpop.permute.xlu1 %1547  ;;  %v11202_v50 = vpack.c.bf16 %v1422_v15, %v1422_v15  ;;  %400 = vst.msk [vmem:[#allocation2 + $0xb9] sm:$0xff] %vm15848_vm0, %v367_v21  ;;  %vm13445_vm0 = vcmp.ne.s32.totalorder %v553_v25, 0  ;;  %v15952_v21 = vmov 0 }
  0xb8   : > { %1641 = vst.msk [vmem:[#allocation3 + $0xc] sm:$0xf] %vm15842_vm1, %v1548_v23  ;;  %vm15845_vm1 = vcmask 142456   ;;  %v539_v23 = vand.u32 15, %v431_v12  ;;  %v15938_v39 = vsel %vm13445_vm0, 4294967295, %v15937_v39  ;;  %v434_v12 = vadd.s32 120, %v12988_v2 }
  0xb9   : > { %v2088_v19 = vpop.permute.xlu0 %2087  ;;  %1274 = vrot.lane.b32.xlu1 %v13292_v56, %s12846_s22 }
  0xba   : > { %2184 = vst.msk [vmem:[#allocation3] sm:$0xf] %vm15844_vm3, %v2088_v19 }
  0xbb   : > { %1561 = vrot.lane.b32.xlu0 %v13297_v60, %s12847_s23  ;;  %v1837_v28 = vpop.permute.xlu1 %1836 }
  0xbc   : > { %1930 = vst.msk [vmem:[#allocation3 + $0xc] sm:$0xf] %vm15843_vm9, %v1837_v28  ;;  %vm15847_vm9 = vcmask 167056  }
  0xbd   : > { %v2092_v30 = vpop.permute.xlu0 %2091  ;;  %1559 = vrot.lane.b32.xlu1 %v11202_v50, %s12847_s23 }
  0xbe   : > { %2186 = vst.msk [vmem:[#allocation3 + $0x8] sm:$0xf] %vm15844_vm3, %v2092_v30  ;;  %v2524_v28 = vld [vmem:[#allocation2 + $0xb8] sm:$0xff] }
  0xbf   : > { %1846 = vrot.lane.b32.xlu0 %v11233_v22, %s12848_s24  ;;  %v2090_v37 = vpop.permute.xlu1 %2089  ;;  %v13435_v30 = vpack.c.bf16 %v2524_v28, %v2524_v28  ;;  %v15958_v28 = vmov 0 }
  0xc0   : > { %2185 = vst.msk [vmem:[#allocation3 + $0x4] sm:$0xf] %vm15844_vm3, %v2090_v37  ;;  %v911_v37 = vld [vmem:[#allocation2 + $0x60] sm:$0xff] }
  0xc1   : > { %v2377_v38 = vpop.permute.xlu0 %2376  ;;  %1563 = vrot.lane.b32.xlu1 %v11204_v34, %s12847_s23 }
  0xc2   : > { %2473 = vst.msk [vmem:[#allocation3] sm:$0xf] %vm15845_vm1, %v2377_v38  ;;  %v3061_v38 = vld [vmem:[#allocation2 + $0x72] sm:$0xff] }
  0xc3   : > { %1850 = vrot.lane.b32.xlu0 %v11235_v35, %s12848_s24  ;;  %v2094_v44 = vpop.permute.xlu1 %2093  ;;  %v2805_v35 = vld [vmem:[#allocation2 + $0x79] sm:$0xff] }
  0xc4   : > { %2187 = vst.msk [vmem:[#allocation3 + $0xc] sm:$0xf] %vm15844_vm3, %v2094_v44  ;;  %vm15846_vm3 = vcmask 191656   ;;  %v13455_v44 = vld [vmem:[#allocation2 + $0x7a] sm:$0xff] }
  0xc5   : > { %v2381_v46 = vpop.permute.xlu0 %2380  ;;  %1848 = vrot.lane.b32.xlu1 %v13077_v0, %s12848_s24  ;;  %v2226_v0 = vld [vmem:[#allocation2 + $0x62] sm:$0xff] }
  0xc6   : > { %2475 = vst.msk [vmem:[#allocation3 + $0x8] sm:$0xf] %vm15845_vm1, %v2381_v46  ;;  %v13391_v63 = vpack.c.bf16 %v2226_v0, %v2226_v0  ;;  %v13465_v0 = vpack.c.bf16 %v2805_v35, %v2805_v35 }
  0xc7   : > { %2103 = vrot.lane.b32.xlu0 %v13262_v40, %s12849_s25  ;;  %v2379_v51 = vpop.permute.xlu1 %2378 }
  0xc8   : > { %2474 = vst.msk [vmem:[#allocation3 + $0x4] sm:$0xf] %vm15845_vm1, %v2379_v51 }
  0xc9   : > { %v2666_v52 = vpop.permute.xlu0 %2665  ;;  %1852 = vrot.lane.b32.xlu1 %v13370_v59, %s12848_s24 }
  0xca   : > { %2762 = vst.msk [vmem:[#allocation3] sm:$0xf] %vm15847_vm9, %v2666_v52  ;;  %v945_v52 = vsel %vm13445_vm0, %v13401_v7, 0.0 }
  0xcb   : > { %2107 = vrot.lane.b32.xlu0 %v13374_v49, %s12849_s25  ;;  %v2383_v57 = vpop.permute.xlu1 %2382 }
  0xcc   : > { %2476 = vst.msk [vmem:[#allocation3 + $0xc] sm:$0xf] %vm15845_vm1, %v2383_v57  ;;  %vm15849_vm1 = vcmask 216256   ;;  %v11143_v57 = vpack.c.bf16 %v945_v52, %v945_v52  ;;  %v1685_v52 = vld [vmem:[#allocation2 + $0x88] sm:$0xff] }
  0xcd   : > { %v2670_v40 = vpop.permute.xlu0 %2669  ;;  %2105 = vrot.lane.b32.xlu1 %v13292_v56, %s12849_s25  ;;  %v2545_v56 = vsel %vm13264_vm14, %v1680_v27, 0.0  ;;  %v2804_v27 = vld [vmem:[#allocation2 + $0x71] sm:$0xff] }
  0xce   : > { %2764 = vst.msk [vmem:[#allocation3 + $0x8] sm:$0xf] %vm15847_vm9, %v2670_v40  ;;  %v11329_v53 = vpack.c.bf16 %v2545_v56, %v2545_v56  ;;  %v13433_v24 = vpack.c.bf16 %v2804_v27, %v2804_v27  ;;  %v11142_v40 = vpack.c.bf16 %v912_v54, %v912_v54  ;;  %v432_v56 = vadd.s32 104, %v12988_v2  ;;  %v1973_v54 = vld [vmem:[#allocation2 + $0x81] sm:$0xff] }
  0xcf   : > { %2392 = vrot.lane.b32.xlu0 %v13297_v60, %s12850_s26  ;;  %v2668_v6 = vpop.permute.xlu1 %2667  ;;  %v11298_v60 = vpack.c.bf16 %v2257_v3, %v2257_v3  ;;  %v13470_v3 = vpack.c.bf16 %v3061_v38, %v3061_v38 }
  0xd0   : > { %2763 = vst.msk [vmem:[#allocation3 + $0x4] sm:$0xf] %vm15847_vm9, %v2668_v6  ;;  %v3092_v6 = vsel %vm13320_vm10, %v13396_v4, 0.0  ;;  %vm15948_vm10 = vcmask 220160  }
  0xd1   : > { %v2923_v8 = vpop.permute.xlu0 %2922  ;;  %2109 = vrot.lane.b32.xlu1 %v13386_v58, %s12849_s25  ;;  %v11394_v10 = vpack.c.bf16 %v3092_v6, %v3092_v6  ;;  %v13551_v6 = vpack.c.bf16 %v1973_v54, %v1973_v54  ;;  %v15985_v54 = vmov 0 }
  0xd2   : > { %3019 = vst.msk [vmem:[#allocation3] sm:$0xf] %vm15846_vm3, %v2923_v8 }
  0xd3   : > { %2396 = vrot.lane.b32.xlu0 %v13391_v63, %s12850_s26  ;;  %v2672_v11 = vpop.permute.xlu1 %2671 }
  0xd4   : > { %2765 = vst.msk [vmem:[#allocation3 + $0xc] sm:$0xf] %vm15847_vm9, %v2672_v11  ;;  %vm15936_vm9 = vcmask 44056   ;;  %v546_v11 = vand.u32 15, %v432_v56 }
  0xd5   : > { %v2927_v16 = vpop.permute.xlu0 %2926  ;;  %2394 = vrot.lane.b32.xlu1 %v11298_v60, %s12850_s26 }
  0xd6   : > { %3021 = vst.msk [vmem:[#allocation3 + $0x8] sm:$0xf] %vm15846_vm3, %v2927_v16 }
  0xd7   : > { %2681 = vrot.lane.b32.xlu0 %v11329_v53, %s12851_s27  ;;  %v2925_v15 = vpop.permute.xlu1 %2924  ;;  %v3094_v53 = vsel %vm13341_vm13, %v13455_v44, 0.0  ;;  %vm15966_vm13 = vcmask 142456  }
  0xd8   : > { %3020 = vst.msk [vmem:[#allocation3 + $0x4] sm:$0xf] %vm15846_vm3, %v2925_v15  ;;  %v560_v15 = vand.u32 15, %v434_v12 }
  0xd9   : > { %v3212_v19 = vpop.permute.xlu0 %3211  ;;  %2398 = vrot.lane.b32.xlu1 %v11300_v18, %s12850_s26 }
  0xda   : > { %3308 = vst.msk [vmem:[#allocation3] sm:$0xf] %vm15849_vm1, %v3212_v19 }
  0xdb   : > { %2685 = vrot.lane.b32.xlu0 %v11331_v20, %s12851_s27  ;;  %v2929_v50 = vpop.permute.xlu1 %2928  ;;  %v11396_v20 = vpack.c.bf16 %v3094_v53, %v3094_v53  ;;  %v2230_v53 = vld [vmem:[#allocation2 + $0x82] sm:$0xff] }
  0xdc   : > { %3022 = vst.msk [vmem:[#allocation3 + $0xc] sm:$0xf] %vm15846_vm3, %v2929_v50  ;;  %vm13438_vm3 = vcmp.ne.s32.totalorder %v539_v23, 0 }
  0xdd   : > { %v3216_v22 = vpop.permute.xlu0 %3215  ;;  %2683 = vrot.lane.b32.xlu1 %v13370_v59, %s12851_s27  ;;  %v15935_v36 = vsel %vm13438_vm3, 4294967295, %v15934_v36  ;;  %v943_v41 = vsel %vm13438_vm3, %v911_v37, 0.0 }
  0xde   : > { %3310 = vst.msk [vmem:[#allocation3 + $0x8] sm:$0xf] %vm15849_vm1, %v3216_v22  ;;  %v11141_v46 = vpack.c.bf16 %v943_v41, %v943_v41  ;;  %v1714_v22 = vsel %vm13438_vm3, %v13401_v7, 0.0 }
  0xdf   : > { %2938 = vrot.lane.b32.xlu0 %v13374_v49, %s12852_s28  ;;  %v3214_v29 = vpop.permute.xlu1 %3213 }
  0xe0   : > { %3309 = vst.msk [vmem:[#allocation3 + $0x4] sm:$0xf] %vm15849_vm1, %v3214_v29  ;;  %vm15939_vm1 = vcmask 19456  }
  0xe1   : > { %v1261_v34 = vpop.permute.xlu0 %1260  ;;  %2687 = vrot.lane.b32.xlu1 %v13141_v33, %s12851_s27  ;;  %1115 = vst.msk [vmem:[#allocation3 + $0x5c] sm:$0xf] %vm15939_vm1, %v13435_v30  ;;  %vm15941_vm15 = vmmov %vm15939_vm1 }
  0xe2   : > { %1353 = vst.msk [vmem:[#allocation3 + $0x10] sm:$0xf] %vm15936_vm9, %v1261_v34  ;;  %vm15940_vm9 = vcmask 216256  }
  0xe3   : > { %2942 = vrot.lane.b32.xlu0 %v13433_v24, %s12852_s28  ;;  %v3218_v59 = vpop.permute.xlu1 %3217  ;;  %1104 = vst.msk [vmem:[#allocation3 + $0x30] sm:$0xf] %vm15941_vm15, %v11141_v46  ;;  %vm15944_vm15 = vmmov %vm15939_vm1  ;;  %v369_v46 = vld [vmem:[%s12993_s21 + $0xb8] sm:$0xff] }
  0xe4   : > { %3311 = vst.msk [vmem:[#allocation3 + $0xc] sm:$0xf] %vm15940_vm9, %v3218_v59  ;;  %vm15945_vm9 = vmmov %vm15939_vm1  ;;  %vm15946_vm1 = vcmask 44056  }
  0xe5   : > { %v1265_v51 = vpop.permute.xlu0 %1264  ;;  %2940 = vrot.lane.b32.xlu1 %v13386_v58, %s12852_s28  ;;  %1106 = vst.msk [vmem:[#allocation3 + $0x38] sm:$0xf] %vm15944_vm15, %v11143_v57 }
  0xe6   : > { %1355 = vst.msk [vmem:[#allocation3 + $0x18] sm:$0xf] %vm15942_vm12, %v1265_v51  ;;  %vm15943_vm12 = vcmask 23552  }
  0xe7   : > { %3227 = vrot.lane.b32.xlu0 %v13391_v63, %s12854_s16  ;;  %401 = vst.msk [vmem:[#allocation2 + $0xc1] sm:$0xff] %vm15943_vm12, %v368_v61  ;;  %v1263_v8 = vpop.permute.xlu1 %1262  ;;  %v12378_v60 = vld [vmem:[#allocation3] sm:$0xff]   ;;  %vm15949_vm12 = vmmov %vm15946_vm1  ;;  %v11240_v61 = vpack.c.bf16 %v1685_v52, %v1685_v52  ;;  %v2809_v52 = vld [vmem:[#allocation2 + $0x99] sm:$0xff] }
  0xe8   : > { %1105 = vst.msk [vmem:[#allocation3 + $0x34] sm:$0xf] %vm15945_vm9, %v11142_v40  ;;  %12222 = vmatprep.mubr.msk.bf16.mxu0 %vm15948_vm10, %v12378_v60  ;;  %vm15955_vm9 = vcmask 93256   ;;  %v1974_v60 = vld [vmem:[#allocation2 + $0x89] sm:$0xff] }
  0xe9   : > { %1354 = vst.msk [vmem:[#allocation3 + $0x14] sm:$0xf] %vm15946_vm1, %v1263_v8  ;;  %v1550_v9 = vpop.permute.xlu0 %1549  ;;  %2944 = vrot.lane.b32.xlu1 %v13465_v0, %s12852_s28  ;;  %vm15950_vm1 = vmmov %vm15947_vm11 }
  0xea   : > { %1642 = vst.msk [vmem:[#allocation3 + $0x10] sm:$0xf] %vm15947_vm11, %v1550_v9  ;;  %vm15951_vm11 = vmmov %vm15948_vm10  ;;  %vm13496_vm10 = vcmp.ne.s32.totalorder %v546_v11, 15  ;;  %v13562_v9 = vpack.c.bf16 %v1974_v60, %v1974_v60  ;;  %v13567_v11 = vpack.c.bf16 %v2230_v53, %v2230_v53  ;;  %v916_v60 = vld [vmem:[#allocation2 + $0x88] sm:$0xff]  ;;  %v13636_v53 = vpack.c.bf16 %v2809_v52, %v2809_v52 }
  0xeb   : > { %3231 = vrot.lane.b32.xlu0 %v13470_v3, %s12854_s16  ;;  %v1267_v14 = vpop.permute.xlu1 %1266  ;;  %v12379_v16 = vld [vmem:[#allocation3 + $0x8] sm:$0xff]   ;;  %v15953_v21 = vsel %vm13496_vm10, 4294967295, %v15952_v21  ;;  %vm15954_vm15 = vmmov %vm15950_vm1  ;;  %v1426_v27 = vsel %vm13496_vm10, %v13396_v4, 0.0  ;;  %v11237_v4 = vpack.c.bf16 %v1714_v22, %v1714_v22  ;;  %v2261_v12 = vsel %vm13496_vm10, %v13455_v44, 0.0 }
  0xec   : > { %1356 = vst.msk [vmem:[#allocation3 + $0x1c] sm:$0xf] %vm15949_vm12, %v1267_v14  ;;  %12223 = vmatmul.mubr.msk.bf16.vlgmr.msra.gmra.mxu0 %vm15951_vm11, %v12379_v16  ;;  %vm15956_vm12 = vmmov %vm15950_vm1  ;;  %vm13517_vm11 = vcmp.ne.s32.totalorder %v560_v15, 15  ;;  %v13572_v14 = vld [vmem:[#allocation2 + $0x8a] sm:$0xff] }
  0xed   : > { %v1554_v18 = vpop.permute.xlu0 %1553  ;;  %3229 = vrot.lane.b32.xlu1 %v11394_v10, %s12854_s16  ;;  %v15959_v28 = vsel %vm13517_vm11, 4294967295, %v15958_v28  ;;  %v1428_v7 = vsel %vm13517_vm11, %v13455_v44, 0.0  ;;  %v370_v10 = vld [vmem:[%s12993_s21 + $0xc0] sm:$0xff]  ;;  %v11302_v44 = vpack.c.bf16 %v2261_v12, %v2261_v12  ;;  %v2263_v15 = vsel %vm13517_vm11, %v13572_v14, 0.0 }
  0xee   : > { %1644 = vst.msk [vmem:[#allocation3 + $0x18] sm:$0xf] %vm15950_vm1, %v1554_v18  ;;  %vm15957_vm1 = vmmov %vm15955_vm9  ;;  %v11208_v38 = vpack.c.bf16 %v1428_v7, %v1428_v7  ;;  %v13578_v18 = vld [vmem:[#allocation2 + $0x90] sm:$0xff] }
  0xef   : > { %1276 = vrot.lane.b32.xlu0 %v13374_v49, %s12846_s22  ;;  %v1552_v23 = vpop.permute.xlu1 %1551 }
  0xf0   : > { %1643 = vst.msk [vmem:[#allocation3 + $0x14] sm:$0xf] %vm15954_vm15, %v1552_v23  ;;  %vm15960_vm15 = vmmov %vm15957_vm1  ;;  %v2551_v23 = vsel %vm13445_vm0, %v13578_v18, 0.0 }
  0xf1   : > { %v1839_v25 = vpop.permute.xlu0 %1838  ;;  %3233 = vrot.lane.b32.xlu1 %v11396_v20, %s12854_s16  ;;  %v11335_v22 = vpack.c.bf16 %v2551_v23, %v2551_v23 }
  0xf2   : > { %1931 = vst.msk [vmem:[#allocation3 + $0x10] sm:$0xf] %vm15955_vm9, %v1839_v25  ;;  %vm15961_vm9 = vcmask 117856  }
  0xf3   : > { %1280 = vrot.lane.b32.xlu0 %v13433_v24, %s12846_s22  ;;  %v1556_v19 = vpop.permute.xlu1 %1555 }
  0xf4   : > { %1645 = vst.msk [vmem:[#allocation3 + $0x1c] sm:$0xf] %vm15956_vm12, %v1556_v19  ;;  %vm15962_vm12 = vmmov %vm15957_vm1  ;;  %v435_v19 = vadd.s32 128, %v12988_v2 }
  0xf5   : > { %v1843_v49 = vpop.permute.xlu0 %1842  ;;  %1278 = vrot.lane.b32.xlu1 %v13386_v58, %s12846_s22  ;;  %v13522_v58 = vld [vmem:[#allocation2 + $0x80] sm:$0xff] }
  0xf6   : > { %1933 = vst.msk [vmem:[#allocation3 + $0x18] sm:$0xf] %vm15957_vm1, %v1843_v49  ;;  %v1716_v35 = vsel %vm13445_vm0, %v13522_v58, 0.0  ;;  %vm15963_vm1 = vmmov %vm15961_vm9  ;;  %v437_v49 = vadd.s32 144, %v12988_v2  ;;  %vm15992_vm0 = vcmask 44056  }
  0xf7   : > { %1565 = vrot.lane.b32.xlu0 %v13391_v63, %s12847_s23  ;;  %v1841_v50 = vpop.permute.xlu1 %1840  ;;  %v11206_v63 = vpack.c.bf16 %v1426_v27, %v1426_v27  ;;  %v11239_v41 = vpack.c.bf16 %v1716_v35, %v1716_v35  ;;  %v2808_v35 = vld [vmem:[#allocation2 + $0x91] sm:$0xff] }
  0xf8   : > { %1932 = vst.msk [vmem:[#allocation3 + $0x14] sm:$0xf] %vm15960_vm15, %v1841_v50  ;;  %vm15964_vm15 = vcmask 23552   ;;  %v11304_v50 = vpack.c.bf16 %v2263_v15, %v2263_v15  ;;  %v581_v7 = vand.u32 15, %v437_v49  ;;  %v436_v49 = vadd.s32 136, %v12988_v2 }
  0xf9   : > { %v2096_v29 = vpop.permute.xlu0 %2095  ;;  %1282 = vrot.lane.b32.xlu1 %v13465_v0, %s12846_s22  ;;  %402 = vst.msk [vmem:[#allocation2 + $0xc9] sm:$0xff] %vm15964_vm15, %v369_v46  ;;  %vm15970_vm15 = vcmask 167056  }
  0xfa   : > { %2188 = vst.msk [vmem:[#allocation3 + $0x10] sm:$0xf] %vm15961_vm9, %v2096_v29  ;;  %vm15965_vm9 = vmmov %vm15963_vm1  ;;  %v371_v29 = vld [vmem:[%s12993_s21 + $0xc8] sm:$0xff] }
  0xfb   : > { %1569 = vrot.lane.b32.xlu0 %v13470_v3, %s12847_s23  ;;  %v1845_v34 = vpop.permute.xlu1 %1844 }
  0xfc   : > { %1934 = vst.msk [vmem:[#allocation3 + $0x1c] sm:$0xf] %vm15962_vm12, %v1845_v34  ;;  %vm15967_vm12 = vmmov %vm15963_vm1 }
  0xfd   : > { %v2100_v37 = vpop.permute.xlu0 %2099  ;;  %1567 = vrot.lane.b32.xlu1 %v11206_v63, %s12847_s23 }
  0xfe   : > { %2190 = vst.msk [vmem:[#allocation3 + $0x18] sm:$0xf] %vm15963_vm1, %v2100_v37  ;;  %vm15968_vm1 = vmmov %vm15966_vm13 }
  0xff   : > { %1854 = vrot.lane.b32.xlu0 %v11237_v4, %s12848_s24  ;;  %v2098_v59 = vpop.permute.xlu1 %2097  ;;  %v567_v4 = vand.u32 15, %v435_v19 }
 0x100   : > { %2189 = vst.msk [vmem:[#allocation3 + $0x14] sm:$0xf] %vm15965_vm9, %v2098_v59  ;;  %vm15971_vm9 = vmmov %vm15968_vm1  ;;  %v15982_v59 = vmov 0 }
 0x101   : > { %v2385_v51 = vpop.permute.xlu0 %2384  ;;  %1571 = vrot.lane.b32.xlu1 %v11208_v38, %s12847_s23 }
 0x102   : > { %2477 = vst.msk [vmem:[#allocation3 + $0x10] sm:$0xf] %vm15966_vm13, %v2385_v51  ;;  %vm15969_vm13 = vmmov %vm15968_vm1 }
 0x103   : > { %1858 = vrot.lane.b32.xlu0 %v11239_v41, %s12848_s24  ;;  %v2102_v57 = vpop.permute.xlu1 %2101  ;;  %v13609_v41 = vpack.c.bf16 %v2808_v35, %v2808_v35 }
 0x104   : > { %2191 = vst.msk [vmem:[#allocation3 + $0x1c] sm:$0xf] %vm15967_vm12, %v2102_v57  ;;  %vm15972_vm12 = vmmov %vm15970_vm15 }
 0x105   : > { %v2389_v40 = vpop.permute.xlu0 %2388  ;;  %1856 = vrot.lane.b32.xlu1 %v13141_v33, %s12848_s24 }
 0x106   : > { %2479 = vst.msk [vmem:[#allocation3 + $0x18] sm:$0xf] %vm15968_vm1, %v2389_v40  ;;  %vm15973_vm1 = vcmask 23552   ;;  %v3065_v40 = vld [vmem:[#allocation2 + $0x92] sm:$0xff] }
 0x107   : > { %2111 = vrot.lane.b32.xlu0 %v13433_v24, %s12849_s25  ;;  %v2387_v56 = vpop.permute.xlu1 %2386  ;;  %403 = vst.msk [vmem:[#allocation2 + $0xd1] sm:$0xff] %vm15973_vm1, %v370_v10  ;;  %404 = vst.msk [vmem:[#allocation2 + $0xd9] sm:$0xff] %vm15973_vm1, %v371_v29  ;;  %vm13611_vm1 = vcmp.ne.s32.totalorder %v567_v4, 0  ;;  %v372_v10 = vld [vmem:[%s12993_s21 + $0xd0] sm:$0xff]  ;;  %v13641_v12 = vpack.c.bf16 %v3065_v40, %v3065_v40  ;;  %v574_v29 = vand.u32 15, %v436_v49 }
 0x108   : > { %2478 = vst.msk [vmem:[#allocation3 + $0x14] sm:$0xf] %vm15969_vm13, %v2387_v56  ;;  %vm15974_vm13 = vmmov %vm15972_vm12  ;;  %v15983_v59 = vsel %vm13611_vm1, 4294967295, %v15982_v59  ;;  %v947_v57 = vsel %vm13611_vm1, %v13522_v58, 0.0 }
 0x109   : > { %v2674_v8 = vpop.permute.xlu0 %2673  ;;  %1860 = vrot.lane.b32.xlu1 %v11240_v61, %s12848_s24 }
 0x10a   : > { %2766 = vst.msk [vmem:[#allocation3 + $0x10] sm:$0xf] %vm15970_vm15, %v2674_v8  ;;  %vm15975_vm15 = vcmask 191656  }
 0x10b   : > { %2115 = vrot.lane.b32.xlu0 %v13551_v6, %s12849_s25  ;;  %v2391_v33 = vpop.permute.xlu1 %2390 }
 0x10c   : > { %2480 = vst.msk [vmem:[#allocation3 + $0x1c] sm:$0xf] %vm15971_vm9, %v2391_v33  ;;  %vm15976_vm9 = vmmov %vm15972_vm12 }
 0x10d   : > { %v2678_v24 = vpop.permute.xlu0 %2677  ;;  %2113 = vrot.lane.b32.xlu1 %v13465_v0, %s12849_s25  ;;  %v2549_v0 = vsel %vm13438_vm3, %v13522_v58, 0.0  ;;  %vm15993_vm3 = vcmask 68656  }
 0x10e   : > { %2768 = vst.msk [vmem:[#allocation3 + $0x18] sm:$0xf] %vm15972_vm12, %v2678_v24  ;;  %v11333_v20 = vpack.c.bf16 %v2549_v0, %v2549_v0  ;;  %vm15977_vm12 = vmmov %vm15975_vm15  ;;  %v11146_v24 = vpack.c.bf16 %v916_v60, %v916_v60 }
 0x10f   : > { %2400 = vrot.lane.b32.xlu0 %v13470_v3, %s12850_s26  ;;  %v2676_v16 = vpop.permute.xlu1 %2675 }
 0x110   : > { %2767 = vst.msk [vmem:[#allocation3 + $0x14] sm:$0xf] %vm15974_vm13, %v2676_v16  ;;  %vm15978_vm13 = vmmov %vm15977_vm12  ;;  %v3096_v16 = vsel %vm13496_vm10, %v13572_v14, 0.0  ;;  %vm16037_vm10 = vcmask 68656  }
 0x111   : > { %v2931_v3 = vpop.permute.xlu0 %2930  ;;  %2117 = vrot.lane.b32.xlu1 %v13562_v9, %s12849_s25  ;;  %v11398_v15 = vpack.c.bf16 %v3096_v16, %v3096_v16  ;;  %v1977_v16 = vld [vmem:[#allocation2 + $0xa1] sm:$0xff] }
 0x112   : > { %3023 = vst.msk [vmem:[#allocation3 + $0x10] sm:$0xf] %vm15975_vm15, %v2931_v3  ;;  %vm15979_vm15 = vcmask 216256  }
 0x113   : > { %2404 = vrot.lane.b32.xlu0 %v13567_v11, %s12850_s26  ;;  %v2680_v25 = vpop.permute.xlu1 %2679 }
 0x114   : > { %2769 = vst.msk [vmem:[#allocation3 + $0x1c] sm:$0xf] %vm15976_vm9, %v2680_v25  ;;  %vm15980_vm9 = vmmov %vm15977_vm12 }
 0x115   : > { %v2935_v27 = vpop.permute.xlu0 %2934  ;;  %2402 = vrot.lane.b32.xlu1 %v11302_v44, %s12850_s26  ;;  %v13647_v44 = vld [vmem:[#allocation2 + $0x9a] sm:$0xff] }
 0x116   : > { %3025 = vst.msk [vmem:[#allocation3 + $0x18] sm:$0xf] %vm15977_vm12, %v2935_v27  ;;  %vm15981_vm12 = vmmov %vm15979_vm15  ;;  %v3098_v23 = vsel %vm13517_vm11, %v13647_v44, 0.0  ;;  %vm16009_vm11 = vcmask 142456  }
 0x117   : > { %2689 = vrot.lane.b32.xlu0 %v11333_v20, %s12851_s27  ;;  %v2933_v63 = vpop.permute.xlu1 %2932 }
 0x118   : > { %3024 = vst.msk [vmem:[#allocation3 + $0x14] sm:$0xf] %vm15978_vm13, %v2933_v63  ;;  %vm15984_vm13 = vmmov %vm15981_vm12  ;;  %v438_v63 = vadd.s32 152, %v12988_v2 }
 0x119   : > { %v3220_v34 = vpop.permute.xlu0 %3219  ;;  %2406 = vrot.lane.b32.xlu1 %v11304_v50, %s12850_s26  ;;  %v11400_v50 = vpack.c.bf16 %v3098_v23, %v3098_v23 }
 0x11a   : > { %3312 = vst.msk [vmem:[#allocation3 + $0x10] sm:$0xf] %vm15979_vm15, %v3220_v34  ;;  %vm13616_vm15 = vcmp.ne.s32.totalorder %v581_v7, 0  ;;  %v15997_v7 = vmov 0  ;;  %v588_v34 = vand.u32 15, %v438_v63 }
 0x11b   : > { %2693 = vrot.lane.b32.xlu0 %v11335_v22, %s12851_s27  ;;  %v2937_v37 = vpop.permute.xlu1 %2936  ;;  %v15986_v54 = vsel %vm13616_vm15, 4294967295, %v15985_v54  ;;  %v949_v58 = vsel %vm13616_vm15, %v13578_v18, 0.0 }
 0x11c   : > { %3026 = vst.msk [vmem:[#allocation3 + $0x1c] sm:$0xf] %vm15980_vm9, %v2937_v37  ;;  %vm15987_vm9 = vcmask 44056   ;;  %v11147_v33 = vpack.c.bf16 %v949_v58, %v949_v58  ;;  %v373_v58 = vld [vmem:[%s12993_s21 + $0xd8] sm:$0xff] }
 0x11d   : > { %v3224_v38 = vpop.permute.xlu0 %3223  ;;  %2691 = vrot.lane.b32.xlu1 %v11240_v61, %s12851_s27  ;;  %v11145_v61 = vpack.c.bf16 %v947_v57, %v947_v57 }
 0x11e   : > { %3314 = vst.msk [vmem:[#allocation3 + $0x18] sm:$0xf] %vm15981_vm12, %v3224_v38  ;;  %vm15988_vm12 = vcmask 19456  }
 0x11f   : > { %2946 = vrot.lane.b32.xlu0 %v13551_v6, %s12852_s28  ;;  %v3222_v46 = vpop.permute.xlu1 %3221  ;;  %1108 = vst.msk [vmem:[#allocation3 + $0x40] sm:$0xf] %vm15988_vm12, %v11145_v61  ;;  %vm15989_vm12 = vcmask 23552  }
 0x120   : > { %3313 = vst.msk [vmem:[#allocation3 + $0x14] sm:$0xf] %vm15984_vm13, %v3222_v46  ;;  %v1718_v46 = vsel %vm13611_vm1, %v13578_v18, 0.0 }
 0x121   : > { %v1269_v51 = vpop.permute.xlu0 %1268  ;;  %2695 = vrot.lane.b32.xlu1 %v13268_v43, %s12851_s27  ;;  %405 = vst.msk [vmem:[#allocation2 + $0xe1] sm:$0xff] %vm15989_vm12, %v372_v10  ;;  %vm15995_vm12 = vmmov %vm15993_vm3 }
 0x122   : > { %1357 = vst.msk [vmem:[#allocation3 + $0x20] sm:$0xf] %vm15987_vm9, %v1269_v51  ;;  %v16001_v51 = vmov 0 }
 0x123   : > { %2950 = vrot.lane.b32.xlu0 %v13609_v41, %s12852_s28  ;;  %v3226_v56 = vpop.permute.xlu1 %3225 }
 0x124   : > { %3315 = vst.msk [vmem:[#allocation3 + $0x1c] sm:$0xf] %vm15984_vm13, %v3226_v56  ;;  %vm15990_vm13 = vcmask 19456  }
 0x125   : > { %v1273_v8 = vpop.permute.xlu0 %1272  ;;  %2948 = vrot.lane.b32.xlu1 %v13562_v9, %s12852_s28  ;;  %1110 = vst.msk [vmem:[#allocation3 + $0x48] sm:$0xf] %vm15990_vm13, %v11147_v33 }
 0x126   : > { %1359 = vst.msk [vmem:[#allocation3 + $0x28] sm:$0xf] %vm15987_vm9, %v1273_v8  ;;  %vm15991_vm9 = vmmov %vm15990_vm13  ;;  %vm15866_vm13 = vcmask 261120  }
 0x127   : > { %3235 = vrot.lane.b32.xlu0 %v13567_v11, %s12854_s16  ;;  %v1271_v0 = vpop.permute.xlu1 %1270  ;;  %v12380_v3 = vld [vmem:[#allocation3 + $0x10] sm:$0xff]   ;;  %1109 = vst.msk [vmem:[#allocation3 + $0x44] sm:$0xf] %vm15991_vm9, %v11146_v24  ;;  %vm15996_vm9 = vcmask 93256   ;;  %v1689_v24 = vld [vmem:[#allocation2 + $0xa8] sm:$0xff] }
 0x128   : > { %1358 = vst.msk [vmem:[#allocation3 + $0x24] sm:$0xf] %vm15992_vm0, %v1271_v0  ;;  %12226 = vmatprep.mubr.msk.bf16.mxu0 %vm15994_vm2, %v12380_v3  ;;  %v11244_v3 = vpack.c.bf16 %v1689_v24, %v1689_v24 }
 0x129   : > { %v1558_v20 = vpop.permute.xlu0 %1557  ;;  %2952 = vrot.lane.b32.xlu1 %v13636_v53, %s12852_s28  ;;  %3756 = vst.msk [vmem:[#allocation4] sm:$0xff] %vm15866_vm13, %v15894_v1  ;;  %3757 = vst.msk [vmem:[#allocation4 + $0x8] sm:$0xff] %vm15866_vm13, %v15894_v1 }
 0x12a   : > { %1646 = vst.msk [vmem:[#allocation3 + $0x20] sm:$0xf] %vm15993_vm3, %v1558_v20  ;;  %v13731_v20 = vpack.c.bf16 %v1977_v16, %v1977_v16 }
 0x12b   : > { %3239 = vrot.lane.b32.xlu0 %v13641_v12, %s12854_s16  ;;  %v1275_v25 = vpop.permute.xlu1 %1274  ;;  %v12381_v19 = vld [vmem:[#allocation3 + $0x18] sm:$0xff]   ;;  %3760 = vst.msk [vmem:[#allocation4 + $0x111] sm:$0xff] %vm15866_vm13, %v15894_v1  ;;  %3761 = vst.msk [vmem:[#allocation4 + $0x119] sm:$0xff] %vm15866_vm13, %v15894_v1 }
 0x12c   : > { %1360 = vst.msk [vmem:[#allocation3 + $0x2c] sm:$0xf] %vm15992_vm0, %v1275_v25  ;;  %12227 = vmatmul.mubr.msk.bf16.gmra.mxu0 %vm15994_vm2, %v12381_v19  ;;  %vm13682_vm0 = vcmp.ne.s32.totalorder %v574_v29, 15  ;;  %vm15999_vm2 = vmmov %vm15995_vm12  ;;  %v1978_v25 = vld [vmem:[#allocation2 + $0xa9] sm:$0xff] }
 0x12d   : > { %v1562_v27 = vpop.permute.xlu0 %1561  ;;  %3237 = vrot.lane.b32.xlu1 %v11398_v15, %s12854_s16  ;;  %v15998_v7 = vsel %vm13682_vm0, 4294967295, %v15997_v7  ;;  %v1430_v37 = vsel %vm13682_vm0, %v13572_v14, 0.0  ;;  %v11241_v14 = vpack.c.bf16 %v1718_v46, %v1718_v46  ;;  %v2234_v19 = vld [vmem:[#allocation2 + $0xa2] sm:$0xff]  ;;  %v13742_v49 = vpack.c.bf16 %v1978_v25, %v1978_v25 }
 0x12e   : > { %1648 = vst.msk [vmem:[#allocation3 + $0x28] sm:$0xf] %vm15993_vm3, %v1562_v27  ;;  %vm3758_vm3 = vcmask 253952   ;;  %v374_v27 = vld [vmem:[%s12993_s21 + $0xe0] sm:$0xff] }
 0x12f   : > { %1284 = vrot.lane.b32.xlu0 %v13551_v6, %s12846_s22  ;;  %v1560_v22 = vpop.permute.xlu1 %1559  ;;  %3762 = vst.msk [vmem:[#allocation4 + $0x121] sm:$0x1] %vm3758_vm3, %v15894_v1  ;;  %3759 = vst.msk [vmem:[#allocation4 + $0x10] sm:$0x1] %vm3758_vm3, %v15894_v1 }
 0x130   : > { %1647 = vst.msk [vmem:[#allocation3 + $0x24] sm:$0xf] %vm15995_vm12, %v1560_v22  ;;  %vm16000_vm12 = vmmov %vm15996_vm9  ;;  %v2265_v22 = vsel %vm13682_vm0, %v13647_v44, 0.0 }
 0x131   : > { %v1847_v4 = vpop.permute.xlu0 %1846  ;;  %3241 = vrot.lane.b32.xlu1 %v11400_v50, %s12854_s16  ;;  %vm16003_vm3 = vmmov %vm16000_vm12  ;;  %v13747_v50 = vpack.c.bf16 %v2234_v19, %v2234_v19  ;;  %v3069_v19 = vld [vmem:[#allocation2 + $0xb2] sm:$0xff] }
 0x132   : > { %1935 = vst.msk [vmem:[#allocation3 + $0x20] sm:$0xf] %vm15996_vm9, %v1847_v4  ;;  %vm13700_vm9 = vcmp.ne.s32.totalorder %v588_v34, 15  ;;  %v13755_v4 = vld [vmem:[#allocation2 + $0xaa] sm:$0xff] }
 0x133   : > { %1288 = vrot.lane.b32.xlu0 %v13609_v41, %s12846_s22  ;;  %v1564_v6 = vpop.permute.xlu1 %1563  ;;  %v16002_v51 = vsel %vm13700_vm9, 4294967295, %v16001_v51  ;;  %v1432_v18 = vsel %vm13700_vm9, %v13647_v44, 0.0  ;;  %v2267_v34 = vsel %vm13700_vm9, %v13755_v4, 0.0 }
 0x134   : > { %1649 = vst.msk [vmem:[#allocation3 + $0x2c] sm:$0xf] %vm15999_vm2, %v1564_v6  ;;  %vm16004_vm2 = vcmask 117856   ;;  %v11212_v56 = vpack.c.bf16 %v1432_v18, %v1432_v18  ;;  %v13758_v6 = vld [vmem:[#allocation2 + $0xb0] sm:$0xff]  ;;  %v11308_v46 = vpack.c.bf16 %v2267_v34, %v2267_v34  ;;  %v439_v18 = vadd.s32 160, %v12988_v2 }
 0x135   : > { %v1851_v35 = vpop.permute.xlu0 %1850  ;;  %1286 = vrot.lane.b32.xlu1 %v13562_v9, %s12846_s22  ;;  %v1688_v9 = vld [vmem:[#allocation2 + $0xa0] sm:$0xff]  ;;  %v13823_v34 = vpack.c.bf16 %v3069_v19, %v3069_v19 }
 0x136   : > { %1937 = vst.msk [vmem:[#allocation3 + $0x28] sm:$0xf] %vm16000_vm12, %v1851_v35  ;;  %v1720_v40 = vsel %vm13616_vm15, %v1688_v9, 0.0  ;;  %vm16005_vm12 = vmmov %vm16003_vm3  ;;  %v2553_v63 = vsel %vm13611_vm1, %v1688_v9, 0.0  ;;  %v375_v9 = vld [vmem:[%s12993_s21 + $0xe8] sm:$0xff]  ;;  %vm16038_vm1 = vcmask 220160  }
 0x137   : > { %1573 = vrot.lane.b32.xlu0 %v13567_v11, %s12847_s23  ;;  %v1849_v38 = vpop.permute.xlu1 %1848  ;;  %v11210_v11 = vpack.c.bf16 %v1430_v37, %v1430_v37  ;;  %v11243_v8 = vpack.c.bf16 %v1720_v40, %v1720_v40  ;;  %v11337_v44 = vpack.c.bf16 %v2553_v63, %v2553_v63  ;;  %v2555_v37 = vsel %vm13616_vm15, %v13758_v6, 0.0  ;;  %v2812_v40 = vld [vmem:[#allocation2 + $0xb1] sm:$0xff] }
 0x138   : > { %1936 = vst.msk [vmem:[#allocation3 + $0x24] sm:$0xf] %vm16003_vm3, %v1849_v38  ;;  %vm16006_vm3 = vmmov %vm16004_vm2  ;;  %vm16036_vm15 = vcmask 44056  }
 0x139   : > { %v2104_v52 = vpop.permute.xlu0 %2103  ;;  %1290 = vrot.lane.b32.xlu1 %v13636_v53, %s12846_s22  ;;  %vm16008_vm13 = vmmov %vm16006_vm3 }
 0x13a   : > { %2192 = vst.msk [vmem:[#allocation3 + $0x20] sm:$0xf] %vm16004_vm2, %v2104_v52  ;;  %vm16007_vm2 = vcmask 23552   ;;  %v11339_v52 = vpack.c.bf16 %v2555_v37, %v2555_v37 }
 0x13b   : > { %1577 = vrot.lane.b32.xlu0 %v13641_v12, %s12847_s23  ;;  %v1853_v57 = vpop.permute.xlu1 %1852  ;;  %406 = vst.msk [vmem:[#allocation2 + $0xe9] sm:$0xff] %vm16007_vm2, %v373_v58  ;;  %v13788_v58 = vpack.c.bf16 %v2812_v40, %v2812_v40 }
 0x13c   : > { %1938 = vst.msk [vmem:[#allocation3 + $0x2c] sm:$0xf] %vm16005_vm12, %v1853_v57  ;;  %vm16010_vm12 = vmmov %vm16006_vm3 }
 0x13d   : > { %v2108_v61 = vpop.permute.xlu0 %2107  ;;  %1575 = vrot.lane.b32.xlu1 %v11210_v11, %s12847_s23 }
 0x13e   : > { %2194 = vst.msk [vmem:[#allocation3 + $0x28] sm:$0xf] %vm16006_vm3, %v2108_v61  ;;  %vm16011_vm3 = vmmov %vm16009_vm11  ;;  %v441_v61 = vadd.s32 176, %v12988_v2 }
 0x13f   : > { %1862 = vrot.lane.b32.xlu0 %v11241_v14, %s12848_s24  ;;  %v2106_v60 = vpop.permute.xlu1 %2105  ;;  %vm16014_vm2 = vmmov %vm16011_vm3 }
 0x140   : > { %2193 = vst.msk [vmem:[#allocation3 + $0x24] sm:$0xf] %vm16008_vm13, %v2106_v60  ;;  %vm16013_vm13 = vcmask 167056   ;;  %v609_v24 = vand.u32 15, %v441_v61 }
 0x141   : > { %v2393_v33 = vpop.permute.xlu0 %2392  ;;  %1579 = vrot.lane.b32.xlu1 %v11212_v56, %s12847_s23 }
 0x142   : > { %2481 = vst.msk [vmem:[#allocation3 + $0x20] sm:$0xf] %vm16009_vm11, %v2393_v33  ;;  %vm16012_vm11 = vmmov %vm16011_vm3 }
 0x143   : > { %1866 = vrot.lane.b32.xlu0 %v11243_v8, %s12848_s24  ;;  %v2110_v10 = vpop.permute.xlu1 %2109  ;;  %v595_v8 = vand.u32 15, %v439_v18 }
 0x144   : > { %2195 = vst.msk [vmem:[#allocation3 + $0x2c] sm:$0xf] %vm16010_vm12, %v2110_v10  ;;  %vm16015_vm12 = vmmov %vm16013_vm13 }
 0x145   : > { %v2397_v0 = vpop.permute.xlu0 %2396  ;;  %1864 = vrot.lane.b32.xlu1 %v13268_v43, %s12848_s24 }
 0x146   : > { %2483 = vst.msk [vmem:[#allocation3 + $0x28] sm:$0xf] %vm16011_vm3, %v2397_v0  ;;  %vm16016_vm3 = vcmask 23552   ;;  %v16026_v0 = vmov 0 }
 0x147   : > { %2119 = vrot.lane.b32.xlu0 %v13609_v41, %s12849_s25  ;;  %v2395_v15 = vpop.permute.xlu1 %2394  ;;  %407 = vst.msk [vmem:[#allocation2 + $0xf1] sm:$0xff] %vm16016_vm3, %v374_v27  ;;  %408 = vst.msk [vmem:[#allocation2 + $0xf9] sm:$0xff] %vm16016_vm3, %v375_v9 }
 0x148   : > { %2482 = vst.msk [vmem:[#allocation3 + $0x24] sm:$0xf] %vm16012_vm11, %v2395_v15  ;;  %vm16017_vm11 = vmmov %vm16015_vm12  ;;  %v919_v15 = vld [vmem:[#allocation2 + $0xa0] sm:$0xff] }
 0x149   : > { %v2682_v23 = vpop.permute.xlu0 %2681  ;;  %1868 = vrot.lane.b32.xlu1 %v11244_v3, %s12848_s24 }
 0x14a   : > { %2770 = vst.msk [vmem:[#allocation3 + $0x20] sm:$0xf] %vm16013_vm13, %v2682_v23  ;;  %vm16018_vm13 = vcmask 191656   ;;  %v2813_v23 = vld [vmem:[#allocation2 + $0xb9] sm:$0xff] }
 0x14b   : > { %2123 = vrot.lane.b32.xlu0 %v13731_v20, %s12849_s25  ;;  %v2399_v43 = vpop.permute.xlu1 %2398  ;;  %v13818_v63 = vpack.c.bf16 %v2813_v23, %v2813_v23 }
 0x14c   : > { %2484 = vst.msk [vmem:[#allocation3 + $0x2c] sm:$0xf] %vm16014_vm2, %v2399_v43  ;;  %vm16019_vm2 = vmmov %vm16017_vm11 }
 0x14d   : > { %v2686_v41 = vpop.permute.xlu0 %2685  ;;  %2121 = vrot.lane.b32.xlu1 %v13636_v53, %s12849_s25 }
 0x14e   : > { %2772 = vst.msk [vmem:[#allocation3 + $0x28] sm:$0xf] %vm16015_vm12, %v2686_v41  ;;  %vm16020_vm12 = vmmov %vm16018_vm13  ;;  %v2532_v60 = vld [vmem:[#allocation2 + $0xf8] sm:$0xff]  ;;  %v16030_v41 = vmov 0 }
 0x14f   : > { %2408 = vrot.lane.b32.xlu0 %v13641_v12, %s12850_s26  ;;  %v2684_v29 = vpop.permute.xlu1 %2683  ;;  %v11306_v12 = vpack.c.bf16 %v2265_v22, %v2265_v22  ;;  %v13790_v10 = vpack.c.bf16 %v2532_v60, %v2532_v60  ;;  %v442_v60 = vadd.s32 184, %v12988_v2 }
 0x150   : > { %2771 = vst.msk [vmem:[#allocation3 + $0x24] sm:$0xf] %vm16017_vm11, %v2684_v29  ;;  %vm16021_vm11 = vmmov %vm16020_vm12  ;;  %v920_v29 = vld [vmem:[#allocation2 + $0xa8] sm:$0xff] }
 0x151   : > { %v2939_v53 = vpop.permute.xlu0 %2938  ;;  %2125 = vrot.lane.b32.xlu1 %v13742_v49, %s12849_s25 }
 0x152   : > { %3027 = vst.msk [vmem:[#allocation3 + $0x20] sm:$0xf] %vm16018_vm13, %v2939_v53  ;;  %vm16022_vm13 = vcmask 216256  }
 0x153   : > { %2412 = vrot.lane.b32.xlu0 %v13747_v50, %s12850_s26  ;;  %v2688_v35 = vpop.permute.xlu1 %2687 }
 0x154   : > { %2773 = vst.msk [vmem:[#allocation3 + $0x2c] sm:$0xf] %vm16019_vm2, %v2688_v35  ;;  %vm16023_vm2 = vmmov %vm16021_vm11  ;;  %v3100_v35 = vsel %vm13682_vm0, %v13755_v4, 0.0 }
 0x155   : > { %v2943_v38 = vpop.permute.xlu0 %2942  ;;  %2410 = vrot.lane.b32.xlu1 %v11306_v12, %s12850_s26  ;;  %v11150_v12 = vpack.c.bf16 %v920_v29, %v920_v29  ;;  %v11402_v9 = vpack.c.bf16 %v3100_v35, %v3100_v35  ;;  %v450_v29 = vadd.s32 248, %v12988_v2  ;;  %v377_v35 = vld [vmem:[%s12993_s21 + $0xf8] sm:$0xff] }
 0x156   : > { %3029 = vst.msk [vmem:[#allocation3 + $0x28] sm:$0xf] %vm16020_vm12, %v2943_v38  ;;  %vm16024_vm12 = vmmov %vm16022_vm13 }
 0x157   : > { %2697 = vrot.lane.b32.xlu0 %v11337_v44, %s12851_s27  ;;  %v2941_v11 = vpop.permute.xlu1 %2940  ;;  %vm16025_vm3 = vmmov %vm16024_vm12  ;;  %v376_v44 = vld [vmem:[%s12993_s21 + $0xf0] sm:$0xff]  ;;  %s12856_s21 = smov 64  }
 0x158   : > { %3028 = vst.msk [vmem:[#allocation3 + $0x24] sm:$0xf] %vm16021_vm11, %v2941_v11  ;;  %vm13793_vm11 = vcmp.ne.s32.totalorder %v595_v8, 0 }
 0x159   : > { %v3228_v14 = vpop.permute.xlu0 %3227  ;;  %2414 = vrot.lane.b32.xlu1 %v11308_v46, %s12850_s26  ;;  %v16027_v0 = vsel %vm13793_vm11, 4294967295, %v16026_v0  ;;  %v13829_v46 = vld [vmem:[#allocation2 + $0xba] sm:$0xff] }
 0x15a   : > { %3316 = vst.msk [vmem:[#allocation3 + $0x20] sm:$0xf] %vm16022_vm13, %v3228_v14  ;;  %vm16028_vm13 = vcmask 44056   ;;  %v3102_v11 = vsel %vm13700_vm9, %v13829_v46, 0.0  ;;  %vm16053_vm9 = vcmask 142456  }
 0x15b   : > { %2701 = vrot.lane.b32.xlu0 %v11339_v52, %s12851_s27  ;;  %v2945_v57 = vpop.permute.xlu1 %2944  ;;  %v11404_v61 = vpack.c.bf16 %v3102_v11, %v3102_v11 }
 0x15c   : > { %3030 = vst.msk [vmem:[#allocation3 + $0x2c] sm:$0xf] %vm16023_vm2, %v2945_v57  ;;  %vm16029_vm2 = vcmask 19456   ;;  %v440_v57 = vadd.s32 168, %v12988_v2 }
 0x15d   : > { %v3232_v56 = vpop.permute.xlu0 %3231  ;;  %2699 = vrot.lane.b32.xlu1 %v11244_v3, %s12851_s27  ;;  %v951_v3 = vsel %vm13793_vm11, %v919_v15, 0.0  ;;  %1123 = vst.msk [vmem:[#allocation3 + $0x7c] sm:$0xf] %vm16029_vm2, %v13790_v10 }
 0x15e   : > { %3318 = vst.msk [vmem:[#allocation3 + $0x28] sm:$0xf] %vm16024_vm12, %v3232_v56  ;;  %v11149_v25 = vpack.c.bf16 %v951_v3, %v951_v3  ;;  %vm13806_vm12 = vcmp.ne.s32.totalorder %v609_v24, 0  ;;  %v602_v8 = vand.u32 15, %v440_v57  ;;  %v5878_v57 = vld [vmem:[#allocation4 + $0x11a] sm:$0xff] }
 0x15f   : > { %2954 = vrot.lane.b32.xlu0 %v13731_v20, %s12852_s28  ;;  %v3230_v33 = vpop.permute.xlu1 %3229  ;;  %v16031_v41 = vsel %vm13806_vm12, 4294967295, %v16030_v41  ;;  %v953_v22 = vsel %vm13806_vm12, %v13758_v6, 0.0 }
 0x160   : > { %3317 = vst.msk [vmem:[#allocation3 + $0x24] sm:$0xf] %vm16025_vm3, %v3230_v33  ;;  %v11151_v53 = vpack.c.bf16 %v953_v22, %v953_v22 }
 0x161   : > { %v1277_v16 = vpop.permute.xlu0 %1276  ;;  %2703 = vrot.lane.b32.xlu1 %v13435_v30, %s12851_s27 }
 0x162   : > { %1361 = vst.msk [vmem:[#allocation3 + $0x30] sm:$0xf] %vm16028_vm13, %v1277_v16  ;;  %vm16032_vm13 = vmmov %vm16029_vm2  ;;  %vm16033_vm2 = vcmask 44056   ;;  %v16041_v16 = vmov 0 }
 0x163   : > { %2958 = vrot.lane.b32.xlu0 %v13788_v58, %s12852_s28  ;;  %v3234_v43 = vpop.permute.xlu1 %3233  ;;  %1112 = vst.msk [vmem:[#allocation3 + $0x50] sm:$0xf] %vm16032_vm13, %v11149_v25  ;;  %1114 = vst.msk [vmem:[#allocation3 + $0x58] sm:$0xf] %vm16032_vm13, %v11151_v53  ;;  %v1722_v25 = vsel %vm13793_vm11, %v13758_v6, 0.0 }
 0x164   : > { %3319 = vst.msk [vmem:[#allocation3 + $0x2c] sm:$0xf] %vm16025_vm3, %v3234_v43  ;;  %vm16034_vm3 = vcmask 23552   ;;  %v16045_v43 = vmov 0 }
 0x165   : > { %v1281_v27 = vpop.permute.xlu0 %1280  ;;  %2956 = vrot.lane.b32.xlu1 %v13742_v49, %s12852_s28  ;;  %409 = vst.msk [vmem:[#allocation2 + $0x101] sm:$0xff] %vm16034_vm3, %v376_v44  ;;  %vm16039_vm3 = vmmov %vm16037_vm10 }
 0x166   : > { %1363 = vst.msk [vmem:[#allocation3 + $0x38] sm:$0xf] %vm16033_vm2, %v1281_v27  ;;  %vm16035_vm2 = vmmov %vm16032_vm13  ;;  %vm16040_vm13 = vcmask 93256  }
 0x167   : > { %3243 = vrot.lane.b32.xlu0 %v13747_v50, %s12854_s16  ;;  %v1279_v37 = vpop.permute.xlu1 %1278  ;;  %v12382_v38 = vld [vmem:[#allocation3 + $0x20] sm:$0xff]   ;;  %1113 = vst.msk [vmem:[#allocation3 + $0x54] sm:$0xf] %vm16035_vm2, %v11150_v12  ;;  %vm13856_vm2 = vcmp.ne.s32.totalorder %v602_v8, 15 }
 0x168   : > { %1362 = vst.msk [vmem:[#allocation3 + $0x34] sm:$0xf] %vm16036_vm15, %v1279_v37  ;;  %12230 = vmatprep.mubr.msk.bf16.mxu0 %vm16038_vm1, %v12382_v38  ;;  %v16042_v16 = vsel %vm13856_vm2, 4294967295, %v16041_v16  ;;  %v1434_v3 = vsel %vm13856_vm2, %v13755_v4, 0.0  ;;  %v11245_v4 = vpack.c.bf16 %v1722_v25, %v1722_v25  ;;  %v672_v38 = vand.u32 15, %v450_v29 }
 0x169   : > { %v1566_v52 = vpop.permute.xlu0 %1565  ;;  %2960 = vrot.lane.b32.xlu1 %v13818_v63, %s12852_s28  ;;  %v2269_v25 = vsel %vm13856_vm2, %v13829_v46, 0.0 }
 0x16a   : > { %1650 = vst.msk [vmem:[#allocation3 + $0x30] sm:$0xf] %vm16037_vm10, %v1566_v52 }
 0x16b   : > { %3247 = vrot.lane.b32.xlu0 %v13823_v34, %s12854_s16  ;;  %v1283_v14 = vpop.permute.xlu1 %1282  ;;  %v12383_v18 = vld [vmem:[#allocation3 + $0x28] sm:$0xff]  }
 0x16c   : > { %1364 = vst.msk [vmem:[#allocation3 + $0x3c] sm:$0xf] %vm16036_vm15, %v1283_v14  ;;  %12231 = vmatmul.mubr.msk.bf16.gmra.mxu0 %vm16038_vm1, %v12383_v18  ;;  %vm16043_vm15 = vmmov %vm16039_vm3  ;;  %v1981_v14 = vld [vmem:[#allocation2 + $0xc1] sm:$0xff]  ;;  %v16054_v18 = vmov 0 }
 0x16d   : > { %v1570_v40 = vpop.permute.xlu0 %1569  ;;  %3245 = vrot.lane.b32.xlu1 %v11402_v9, %s12854_s16  ;;  %v1693_v9 = vld [vmem:[#allocation2 + $0xc8] sm:$0xff] }
 0x16e   : > { %1652 = vst.msk [vmem:[#allocation3 + $0x38] sm:$0xf] %vm16037_vm10, %v1570_v40  ;;  %vm16044_vm10 = vmmov %vm16040_vm13 }
 0x16f   : > { %1292 = vrot.lane.b32.xlu0 %v13731_v20, %s12846_s22  ;;  %v1568_v56 = vpop.permute.xlu1 %1567  ;;  %v616_v20 = vand.u32 15, %v442_v60  ;;  %v13910_v60 = vpack.c.bf16 %v1981_v14, %v1981_v14 }
 0x170   : > { %1651 = vst.msk [vmem:[#allocation3 + $0x34] sm:$0xf] %vm16039_vm3, %v1568_v56  ;;  %vm16047_vm3 = vmmov %vm16044_vm10  ;;  %v11248_v56 = vpack.c.bf16 %v1693_v9, %v1693_v9  ;;  %v2816_v9 = vld [vmem:[#allocation2 + $0xd1] sm:$0xff] }
 0x171   : > { %v1855_v33 = vpop.permute.xlu0 %1854  ;;  %3249 = vrot.lane.b32.xlu1 %v11404_v61, %s12854_s16  ;;  %vm13872_vm1 = vcmp.ne.s32.totalorder %v616_v20, 15 }
 0x172   : > { %1939 = vst.msk [vmem:[#allocation3 + $0x30] sm:$0xf] %vm16040_vm13, %v1855_v33  ;;  %v16046_v43 = vsel %vm13872_vm1, 4294967295, %v16045_v43  ;;  %vm16048_vm13 = vcmask 117856   ;;  %v1436_v6 = vsel %vm13872_vm1, %v13829_v46, 0.0 }
 0x173   : > { %1296 = vrot.lane.b32.xlu0 %v13788_v58, %s12846_s22  ;;  %v1572_v24 = vpop.permute.xlu1 %1571  ;;  %v11216_v12 = vpack.c.bf16 %v1436_v6, %v1436_v6  ;;  %v13936_v6 = vld [vmem:[#allocation2 + $0xd0] sm:$0xff] }
 0x174   : > { %1653 = vst.msk [vmem:[#allocation3 + $0x3c] sm:$0xf] %vm16043_vm15, %v1572_v24  ;;  %vm16049_vm15 = vmmov %vm16047_vm3 }
 0x175   : > { %v1859_v15 = vpop.permute.xlu0 %1858  ;;  %1294 = vrot.lane.b32.xlu1 %v13742_v49, %s12846_s22  ;;  %v1692_v49 = vld [vmem:[#allocation2 + $0xc0] sm:$0xff] }
 0x176   : > { %1941 = vst.msk [vmem:[#allocation3 + $0x38] sm:$0xf] %vm16044_vm10, %v1859_v15  ;;  %v1724_v22 = vsel %vm13806_vm12, %v1692_v49, 0.0  ;;  %vm16050_vm10 = vmmov %vm16048_vm13  ;;  %v2238_v15 = vld [vmem:[#allocation2 + $0xc2] sm:$0xff] }
 0x177   : > { %1581 = vrot.lane.b32.xlu0 %v13747_v50, %s12847_s23  ;;  %v1857_v23 = vpop.permute.xlu1 %1856  ;;  %v11214_v50 = vpack.c.bf16 %v1434_v3, %v1434_v3  ;;  %v11247_v44 = vpack.c.bf16 %v1724_v22, %v1724_v22  ;;  %v2559_v22 = vsel %vm13806_vm12, %v13936_v6, 0.0  ;;  %vm16079_vm12 = vcmask 68656  }
 0x178   : > { %1940 = vst.msk [vmem:[#allocation3 + $0x34] sm:$0xf] %vm16047_vm3, %v1857_v23  ;;  %vm16051_vm3 = vcmask 23552   ;;  %v13926_v23 = vpack.c.bf16 %v2238_v15, %v2238_v15  ;;  %v2817_v15 = vld [vmem:[#allocation2 + $0xd9] sm:$0xff] }
 0x179   : > { %v2112_v19 = vpop.permute.xlu0 %2111  ;;  %1298 = vrot.lane.b32.xlu1 %v13818_v63, %s12846_s22  ;;  %410 = vst.msk [vmem:[#allocation2 + $0x109] sm:$0xff] %vm16051_vm3, %v377_v35  ;;  %vm16056_vm3 = vmmov %vm16053_vm9 }
 0x17a   : > { %2196 = vst.msk [vmem:[#allocation3 + $0x30] sm:$0xf] %vm16048_vm13, %v2112_v19  ;;  %vm16052_vm13 = vmmov %vm16050_vm10 }
 0x17b   : > { %1585 = vrot.lane.b32.xlu0 %v13823_v34, %s12847_s23  ;;  %v1861_v27 = vpop.permute.xlu1 %1860 }
 0x17c   : > { %1942 = vst.msk [vmem:[#allocation3 + $0x3c] sm:$0xf] %vm16049_vm15, %v1861_v27  ;;  %vm13898_vm15 = vcmp.ne.s32.totalorder %v672_v38, 15  ;;  %v2528_v38 = vld [vmem:[#allocation2 + $0xd8] sm:$0xff] }
 0x17d   : > { %v2116_v53 = vpop.permute.xlu0 %2115  ;;  %1583 = vrot.lane.b32.xlu1 %v11214_v50, %s12847_s23  ;;  %v16055_v18 = vsel %vm13898_vm15, 4294967295, %v16054_v18  ;;  %v5910_v61 = vsel %vm13898_vm15, %v5878_v57, 0.0  ;;  %v2557_v50 = vsel %vm13793_vm11, %v1692_v49, 0.0  ;;  %v445_v57 = vadd.s32 208, %v12988_v2 }
 0x17e   : > { %2198 = vst.msk [vmem:[#allocation3 + $0x38] sm:$0xf] %vm16050_vm10, %v2116_v53  ;;  %v11704_v8 = vpack.c.bf16 %v5910_v61, %v5910_v61  ;;  %v11341_v46 = vpack.c.bf16 %v2557_v50, %v2557_v50  ;;  %v13966_v61 = vpack.c.bf16 %v2816_v9, %v2816_v9  ;;  %vm16080_vm11 = vcmask 220160  }
 0x17f   : > { %1870 = vrot.lane.b32.xlu0 %v11245_v4, %s12848_s24  ;;  %v2114_v37 = vpop.permute.xlu1 %2113  ;;  %v13933_v4 = vld [vmem:[#allocation2 + $0xca] sm:$0xff] }
 0x180   : > { %2197 = vst.msk [vmem:[#allocation3 + $0x34] sm:$0xf] %vm16052_vm13, %v2114_v37  ;;  %vm16057_vm13 = vmmov %vm16056_vm3  ;;  %v2271_v49 = vsel %vm13872_vm1, %v13933_v4, 0.0  ;;  %v443_v37 = vadd.s32 192, %v12988_v2 }
 0x181   : > { %v2401_v52 = vpop.permute.xlu0 %2400  ;;  %1587 = vrot.lane.b32.xlu1 %v11216_v12, %s12847_s23  ;;  %v11312_v53 = vpack.c.bf16 %v2271_v49, %v2271_v49  ;;  %v11343_v12 = vpack.c.bf16 %v2559_v22, %v2559_v22  ;;  %v13989_v49 = vpack.c.bf16 %v2817_v15, %v2817_v15 }
 0x182   : > { %2485 = vst.msk [vmem:[#allocation3 + $0x30] sm:$0xf] %vm16053_vm9, %v2401_v52  ;;  %vm15879_vm9 = vcmask 257024   ;;  %v623_v14 = vand.u32 15, %v443_v37  ;;  %v14000_v37 = vld [vmem:[#allocation2 + $0xda] sm:$0xff] }
 0x183   : > { %1874 = vrot.lane.b32.xlu0 %v11247_v44, %s12848_s24  ;;  %v2118_v11 = vpop.permute.xlu1 %2117  ;;  %6070 = vst.msk [vmem:[#allocation5 + $0x17c] sm:$0xf] %vm15879_vm9, %v11704_v8  ;;  %vm16075_vm9 = vcmask 44056  }
 0x184   : > { %2199 = vst.msk [vmem:[#allocation3 + $0x3c] sm:$0xf] %vm16050_vm10, %v2118_v11  ;;  %vm16058_vm10 = vcmask 167056  }
 0x185   : > { %v2405_v40 = vpop.permute.xlu0 %2404  ;;  %1872 = vrot.lane.b32.xlu1 %v13435_v30, %s12848_s24  ;;  %v1982_v30 = vld [vmem:[#allocation2 + $0xc9] sm:$0xff]  ;;  %vm16059_vm0 = vmmov %vm16058_vm10 }
 0x186   : > { %2487 = vst.msk [vmem:[#allocation3 + $0x38] sm:$0xf] %vm16056_vm3, %v2405_v40  ;;  %v13922_v3 = vpack.c.bf16 %v1982_v30, %v1982_v30  ;;  %v13962_v40 = vpack.c.bf16 %v2528_v38, %v2528_v38  ;;  %v637_v30 = vand.u32 15, %v445_v57 }
 0x187   : > { %2127 = vrot.lane.b32.xlu0 %v13788_v58, %s12849_s25  ;;  %v2403_v33 = vpop.permute.xlu1 %2402 }
 0x188   : > { %2486 = vst.msk [vmem:[#allocation3 + $0x34] sm:$0xf] %vm16057_vm13, %v2403_v33  ;;  %vm16060_vm13 = vcmask 191656  }
 0x189   : > { %v2690_v24 = vpop.permute.xlu0 %2689  ;;  %1876 = vrot.lane.b32.xlu1 %v11248_v56, %s12848_s24 }
 0x18a   : > { %2774 = vst.msk [vmem:[#allocation3 + $0x30] sm:$0xf] %vm16058_vm10, %v2690_v24  ;;  %vm16061_vm10 = vmmov %vm16059_vm0  ;;  %v16068_v24 = vmov 0 }
 0x18b   : > { %2131 = vrot.lane.b32.xlu0 %v13910_v60, %s12849_s25  ;;  %v2407_v20 = vpop.permute.xlu1 %2406 }
 0x18c   : > { %2488 = vst.msk [vmem:[#allocation3 + $0x3c] sm:$0xf] %vm16056_vm3, %v2407_v20  ;;  %vm16062_vm3 = vmmov %vm16060_vm13  ;;  %v923_v20 = vld [vmem:[#allocation2 + $0xc0] sm:$0xff] }
 0x18d   : > { %v2694_v58 = vpop.permute.xlu0 %2693  ;;  %2129 = vrot.lane.b32.xlu1 %v13818_v63, %s12849_s25 }
 0x18e   : > { %2776 = vst.msk [vmem:[#allocation3 + $0x38] sm:$0xf] %vm16059_vm0, %v2694_v58 }
 0x18f   : > { %2416 = vrot.lane.b32.xlu0 %v13823_v34, %s12850_s26  ;;  %v2692_v19 = vpop.permute.xlu1 %2691  ;;  %v11310_v34 = vpack.c.bf16 %v2269_v25, %v2269_v25 }
 0x190   : > { %2775 = vst.msk [vmem:[#allocation3 + $0x34] sm:$0xf] %vm16059_vm0, %v2692_v19  ;;  %vm16063_vm0 = vmmov %vm16062_vm3  ;;  %v3073_v19 = vld [vmem:[#allocation2 + $0xd2] sm:$0xff] }
 0x191   : > { %v2947_v63 = vpop.permute.xlu0 %2946  ;;  %2133 = vrot.lane.b32.xlu1 %v13922_v3, %s12849_s25 }
 0x192   : > { %3031 = vst.msk [vmem:[#allocation3 + $0x30] sm:$0xf] %vm16060_vm13, %v2947_v63  ;;  %vm16064_vm13 = vcmask 216256   ;;  %v16072_v63 = vmov 0 }
 0x193   : > { %2420 = vrot.lane.b32.xlu0 %v13926_v23, %s12850_s26  ;;  %v2696_v27 = vpop.permute.xlu1 %2695 }
 0x194   : > { %2777 = vst.msk [vmem:[#allocation3 + $0x3c] sm:$0xf] %vm16061_vm10, %v2696_v27  ;;  %vm16065_vm10 = vmmov %vm16063_vm0 }
 0x195   : > { %v2951_v29 = vpop.permute.xlu0 %2950  ;;  %2418 = vrot.lane.b32.xlu1 %v11310_v34, %s12850_s26  ;;  %v925_v34 = vld [vmem:[#allocation2 + $0xd0] sm:$0xff] }
 0x196   : > { %3033 = vst.msk [vmem:[#allocation3 + $0x38] sm:$0xf] %vm16062_vm3, %v2951_v29  ;;  %vm16066_vm3 = vmmov %vm16064_vm13  ;;  %v13995_v29 = vpack.c.bf16 %v3073_v19, %v3073_v19 }
 0x197   : > { %2705 = vrot.lane.b32.xlu0 %v11341_v46, %s12851_s27  ;;  %v2949_v44 = vpop.permute.xlu1 %2948  ;;  %v924_v46 = vld [vmem:[#allocation2 + $0xc8] sm:$0xff] }
 0x198   : > { %3032 = vst.msk [vmem:[#allocation3 + $0x34] sm:$0xf] %vm16063_vm0, %v2949_v44  ;;  %vm16067_vm0 = vmmov %vm16066_vm3  ;;  %v11154_v22 = vpack.c.bf16 %v924_v46, %v924_v46 }
 0x199   : > { %v3236_v35 = vpop.permute.xlu0 %3235  ;;  %2422 = vrot.lane.b32.xlu1 %v11312_v53, %s12850_s26  ;;  %v3104_v53 = vsel %vm13856_vm2, %v13933_v4, 0.0  ;;  %vm16103_vm2 = vcmask 142456  }
 0x19a   : > { %3320 = vst.msk [vmem:[#allocation3 + $0x30] sm:$0xf] %vm16064_vm13, %v3236_v35  ;;  %vm13969_vm13 = vcmp.ne.s32.totalorder %v623_v14, 0  ;;  %v11406_v9 = vpack.c.bf16 %v3104_v53, %v3104_v53  ;;  %v3106_v14 = vsel %vm13872_vm1, %v14000_v37, 0.0 }
 0x19b   : > { %2709 = vrot.lane.b32.xlu0 %v11343_v12, %s12851_s27  ;;  %v2953_v52 = vpop.permute.xlu1 %2952  ;;  %v16069_v24 = vsel %vm13969_vm13, 4294967295, %v16068_v24  ;;  %v11408_v15 = vpack.c.bf16 %v3106_v14, %v3106_v14 }
 0x19c   : > { %3034 = vst.msk [vmem:[#allocation3 + $0x3c] sm:$0xf] %vm16065_vm10, %v2953_v52  ;;  %vm16070_vm10 = vcmask 44056   ;;  %v926_v52 = vld [vmem:[#allocation2 + $0xd8] sm:$0xff] }
 0x19d   : > { %v3240_v11 = vpop.permute.xlu0 %3239  ;;  %2707 = vrot.lane.b32.xlu1 %v11248_v56, %s12851_s27  ;;  %v955_v56 = vsel %vm13969_vm13, %v923_v20, 0.0 }
 0x19e   : > { %3322 = vst.msk [vmem:[#allocation3 + $0x38] sm:$0xf] %vm16066_vm3, %v3240_v11  ;;  %v11153_v58 = vpack.c.bf16 %v955_v56, %v955_v56  ;;  %vm16071_vm3 = vmmov %vm16067_vm0  ;;  %v11156_v11 = vpack.c.bf16 %v926_v52, %v926_v52 }
 0x19f   : > { %2962 = vrot.lane.b32.xlu0 %v13910_v60, %s12852_s28  ;;  %v3238_v8 = vpop.permute.xlu1 %3237 }
 0x1a0   : > { %3321 = vst.msk [vmem:[#allocation3 + $0x34] sm:$0xf] %vm16067_vm0, %v3238_v8  ;;  %vm13981_vm0 = vcmp.ne.s32.totalorder %v637_v30, 0  ;;  %v14017_v8 = vld [vmem:[%s15832_s2] ss:$0 sm:$0xff]  ;;  %v444_v30 = vadd.s32 200, %v12988_v2 }
 0x1a1   : > { %v1285_v33 = vpop.permute.xlu0 %1284  ;;  %2711 = vrot.lane.b32.xlu1 %v13962_v40, %s12851_s27  ;;  %v16073_v63 = vsel %vm13981_vm0, 4294967295, %v16072_v63  ;;  %v957_v27 = vsel %vm13981_vm0, %v925_v34, 0.0  ;;  %v446_v34 = vadd.s32 216, %v12988_v2 }
 0x1a2   : > { %1365 = vst.msk [vmem:[#allocation3 + $0x40] sm:$0xf] %vm16070_vm10, %v1285_v33  ;;  %vm16074_vm10 = vcmask 19456   ;;  %v11155_v12 = vpack.c.bf16 %v957_v27, %v957_v27 }
 0x1a3   : > { %2966 = vrot.lane.b32.xlu0 %v13966_v61, %s12852_s28  ;;  %v3242_v25 = vpop.permute.xlu1 %3241  ;;  %1116 = vst.msk [vmem:[#allocation3 + $0x60] sm:$0xf] %vm16074_vm10, %v11153_v58  ;;  %v644_v52 = vand.u32 15, %v446_v34 }
 0x1a4   : > { %3323 = vst.msk [vmem:[#allocation3 + $0x3c] sm:$0xf] %vm16071_vm3, %v3242_v25  ;;  %vm16077_vm3 = vcmask 44056  }
 0x1a5   : > { %v1289_v50 = vpop.permute.xlu0 %1288  ;;  %2964 = vrot.lane.b32.xlu1 %v13922_v3, %s12852_s28 }
 0x1a6   : > { %1367 = vst.msk [vmem:[#allocation3 + $0x48] sm:$0xf] %vm16075_vm9, %v1289_v50  ;;  %vm16076_vm9 = vmmov %vm16074_vm10  ;;  %v630_v50 = vand.u32 15, %v444_v30 }
 0x1a7   : > { %3251 = vrot.lane.b32.xlu0 %v13926_v23, %s12854_s16  ;;  %v1287_v44 = vpop.permute.xlu1 %1286  ;;  %v12384_v35 = vld [vmem:[#allocation3 + $0x30] sm:$0xff]   ;;  %1117 = vst.msk [vmem:[#allocation3 + $0x64] sm:$0xf] %vm16076_vm9, %v11154_v22  ;;  %vm16078_vm10 = vmmov %vm16076_vm9 }
 0x1a8   : > { %1366 = vst.msk [vmem:[#allocation3 + $0x44] sm:$0xf] %vm16077_vm3, %v1287_v44  ;;  %12234 = vmatprep.mubr.msk.bf16.mxu0 %vm16080_vm11, %v12384_v35  ;;  %vm16082_vm11 = vmmov %vm16077_vm3  ;;  %vm16084_vm3 = vcmask 220160  }
 0x1a9   : > { %v1574_v38 = vpop.permute.xlu0 %1573  ;;  %1118 = vst.msk [vmem:[#allocation3 + $0x68] sm:$0xf] %vm16078_vm10, %v11155_v12  ;;  %2968 = vrot.lane.b32.xlu1 %v13989_v49, %s12852_s28 }
 0x1aa   : > { %1654 = vst.msk [vmem:[#allocation3 + $0x40] sm:$0xf] %vm16079_vm12, %v1574_v38  ;;  %vm16081_vm12 = vmmov %vm16076_vm9  ;;  %vm16083_vm9 = vcmask 68656   ;;  %v16088_v38 = vmov 0 }
 0x1ab   : > { %3255 = vrot.lane.b32.xlu0 %v13995_v29, %s12854_s16  ;;  %v1291_v57 = vpop.permute.xlu1 %1290  ;;  %v12385_v33 = vld [vmem:[#allocation3 + $0x38] sm:$0xff]   ;;  %1119 = vst.msk [vmem:[#allocation3 + $0x6c] sm:$0xf] %vm16081_vm12, %v11156_v11  ;;  %vm16085_vm10 = vmmov %vm16083_vm9  ;;  %vm16086_vm12 = vcmask 93256  }
 0x1ac   : > { %1368 = vst.msk [vmem:[#allocation3 + $0x4c] sm:$0xf] %vm16082_vm11, %v1291_v57  ;;  %v12224_v56 = vpop.f32.mrf.mxu0  ;;  %12235 = vmatmul.mubr.msk.bf16.gmra.mxu0 %vm16084_vm3, %v12385_v33  ;;  %vm16087_vm11 = vcmask 261120  }
 0x1ad   : > { %v1578_v20 = vpop.permute.xlu0 %1577  ;;  %3253 = vrot.lane.b32.xlu1 %v11406_v9, %s12854_s16  ;;  %v3573_v58 = vadd.f32 %v12224_v56, %v14017_v8  ;;  %vm16090_vm3 = vmmov %vm16087_vm11  ;;  %v16092_v56 = vmov 0 }
 0x1ae   : > { %1656 = vst.msk [vmem:[#allocation3 + $0x48] sm:$0xf] %vm16083_vm9, %v1578_v20  ;;  %v3564_v19 = vpop.f32.mrf.mxu0  ;;  %vm14037_vm9 = vcmp.ne.s32.totalorder %v630_v50, 15  ;;  %v1726_v20 = vsel %vm13969_vm13, %v13936_v6, 0.0 }
 0x1af   : > { %1300 = vrot.lane.b32.xlu0 %v13910_v60, %s12846_s22  ;;  %v1576_v25 = vpop.permute.xlu1 %1575  ;;  %v3693_v46 = vmax.f32 %v3573_v58, 0.0  ;;  %v3565_v22 = vadd.f32 %v14017_v8, %v3564_v19  ;;  %v16089_v38 = vsel %vm14037_vm9, 4294967295, %v16088_v38  ;;  %v1438_v33 = vsel %vm14037_vm9, %v13933_v4, 0.0 }
 0x1b0   : > { %1655 = vst.msk [vmem:[#allocation3 + $0x44] sm:$0xf] %vm16085_vm10, %v1576_v25  ;;  %v12225_v53 = vpop.f32.mrf.mxu0  ;;  %v11249_v6 = vpack.c.bf16 %v1726_v20, %v1726_v20 }
 0x1b1   : > { %v1863_v27 = vpop.permute.xlu0 %1862  ;;  %3257 = vrot.lane.b32.xlu1 %v11408_v15, %s12854_s16  ;;  %3726 = vst.msk [vmem:[#allocation4 + $0x21] sm:$0xff] %vm16087_vm11, %v3693_v46  ;;  %v3691_v60 = vmax.f32 %v3565_v22, 0.0  ;;  %v3576_v12 = vadd.f32 %v12225_v53, %v14017_v8  ;;  %vm16091_vm11 = vmmov %vm16090_vm3  ;;  %v14062_v15 = vld [vmem:[#allocation2 + $0xe0] sm:$0xff] }
 0x1b2   : > { %1943 = vst.msk [vmem:[#allocation3 + $0x40] sm:$0xf] %vm16086_vm12, %v1863_v27  ;;  %v3567_v35 = vpop.f32.mrf.mxu0  ;;  %v1728_v50 = vsel %vm13981_vm0, %v14062_v15, 0.0 }
 0x1b3   : > { %1304 = vrot.lane.b32.xlu0 %v13966_v61, %s12846_s22  ;;  %v1580_v44 = vpop.permute.xlu1 %1579  ;;  %3724 = vst.msk [vmem:[#allocation4 + $0x11] sm:$0xff] %vm16090_vm3, %v3691_v60  ;;  %v3694_v9 = vmax.f32 %v3576_v12, 0.0  ;;  %v3568_v14 = vadd.f32 %v14017_v8, %v3567_v35  ;;  %vm14056_vm3 = vcmp.ne.s32.totalorder %v644_v52, 15  ;;  %v11251_v52 = vpack.c.bf16 %v1728_v50, %v1728_v50 }
 0x1b4   : > { %1657 = vst.msk [vmem:[#allocation3 + $0x4c] sm:$0xf] %vm16085_vm10, %v1580_v44  ;;  %v16093_v56 = vsel %vm14056_vm3, 4294967295, %v16092_v56  ;;  %vm16095_vm10 = vmmov %vm16091_vm11  ;;  %v1440_v58 = vsel %vm14056_vm3, %v14000_v37, 0.0 }
 0x1b5   : > { %v1867_v11 = vpop.permute.xlu0 %1866  ;;  %1302 = vrot.lane.b32.xlu1 %v13922_v3, %s12846_s22  ;;  %3727 = vst.msk [vmem:[#allocation4 + $0x29] sm:$0xff] %vm16091_vm11, %v3694_v9  ;;  %v3692_v57 = vmax.f32 %v3568_v14, 0.0  ;;  %16094 = vst [vmem:[#allocation14_spill] sm:$0xff] %v16093_v56  ;;  %vm16096_vm11 = vcmask 117856   ;;  %v11220_v12 = vpack.c.bf16 %v1440_v58, %v1440_v58 }
 0x1b6   : > { %1945 = vst.msk [vmem:[#allocation3 + $0x48] sm:$0xf] %vm16086_vm12, %v1867_v11 }
 0x1b7   : > { %1589 = vrot.lane.b32.xlu0 %v13926_v23, %s12847_s23  ;;  %v1865_v30 = vpop.permute.xlu1 %1864  ;;  %3725 = vst.msk [vmem:[#allocation4 + $0x19] sm:$0xff] %vm16095_vm10, %v3692_v57  ;;  %v11218_v23 = vpack.c.bf16 %v1438_v33, %v1438_v33  ;;  %vm16097_vm10 = vmmov %vm16086_vm12 }
 0x1b8   : > { %1944 = vst.msk [vmem:[#allocation3 + $0x44] sm:$0xf] %vm16086_vm12, %v1865_v30  ;;  %v5591_v4 = vld [vmem:[#allocation4 + $0x21] sm:$0xff]  ;;  %vm16098_vm12 = vcmask 257024  }
 0x1b9   : > { %v2120_v3 = vpop.permute.xlu0 %2119  ;;  %1306 = vrot.lane.b32.xlu1 %v13989_v49, %s12846_s22  ;;  %v14072_v25 = vpack.c.bf16 %v5591_v4, %v5591_v4 }
 0x1ba   : > { %2200 = vst.msk [vmem:[#allocation3 + $0x40] sm:$0xf] %vm16096_vm11, %v2120_v3  ;;  %v14077_v34 = vld [vmem:[#allocation4 + $0x10] sm:$0xff] }
 0x1bb   : > { %1593 = vrot.lane.b32.xlu0 %v13995_v29, %s12847_s23  ;;  %v1869_v19 = vpop.permute.xlu1 %1868  ;;  %v3990_v46 = vld [vmem:[#allocation4 + $0x11] sm:$0xff]  ;;  %v3797_v53 = vsel %vm13042_vm5, %v14077_v34, 0.0  ;;  %4985 = vst.msk [vmem:[#allocation5 + $0x1c] sm:$0xf] %vm16098_vm12, %v14072_v25 }
 0x1bc   : > { %1946 = vst.msk [vmem:[#allocation3 + $0x4c] sm:$0xf] %vm16097_vm10, %v1869_v19  ;;  %v14080_v22 = vpack.c.bf16 %v3990_v46, %v3990_v46  ;;  %v5847_v60 = vld [vmem:[#allocation4 + $0x22] sm:$0xff]  ;;  %v11419_v44 = vpack.c.bf16 %v3797_v53, %v3797_v53  ;;  %vm16099_vm10 = vmmov %vm16098_vm12  ;;  %v1985_v46 = vld [vmem:[#allocation2 + $0xe1] sm:$0xff] }
 0x1bd   : > { %v2124_v27 = vpop.permute.xlu0 %2123  ;;  %1591 = vrot.lane.b32.xlu1 %v11218_v23, %s12847_s23  ;;  %v11673_v35 = vpack.c.bf16 %v5847_v60, %v5847_v60  ;;  %v4826_v9 = vld [vmem:[#allocation4 + $0x29] sm:$0xff]  ;;  %vm16100_vm1 = vmmov %vm16099_vm10 }
 0x1be   : > { %2202 = vst.msk [vmem:[#allocation3 + $0x48] sm:$0xf] %vm16096_vm11, %v2124_v27  ;;  %v3768_v11 = vld [vmem:[#allocation4 + $0x28] sm:$0xff]  ;;  %v11548_v57 = vpack.c.bf16 %v4826_v9, %v4826_v9  ;;  %vm16101_vm12 = vmmov %vm16096_vm11  ;;  %v3991_v20 = vld [vmem:[#allocation4 + $0x19] sm:$0xff] }
 0x1bf   : > { %1878 = vrot.lane.b32.xlu0 %v11249_v6, %s12848_s24  ;;  %4983 = vst.msk [vmem:[#allocation5 + $0x4] sm:$0xf] %vm16099_vm10, %v14080_v22  ;;  %v2122_v14 = vpop.permute.xlu1 %2121  ;;  %v11422_v33 = vpack.c.bf16 %v3768_v11, %v3768_v11  ;;  %vm16102_vm11 = vmmov %vm16100_vm1  ;;  %v3766_v3 = vld [vmem:[#allocation4 + $0x18] sm:$0xff]  ;;  %v14097_v23 = vpack.c.bf16 %v3991_v20, %v3991_v20  ;;  %v3767_v4 = vld [vmem:[#allocation4 + $0x20] sm:$0xff] }
 0x1c0   : > { %3958 = vst.msk [vmem:[#allocation5 + $0x18] sm:$0xf] %vm16100_vm1, %v11419_v44  ;;  %vm16104_vm10 = vmmov %vm16100_vm1  ;;  %v1697_v6 = vld [vmem:[#allocation2 + $0xe8] sm:$0xff]  ;;  %v11420_v58 = vpack.c.bf16 %v3766_v3, %v3766_v3  ;;  %v3799_v19 = vsel %vm13133_vm7, %v3767_v4, 0.0  ;;  %v14140_v3 = vld [vmem:[#allocation2 + $0xf0] sm:$0xff] }
 0x1c1   : > { %2201 = vst.msk [vmem:[#allocation3 + $0x44] sm:$0xf] %vm16101_vm12, %v2122_v14  ;;  %v2409_v30 = vpop.permute.xlu0 %2408  ;;  %1595 = vrot.lane.b32.xlu1 %v11220_v12, %s12847_s23  ;;  %vm16105_vm5 = vmmov %vm16100_vm1  ;;  %v11421_v27 = vpack.c.bf16 %v3799_v19, %v3799_v19  ;;  %v11252_v60 = vpack.c.bf16 %v1697_v6, %v1697_v6  ;;  %v14114_v12 = vpack.c.bf16 %v1985_v46, %v1985_v46  ;;  %v2242_v9 = vld [vmem:[#allocation2 + $0xe2] sm:$0xff]  ;;  %v14137_v20 = vld [vmem:[#allocation2 + $0xea] sm:$0xff]  ;;  %v2563_v6 = vsel %vm13981_vm0, %v14140_v3, 0.0 }
 0x1c2   : > { %6039 = vst.msk [vmem:[#allocation5 + $0x8] sm:$0xf] %vm16102_vm11, %v11673_v35  ;;  %vm16109_vm11 = vcmask 142456   ;;  %v14129_v14 = vpack.c.bf16 %v2242_v9, %v2242_v9 }
 0x1c3   : > { %2489 = vst.msk [vmem:[#allocation3 + $0x40] sm:$0xf] %vm16103_vm2, %v2409_v30  ;;  %1882 = vrot.lane.b32.xlu0 %v11251_v52, %s12848_s24  ;;  %v2126_v50 = vpop.permute.xlu1 %2125  ;;  %vm16106_vm2 = vmmov %vm16100_vm1  ;;  %v2561_v30 = vsel %vm13969_vm13, %v14062_v15, 0.0  ;;  %v2275_v15 = vsel %vm14056_vm3, %v14137_v20, 0.0  ;;  %vm16163_vm13 = vcmask 167056  }
 0x1c4   : > { %4986 = vst.msk [vmem:[#allocation5 + $0x28] sm:$0xf] %vm16104_vm10, %v11548_v57  ;;  %vm16107_vm1 = vmmov %vm16101_vm12  ;;  %v2273_v57 = vsel %vm14037_vm9, %v14000_v37, 0.0  ;;  %v11345_v37 = vpack.c.bf16 %v2561_v30, %v2561_v30  ;;  %v11316_v19 = vpack.c.bf16 %v2275_v15, %v2275_v15 }
 0x1c5   : > { %3961 = vst.msk [vmem:[#allocation5 + $0x3c] sm:$0xf] %vm16105_vm5, %v11422_v33  ;;  %v2413_v53 = vpop.permute.xlu0 %2412  ;;  %vm16108_vm12 = vmmov %vm16106_vm2  ;;  %1880 = vrot.lane.b32.xlu1 %v13962_v40, %s12848_s24  ;;  %v1986_v40 = vld [vmem:[#allocation2 + $0xe9] sm:$0xff] }
 0x1c6   : > { %4984 = vst.msk [vmem:[#allocation5 + $0x10] sm:$0xf] %vm16106_vm2, %v14097_v23  ;;  %vm16110_vm5 = vmmov %vm16106_vm2  ;;  %vm16112_vm2 = vcmask 167056  }
 0x1c7   : > { %2203 = vst.msk [vmem:[#allocation3 + $0x4c] sm:$0xf] %vm16107_vm1, %v2126_v50  ;;  %2135 = vrot.lane.b32.xlu0 %v13966_v61, %s12849_s25  ;;  %v2411_v44 = vpop.permute.xlu1 %2410  ;;  %vm16111_vm10 = vmmov %vm16109_vm11  ;;  %v14125_v61 = vpack.c.bf16 %v1986_v40, %v1986_v40  ;;  %v11347_v50 = vpack.c.bf16 %v2563_v6, %v2563_v6  ;;  %v449_v40 = vadd.s32 240, %v12988_v2  ;;  %v3077_v6 = vld [vmem:[#allocation2 + $0xf2] sm:$0xff] }
 0x1c8   : > { %3959 = vst.msk [vmem:[#allocation5 + $0x24] sm:$0xf] %vm16108_vm12, %v11420_v58  ;;  %vm16113_vm1 = vmmov %vm16111_vm10 }
 0x1c9   : > { %2491 = vst.msk [vmem:[#allocation3 + $0x48] sm:$0xf] %vm16109_vm11, %v2413_v53  ;;  %v2698_v35 = vpop.permute.xlu0 %2697  ;;  %1884 = vrot.lane.b32.xlu1 %v11252_v60, %s12848_s24  ;;  %vm16114_vm12 = vmmov %vm16112_vm2  ;;  %v447_v53 = vadd.s32 224, %v12988_v2 }
 0x1ca   : > { %3960 = vst.msk [vmem:[#allocation5 + $0x30] sm:$0xf] %vm16110_vm5, %v11421_v27  ;;  %vm16115_vm11 = vmmov %vm16112_vm2  ;;  %vm16116_vm5 = vcmask 191656  }
 0x1cb   : > { %2490 = vst.msk [vmem:[#allocation3 + $0x44] sm:$0xf] %vm16111_vm10, %v2411_v44  ;;  %2139 = vrot.lane.b32.xlu0 %v14114_v12, %s12849_s25  ;;  %v2415_v52 = vpop.permute.xlu1 %2414  ;;  %vm16117_vm10 = vmmov %vm16112_vm2  ;;  %v651_v9 = vand.u32 15, %v447_v53  ;;  %v14198_v53 = vpack.c.bf16 %v3077_v6, %v3077_v6 }
 0x1cc   : > { %2778 = vst.msk [vmem:[#allocation3 + $0x40] sm:$0xf] %vm16112_vm2, %v2698_v35  ;;  %vm16118_vm2 = vmmov %vm16116_vm5  ;;  %v2820_v35 = vld [vmem:[#allocation2 + $0xf1] sm:$0xff] }
 0x1cd   : > { %2492 = vst.msk [vmem:[#allocation3 + $0x4c] sm:$0xf] %vm16113_vm1, %v2415_v52  ;;  %v2702_v11 = vpop.permute.xlu0 %2701  ;;  %2137 = vrot.lane.b32.xlu1 %v13989_v49, %s12849_s25  ;;  %vm16119_vm1 = vmmov %vm16118_vm2 }
 0x1ce   : > { %2780 = vst.msk [vmem:[#allocation3 + $0x48] sm:$0xf] %vm16114_vm12, %v2702_v11  ;;  %vm16120_vm12 = vcmask 216256   ;;  %v14168_v11 = vpack.c.bf16 %v2820_v35, %v2820_v35  ;;  %v928_v35 = vld [vmem:[#allocation2 + $0xe8] sm:$0xff] }
 0x1cf   : > { %2424 = vrot.lane.b32.xlu0 %v13995_v29, %s12850_s26  ;;  %v2700_v33 = vpop.permute.xlu1 %2699  ;;  %v11314_v29 = vpack.c.bf16 %v2273_v57, %v2273_v57 }
 0x1d0   : > { %2779 = vst.msk [vmem:[#allocation3 + $0x44] sm:$0xf] %vm16115_vm11, %v2700_v33  ;;  %vm16121_vm11 = vmmov %vm16119_vm1  ;;  %v665_v33 = vand.u32 15, %v449_v40 }
 0x1d1   : > { %v2955_v49 = vpop.permute.xlu0 %2954  ;;  %2141 = vrot.lane.b32.xlu1 %v14125_v61, %s12849_s25 }
 0x1d2   : > { %3035 = vst.msk [vmem:[#allocation3 + $0x40] sm:$0xf] %vm16116_vm5, %v2955_v49  ;;  %vm16122_vm5 = vmmov %vm16120_vm12 }
 0x1d3   : > { %2428 = vrot.lane.b32.xlu0 %v14129_v14, %s12850_s26  ;;  %v2704_v4 = vpop.permute.xlu1 %2703 }
 0x1d4   : > { %2781 = vst.msk [vmem:[#allocation3 + $0x4c] sm:$0xf] %vm16117_vm10, %v2704_v4  ;;  %vm16123_vm10 = vmmov %vm16122_vm5 }
 0x1d5   : > { %v2959_v58 = vpop.permute.xlu0 %2958  ;;  %2426 = vrot.lane.b32.xlu1 %v11314_v29, %s12850_s26  ;;  %v927_v29 = vld [vmem:[#allocation2 + $0xe0] sm:$0xff] }
 0x1d6   : > { %3037 = vst.msk [vmem:[#allocation3 + $0x48] sm:$0xf] %vm16118_vm2, %v2959_v58  ;;  %vm14171_vm2 = vcmp.ne.s32.totalorder %v651_v9, 0  ;;  %v16127_v58 = vmov 0  ;;  %v14203_v9 = vld [vmem:[#allocation2 + $0xfa] sm:$0xff] }
 0x1d7   : > { %2713 = vrot.lane.b32.xlu0 %v11345_v37, %s12851_s27  ;;  %v2957_v46 = vpop.permute.xlu1 %2956  ;;  %v2821_v37 = vld [vmem:[#allocation2 + $0xf9] sm:$0xff] }
 0x1d8   : > { %3036 = vst.msk [vmem:[#allocation3 + $0x44] sm:$0xf] %vm16119_vm1, %v2957_v46  ;;  %vm16126_vm1 = vcmask 44056   ;;  %v14194_v46 = vpack.c.bf16 %v2821_v37, %v2821_v37 }
 0x1d9   : > { %v3244_v27 = vpop.permute.xlu0 %3243  ;;  %2430 = vrot.lane.b32.xlu1 %v11316_v19, %s12850_s26 }
 0x1da   : > { %3324 = vst.msk [vmem:[#allocation3 + $0x40] sm:$0xf] %vm16120_vm12, %v3244_v27  ;;  %vm14182_vm12 = vcmp.ne.s32.totalorder %v665_v33, 0 }
 0x1db   : > { %2717 = vrot.lane.b32.xlu0 %v11347_v50, %s12851_s27  ;;  %v2961_v44 = vpop.permute.xlu1 %2960  ;;  %v16128_v58 = vsel %vm14182_vm12, 4294967295, %v16127_v58  ;;  %v961_v50 = vsel %vm14182_vm12, %v14140_v3, 0.0 }
 0x1dc   : > { %3038 = vst.msk [vmem:[#allocation3 + $0x4c] sm:$0xf] %vm16121_vm11, %v2961_v44  ;;  %vm16129_vm11 = vmmov %vm16122_vm5  ;;  %v11159_v27 = vpack.c.bf16 %v961_v50, %v961_v50  ;;  %v3108_v44 = vsel %vm14037_vm9, %v14137_v20, 0.0 }
 0x1dd   : > { %v3248_v52 = vpop.permute.xlu0 %3247  ;;  %2715 = vrot.lane.b32.xlu1 %v11252_v60, %s12851_s27  ;;  %v959_v60 = vsel %vm14171_vm2, %v927_v29, 0.0  ;;  %v3110_v29 = vsel %vm14056_vm3, %v14203_v9, 0.0 }
 0x1de   : > { %3326 = vst.msk [vmem:[#allocation3 + $0x48] sm:$0xf] %vm16122_vm5, %v3248_v52  ;;  %v11157_v15 = vpack.c.bf16 %v959_v60, %v959_v60  ;;  %vm16130_vm5 = vcmask 19456  }
 0x1df   : > { %2970 = vrot.lane.b32.xlu0 %v14114_v12, %s12852_s28  ;;  %v3246_v57 = vpop.permute.xlu1 %3245 }
 0x1e0   : > { %3325 = vst.msk [vmem:[#allocation3 + $0x44] sm:$0xf] %vm16123_vm10, %v3246_v57  ;;  %vm16131_vm10 = vmmov %vm16126_vm1  ;;  %v11158_v57 = vpack.c.bf16 %v928_v35, %v928_v35 }
 0x1e1   : > { %v1293_v30 = vpop.permute.xlu0 %1292  ;;  %2719 = vrot.lane.b32.xlu1 %v13790_v10, %s12851_s27  ;;  %1120 = vst.msk [vmem:[#allocation3 + $0x70] sm:$0xf] %vm16130_vm5, %v11157_v15  ;;  %v448_v15 = vadd.s32 232, %v12988_v2 }
 0x1e2   : > { %1369 = vst.msk [vmem:[#allocation3 + $0x50] sm:$0xf] %vm16126_vm1, %v1293_v30  ;;  %vm16132_vm1 = vmmov %vm16130_vm5  ;;  %vm16134_vm5 = vcmask 68656   ;;  %v11410_v30 = vpack.c.bf16 %v3108_v44, %v3108_v44 }
 0x1e3   : > { %2974 = vrot.lane.b32.xlu0 %v14168_v11, %s12852_s28  ;;  %v3250_v4 = vpop.permute.xlu1 %3249  ;;  %1122 = vst.msk [vmem:[#allocation3 + $0x78] sm:$0xf] %vm16132_vm1, %v11159_v27  ;;  %vm16136_vm9 = vmmov %vm16132_vm1  ;;  %v658_v35 = vand.u32 15, %v448_v15 }
 0x1e4   : > { %3327 = vst.msk [vmem:[#allocation3 + $0x4c] sm:$0xf] %vm16129_vm11, %v3250_v4  ;;  %vm16133_vm11 = vmmov %vm16131_vm10 }
 0x1e5   : > { %v1297_v19 = vpop.permute.xlu0 %1296  ;;  %2972 = vrot.lane.b32.xlu1 %v14125_v61, %s12852_s28  ;;  %1121 = vst.msk [vmem:[#allocation3 + $0x74] sm:$0xf] %vm16136_vm9, %v11158_v57  ;;  %vm16137_vm1 = vmmov %vm16133_vm11 }
 0x1e6   : > { %1371 = vst.msk [vmem:[#allocation3 + $0x58] sm:$0xf] %vm16131_vm10, %v1297_v19  ;;  %vm16135_vm10 = vcmask 220160   ;;  %v11412_v19 = vpack.c.bf16 %v3110_v29, %v3110_v29 }
 0x1e7   : > { %3259 = vrot.lane.b32.xlu0 %v14129_v14, %s12854_s16  ;;  %v1295_v40 = vpop.permute.xlu1 %1294  ;;  %v12386_v52 = vld [vmem:[#allocation3 + $0x40] sm:$0xff]   ;;  %vm16139_vm9 = vmmov %vm16135_vm10 }
 0x1e8   : > { %1370 = vst.msk [vmem:[#allocation3 + $0x54] sm:$0xf] %vm16133_vm11, %v1295_v40  ;;  %12238 = vmatprep.mubr.msk.bf16.mxu0 %vm16135_vm10, %v12386_v52  ;;  %vm16138_vm11 = vmmov %vm16134_vm5  ;;  %vm16140_vm10 = vcmask 93256  }
 0x1e9   : > { %v1582_v33 = vpop.permute.xlu0 %1581  ;;  %2976 = vrot.lane.b32.xlu1 %v14194_v46, %s12852_s28 }
 0x1ea   : > { %1658 = vst.msk [vmem:[#allocation3 + $0x50] sm:$0xf] %vm16134_vm5, %v1582_v33 }
 0x1eb   : > { %3263 = vrot.lane.b32.xlu0 %v14198_v53, %s12854_s16  ;;  %v1299_v60 = vpop.permute.xlu1 %1298  ;;  %v12387_v37 = vld [vmem:[#allocation3 + $0x48] sm:$0xff]  }
 0x1ec   : > { %1372 = vst.msk [vmem:[#allocation3 + $0x5c] sm:$0xf] %vm16137_vm1, %v1299_v60  ;;  %v12228_v6 = vpop.f32.mrf.mxu0  ;;  %12239 = vmatmul.mubr.msk.bf16.gmra.mxu0 %vm16139_vm9, %v12387_v37  ;;  %vm16141_vm1 = vcmask 261120  }
 0x1ed   : > { %v1586_v4 = vpop.permute.xlu0 %1585  ;;  %3261 = vrot.lane.b32.xlu1 %v11410_v30, %s12854_s16  ;;  %v3589_v50 = vadd.f32 %v12228_v6, %v14017_v8  ;;  %vm16144_vm9 = vmmov %vm16141_vm1 }
 0x1ee   : > { %1660 = vst.msk [vmem:[#allocation3 + $0x58] sm:$0xf] %vm16138_vm11, %v1586_v4  ;;  %v3580_v44 = vpop.f32.mrf.mxu0  ;;  %vm14233_vm11 = vcmp.ne.s32.totalorder %v658_v35, 15 }
 0x1ef   : > { %1308 = vrot.lane.b32.xlu0 %v14114_v12, %s12846_s22  ;;  %v1584_v27 = vpop.permute.xlu1 %1583  ;;  %v3697_v2 = vmax.f32 %v3589_v50, 0.0  ;;  %v3581_v52 = vadd.f32 %v14017_v8, %v3580_v44  ;;  %v14254_v44 = vld [vmem:[#allocation2 + $0x100] sm:$0xff] }
 0x1f0   : > { %1659 = vst.msk [vmem:[#allocation3 + $0x54] sm:$0xf] %vm16134_vm5, %v1584_v27  ;;  %v12229_v57 = vpop.f32.mrf.mxu0  ;;  %v1730_v27 = vsel %vm14171_vm2, %v14140_v3, 0.0  ;;  %v1444_v3 = vsel %vm13898_vm15, %v14203_v9, 0.0 }
 0x1f1   : > { %v1871_v40 = vpop.permute.xlu0 %1870  ;;  %3265 = vrot.lane.b32.xlu1 %v11412_v19, %s12854_s16  ;;  %3730 = vst.msk [vmem:[#allocation4 + $0x41] sm:$0xff] %vm16141_vm1, %v3697_v2  ;;  %v3695_v33 = vmax.f32 %v3581_v52, 0.0  ;;  %v3592_v12 = vadd.f32 %v12229_v57, %v14017_v8  ;;  %v1442_v19 = vsel %vm14233_vm11, %v14137_v20, 0.0  ;;  %v11253_v20 = vpack.c.bf16 %v1730_v27, %v1730_v27 }
 0x1f2   : > { %1947 = vst.msk [vmem:[#allocation3 + $0x50] sm:$0xf] %vm16140_vm10, %v1871_v40  ;;  %v3583_v29 = vpop.f32.mrf.mxu0  ;;  %v1732_v57 = vsel %vm14182_vm12, %v14254_v44, 0.0 }
 0x1f3   : > { %1312 = vrot.lane.b32.xlu0 %v14168_v11, %s12846_s22  ;;  %v1588_v30 = vpop.permute.xlu1 %1587  ;;  %3728 = vst.msk [vmem:[#allocation4 + $0x31] sm:$0xff] %vm16144_vm9, %v3695_v33  ;;  %v3698_v37 = vmax.f32 %v3592_v12, 0.0  ;;  %v3584_v4 = vadd.f32 %v14017_v8, %v3583_v29  ;;  %vm16145_vm9 = vmmov %vm16141_vm1 }
 0x1f4   : > { %1661 = vst.msk [vmem:[#allocation3 + $0x5c] sm:$0xf] %vm16134_vm5, %v1588_v30  ;;  %vm16146_vm5 = vmmov %vm16140_vm10 }
 0x1f5   : > { %v1875_v15 = vpop.permute.xlu0 %1874  ;;  %1310 = vrot.lane.b32.xlu1 %v14125_v61, %s12846_s22  ;;  %3731 = vst.msk [vmem:[#allocation4 + $0x49] sm:$0xff] %vm16141_vm1, %v3698_v37  ;;  %v3696_v6 = vmax.f32 %v3584_v4, 0.0  ;;  %vm16148_vm1 = vmmov %vm16146_vm5 }
 0x1f6   : > { %1949 = vst.msk [vmem:[#allocation3 + $0x58] sm:$0xf] %vm16140_vm10, %v1875_v15  ;;  %vm16147_vm10 = vcmask 117856   ;;  %v11224_v15 = vpack.c.bf16 %v1444_v3, %v1444_v3 }
 0x1f7   : > { %1597 = vrot.lane.b32.xlu0 %v14129_v14, %s12847_s23  ;;  %v1873_v50 = vpop.permute.xlu1 %1872  ;;  %3729 = vst.msk [vmem:[#allocation4 + $0x39] sm:$0xff] %vm16145_vm9, %v3696_v6  ;;  %v11222_v14 = vpack.c.bf16 %v1442_v19, %v1442_v19  ;;  %vm16149_vm9 = vcmask 257024   ;;  %v11255_v6 = vpack.c.bf16 %v1732_v57, %v1732_v57 }
 0x1f8   : > { %1948 = vst.msk [vmem:[#allocation3 + $0x54] sm:$0xf] %vm16146_vm5, %v1873_v50  ;;  %v4829_v35 = vld [vmem:[#allocation4 + $0x41] sm:$0xff]  ;;  %vm16150_vm5 = vmmov %vm16147_vm10 }
 0x1f9   : > { %v2128_v61 = vpop.permute.xlu0 %2127  ;;  %1314 = vrot.lane.b32.xlu1 %v14194_v46, %s12846_s22  ;;  %v11551_v2 = vpack.c.bf16 %v4829_v35, %v4829_v35  ;;  %s12780_s22 = sshll.u32 %s12859_s29, 4  ;;  %s12781_s22 = int_to_ptr.vmem [resolvable:$false] %s12780_s22 }
 0x1fa   : > { %2204 = vst.msk [vmem:[#allocation3 + $0x50] sm:$0xf] %vm16147_vm10, %v2128_v61  ;;  %v14264_v40 = vld [vmem:[#allocation4 + $0x2a] sm:$0xff]  ;;  %vm16151_vm10 = vmmov %vm16149_vm9 }
 0x1fb   : > { %1601 = vrot.lane.b32.xlu0 %v14198_v53, %s12847_s23  ;;  %v1877_v52 = vpop.permute.xlu1 %1876  ;;  %v5880_v33 = vsel %vm13038_vm4, %v14264_v40, 0.0  ;;  %v4827_v30 = vld [vmem:[#allocation4 + $0x31] sm:$0xff]  ;;  %4989 = vst.msk [vmem:[#allocation5 + $0x4c] sm:$0xf] %vm16149_vm9, %v11551_v2 }
 0x1fc   : > { %1950 = vst.msk [vmem:[#allocation3 + $0x5c] sm:$0xf] %vm16148_vm1, %v1877_v52  ;;  %v11674_v29 = vpack.c.bf16 %v5880_v33, %v5880_v33  ;;  %v5851_v37 = vld [vmem:[#allocation4 + $0x42] sm:$0xff]  ;;  %v11549_v61 = vpack.c.bf16 %v4827_v30, %v4827_v30  ;;  %vm16152_vm1 = vmmov %vm16149_vm9  ;;  %v5593_v55 = vld [vmem:[#allocation4 + $0x31] sm:$0xff] }
 0x1fd   : > { %v2132_v12 = vpop.permute.xlu0 %2131  ;;  %1599 = vrot.lane.b32.xlu1 %v11222_v14, %s12847_s23  ;;  %v14276_v4 = vpack.c.bf16 %v5851_v37, %v5851_v37  ;;  %vm16153_vm9 = vmmov %vm16150_vm5  ;;  %v4830_v3 = vld [vmem:[#allocation4 + $0x49] sm:$0xff] }
 0x1fe   : > { %2206 = vst.msk [vmem:[#allocation3 + $0x58] sm:$0xf] %vm16150_vm5, %v2132_v12  ;;  %v5849_v19 = vld [vmem:[#allocation4 + $0x32] sm:$0xff]  ;;  %v14279_v50 = vld [vmem:[#allocation4 + $0x3a] sm:$0xff]  ;;  %v3772_v52 = vld [vmem:[#allocation4 + $0x48] sm:$0xff]  ;;  %vm16154_vm5 = vcmask 142456   ;;  %v11552_v1 = vpack.c.bf16 %v4830_v3, %v4830_v3 }
 0x1ff   : > { %1886 = vrot.lane.b32.xlu0 %v11253_v20, %s12848_s24  ;;  %6040 = vst.msk [vmem:[#allocation5 + $0x14] sm:$0xf] %vm16151_vm10, %v11674_v29  ;;  %v2130_v27 = vpop.permute.xlu1 %2129  ;;  %v5882_v35 = vsel %vm13059_vm6, %v14279_v50, 0.0  ;;  %v14285_v2 = vpack.c.bf16 %v5849_v19, %v5849_v19  ;;  %v3769_v20 = vld [vmem:[#allocation4 + $0x30] sm:$0xff]  ;;  %vm16155_vm10 = vmmov %vm16152_vm1  ;;  %v4828_v33 = vld [vmem:[#allocation4 + $0x39] sm:$0xff]  ;;  %v11426_v56 = vpack.c.bf16 %v3772_v52, %v3772_v52 }
 0x200   : > { %6043 = vst.msk [vmem:[#allocation5 + $0x38] sm:$0xf] %vm16152_vm1, %v14276_v4  ;;  %v11676_v57 = vpack.c.bf16 %v5882_v35, %v5882_v35  ;;  %v3770_v12 = vld [vmem:[#allocation4 + $0x38] sm:$0xff]  ;;  %v3771_v30 = vld [vmem:[#allocation4 + $0x40] sm:$0xff]  ;;  %vm16156_vm3 = vmmov %vm16152_vm1  ;;  %v11550_v37 = vpack.c.bf16 %v4828_v33, %v4828_v33  ;;  %v3801_v35 = vsel %vm13137_vm8, %v3769_v20, 0.0 }
 0x201   : > { %2205 = vst.msk [vmem:[#allocation3 + $0x54] sm:$0xf] %vm16153_vm9, %v2130_v27  ;;  %v2417_v14 = vpop.permute.xlu0 %2416  ;;  %1603 = vrot.lane.b32.xlu1 %v11224_v15, %s12847_s23  ;;  %v1701_v29 = vld [vmem:[#allocation2 + $0x108] sm:$0xff]  ;;  %v11424_v15 = vpack.c.bf16 %v3770_v12, %v3770_v12  ;;  %vm16162_vm0 = vmmov %vm16152_vm1 }
 0x202   : > { %2493 = vst.msk [vmem:[#allocation3 + $0x50] sm:$0xf] %vm16154_vm5, %v2417_v14  ;;  %v1989_v27 = vld [vmem:[#allocation2 + $0x101] sm:$0xff]  ;;  %vm16157_vm5 = vmmov %vm16152_vm1  ;;  %v11423_v14 = vpack.c.bf16 %v3801_v35, %v3801_v35 }
 0x203   : > { %4987 = vst.msk [vmem:[#allocation5 + $0x34] sm:$0xf] %vm16155_vm10, %v11549_v61  ;;  %1890 = vrot.lane.b32.xlu0 %v11255_v6, %s12848_s24  ;;  %v2134_v19 = vpop.permute.xlu1 %2133  ;;  %v3803_v6 = vsel %vm13264_vm14, %v3771_v30, 0.0  ;;  %vm16159_vm10 = vmmov %vm16152_vm1  ;;  %v11287_v33 = vpack.c.bf16 %v1989_v27, %v1989_v27  ;;  %v2246_v12 = vld [vmem:[#allocation2 + $0x102] sm:$0xff]  ;;  %v2247_v27 = vld [vmem:[#allocation2 + $0x10a] sm:$0xff] }
 0x204   : > { %6041 = vst.msk [vmem:[#allocation5 + $0x20] sm:$0xf] %vm16156_vm3, %v14285_v2  ;;  %vm16158_vm3 = vcmask 142456   ;;  %v11425_v20 = vpack.c.bf16 %v3803_v6, %v3803_v6  ;;  %v11319_v30 = vpack.c.bf16 %v2246_v12, %v2246_v12  ;;  %v2824_v12 = vld [vmem:[#allocation2 + $0x111] sm:$0xff] }
 0x205   : > { %6042 = vst.msk [vmem:[#allocation5 + $0x2c] sm:$0xf] %vm16152_vm1, %v11676_v57  ;;  %v2421_v61 = vpop.permute.xlu0 %2420  ;;  %1888 = vrot.lane.b32.xlu1 %v13790_v10, %s12848_s24  ;;  %v11256_v57 = vpack.c.bf16 %v1701_v29, %v1701_v29  ;;  %3962 = vst.msk [vmem:[#allocation5 + $0x48] sm:$0xf] %vm16152_vm1, %v11423_v14  ;;  %v2277_v29 = vsel %vm14233_vm11, %v14203_v9, 0.0  ;;  %v2279_v9 = vsel %vm13898_vm15, %v2247_v27, 0.0 }
 0x206   : > { %2207 = vst.msk [vmem:[#allocation3 + $0x5c] sm:$0xf] %vm16153_vm9, %v2134_v19  ;;  %vm16160_vm9 = vmmov %vm16152_vm1  ;;  %v2565_v19 = vsel %vm14171_vm2, %v14254_v44, 0.0  ;;  %v11320_v6 = vpack.c.bf16 %v2279_v9, %v2279_v9 }
 0x207   : > { %4988 = vst.msk [vmem:[#allocation5 + $0x40] sm:$0xf] %vm16157_vm5, %v11550_v37  ;;  %2143 = vrot.lane.b32.xlu0 %v14168_v11, %s12849_s25  ;;  %vm16161_vm5 = vmmov %vm16152_vm1  ;;  %v2419_v3 = vpop.permute.xlu1 %2418  ;;  %v1990_v11 = vld [vmem:[#allocation2 + $0x109] sm:$0xff] }
 0x208   : > { %2495 = vst.msk [vmem:[#allocation3 + $0x58] sm:$0xf] %vm16158_vm3, %v2421_v61  ;;  %2494 = vst.msk [vmem:[#allocation3 + $0x54] sm:$0xf] %vm16158_vm3, %v2419_v3 }
 0x209   : > { %3963 = vst.msk [vmem:[#allocation5 + $0x54] sm:$0xf] %vm16159_vm10, %v11424_v15  ;;  %v2706_v10 = vpop.permute.xlu0 %2705  ;;  %1892 = vrot.lane.b32.xlu1 %v11256_v57, %s12848_s24  ;;  %vm16164_vm10 = vmmov %vm16158_vm3  ;;  %v2535_v15 = vld [vmem:[#allocation2 + $0x110] sm:$0xff]  ;;  %s338_s24 = sand.u32 1, %s12832_s10  }
 0x20a   : > { %4990 = vst.msk [vmem:[#allocation5 + $0x58] sm:$0xf] %vm16160_vm9, %v11552_v1  ;;  %vm16165_vm1 = vmmov %vm16163_vm13  ;;  %v2567_v44 = vsel %vm14182_vm12, %v2535_v15, 0.0  ;;  %v3763_v15 = vld [vmem:[#allocation4] sm:$0xff]  ;;  %vm16214_vm12 = vcmask 142456  }
 0x20b   : > { %3965 = vst.msk [vmem:[#allocation5 + $0x6c] sm:$0xf] %vm16161_vm5, %v11426_v56  ;;  %2147 = vrot.lane.b32.xlu0 %v11287_v33, %s12849_s25  ;;  %v2423_v52 = vpop.permute.xlu1 %2422  ;;  %v11288_v56 = vpack.c.bf16 %v1990_v11, %v1990_v11  ;;  %vm16168_vm9 = vmmov %vm16165_vm1  ;;  %v2536_v11 = vld [vmem:[#allocation2 + $0x118] sm:$0xff] }
 0x20c   : > { %3964 = vst.msk [vmem:[#allocation5 + $0x60] sm:$0xf] %vm16162_vm0, %v11425_v20  ;;  %vm16167_vm0 = vcmask 191656   ;;  %v11351_v20 = vpack.c.bf16 %v2567_v44, %v2567_v44 }
 0x20d   : > { %2782 = vst.msk [vmem:[#allocation3 + $0x50] sm:$0xf] %vm16163_vm13, %v2706_v10  ;;  %v2710_v1 = vpop.permute.xlu0 %2709  ;;  %2145 = vrot.lane.b32.xlu1 %v14194_v46, %s12849_s25  ;;  %vm16166_vm13 = vmmov %vm16165_vm1  ;;  %v11318_v46 = vpack.c.bf16 %v2277_v29, %v2277_v29  ;;  %v11352_v29 = vpack.c.bf16 %v2536_v11, %v2536_v11  ;;  %v3764_v11 = vld [vmem:[#allocation4 + $0x8] sm:$0xff] }
 0x20e   : > { %2496 = vst.msk [vmem:[#allocation3 + $0x5c] sm:$0xf] %vm16164_vm10, %v2423_v52  ;;  %vm16169_vm5 = vmmov %vm16167_vm0  ;;  %vm16171_vm10 = vcmask 216256  }
 0x20f   : > { %2784 = vst.msk [vmem:[#allocation3 + $0x58] sm:$0xf] %vm16165_vm1, %v2710_v1  ;;  %2432 = vrot.lane.b32.xlu0 %v14198_v53, %s12850_s26  ;;  %v2708_v37 = vpop.permute.xlu1 %2707  ;;  %v11349_v53 = vpack.c.bf16 %v2565_v19, %v2565_v19  ;;  %vm16170_vm3 = vmmov %vm16167_vm0 }
 0x210   : > { %2783 = vst.msk [vmem:[#allocation3 + $0x54] sm:$0xf] %vm16166_vm13, %v2708_v37  ;;  %vm16172_vm1 = vmmov %vm16167_vm0  ;;  %v11383_v37 = vpack.c.bf16 %v2824_v12, %v2824_v12 }
 0x211   : > { %v2963_v35 = vpop.permute.xlu0 %2962  ;;  %2149 = vrot.lane.b32.xlu1 %v11288_v56, %s12849_s25  ;;  %vm16173_vm13 = vmmov %vm16171_vm10  ;;  %s11125_s25 = sshll.u32 %s12931_s13, 4  ;;  %s12782_s13 = scalar_lea.vmem %s12781_s22, 32 }
 0x212   : > { %3039 = vst.msk [vmem:[#allocation3 + $0x50] sm:$0xf] %vm16167_vm0, %v2963_v35  ;;  %vm16174_vm0 = vmmov %vm16171_vm10 }
 0x213   : > { %2436 = vrot.lane.b32.xlu0 %v11319_v30, %s12850_s26  ;;  %v2712_v61 = vpop.permute.xlu1 %2711 }
 0x214   : > { %2785 = vst.msk [vmem:[#allocation3 + $0x5c] sm:$0xf] %vm16168_vm9, %v2712_v61  ;;  %vm16175_vm9 = vcmask 44056   ;;  %v3081_v61 = vld [vmem:[#allocation2 + $0x112] sm:$0xff] }
 0x215   : > { %v2967_v14 = vpop.permute.xlu0 %2966  ;;  %2434 = vrot.lane.b32.xlu1 %v11318_v46, %s12850_s26 }
 0x216   : > { %3041 = vst.msk [vmem:[#allocation3 + $0x58] sm:$0xf] %vm16169_vm5, %v2967_v14  ;;  %vm16176_vm5 = vnez %v15911_v17  ;;  %v3988_v14 = vld [vmem:[#allocation4 + $0x1] sm:$0xff] }
 0x217   : > { %2721 = vrot.lane.b32.xlu0 %v11349_v53, %s12851_s27  ;;  %v2965_v3 = vpop.permute.xlu1 %2964  ;;  %v3795_v46 = vsel %vm16176_vm5, %v3763_v15, 0.0  ;;  %v2825_v53 = vld [vmem:[#allocation2 + $0x119] sm:$0xff] }
 0x218   : > { %3040 = vst.msk [vmem:[#allocation3 + $0x54] sm:$0xf] %vm16170_vm3, %v2965_v3  ;;  %vm16177_vm3 = vmmov %vm16174_vm0  ;;  %v11384_v44 = vpack.c.bf16 %v2825_v53, %v2825_v53  ;;  %v3082_v3 = vld [vmem:[#allocation2 + $0x11a] sm:$0xff] }
 0x219   : > { %v3252_v10 = vpop.permute.xlu0 %3251  ;;  %2438 = vrot.lane.b32.xlu1 %v11320_v6, %s12850_s26  ;;  %v11415_v6 = vpack.c.bf16 %v3081_v61, %v3081_v61  ;;  %v5015_v61 = vld [vmem:[#allocation4 + $0x12] sm:$0xff] }
 0x21a   : > { %3328 = vst.msk [vmem:[#allocation3 + $0x50] sm:$0xf] %vm16171_vm10, %v3252_v10  ;;  %vm16178_vm10 = vcmask 257024   ;;  %v12392_v10 = vld [vmem:[%s15833_s3 + $0x78] sm:$0xff]  }
 0x21b   : > { %2725 = vrot.lane.b32.xlu0 %v11351_v20, %s12851_s27  ;;  %v2969_v52 = vpop.permute.xlu1 %2968  ;;  %v3112_v20 = vsel %vm14233_vm11, %v2247_v27, 0.0  ;;  %11727 = vmatprep.subr.bf16.mxu1 %v12392_v10  ;;  %v4245_v10 = vld [vmem:[#allocation4 + $0x2] sm:$0xff] }
 0x21c   : > { %3042 = vst.msk [vmem:[#allocation3 + $0x5c] sm:$0xf] %vm16172_vm1, %v2969_v52  ;;  %vm16179_vm1 = vmmov %vm16175_vm9  ;;  %v11414_v27 = vpack.c.bf16 %v3112_v20, %v3112_v20 }
 0x21d   : > { %v3256_v1 = vpop.permute.xlu0 %3255  ;;  %2723 = vrot.lane.b32.xlu1 %v11256_v57, %s12851_s27  ;;  %v11417_v57 = vpack.c.bf16 %v3795_v46, %v3795_v46  ;;  %v12396_v46 = vld [vmem:[%s15833_s3 + $0x30] sm:$0xff]  }
 0x21e   : > { %3330 = vst.msk [vmem:[#allocation3 + $0x58] sm:$0xf] %vm16173_vm13, %v3256_v1  ;;  %v11418_v1 = vpack.c.bf16 %v3764_v11, %v3764_v11  ;;  %vm16180_vm13 = vmmov %vm16179_vm1  ;;  %v12401_v11 = vld [vmem:[%s15833_s3 + $0x28] sm:$0xff]  }
 0x21f   : > { %2978 = vrot.lane.b32.xlu0 %v11287_v33, %s12852_s28  ;;  %v3254_v19 = vpop.permute.xlu1 %3253  ;;  %3956 = vst.msk [vmem:[#allocation5] sm:$0xf] %vm16178_vm10, %v11417_v57 }
 0x220   : > { %3329 = vst.msk [vmem:[#allocation3 + $0x54] sm:$0xf] %vm16174_vm0, %v3254_v19  ;;  %vm16181_vm0 = vcmask 68656   ;;  %v12395_v19 = vld [vmem:[%s15833_s3 + $0x70] sm:$0xff]  }
 0x221   : > { %v1301_v35 = vpop.permute.xlu0 %1300  ;;  %2727 = vrot.lane.b32.xlu1 %v11352_v29, %s12851_s27  ;;  %v11449_v29 = vpack.c.bf16 %v3988_v14, %v3988_v14  ;;  %v3989_v14 = vld [vmem:[#allocation4 + $0x9] sm:$0xff]  ;;  %s10070_s27 = scalar_lea.hbm %s15839_s9, %s11125_s25 }
 0x222   : > { %1373 = vst.msk [vmem:[#allocation3 + $0x60] sm:$0xf] %vm16175_vm9, %v1301_v35  ;;  %vm16182_vm9 = vcmask 220160  }
 0x223   : > { %2982 = vrot.lane.b32.xlu0 %v11383_v37, %s12852_s28  ;;  %v3258_v9 = vpop.permute.xlu1 %3257  ;;  %v3114_v37 = vsel %vm13898_vm15, %v3082_v3, 0.0 }
 0x224   : > { %3331 = vst.msk [vmem:[#allocation3 + $0x5c] sm:$0xf] %vm16177_vm3, %v3258_v9  ;;  %vm16183_vm3 = vmmov %vm16178_vm10  ;;  %v11416_v9 = vpack.c.bf16 %v3114_v37, %v3114_v37  ;;  %v12402_v37 = vld [vmem:[%s15833_s3 + $0x80] sm:$0xff]  }
 0x225   : > { %v1305_v33 = vpop.permute.xlu0 %1304  ;;  %2980 = vrot.lane.b32.xlu1 %v11288_v56, %s12852_s28  ;;  %v12393_v56 = vld [vmem:[%s15833_s3 + $0x38] sm:$0xff]   ;;  %3957 = vst.msk [vmem:[#allocation5 + $0xc] sm:$0xf] %vm16183_vm3, %v11418_v1  ;;  %vm16184_vm10 = vmmov %vm16179_vm1  ;;  %vm16188_vm3 = vcmask 261120  }
 0x226   : > { %1375 = vst.msk [vmem:[#allocation3 + $0x68] sm:$0xf] %vm16179_vm1, %v1305_v33  ;;  %11728 = vmatpush3.bf16.msra.mxu1 %v12393_v56  ;;  %vm16185_vm1 = vmmov %vm16181_vm0  ;;  %v12398_v33 = vld [vmem:[%s15833_s3 + $0x88] sm:$0xff]   ;;  %v14399_v56 = vpack.c.bf16 %v5015_v61, %v5015_v61  ;;  %v12404_v61 = vld [vmem:[%s15833_s3 + $0x20] sm:$0xff]  }
 0x227   : > { %3267 = vrot.lane.b32.xlu0 %v11319_v30, %s12854_s16  ;;  %v1303_v52 = vpop.permute.xlu1 %1302  ;;  %v12388_v12 = vld [vmem:[#allocation3 + $0x50] sm:$0xff]   ;;  %11729 = vmatprep.subr.bf16.mxu1 %v12395_v19 }
 0x228   : > { %1374 = vst.msk [vmem:[#allocation3 + $0x64] sm:$0xf] %vm16180_vm13, %v1303_v52  ;;  %12242 = vmatprep.mubr.msk.bf16.mxu0 %vm16182_vm9, %v12388_v12  ;;  %vm16186_vm13 = vmmov %vm16182_vm9  ;;  %12254 = vmatprep.subr.bf16.mxu0 %v12398_v33  ;;  %vm16187_vm9 = vcmask 93256  }
 0x229   : > { %v1590_v30 = vpop.permute.xlu0 %1589  ;;  %2984 = vrot.lane.b32.xlu1 %v11384_v44, %s12852_s28  ;;  %12255 = vmatpush3.bf16.msra.mxu0 %v12398_v33  ;;  %s12857_s28 = smov 96  }
 0x22a   : > { %1662 = vst.msk [vmem:[#allocation3 + $0x60] sm:$0xf] %vm16181_vm0, %v1590_v30  ;;  %11730 = vmatpush3.bf16.msra.mxu1 %v12396_v46  ;;  %v14412_v46 = vld [vmem:[#allocation4 + $0x20] sm:$0xff]  ;;  %12256 = vmatprep.subr.bf16.mxu0 %v12402_v37 }
 0x22b   : > { %3271 = vrot.lane.b32.xlu0 %v11415_v6, %s12854_s16  ;;  %v1307_v35 = vpop.permute.xlu1 %1306  ;;  %v12389_v15 = vld [vmem:[#allocation3 + $0x58] sm:$0xff]   ;;  %v12399_v6 = vld [vmem:[%s15833_s3 + $0x68] sm:$0xff]  }
 0x22c   : > { %1376 = vst.msk [vmem:[#allocation3 + $0x6c] sm:$0xf] %vm16184_vm10, %v1307_v35  ;;  %v12232_v57 = vpop.f32.mrf.mxu0  ;;  %12243 = vmatmul.mubr.msk.bf16.gmra.mxu0 %vm16186_vm13, %v12389_v15  ;;  %11731 = vmatprep.subr.bf16.mxu1 %v12399_v6  ;;  %v11481_v15 = vpack.c.bf16 %v4245_v10, %v4245_v10  ;;  %vm16189_vm10 = vmmov %vm16188_vm3 }
 0x22d   : > { %v1594_v53 = vpop.permute.xlu0 %1593  ;;  %3269 = vrot.lane.b32.xlu1 %v11414_v27, %s12854_s16  ;;  %v3605_v44 = vadd.f32 %v12232_v57, %v14017_v8  ;;  %v11450_v27 = vpack.c.bf16 %v3989_v14, %v3989_v14  ;;  %12257 = vmatpush3.bf16.msra.mxu0 %v12402_v37  ;;  %vm16191_vm13 = vmmov %vm16187_vm9  ;;  %v4566_v37 = vsel %vm16176_vm5, %v14077_v34, 0.0 }
 0x22e   : > { %1664 = vst.msk [vmem:[#allocation3 + $0x68] sm:$0xf] %vm16185_vm1, %v1594_v53  ;;  %v3596_v3 = vpop.f32.mrf.mxu0  ;;  %11732 = vmatpush3.bf16.msra.mxu1 %v12401_v11  ;;  %v12403_v53 = vld [vmem:[%s15833_s3 + $0x60] sm:$0xff]   ;;  %vm16190_vm1 = vmmov %vm16181_vm0  ;;  %v11513_v34 = vpack.c.bf16 %v4566_v37, %v4566_v37 }
 0x22f   : > { %4116 = vrot.lane.b32.xlu0 %v11449_v29, %s12855_s14  ;;  %v1592_v20 = vpop.permute.xlu1 %1591  ;;  %v3701_v52 = vmax.f32 %v3605_v44, 0.0  ;;  %v3597_v1 = vadd.f32 %v14017_v8, %v3596_v3  ;;  %v14403_v29 = vld [vmem:[#allocation4 + $0x1a] sm:$0xff]  ;;  %11733 = vmatprep.subr.bf16.mxu1 %v12403_v53  ;;  %v4246_v3 = vld [vmem:[#allocation4 + $0xa] sm:$0xff] }
 0x230   : > { %1663 = vst.msk [vmem:[#allocation3 + $0x64] sm:$0xf] %vm16181_vm0, %v1592_v20  ;;  %v12233_v30 = vpop.f32.mrf.mxu0  ;;  %v5048_v6 = vsel %vm13038_vm4, %v14403_v29, 0.0  ;;  %v5335_v20 = vsel %vm16176_vm5, %v14412_v46, 0.0  ;;  %vm16192_vm0 = vmmov %vm16188_vm3  ;;  %vm16198_vm5 = vcmask 257024  }
 0x231   : > { %v1879_v12 = vpop.permute.xlu0 %1878  ;;  %3273 = vrot.lane.b32.xlu1 %v11416_v9, %s12854_s16  ;;  %3734 = vst.msk [vmem:[#allocation4 + $0x61] sm:$0xff] %vm16188_vm3, %v3701_v52  ;;  %v3699_v19 = vmax.f32 %v3597_v1, 0.0  ;;  %v3608_v35 = vadd.f32 %v12233_v30, %v14017_v8  ;;  %v11578_v52 = vpack.c.bf16 %v5048_v6, %v5048_v6  ;;  %vm16194_vm3 = vmmov %vm16191_vm13  ;;  %v11609_v30 = vpack.c.bf16 %v5335_v20, %v5335_v20  ;;  %s10060_s16 = scalar_lea.sflag [#allocation10], %s338_s24 }
 0x232   : > { %1951 = vst.msk [vmem:[#allocation3 + $0x60] sm:$0xf] %vm16187_vm9, %v1879_v12  ;;  %v3599_v9 = vpop.f32.mrf.mxu0  ;;  %11734 = vmatpush3.bf16.msra.mxu1 %v12404_v61  ;;  %v12408_v12 = vld [vmem:[%s15833_s3 + $0x18] sm:$0xff]   ;;  %vm16193_vm9 = vmmov %vm16192_vm0  ;;  %v5304_v61 = vld [vmem:[#allocation4 + $0x28] sm:$0xff] }
 0x233   : > { %5175 = vrot.lane.b32.xlu0 %v14399_v56, %s12855_s14  ;;  %v1596_v57 = vpop.permute.xlu1 %1595  ;;  %3732 = vst.msk [vmem:[#allocation4 + $0x51] sm:$0xff] %vm16189_vm10, %v3699_v19  ;;  %v3702_v33 = vmax.f32 %v3608_v35, 0.0  ;;  %v3600_v14 = vadd.f32 %v14017_v8, %v3599_v9  ;;  %v12406_v8 = vld [vmem:[%s15833_s3 + $0x58] sm:$0xff]   ;;  %vm16195_vm10 = vcmask 117856   ;;  %v12409_v35 = vld [vmem:[%s15833_s3 + $0x50] sm:$0xff]  }
 0x234   : > { %1665 = vst.msk [vmem:[#allocation3 + $0x6c] sm:$0xf] %vm16190_vm1, %v1596_v57  ;;  %11735 = vmatprep.subr.bf16.mxu1 %v12406_v8  ;;  %vm16197_vm1 = vmmov %vm16194_vm3 }
 0x235   : > { %v1883_v44 = vpop.permute.xlu0 %1882  ;;  %4118 = vrot.lane.b32.xlu1 %v11450_v27, %s12855_s14  ;;  %3735 = vst.msk [vmem:[#allocation4 + $0x69] sm:$0xff] %vm16192_vm0, %v3702_v33  ;;  %v3700_v10 = vmax.f32 %v3600_v14, 0.0  ;;  %v4278_v27 = vsel %vm13038_vm4, %v4246_v3, 0.0  ;;  %vm16196_vm4 = vnez %v15923_v62  ;;  %v12410_v33 = vld [vmem:[%s15833_s3 + $0x10] sm:$0xff]   ;;  %v12412_v3 = vld [vmem:[%s15833_s3 + $0x48] sm:$0xff]   ;;  %vm16200_vm0 = vmmov %vm16198_vm5 }
 0x236   : > { %1953 = vst.msk [vmem:[#allocation3 + $0x68] sm:$0xf] %vm16191_vm13, %v1883_v44  ;;  %11736 = vmatpush3.bf16.msra.mxu1 %v12408_v12  ;;  %v11482_v57 = vpack.c.bf16 %v4278_v27, %v4278_v27  ;;  %vm16199_vm13 = vmmov %vm16195_vm10  ;;  %v4535_v12 = vld [vmem:[#allocation4 + $0x18] sm:$0xff] }
 0x237   : > { %4405 = vrot.lane.b32.xlu0 %v11481_v15, %s12856_s21  ;;  %v1881_v11 = vpop.permute.xlu1 %1880  ;;  %3733 = vst.msk [vmem:[#allocation4 + $0x59] sm:$0xff] %vm16193_vm9, %v3700_v10  ;;  %11737 = vmatprep.subr.bf16.mxu1 %v12409_v35  ;;  %vm16201_vm9 = vmmov %vm16200_vm0 }
 0x238   : > { %1952 = vst.msk [vmem:[#allocation3 + $0x64] sm:$0xf] %vm16194_vm3, %v1881_v11  ;;  %v4833_v19 = vld [vmem:[#allocation4 + $0x61] sm:$0xff]  ;;  %vm16202_vm3 = vnez %v15925_v5  ;;  %vm16212_vm15 = vmmov %vm16200_vm0 }
 0x239   : > { %v2136_v1 = vpop.permute.xlu0 %2135  ;;  %5177 = vrot.lane.b32.xlu1 %v11578_v52, %s12855_s14  ;;  %v11555_v15 = vpack.c.bf16 %v4833_v19, %v4833_v19  ;;  %v14473_v52 = vpack.c.bf16 %v5304_v61, %v5304_v61  ;;  %v12414_v19 = vld [vmem:[%s15833_s3 + $0x8] sm:$0xff]  }
 0x23a   : > { %2208 = vst.msk [vmem:[#allocation3 + $0x60] sm:$0xf] %vm16195_vm10, %v2136_v1  ;;  %v14452_v45 = vld [vmem:[#allocation4 + $0x4a] sm:$0xff]  ;;  %11738 = vmatpush3.bf16.msra.mxu1 %v12410_v33 }
 0x23b   : > { %5463 = vrot.lane.b32.xlu0 %v11609_v30, %s12856_s21  ;;  %v1885_v53 = vpop.permute.xlu1 %1884  ;;  %v5884_v9 = vsel %vm16196_vm4, %v14452_v45, 0.0  ;;  %v4831_v44 = vld [vmem:[#allocation4 + $0x51] sm:$0xff]  ;;  %4993 = vst.msk [vmem:[#allocation5 + $0x7c] sm:$0xf] %vm16198_vm5, %v11555_v15  ;;  %11739 = vmatprep.subr.bf16.mxu1 %v12412_v3  ;;  %vm16204_vm5 = vmmov %vm16200_vm0 }
 0x23c   : > { %1954 = vst.msk [vmem:[#allocation3 + $0x6c] sm:$0xf] %vm16197_vm1, %v1885_v53  ;;  %v11678_v14 = vpack.c.bf16 %v5884_v9, %v5884_v9  ;;  %v5855_v6 = vld [vmem:[#allocation4 + $0x62] sm:$0xff]  ;;  %v11553_v1 = vpack.c.bf16 %v4831_v44, %v4831_v44  ;;  %v3773_v35 = vld [vmem:[#allocation4 + $0x50] sm:$0xff]  ;;  %vm16203_vm1 = vcmask 142456  }
 0x23d   : > { %v2140_v17 = vpop.permute.xlu0 %2139  ;;  %4407 = vrot.lane.b32.xlu1 %v11482_v57, %s12856_s21  ;;  %v14464_v20 = vpack.c.bf16 %v5855_v6, %v5855_v6  ;;  %v4834_v15 = vld [vmem:[#allocation4 + $0x69] sm:$0xff]  ;;  %v12416_v6 = vld [vmem:[%s15833_s3] sm:$0xff]  }
 0x23e   : > { %2210 = vst.msk [vmem:[#allocation3 + $0x68] sm:$0xf] %vm16199_vm13, %v2140_v17  ;;  %v5853_v10 = vld [vmem:[#allocation4 + $0x52] sm:$0xff]  ;;  %v14471_v8 = vld [vmem:[#allocation4 + $0x5a] sm:$0xff]  ;;  %vm16205_vm13 = vmmov %vm16200_vm0  ;;  %11740 = vmatpush3.bf16.msra.mxu1 %v12414_v19 }
 0x23f   : > { %4694 = vrot.lane.b32.xlu0 %v11513_v34, %s12857_s28  ;;  %6044 = vst.msk [vmem:[#allocation5 + $0x44] sm:$0xf] %vm16200_vm0, %v11678_v14  ;;  %v2138_v11 = vpop.permute.xlu1 %2137  ;;  %v5886_v30 = vsel %vm16202_vm3, %v14471_v8, 0.0  ;;  %v14480_v27 = vpack.c.bf16 %v5853_v10, %v5853_v10  ;;  %v4832_v57 = vld [vmem:[#allocation4 + $0x59] sm:$0xff]  ;;  %v3776_v33 = vld [vmem:[#allocation4 + $0x68] sm:$0xff]  ;;  %v11514_v14 = vpack.c.bf16 %v4535_v12, %v4535_v12 }
 0x240   : > { %6047 = vst.msk [vmem:[#allocation5 + $0x68] sm:$0xf] %vm16201_vm9, %v14464_v20  ;;  %v11680_v53 = vpack.c.bf16 %v5886_v30, %v5886_v30  ;;  %v3774_v9 = vld [vmem:[#allocation4 + $0x58] sm:$0xff]  ;;  %v3775_v17 = vld [vmem:[#allocation4 + $0x60] sm:$0xff]  ;;  %v11554_v61 = vpack.c.bf16 %v4832_v57, %v4832_v57  ;;  %vm16206_vm9 = vnez %v15929_v47  ;;  %v11430_v19 = vpack.c.bf16 %v3776_v33, %v3776_v33 }
 0x241   : > { %2209 = vst.msk [vmem:[#allocation3 + $0x64] sm:$0xf] %vm16195_vm10, %v2138_v11  ;;  %v2425_v37 = vpop.permute.xlu0 %2424  ;;  %5465 = vrot.lane.b32.xlu1 %v14473_v52, %s12856_s21  ;;  %v12415_v34 = vld [vmem:[%s15833_s3 + $0x40] sm:$0xff]   ;;  %v3805_v3 = vsel %vm16206_vm9, %v3773_v35, 0.0  ;;  %v11428_v10 = vpack.c.bf16 %v3774_v9, %v3774_v9  ;;  %v5050_v33 = vsel %vm13059_vm6, %v14264_v40, 0.0 }
 0x242   : > { %2497 = vst.msk [vmem:[#allocation3 + $0x60] sm:$0xf] %vm16203_vm1, %v2425_v37  ;;  %11741 = vmatprep.subr.bf16.mxu1 %v12415_v34  ;;  %vm16207_vm1 = vmmov %vm16200_vm0  ;;  %v11427_v30 = vpack.c.bf16 %v3805_v3, %v3805_v3  ;;  %v11556_v37 = vpack.c.bf16 %v4834_v15, %v4834_v15 }
 0x243   : > { %4991 = vst.msk [vmem:[#allocation5 + $0x64] sm:$0xf] %vm16204_vm5, %v11553_v1  ;;  %5719 = vrot.lane.b32.xlu0 %v14072_v25, %s12857_s28  ;;  %v2142_v44 = vpop.permute.xlu1 %2141  ;;  %v5592_v1 = vld [vmem:[#allocation4 + $0x29] sm:$0xff]  ;;  %vm16208_vm5 = vnez %v15935_v36  ;;  %11742 = vmatpush3.bf16.msra.mxu1 %v12416_v6  ;;  %v11580_v6 = vpack.c.bf16 %v5050_v33, %v5050_v33  ;;  %v14578_v33 = vld [vmem:[#allocation4 + $0x40] sm:$0xff] }
 0x244   : > { %6045 = vst.msk [vmem:[#allocation5 + $0x50] sm:$0xf] %vm16205_vm13, %v14480_v27  ;;  %v3807_v12 = vsel %vm16208_vm5, %v3775_v17, 0.0  ;;  %vm16209_vm13 = vcmask 142456   ;;  %v14515_v57 = vpack.c.bf16 %v5592_v1, %v5592_v1 }
 0x245   : > { %6046 = vst.msk [vmem:[#allocation5 + $0x5c] sm:$0xf] %vm16200_vm0, %v11680_v53  ;;  %v2429_v11 = vpop.permute.xlu0 %2428  ;;  %4696 = vrot.lane.b32.xlu1 %v11514_v14, %s12857_s28  ;;  %v5017_v53 = vld [vmem:[#allocation4 + $0x22] sm:$0xff]  ;;  %3967 = vst.msk [vmem:[#allocation5 + $0x84] sm:$0xf] %vm16200_vm0, %v11428_v10  ;;  %v11429_v35 = vpack.c.bf16 %v3807_v12, %v3807_v12  ;;  %v5306_v12 = vld [vmem:[#allocation4 + $0x38] sm:$0xff] }
 0x246   : > { %2211 = vst.msk [vmem:[#allocation3 + $0x6c] sm:$0xf] %vm16195_vm10, %v2142_v44  ;;  %vm16210_vm10 = vmmov %vm16200_vm0  ;;  %v14519_v17 = vpack.c.bf16 %v5017_v53, %v5017_v53 }
 0x247   : > { %4992 = vst.msk [vmem:[#allocation5 + $0x70] sm:$0xf] %vm16207_vm1, %v11554_v61  ;;  %4120 = vrot.lane.b32.xlu0 %v14080_v22, %s12855_s14  ;;  %vm16211_vm1 = vmmov %vm16200_vm0  ;;  %v2427_v15 = vpop.permute.xlu1 %2426  ;;  %v14526_v22 = vld [vmem:[#allocation4 + $0x30] sm:$0xff] }
 0x248   : > { %2499 = vst.msk [vmem:[#allocation3 + $0x68] sm:$0xf] %vm16209_vm13, %v2429_v11  ;;  %vm16213_vm13 = vmmov %vm16200_vm0  ;;  %vm16215_vm0 = vcmask 167056   ;;  %v4280_v11 = vsel %vm13059_vm6, %v14403_v29, 0.0 }
 0x249   : > { %3966 = vst.msk [vmem:[#allocation5 + $0x78] sm:$0xf] %vm16210_vm10, %v11427_v30  ;;  %v2714_v9 = vpop.permute.xlu0 %2713  ;;  %5721 = vrot.lane.b32.xlu1 %v14515_v57, %s12857_s28  ;;  %vm16218_vm10 = vnez %v15915_v48  ;;  %v11484_v1 = vpack.c.bf16 %v4280_v11, %v4280_v11 }
 0x24a   : > { %4994 = vst.msk [vmem:[#allocation5 + $0x88] sm:$0xf] %vm16211_vm1, %v11556_v37  ;;  %v5337_v44 = vsel %vm16218_vm10, %v14526_v22, 0.0  ;;  %vm16219_vm1 = vmmov %vm16215_vm0 }
 0x24b   : > { %3969 = vst.msk [vmem:[#allocation5 + $0x9c] sm:$0xf] %vm16212_vm15, %v11430_v19  ;;  %5179 = vrot.lane.b32.xlu0 %v14519_v17, %s12855_s14  ;;  %v2431_v34 = vpop.permute.xlu1 %2430  ;;  %vm16216_vm15 = vmmov %vm16214_vm12  ;;  %v11611_v10 = vpack.c.bf16 %v5337_v44, %v5337_v44  ;;  %v14554_v19 = vpack.c.bf16 %v5306_v12, %v5306_v12  ;;  %v5052_v44 = vsel %vm16196_vm4, %v14279_v50, 0.0  ;;  %v4282_v50 = vsel %vm16196_vm4, %v14264_v40, 0.0  ;;  %v5308_v40 = vld [vmem:[#allocation4 + $0x48] sm:$0xff] }
 0x24c   : > { %3968 = vst.msk [vmem:[#allocation5 + $0x90] sm:$0xf] %vm16213_vm13, %v11429_v35  ;;  %vm16220_vm13 = vcmask 191656   ;;  %v5595_v12 = vld [vmem:[#allocation4 + $0x41] sm:$0xff] }
 0x24d   : > { %2498 = vst.msk [vmem:[#allocation3 + $0x64] sm:$0xf] %vm16214_vm12, %v2427_v15  ;;  %v2718_v61 = vpop.permute.xlu0 %2717  ;;  %vm16217_vm12 = vmmov %vm16215_vm0  ;;  %4122 = vrot.lane.b32.xlu1 %v14097_v23, %s12855_s14  ;;  %v4568_v23 = vsel %vm16218_vm10, %v14412_v46, 0.0  ;;  %v14557_v46 = vpack.c.bf16 %v5593_v55, %v5593_v55  ;;  %v5594_v15 = vld [vmem:[#allocation4 + $0x39] sm:$0xff] }
 0x24e   : > { %2786 = vst.msk [vmem:[#allocation3 + $0x60] sm:$0xf] %vm16215_vm0, %v2714_v9  ;;  %v11515_v37 = vpack.c.bf16 %v4568_v23, %v4568_v23  ;;  %vm16222_vm6 = vmmov %vm16220_vm13 }
 0x24f   : > { %2500 = vst.msk [vmem:[#allocation3 + $0x6c] sm:$0xf] %vm16216_vm15, %v2431_v34  ;;  %4409 = vrot.lane.b32.xlu0 %v14399_v56, %s12856_s21  ;;  %v2716_v14 = vpop.permute.xlu1 %2715  ;;  %vm16221_vm15 = vmmov %vm16220_vm13  ;;  %v14570_v34 = vpack.c.bf16 %v5594_v15, %v5594_v15 }
 0x250   : > { %2788 = vst.msk [vmem:[#allocation3 + $0x68] sm:$0xf] %vm16217_vm12, %v2718_v61  ;;  %vm16223_vm12 = vcmask 216256   ;;  %vm16224_vm10 = vmmov %vm16222_vm6 }
 0x251   : > { %2787 = vst.msk [vmem:[#allocation3 + $0x64] sm:$0xf] %vm16219_vm1, %v2716_v14  ;;  %v2971_v3 = vpop.permute.xlu0 %2970  ;;  %5181 = vrot.lane.b32.xlu1 %v11580_v6, %s12855_s14  ;;  %vm16225_vm1 = vmmov %vm16223_vm12  ;;  %v5339_v14 = vsel %vm13133_vm7, %v14578_v33, 0.0 }
 0x252   : > { %3043 = vst.msk [vmem:[#allocation3 + $0x60] sm:$0xf] %vm16220_vm13, %v2971_v3  ;;  %vm16226_vm13 = vmmov %vm16225_vm1  ;;  %v11582_v3 = vpack.c.bf16 %v5052_v44, %v5052_v44  ;;  %v11613_v23 = vpack.c.bf16 %v5339_v14, %v5339_v14 }
 0x253   : > { %5467 = vrot.lane.b32.xlu0 %v11611_v10, %s12856_s21  ;;  %v2720_v56 = vpop.permute.xlu1 %2719 }
 0x254   : > { %2789 = vst.msk [vmem:[#allocation3 + $0x6c] sm:$0xf] %vm16215_vm0, %v2720_v56  ;;  %vm16227_vm0 = vcmask 44056   ;;  %v11486_v56 = vpack.c.bf16 %v4282_v50, %v4282_v50 }
 0x255   : > { %v2975_v30 = vpop.permute.xlu0 %2974  ;;  %4411 = vrot.lane.b32.xlu1 %v11484_v1, %s12856_s21 }
 0x256   : > { %3045 = vst.msk [vmem:[#allocation3 + $0x68] sm:$0xf] %vm16221_vm15, %v2975_v30  ;;  %vm16228_vm15 = vmmov %vm16225_vm1 }
 0x257   : > { %4698 = vrot.lane.b32.xlu0 %v11515_v37, %s12857_s28  ;;  %v2973_v29 = vpop.permute.xlu1 %2972 }
 0x258   : > { %3044 = vst.msk [vmem:[#allocation3 + $0x64] sm:$0xf] %vm16222_vm6, %v2973_v29  ;;  %vm16229_vm6 = vmmov %vm16227_vm0 }
 0x259   : > { %v3260_v48 = vpop.permute.xlu0 %3259  ;;  %5469 = vrot.lane.b32.xlu1 %v14554_v19, %s12856_s21 }
 0x25a   : > { %3332 = vst.msk [vmem:[#allocation3 + $0x60] sm:$0xf] %vm16223_vm12, %v3260_v48  ;;  %vm16230_vm12 = vmmov %vm16227_vm0  ;;  %v14614_v48 = vpack.c.bf16 %v5308_v40, %v5308_v40 }
 0x25b   : > { %5723 = vrot.lane.b32.xlu0 %v14557_v46, %s12857_s28  ;;  %v2977_v53 = vpop.permute.xlu1 %2976 }
 0x25c   : > { %3046 = vst.msk [vmem:[#allocation3 + $0x6c] sm:$0xf] %vm16224_vm10, %v2977_v53  ;;  %vm16231_vm10 = vcmask 68656  }
 0x25d   : > { %v3264_v35 = vpop.permute.xlu0 %3263  ;;  %4700 = vrot.lane.b32.xlu1 %v14473_v52, %s12857_s28  ;;  %vm16234_vm4 = vmmov %vm16231_vm10 }
 0x25e   : > { %3334 = vst.msk [vmem:[#allocation3 + $0x68] sm:$0xf] %vm16225_vm1, %v3264_v35  ;;  %vm16232_vm1 = vcmask 220160  }
 0x25f   : > { %4124 = vrot.lane.b32.xlu0 %v14072_v25, %s12855_s14  ;;  %v3262_v9 = vpop.permute.xlu1 %3261 }
 0x260   : > { %3333 = vst.msk [vmem:[#allocation3 + $0x64] sm:$0xf] %vm16226_vm13, %v3262_v9  ;;  %vm16233_vm13 = vmmov %vm16227_vm0  ;;  %v14618_v9 = vpack.c.bf16 %v5595_v12, %v5595_v12 }
 0x261   : > { %v1309_v61 = vpop.permute.xlu0 %1308  ;;  %5725 = vrot.lane.b32.xlu1 %v14570_v34, %s12857_s28 }
 0x262   : > { %1377 = vst.msk [vmem:[#allocation3 + $0x70] sm:$0xf] %vm16227_vm0, %v1309_v61  ;;  %vm16235_vm0 = vmmov %vm16232_vm1 }
 0x263   : > { %5183 = vrot.lane.b32.xlu0 %v14285_v2, %s12855_s14  ;;  %v3266_v52 = vpop.permute.xlu1 %3265 }
 0x264   : > { %3335 = vst.msk [vmem:[#allocation3 + $0x6c] sm:$0xf] %vm16228_vm15, %v3266_v52  ;;  %vm16237_vm15 = vcmask 93256  }
 0x265   : > { %v1313_v25 = vpop.permute.xlu0 %1312  ;;  %4126 = vrot.lane.b32.xlu1 %v14515_v57, %s12855_s14  ;;  %v4570_v57 = vsel %vm13133_vm7, %v14526_v22, 0.0  ;;  %vm16236_vm7 = vmmov %vm16234_vm4 }
 0x266   : > { %1379 = vst.msk [vmem:[#allocation3 + $0x78] sm:$0xf] %vm16229_vm6, %v1313_v25  ;;  %v11517_v62 = vpack.c.bf16 %v4570_v57, %v4570_v57  ;;  %vm16238_vm6 = vcmask 261120  }
 0x267   : > { %4413 = vrot.lane.b32.xlu0 %v14519_v17, %s12856_s21  ;;  %v1311_v6 = vpop.permute.xlu1 %1310  ;;  %v12390_v10 = vld [vmem:[#allocation3 + $0x60] sm:$0xff]  }
 0x268   : > { %1378 = vst.msk [vmem:[#allocation3 + $0x74] sm:$0xf] %vm16230_vm12, %v1311_v6  ;;  %12246 = vmatprep.mubr.msk.bf16.mxu0 %vm16232_vm1, %v12390_v10  ;;  %vm16239_vm12 = vmmov %vm16238_vm6 }
 0x269   : > { %v1598_v11 = vpop.permute.xlu0 %1597  ;;  %5185 = vrot.lane.b32.xlu1 %v11582_v3, %s12855_s14  ;;  %vm16241_vm1 = vmmov %vm16237_vm15 }
 0x26a   : > { %1666 = vst.msk [vmem:[#allocation3 + $0x70] sm:$0xf] %vm16231_vm10, %v1598_v11  ;;  %vm16240_vm10 = vmmov %vm16234_vm4  ;;  %v5596_v11 = vld [vmem:[#allocation4 + $0x49] sm:$0xff] }
 0x26b   : > { %5471 = vrot.lane.b32.xlu0 %v11613_v23, %s12856_s21  ;;  %v1315_v17 = vpop.permute.xlu1 %1314  ;;  %v12391_v1 = vld [vmem:[#allocation3 + $0x68] sm:$0xff]   ;;  %v14636_v57 = vpack.c.bf16 %v5596_v11, %v5596_v11 }
 0x26c   : > { %1380 = vst.msk [vmem:[#allocation3 + $0x7c] sm:$0xf] %vm16233_vm13, %v1315_v17  ;;  %v12236_v37 = vpop.f32.mrf.mxu0  ;;  %12247 = vmatmul.mubr.msk.bf16.gmra.mxu0 %vm16235_vm0, %v12391_v1  ;;  %vm16242_vm13 = vmmov %vm16238_vm6 }
 0x26d   : > { %v1602_v30 = vpop.permute.xlu0 %1601  ;;  %4415 = vrot.lane.b32.xlu1 %v11486_v56, %s12856_s21  ;;  %v3621_v22 = vadd.f32 %v14610_v31, %v12236_v37  ;;  %vm16244_vm0 = vmmov %vm16241_vm1  ;;  %v14645_v56 = vld [vmem:[#allocation4 + $0x50] sm:$0xff]  ;;  %v5054_v37 = vsel %vm16202_vm3, %v14452_v45, 0.0 }
 0x26e   : > { %1668 = vst.msk [vmem:[#allocation3 + $0x78] sm:$0xf] %vm16234_vm4, %v1602_v30  ;;  %v3612_v29 = vpop.f32.mrf.mxu0  ;;  %vm16243_vm4 = vmmov %vm16238_vm6 }
 0x26f   : > { %4702 = vrot.lane.b32.xlu0 %v11517_v62, %s12857_s28  ;;  %v1600_v55 = vpop.permute.xlu1 %1599  ;;  %v3705_v53 = vmax.f32 %v3621_v22, 0.0  ;;  %v3613_v15 = vadd.f32 %v14610_v31, %v3612_v29  ;;  %v4252_v29 = vld [vmem:[#allocation4 + $0x3a] sm:$0xff] }
 0x270   : > { %1667 = vst.msk [vmem:[#allocation3 + $0x74] sm:$0xf] %vm16236_vm7, %v1600_v55  ;;  %v12237_v61 = vpop.f32.mrf.mxu0  ;;  %vm16245_vm7 = vcmask 117856   ;;  %v5341_v55 = vsel %vm13137_vm8, %v14645_v56, 0.0  ;;  %v4284_v11 = vsel %vm16202_vm3, %v4252_v29, 0.0 }
 0x271   : > { %v1887_v35 = vpop.permute.xlu0 %1886  ;;  %5473 = vrot.lane.b32.xlu1 %v14614_v48, %s12856_s21  ;;  %3738 = vst.msk [vmem:[#allocation4 + $0x81] sm:$0xff] %vm16238_vm6, %v3705_v53  ;;  %v3703_v52 = vmax.f32 %v3613_v15, 0.0  ;;  %v3624_v25 = vadd.f32 %v14610_v31, %v12237_v61  ;;  %vm16247_vm6 = vmmov %vm16244_vm0 }
 0x272   : > { %1955 = vst.msk [vmem:[#allocation3 + $0x70] sm:$0xf] %vm16237_vm15, %v1887_v35  ;;  %v3615_v14 = vpop.f32.mrf.mxu0  ;;  %vm16246_vm15 = vnez %v15931_v13  ;;  %v5599_v13 = vld [vmem:[#allocation4 + $0x61] sm:$0xff] }
 0x273   : > { %5727 = vrot.lane.b32.xlu0 %v14618_v9, %s12857_s28  ;;  %v1604_v44 = vpop.permute.xlu1 %1603  ;;  %3736 = vst.msk [vmem:[#allocation4 + $0x71] sm:$0xff] %vm16239_vm12, %v3703_v52  ;;  %v3706_v6 = vmax.f32 %v3624_v25, 0.0  ;;  %v3616_v10 = vadd.f32 %v14610_v31, %v3615_v14  ;;  %vm16248_vm12 = vcmask 257024   ;;  %v11584_v25 = vpack.c.bf16 %v5054_v37, %v5054_v37 }
 0x274   : > { %1669 = vst.msk [vmem:[#allocation3 + $0x7c] sm:$0xf] %vm16240_vm10, %v1604_v44  ;;  %vm16249_vm10 = vmmov %vm16245_vm7 }
 0x275   : > { %v1891_v3 = vpop.permute.xlu0 %1890  ;;  %4704 = vrot.lane.b32.xlu1 %v14554_v19, %s12857_s28  ;;  %3739 = vst.msk [vmem:[#allocation4 + $0x89] sm:$0xff] %vm16242_vm13, %v3706_v6  ;;  %v3704_v23 = vmax.f32 %v3616_v10, 0.0  ;;  %v11615_v10 = vpack.c.bf16 %v5341_v55, %v5341_v55  ;;  %v5310_v55 = vld [vmem:[#allocation4 + $0x58] sm:$0xff] }
 0x276   : > { %1957 = vst.msk [vmem:[#allocation3 + $0x78] sm:$0xf] %vm16241_vm1, %v1891_v3  ;;  %vm16250_vm1 = vmmov %vm16248_vm12 }
 0x277   : > { %4128 = vrot.lane.b32.xlu0 %v14557_v46, %s12855_s14  ;;  %v1889_v50 = vpop.permute.xlu1 %1888  ;;  %3737 = vst.msk [vmem:[#allocation4 + $0x79] sm:$0xff] %vm16243_vm4, %v3704_v23  ;;  %vm16251_vm13 = vmmov %vm16250_vm1  ;;  %vm16252_vm4 = vnez %v15933_v26 }
 0x278   : > { %1956 = vst.msk [vmem:[#allocation3 + $0x74] sm:$0xf] %vm16244_vm0, %v1889_v50  ;;  %v5603_v19 = vld [vmem:[#allocation4 + $0x81] sm:$0xff]  ;;  %vm16253_vm0 = vmmov %vm16245_vm7 }
 0x279   : > { %v2144_v17 = vpop.permute.xlu0 %2143  ;;  %5729 = vrot.lane.b32.xlu1 %v14636_v57, %s12857_s28  ;;  %v14647_v46 = vpack.c.bf16 %v5603_v19, %v5603_v19  ;;  %v4572_v19 = vsel %vm13137_vm8, %v14578_v33, 0.0  ;;  %vm16257_vm3 = vmmov %vm16250_vm1  ;;  %v11488_v33 = vpack.c.bf16 %v4284_v11, %v4284_v11  ;;  %v5598_v11 = vld [vmem:[#allocation4 + $0x59] sm:$0xff] }
 0x27a   : > { %2212 = vst.msk [vmem:[#allocation3 + $0x70] sm:$0xf] %vm16245_vm7, %v2144_v17  ;;  %v14649_v1 = vld [vmem:[#allocation4 + $0x6a] sm:$0xff]  ;;  %vm16254_vm7 = vcmask 142456   ;;  %vm16259_vm8 = vmmov %vm16250_vm1 }
 0x27b   : > { %5187 = vrot.lane.b32.xlu0 %v14276_v4, %s12855_s14  ;;  %v1893_v30 = vpop.permute.xlu1 %1892  ;;  %v5888_v62 = vsel %vm16246_vm15, %v14649_v1, 0.0  ;;  %v4835_v12 = vld [vmem:[#allocation4 + $0x71] sm:$0xff]  ;;  %4997 = vst.msk [vmem:[#allocation5 + $0xac] sm:$0xf] %vm16248_vm12, %v14647_v46  ;;  %vm16256_vm12 = vmmov %vm16250_vm1 }
 0x27c   : > { %1958 = vst.msk [vmem:[#allocation3 + $0x7c] sm:$0xf] %vm16247_vm6, %v1893_v30  ;;  %v11682_v4 = vpack.c.bf16 %v5888_v62, %v5888_v62  ;;  %v5859_v22 = vld [vmem:[#allocation4 + $0x82] sm:$0xff]  ;;  %v3777_v14 = vld [vmem:[#allocation4 + $0x70] sm:$0xff]  ;;  %vm16255_vm6 = vmmov %vm16250_vm1 }
 0x27d   : > { %v2148_v40 = vpop.permute.xlu0 %2147  ;;  %4130 = vrot.lane.b32.xlu1 %v14570_v34, %s12855_s14  ;;  %v5604_v53 = vld [vmem:[#allocation4 + $0x89] sm:$0xff]  ;;  %v14666_v35 = vpack.c.bf16 %v5859_v22, %v5859_v22  ;;  %v11557_v34 = vpack.c.bf16 %v4835_v12, %v4835_v12  ;;  %v11519_v22 = vpack.c.bf16 %v4572_v19, %v4572_v19 }
 0x27e   : > { %2214 = vst.msk [vmem:[#allocation3 + $0x78] sm:$0xf] %vm16249_vm10, %v2148_v40  ;;  %v5857_v15 = vld [vmem:[#allocation4 + $0x72] sm:$0xff]  ;;  %v14671_v61 = vld [vmem:[#allocation4 + $0x7a] sm:$0xff]  ;;  %v14673_v44 = vpack.c.bf16 %v5604_v53, %v5604_v53  ;;  %v3780_v62 = vld [vmem:[#allocation4 + $0x88] sm:$0xff]  ;;  %vm16258_vm10 = vnez %v15938_v39 }
 0x27f   : > { %4417 = vrot.lane.b32.xlu0 %v14285_v2, %s12856_s21  ;;  %6048 = vst.msk [vmem:[#allocation5 + $0x74] sm:$0xf] %vm16250_vm1, %v11682_v4  ;;  %v2146_v52 = vpop.permute.xlu1 %2145  ;;  %v5890_v6 = vsel %vm16252_vm4, %v14671_v61, 0.0  ;;  %v14680_v3 = vpack.c.bf16 %v5857_v15, %v5857_v15  ;;  %v5602_v23 = vld [vmem:[#allocation4 + $0x79] sm:$0xff]  ;;  %v3809_v40 = vsel %vm16258_vm10, %v3777_v14, 0.0  ;;  %v11434_v53 = vpack.c.bf16 %v3780_v62, %v3780_v62  ;;  %v5597_v15 = vld [vmem:[#allocation4 + $0x51] sm:$0xff] }
 0x280   : > { %6051 = vst.msk [vmem:[#allocation5 + $0x98] sm:$0xf] %vm16251_vm13, %v14666_v35  ;;  %v3778_v50 = vld [vmem:[#allocation4 + $0x78] sm:$0xff]  ;;  %v11684_v17 = vpack.c.bf16 %v5890_v6, %v5890_v6  ;;  %v14690_v30 = vpack.c.bf16 %v5602_v23, %v5602_v23  ;;  %v3779_v5 = vld [vmem:[#allocation4 + $0x80] sm:$0xff]  ;;  %v11431_v37 = vpack.c.bf16 %v3809_v40, %v3809_v40  ;;  %vm16260_vm13 = vmmov %vm16253_vm0  ;;  %v14716_v6 = vpack.c.bf16 %v5597_v15, %v5597_v15 }
 0x281   : > { %2213 = vst.msk [vmem:[#allocation3 + $0x74] sm:$0xf] %vm16253_vm0, %v2146_v52  ;;  %v2433_v2 = vpop.permute.xlu0 %2432  ;;  %5189 = vrot.lane.b32.xlu1 %v11584_v25, %s12855_s14  ;;  %v11432_v12 = vpack.c.bf16 %v3778_v50, %v3778_v50  ;;  %vm16261_vm0 = vnez %v15983_v59  ;;  %v14729_v50 = vpack.c.bf16 %v5598_v11, %v5598_v11  ;;  %v4253_v19 = vld [vmem:[#allocation4 + $0x42] sm:$0xff]  ;;  %v5056_v40 = vsel %vm16246_vm15, %v14471_v8, 0.0 }
 0x282   : > { %2501 = vst.msk [vmem:[#allocation3 + $0x70] sm:$0xf] %vm16254_vm7, %v2433_v2  ;;  %v3811_v29 = vsel %vm16261_vm0, %v3779_v5, 0.0  ;;  %v14737_v5 = vld [vmem:[#allocation4 + $0x60] sm:$0xff]  ;;  %v11489_v62 = vpack.c.bf16 %v4253_v19, %v4253_v19 }
 0x283   : > { %4995 = vst.msk [vmem:[#allocation5 + $0x94] sm:$0xf] %vm16255_vm6, %v11557_v34  ;;  %5475 = vrot.lane.b32.xlu0 %v11615_v10, %s12856_s21  ;;  %v2150_v32 = vpop.permute.xlu1 %2149  ;;  %vm16262_vm6 = vmmov %vm16250_vm1  ;;  %v11433_v52 = vpack.c.bf16 %v3811_v29, %v3811_v29  ;;  %v14712_v34 = vpack.c.bf16 %v5310_v55, %v5310_v55 }
 0x284   : > { %4998 = vst.msk [vmem:[#allocation5 + $0xb8] sm:$0xf] %vm16256_vm12, %v14673_v44  ;;  %vm16263_vm12 = vmmov %vm16250_vm1 }
 0x285   : > { %6049 = vst.msk [vmem:[#allocation5 + $0x80] sm:$0xf] %vm16257_vm3, %v14680_v3  ;;  %v2437_v4 = vpop.permute.xlu0 %2436  ;;  %4419 = vrot.lane.b32.xlu1 %v11488_v33, %s12856_s21  ;;  %vm16264_vm3 = vmmov %vm16250_vm1 }
 0x286   : > { %6050 = vst.msk [vmem:[#allocation5 + $0x8c] sm:$0xf] %vm16250_vm1, %v11684_v17  ;;  %3972 = vst.msk [vmem:[#allocation5 + $0xc0] sm:$0xf] %vm16250_vm1, %v11433_v52  ;;  %v5312_v52 = vld [vmem:[#allocation4 + $0x68] sm:$0xff] }
 0x287   : > { %4996 = vst.msk [vmem:[#allocation5 + $0xa0] sm:$0xf] %vm16259_vm8, %v14690_v30  ;;  %4706 = vrot.lane.b32.xlu0 %v11519_v22, %s12857_s28  ;;  %v2435_v25 = vpop.permute.xlu1 %2434  ;;  %vm16265_vm8 = vmmov %vm16254_vm7  ;;  %v4286_v22 = vsel %vm16246_vm15, %v14452_v45, 0.0  ;;  %vm15906_vm15 = vcmask 519424  }
 0x288   : > { %2215 = vst.msk [vmem:[#allocation3 + $0x7c] sm:$0xf] %vm16260_vm13, %v2150_v32  ;;  %vm16266_vm13 = vcmask 167056   ;;  %v5343_v32 = vsel %vm13264_vm14, %v14737_v5, 0.0  ;;  %v11490_v29 = vpack.c.bf16 %v4286_v22, %v4286_v22 }
 0x289   : > { %2503 = vst.msk [vmem:[#allocation3 + $0x78] sm:$0xf] %vm16254_vm7, %v2437_v4  ;;  %v2722_v14 = vpop.permute.xlu0 %2721  ;;  %5477 = vrot.lane.b32.xlu1 %v14712_v34, %s12856_s21  ;;  %v11617_v4 = vpack.c.bf16 %v5343_v32, %v5343_v32 }
 0x28a   : > { %3970 = vst.msk [vmem:[#allocation5 + $0xa8] sm:$0xf] %vm16262_vm6, %v11431_v37  ;;  %vm16267_vm6 = vmmov %vm16266_vm13  ;;  %v11586_v37 = vpack.c.bf16 %v5056_v40, %v5056_v40  ;;  %v5058_v40 = vsel %vm16252_vm4, %v14649_v1, 0.0 }
 0x28b   : > { %3971 = vst.msk [vmem:[#allocation5 + $0xb4] sm:$0xf] %vm16263_vm12, %v11432_v12  ;;  %5731 = vrot.lane.b32.xlu0 %v14716_v6, %s12857_s28  ;;  %v2439_v2 = vpop.permute.xlu1 %2438  ;;  %vm16268_vm12 = vmmov %vm16267_vm6 }
 0x28c   : > { %3973 = vst.msk [vmem:[#allocation5 + $0xcc] sm:$0xf] %vm16264_vm3, %v11434_v53  ;;  %vm16269_vm3 = vcmask 191656   ;;  %vm16270_vm1 = vmmov %vm16267_vm6 }
 0x28d   : > { %2502 = vst.msk [vmem:[#allocation3 + $0x74] sm:$0xf] %vm16265_vm8, %v2435_v25  ;;  %v2726_v10 = vpop.permute.xlu0 %2725  ;;  %4708 = vrot.lane.b32.xlu1 %v14614_v48, %s12857_s28  ;;  %vm16271_vm8 = vmmov %vm16269_vm3  ;;  %v14764_v25 = vpack.c.bf16 %v5312_v52, %v5312_v52 }
 0x28e   : > { %2790 = vst.msk [vmem:[#allocation3 + $0x70] sm:$0xf] %vm16266_vm13, %v2722_v14  ;;  %vm16272_vm13 = vmmov %vm16269_vm3 }
 0x28f   : > { %2504 = vst.msk [vmem:[#allocation3 + $0x7c] sm:$0xf] %vm16254_vm7, %v2439_v2  ;;  %4132 = vrot.lane.b32.xlu0 %v14618_v9, %s12855_s14  ;;  %v2724_v23 = vpop.permute.xlu1 %2723  ;;  %vm16273_vm7 = vcmask 216256  }
 0x290   : > { %2792 = vst.msk [vmem:[#allocation3 + $0x78] sm:$0xf] %vm16267_vm6, %v2726_v10  ;;  %vm16274_vm6 = vmmov %vm16269_vm3  ;;  %v5600_v10 = vld [vmem:[#allocation4 + $0x69] sm:$0xff] }
 0x291   : > { %2791 = vst.msk [vmem:[#allocation3 + $0x74] sm:$0xf] %vm16268_vm12, %v2724_v23  ;;  %v2979_v17 = vpop.permute.xlu0 %2978  ;;  %5733 = vrot.lane.b32.xlu1 %v14729_v50, %s12857_s28  ;;  %vm16275_vm12 = vmmov %vm16273_vm7  ;;  %v14780_v23 = vpack.c.bf16 %v5600_v10, %v5600_v10  ;;  %v5314_v10 = vld [vmem:[#allocation4 + $0x78] sm:$0xff] }
 0x292   : > { %3047 = vst.msk [vmem:[#allocation3 + $0x70] sm:$0xf] %vm16269_vm3, %v2979_v17  ;;  %vm16277_vm3 = vmmov %vm16273_vm7 }
 0x293   : > { %5191 = vrot.lane.b32.xlu0 %v14480_v27, %s12855_s14  ;;  %v2728_v48 = vpop.permute.xlu1 %2727 }
 0x294   : > { %2793 = vst.msk [vmem:[#allocation3 + $0x7c] sm:$0xf] %vm16270_vm1, %v2728_v48  ;;  %vm4501_vm1 = vcmask 781824  }
 0x295   : > { %v2983_v9 = vpop.permute.xlu0 %2982  ;;  %4134 = vrot.lane.b32.xlu1 %v14636_v57, %s12855_s14  ;;  %v4574_v57 = vsel %vm13264_vm14, %v14645_v56, 0.0  ;;  %vm16276_vm14 = vmmov %vm16273_vm7  ;;  %v14767_v56 = vpack.c.bf16 %v5599_v13, %v5599_v13 }
 0x296   : > { %3049 = vst.msk [vmem:[#allocation3 + $0x78] sm:$0xf] %vm16271_vm8, %v2983_v9  ;;  %v11521_v15 = vpack.c.bf16 %v4574_v57, %v4574_v57  ;;  %vm16278_vm8 = vcmask 220160  }
 0x297   : > { %4421 = vrot.lane.b32.xlu0 %v11489_v62, %s12856_s21  ;;  %v2981_v33 = vpop.permute.xlu1 %2980  ;;  %v12400_v62 = vld [vmem:[#allocation5 + $0x8] ss:$12 sps:$4 sm:$0xff]  }
 0x298   : > { %3048 = vst.msk [vmem:[#allocation3 + $0x74] sm:$0xf] %vm16272_vm13, %v2981_v33  ;;  %vm16279_vm13 = vmmov %vm16278_vm8 }
 0x299   : > { %v3268_v12 = vpop.permute.xlu0 %3267  ;;  %5193 = vrot.lane.b32.xlu1 %v11586_v37, %s12855_s14 }
 0x29a   : > { %3336 = vst.msk [vmem:[#allocation3 + $0x70] sm:$0xf] %vm16273_vm7, %v3268_v12  ;;  %vm16280_vm7 = vcmask 261120  }
 0x29b   : > { %5479 = vrot.lane.b32.xlu0 %v11617_v4, %s12856_s21  ;;  %v2985_v55 = vpop.permute.xlu1 %2984  ;;  %v11588_v4 = vpack.c.bf16 %v5058_v40, %v5058_v40 }
 0x29c   : > { %3050 = vst.msk [vmem:[#allocation3 + $0x7c] sm:$0xf] %vm16274_vm6, %v2985_v55  ;;  %vm4790_vm6 = vcmask 1044224  }
 0x29d   : > { %v3272_v53 = vpop.permute.xlu0 %3271  ;;  %4423 = vrot.lane.b32.xlu1 %v11490_v29, %s12856_s21  ;;  %v4288_v29 = vsel %vm16252_vm4, %v14471_v8, 0.0  ;;  %v12405_v8 = vld [vmem:[#allocation5 + $0x20] ss:$12 sps:$4 sm:$0xff]   ;;  %vm16282_vm4 = vmmov %vm16280_vm7 }
 0x29e   : > { %3338 = vst.msk [vmem:[#allocation3 + $0x78] sm:$0xf] %vm16275_vm12, %v3272_v53  ;;  %v4576_v53 = vsel %vm16206_vm9, %v14737_v5, 0.0  ;;  %vm16281_vm12 = vmmov %vm16280_vm7  ;;  %v11492_v26 = vpack.c.bf16 %v4288_v29, %v4288_v29 }
 0x29f   : > { %4710 = vrot.lane.b32.xlu0 %v11521_v15, %s12857_s28  ;;  %v3270_v45 = vpop.permute.xlu1 %3269  ;;  %v11523_v5 = vpack.c.bf16 %v4576_v53, %v4576_v53 }
 0x2a0   : > { %3337 = vst.msk [vmem:[#allocation3 + $0x74] sm:$0xf] %vm16276_vm14, %v3270_v45  ;;  %vm16284_vm14 = vmmov %vm16282_vm4 }
 0x2a1   : > { %v4117_v42 = vpop.permute.xlu0 %4116  ;;  %5481 = vrot.lane.b32.xlu1 %v14764_v25, %s12856_s21 }
 0x2a2   : > { %4213 = vst.msk [vmem:[#allocation5] sm:$0xf] %vm15906_vm15, %v4117_v42 }
 0x2a3   : > { %5735 = vrot.lane.b32.xlu0 %v14767_v56, %s12857_s28  ;;  %v3274_v14 = vpop.permute.xlu1 %3273 }
 0x2a4   : > { %3339 = vst.msk [vmem:[#allocation3 + $0x7c] sm:$0xf] %vm16277_vm3, %v3274_v14  ;;  %vm16285_vm3 = vmmov %vm16282_vm4 }
 0x2a5   : > { %v5176_v2 = vpop.permute.xlu0 %5175  ;;  %4712 = vrot.lane.b32.xlu1 %v14712_v34, %s12857_s28  ;;  %v14789_v34 = vld [vmem:[#allocation4 + $0x70] sm:$0xff] }
 0x2a6   : > { %5271 = vst.msk [vmem:[#allocation5 + $0x4] sm:$0xf] %vm15906_vm15, %v5176_v2  ;;  %v12407_v2 = vld [vmem:[#allocation5 + $0x38] ss:$12 sps:$4 sm:$0xff]  }
 0x2a7   : > { %4136 = vrot.lane.b32.xlu0 %v14716_v6, %s12855_s14  ;;  %v4119_v11 = vpop.permute.xlu1 %4118  ;;  %v12394_v17 = vld [vmem:[#allocation3 + $0x70] sm:$0xff]  }
 0x2a8   : > { %4214 = vst.msk [vmem:[#allocation5 + $0xc] sm:$0xf] %vm15906_vm15, %v4119_v11  ;;  %12250 = vmatprep.mubr.msk.bf16.mxu0 %vm16278_vm8, %v12394_v17  ;;  %v5601_v11 = vld [vmem:[#allocation4 + $0x71] sm:$0xff]  ;;  %vm16286_vm8 = vmmov %vm16285_vm3 }
 0x2a9   : > { %v4406_v19 = vpop.permute.xlu0 %4405  ;;  %5737 = vrot.lane.b32.xlu1 %v14780_v23, %s12857_s28 }
 0x2aa   : > { %4502 = vst.msk [vmem:[#allocation5] sm:$0xf] %vm4501_vm1, %v4406_v19 }
 0x2ab   : > { %5195 = vrot.lane.b32.xlu0 %v14464_v20, %s12855_s14  ;;  %v5178_v6 = vpop.permute.xlu1 %5177  ;;  %v12397_v48 = vld [vmem:[#allocation3 + $0x78] sm:$0xff]   ;;  %v5345_v20 = vsel %vm16206_vm9, %v14789_v34, 0.0  ;;  %vm16283_vm9 = vmmov %vm16282_vm4 }
 0x2ac   : > { %5272 = vst.msk [vmem:[#allocation5 + $0x10] sm:$0xf] %vm15906_vm15, %v5178_v6  ;;  %v12240_v32 = vpop.f32.mrf.mxu0  ;;  %12251 = vmatmul.mubr.msk.bf16.gmra.mxu0 %vm16279_vm13, %v12397_v48  ;;  %v11619_v55 = vpack.c.bf16 %v5345_v20, %v5345_v20  ;;  %v14828_v6 = vpack.c.bf16 %v5314_v10, %v5314_v10  ;;  %vm16287_vm13 = vnez %v15953_v21 }
 0x2ad   : > { %v5464_v9 = vpop.permute.xlu0 %5463  ;;  %4138 = vrot.lane.b32.xlu1 %v14729_v50, %s12855_s14  ;;  %v3637_v33 = vadd.f32 %v14610_v31, %v12240_v32  ;;  %12258 = vmatprep.mubr.msk.bf16.mxu0 %vm16280_vm7, %v12400_v62  ;;  %vm16288_vm7 = vcmask 257024  }
 0x2ae   : > { %5559 = vst.msk [vmem:[#allocation5 + $0x4] sm:$0xf] %vm4501_vm1, %v5464_v9  ;;  %v3628_v12 = vpop.f32.mrf.mxu0  ;;  %v14832_v9 = vpack.c.bf16 %v5601_v11, %v5601_v11 }
 0x2af   : > { %4425 = vrot.lane.b32.xlu0 %v14480_v27, %s12856_s21  ;;  %v4408_v37 = vpop.permute.xlu1 %4407  ;;  %v3709_v22 = vmax.f32 %v3637_v33, 0.0  ;;  %v3629_v50 = vadd.f32 %v14610_v31, %v3628_v12  ;;  %v12411_v33 = vld [vmem:[#allocation5 + $0x50] ss:$12 sps:$4 sm:$0xff]  }
 0x2b0   : > { %4503 = vst.msk [vmem:[#allocation5 + $0xc] sm:$0xf] %vm4501_vm1, %v4408_v37  ;;  %v12241_v27 = vpop.f32.mrf.mxu0 }
 0x2b1   : > { %v4695_v57 = vpop.permute.xlu0 %4694  ;;  %5197 = vrot.lane.b32.xlu1 %v11588_v4, %s12855_s14  ;;  %3742 = vst.msk [vmem:[#allocation4 + $0xa1] sm:$0xff] %vm16281_vm12, %v3709_v22  ;;  %v3707_v15 = vmax.f32 %v3629_v50, 0.0  ;;  %v3640_v52 = vadd.f32 %v14610_v31, %v12241_v27  ;;  %v12413_v22 = vld [vmem:[#allocation5 + $0x68] ss:$12 sps:$4 sm:$0xff]   ;;  %vm16289_vm12 = vmmov %vm16285_vm3 }
 0x2b2   : > { %4791 = vst.msk [vmem:[#allocation5] sm:$0xf] %vm4790_vm6, %v4695_v57  ;;  %v3631_v45 = vpop.f32.mrf.mxu0 }
 0x2b3   : > { %5483 = vrot.lane.b32.xlu0 %v11619_v55, %s12856_s21  ;;  %v5466_v13 = vpop.permute.xlu1 %5465  ;;  %3740 = vst.msk [vmem:[#allocation4 + $0x91] sm:$0xff] %vm16282_vm4, %v3707_v15  ;;  %v3710_v42 = vmax.f32 %v3640_v52, 0.0  ;;  %v3632_v14 = vadd.f32 %v14610_v31, %v3631_v45  ;;  %vm16290_vm4 = vmmov %vm16285_vm3 }
 0x2b4   : > { %5560 = vst.msk [vmem:[#allocation5 + $0x10] sm:$0xf] %vm4501_vm1, %v5466_v13  ;;  %12259 = vmatmul.mubr.msk.bf16.vlgmr.msra.gmra.mxu0 %vm16283_vm9, %v12405_v8  ;;  %vm16291_vm9 = vmmov %vm16288_vm7 }
 0x2b5   : > { %v5720_v47 = vpop.permute.xlu0 %5719  ;;  %4427 = vrot.lane.b32.xlu1 %v11492_v26, %s12856_s21  ;;  %3743 = vst.msk [vmem:[#allocation4 + $0xa9] sm:$0xff] %vm16284_vm14, %v3710_v42  ;;  %v3708_v17 = vmax.f32 %v3632_v14, 0.0  ;;  %12262 = vmatprep.mubr.msk.bf16.mxu0 %vm16285_vm3, %v12407_v2  ;;  %vm16292_vm14 = vmmov %vm16288_vm7  ;;  %vm16293_vm3 = vnez %v15986_v54 }
 0x2b6   : > { %5815 = vst.msk [vmem:[#allocation5 + $0x4] sm:$0xf] %vm4790_vm6, %v5720_v47 }
 0x2b7   : > { %4714 = vrot.lane.b32.xlu0 %v11523_v5, %s12857_s28  ;;  %v4697_v19 = vpop.permute.xlu1 %4696  ;;  %3741 = vst.msk [vmem:[#allocation4 + $0x99] sm:$0xff] %vm16286_vm8, %v3708_v17  ;;  %vm16294_vm8 = vmmov %vm16288_vm7  ;;  %v4257_v5 = vld [vmem:[#allocation4 + $0x62] sm:$0xff] }
 0x2b8   : > { %4792 = vst.msk [vmem:[#allocation5 + $0xc] sm:$0xf] %vm4790_vm6, %v4697_v19  ;;  %v5607_v62 = vld [vmem:[#allocation4 + $0xa1] sm:$0xff] }
 0x2b9   : > { %v4121_v48 = vpop.permute.xlu0 %4120  ;;  %5485 = vrot.lane.b32.xlu1 %v14828_v6, %s12856_s21  ;;  %v14839_v40 = vpack.c.bf16 %v5607_v62, %v5607_v62  ;;  %v14888_v17 = vld [vmem:[#allocation4 + $0x80] sm:$0xff] }
 0x2ba   : > { %4215 = vst.msk [vmem:[#allocation5 + $0x18] sm:$0xf] %vm15906_vm15, %v4121_v48  ;;  %v14841_v32 = vld [vmem:[#allocation4 + $0x8a] sm:$0xff] }
 0x2bb   : > { %5739 = vrot.lane.b32.xlu0 %v14832_v9, %s12857_s28  ;;  %v5722_v20 = vpop.permute.xlu1 %5721  ;;  %v5605_v37 = vld [vmem:[#allocation4 + $0x91] sm:$0xff]  ;;  %v5892_v12 = vsel %vm16287_vm13, %v14841_v32, 0.0  ;;  %5001 = vst.msk [vmem:[#allocation5 + $0xdc] sm:$0xf] %vm16288_vm7, %v14839_v40  ;;  %vm16295_vm7 = vnez %v15959_v28 }
 0x2bc   : > { %5816 = vst.msk [vmem:[#allocation5 + $0x10] sm:$0xf] %vm4790_vm6, %v5722_v20  ;;  %v14847_v50 = vpack.c.bf16 %v5605_v37, %v5605_v37  ;;  %v3781_v57 = vld [vmem:[#allocation4 + $0x90] sm:$0xff]  ;;  %v11686_v55 = vpack.c.bf16 %v5892_v12, %v5892_v12  ;;  %v5863_v29 = vld [vmem:[#allocation4 + $0xa2] sm:$0xff]  ;;  %12263 = vmatmul.mubr.msk.bf16.gmra.mxu0 %vm16289_vm12, %v12411_v33  ;;  %vm16296_vm12 = vmmov %vm16294_vm8 }
 0x2bd   : > { %v5180_v4 = vpop.permute.xlu0 %5179  ;;  %4716 = vrot.lane.b32.xlu1 %v14764_v25, %s12857_s28  ;;  %v5608_v27 = vld [vmem:[#allocation4 + $0xa9] sm:$0xff]  ;;  %v14855_v53 = vpack.c.bf16 %v5863_v29, %v5863_v29  ;;  %12266 = vmatprep.mubr.msk.bf16.mxu0 %vm16290_vm4, %v12413_v22  ;;  %v3813_v45 = vsel %vm16293_vm3, %v3781_v57, 0.0  ;;  %vm16297_vm4 = vmmov %vm16294_vm8  ;;  %v11493_v22 = vpack.c.bf16 %v4257_v5, %v4257_v5  ;;  %v5060_v57 = vsel %vm16287_vm13, %v14671_v61, 0.0 }
 0x2be   : > { %5273 = vst.msk [vmem:[#allocation5 + $0x1c] sm:$0xf] %vm15906_vm15, %v5180_v4  ;;  %v5861_v15 = vld [vmem:[#allocation4 + $0x92] sm:$0xff]  ;;  %v14863_v52 = vld [vmem:[#allocation4 + $0x9a] sm:$0xff]  ;;  %v14865_v25 = vpack.c.bf16 %v5608_v27, %v5608_v27  ;;  %v3784_v11 = vld [vmem:[#allocation4 + $0xa8] sm:$0xff]  ;;  %v11435_v19 = vpack.c.bf16 %v3813_v45, %v3813_v45  ;;  %v5347_v27 = vsel %vm16208_vm5, %v14888_v17, 0.0  ;;  %v11590_v45 = vpack.c.bf16 %v5060_v57, %v5060_v57 }
 0x2bf   : > { %4140 = vrot.lane.b32.xlu0 %v14767_v56, %s12855_s14  ;;  %4999 = vst.msk [vmem:[#allocation5 + $0xc4] sm:$0xf] %vm16291_vm9, %v14847_v50  ;;  %v4123_v13 = vpop.permute.xlu1 %4122  ;;  %v5894_v56 = vsel %vm16295_vm7, %v14863_v52, 0.0  ;;  %v14874_v26 = vpack.c.bf16 %v5861_v15, %v5861_v15  ;;  %v5606_v42 = vld [vmem:[#allocation4 + $0x99] sm:$0xff]  ;;  %vm16298_vm9 = vmmov %vm16297_vm4  ;;  %v12417_v62 = vld [vmem:[#allocation5] ss:$12 sps:$4 sm:$0xff]   ;;  %v11438_v29 = vpack.c.bf16 %v3784_v11, %v3784_v11 }
 0x2c0   : > { %6052 = vst.msk [vmem:[#allocation5 + $0xa4] sm:$0xf] %vm16292_vm14, %v11686_v55  ;;  %v3782_v14 = vld [vmem:[#allocation4 + $0x98] sm:$0xff]  ;;  %v11688_v47 = vpack.c.bf16 %v5894_v56, %v5894_v56  ;;  %v14880_v2 = vpack.c.bf16 %v5606_v42, %v5606_v42  ;;  %v3783_v10 = vld [vmem:[#allocation4 + $0xa0] sm:$0xff]  ;;  %vm16299_vm14 = vmmov %vm16297_vm4  ;;  %v11621_v56 = vpack.c.bf16 %v5347_v27, %v5347_v27  ;;  %v4578_v42 = vsel %vm16208_vm5, %v14789_v34, 0.0 }
 0x2c1   : > { %6055 = vst.msk [vmem:[#allocation5 + $0xc8] sm:$0xf] %vm16294_vm8, %v14855_v53  ;;  %v4410_v8 = vpop.permute.xlu0 %4409  ;;  %5741 = vrot.lane.b32.xlu1 %v14690_v30, %s12857_s28  ;;  %v11436_v33 = vpack.c.bf16 %v3782_v14, %v3782_v14  ;;  %vm16300_vm8 = vnez %v16027_v0  ;;  %v12420_v4 = vld [vmem:[#allocation5 + $0x80] ss:$12 sps:$4 sm:$0xff]   ;;  %v11525_v11 = vpack.c.bf16 %v4578_v42, %v4578_v42  ;;  %vm16307_vm5 = vcmask 519424  }
 0x2c2   : > { %4216 = vst.msk [vmem:[#allocation5 + $0x24] sm:$0xf] %vm15906_vm15, %v4123_v13  ;;  %v3815_v37 = vsel %vm16300_vm8, %v3783_v10, 0.0  ;;  %v5062_v57 = vsel %vm16295_vm7, %v14841_v32, 0.0 }
 0x2c3   : > { %4504 = vst.msk [vmem:[#allocation5 + $0x18] sm:$0xf] %vm4501_vm1, %v4410_v8  ;;  %5199 = vrot.lane.b32.xlu0 %v14680_v3, %s12855_s14  ;;  %v5182_v48 = vpop.permute.xlu1 %5181  ;;  %v12419_v20 = vld [vmem:[#allocation5 + $0x4] ss:$12 sps:$4 sm:$0xff]   ;;  %v11437_v55 = vpack.c.bf16 %v3815_v37, %v3815_v37  ;;  %v4290_v8 = vsel %vm16287_vm13, %v14649_v1, 0.0  ;;  %vm16308_vm13 = vmmov %vm16307_vm5 }
 0x2c4   : > { %5002 = vst.msk [vmem:[#allocation5 + $0xe8] sm:$0xf] %vm16296_vm12, %v14865_v25  ;;  %vm16301_vm12 = vmmov %vm16297_vm4  ;;  %6606 = vmatprep.mubr.bf16.mxu1 %v12419_v20  ;;  %v11494_v5 = vpack.c.bf16 %v4290_v8, %v4290_v8  ;;  %v5318_v8 = vld [vmem:[#allocation4 + $0x98] sm:$0xff] }
 0x2c5   : > { %6053 = vst.msk [vmem:[#allocation5 + $0xb0] sm:$0xf] %vm16297_vm4, %v14874_v26  ;;  %v5468_v12 = vpop.permute.xlu0 %5467  ;;  %4142 = vrot.lane.b32.xlu1 %v14780_v23, %s12855_s14  ;;  %3975 = vst.msk [vmem:[#allocation5 + $0xe4] sm:$0xf] %vm16297_vm4, %v11436_v33  ;;  %6607 = vmatmul.mubr.bf16.vlgmr.msra.gmra.mxu1 %v12417_v62  ;;  %v14947_v33 = vld [vmem:[#allocation4 + $0x90] sm:$0xff] }
 0x2c6   : > { %6054 = vst.msk [vmem:[#allocation5 + $0xbc] sm:$0xf] %vm16298_vm9, %v11688_v47  ;;  %vm16302_vm9 = vcmask 261120  }
 0x2c7   : > { %5000 = vst.msk [vmem:[#allocation5 + $0xd0] sm:$0xf] %vm16299_vm14, %v14880_v2  ;;  %12267 = vmatmul.mubr.msk.bf16.gmra.mxu0 %vm16302_vm9, %v12420_v4  ;;  %4429 = vrot.lane.b32.xlu0 %v11493_v22, %s12856_s21  ;;  %v12421_v15 = vld [vmem:[#allocation5 + $0x98] ss:$12 sps:$4 sm:$0xff]   ;;  %vm16303_vm14 = vmmov %vm16297_vm4  ;;  %v4412_v13 = vpop.permute.xlu1 %4411 }
 0x2c8   : > { %5274 = vst.msk [vmem:[#allocation5 + $0x28] sm:$0xf] %vm15906_vm15, %v5182_v48  ;;  %vm16305_vm15 = vmmov %vm16302_vm9 }
 0x2c9   : > { %3974 = vst.msk [vmem:[#allocation5 + $0xd8] sm:$0xf] %vm16301_vm12, %v11435_v19  ;;  %vm16304_vm12 = vmmov %vm16297_vm4  ;;  %v4699_v23 = vpop.permute.xlu0 %4698  ;;  %12270 = vmatprep.mubr.msk.bf16.mxu0 %vm16305_vm15, %v12421_v15  ;;  %5201 = vrot.lane.b32.xlu1 %v11590_v45, %s12855_s14  ;;  %v5316_v19 = vld [vmem:[#allocation4 + $0x88] sm:$0xff] }
 0x2ca   : > { %5561 = vst.msk [vmem:[#allocation5 + $0x1c] sm:$0xf] %vm4501_vm1, %v5468_v12  ;;  %4505 = vst.msk [vmem:[#allocation5 + $0x24] sm:$0xf] %vm4501_vm1, %v4412_v13  ;;  %v14927_v21 = vpack.c.bf16 %v5316_v19, %v5316_v19  ;;  %v4292_v13 = vsel %vm16295_vm7, %v14671_v61, 0.0  ;;  %v14975_v61 = vpack.c.bf16 %v5318_v8, %v5318_v8 }
 0x2cb   : > { %3976 = vst.msk [vmem:[#allocation5 + $0xf0] sm:$0xf] %vm16303_vm14, %v11437_v55  ;;  %5487 = vrot.lane.b32.xlu0 %v11621_v56, %s12856_s21  ;;  %v5470_v47 = vpop.permute.xlu1 %5469  ;;  %vm16306_vm15 = vmmov %vm16302_vm9  ;;  %v11496_v45 = vpack.c.bf16 %v4292_v13, %v4292_v13 }
 0x2cc   : > { %3977 = vst.msk [vmem:[#allocation5 + $0xfc] sm:$0xf] %vm16304_vm12, %v11438_v29  ;;  %vm16309_vm4 = vmmov %vm16307_vm5  ;;  %v11592_v29 = vpack.c.bf16 %v5062_v57, %v5062_v57 }
 0x2cd   : > { %4793 = vst.msk [vmem:[#allocation5 + $0x18] sm:$0xf] %vm4790_vm6, %v4699_v23  ;;  %v12422_v14 = vld [vmem:[#allocation5 + $0xb0] ss:$12 sps:$4 sm:$0xff]   ;;  %v5724_v10 = vpop.permute.xlu0 %5723  ;;  %4431 = vrot.lane.b32.xlu1 %v11494_v5, %s12856_s21  ;;  %vm16310_vm9 = vmmov %vm16309_vm4 }
 0x2ce   : > { %5562 = vst.msk [vmem:[#allocation5 + $0x28] sm:$0xf] %vm4501_vm1, %v5470_v47  ;;  %vm16312_vm7 = vmmov %vm16309_vm4 }
 0x2cf   : > { %5817 = vst.msk [vmem:[#allocation5 + $0x1c] sm:$0xf] %vm4790_vm6, %v5724_v10  ;;  %12271 = vmatmul.mubr.msk.bf16.gmra.mxu0 %vm16306_vm15, %v12422_v14  ;;  %4718 = vrot.lane.b32.xlu0 %v11525_v11, %s12857_s28  ;;  %v4701_v36 = vpop.permute.xlu1 %4700  ;;  %vm16313_vm14 = vmmov %vm16309_vm4 }
 0x2d0   : > { %4794 = vst.msk [vmem:[#allocation5 + $0x24] sm:$0xf] %vm4790_vm6, %v4701_v36  ;;  %vm16314_vm12 = vmmov %vm16306_vm15 }
 0x2d1   : > { %v4125_v1 = vpop.permute.xlu0 %4124  ;;  %5489 = vrot.lane.b32.xlu1 %v14927_v21, %s12856_s21  ;;  %vm16315_vm15 = vmmov %vm16314_vm12 }
 0x2d2   : > { %4217 = vst.msk [vmem:[#allocation5 + $0x30] sm:$0xf] %vm16307_vm5, %v4125_v1  ;;  %v4261_v1 = vld [vmem:[#allocation4 + $0x82] sm:$0xff]  ;;  %vm16316_vm5 = vmmov %vm16309_vm4 }
 0x2d3   : > { %5743 = vrot.lane.b32.xlu0 %v14647_v46, %s12857_s28  ;;  %v5726_v34 = vpop.permute.xlu1 %5725 }
 0x2d4   : > { %5818 = vst.msk [vmem:[#allocation5 + $0x28] sm:$0xf] %vm4790_vm6, %v5726_v34 }
 0x2d5   : > { %v5184_v48 = vpop.permute.xlu0 %5183  ;;  %4720 = vrot.lane.b32.xlu1 %v14828_v6, %s12857_s28 }
 0x2d6   : > { %5275 = vst.msk [vmem:[#allocation5 + $0x34] sm:$0xf] %vm16308_vm13, %v5184_v48  ;;  %v6075_v12 = vld [vmem:[#allocation5 + $0x18] sm:$0xff]  ;;  %vm16317_vm13 = vnez %v15998_v7 }
 0x2d7   : > { %4144 = vrot.lane.b32.xlu0 %v14832_v9, %s12855_s14  ;;  %v4127_v62 = vpop.permute.xlu1 %4126  ;;  %v14999_v48 = vld [vmem:[#allocation4 + $0xa0] sm:$0xff] }
 0x2d8   : > { %4218 = vst.msk [vmem:[#allocation5 + $0x3c] sm:$0xf] %vm16309_vm4, %v4127_v62 }
 0x2d9   : > { %v4414_v20 = vpop.permute.xlu0 %4413  ;;  %5745 = vrot.lane.b32.xlu1 %v14673_v44, %s12857_s28 }
 0x2da   : > { %4506 = vst.msk [vmem:[#allocation5 + $0x30] sm:$0xf] %vm4501_vm1, %v4414_v20 }
 0x2db   : > { %5203 = vrot.lane.b32.xlu0 %v14666_v35, %s12855_s14  ;;  %v5186_v37 = vpop.permute.xlu1 %5185  ;;  %v6077_v6 = vld [vmem:[#allocation5 + $0x24] sm:$0xff]  ;;  %v5349_v35 = vsel %vm16258_vm10, %v14947_v33, 0.0 }
 0x2dc   : > { %v12423_v4 = vld [vmem:[#allocation5 + $0x1c] ss:$12 sps:$4 sm:$0xff]   ;;  %5276 = vst.msk [vmem:[#allocation5 + $0x40] sm:$0xf] %vm16310_vm9, %v5186_v37  ;;  %v10762_v22 = vcombine.low %v6075_v12, %v6077_v6  ;;  %v11623_v15 = vpack.c.bf16 %v5349_v35, %v5349_v35  ;;  %v11497_v37 = vpack.c.bf16 %v4261_v1, %v4261_v1 }
 0x2dd   : > { %v5472_v9 = vpop.permute.xlu0 %5471  ;;  %4146 = vrot.lane.b32.xlu1 %v14690_v30, %s12855_s14  ;;  %6614 = vmatprep.mubr.bf16.mxu1 %v12423_v4  ;;  %v4580_v30 = vsel %vm16258_vm10, %v14888_v17, 0.0  ;;  %vm16311_vm10 = vmmov %vm16309_vm4 }
 0x2de   : > { %5563 = vst.msk [vmem:[#allocation5 + $0x34] sm:$0xf] %vm4501_vm1, %v5472_v9  ;;  %6615 = vmatmul.mubr.bf16.gmra.mxu1 %v10762_v22  ;;  %v11527_v56 = vpack.c.bf16 %v4580_v30, %v4580_v30  ;;  %vm16318_vm4 = vmmov %vm16314_vm12 }
 0x2df   : > { %4433 = vrot.lane.b32.xlu0 %v14680_v3, %s12856_s21  ;;  %v4416_v55 = vpop.permute.xlu1 %4415  ;;  %vm16319_vm9 = vmmov %vm16318_vm4 }
 0x2e0   : > { %4507 = vst.msk [vmem:[#allocation5 + $0x3c] sm:$0xf] %vm4501_vm1, %v4416_v55  ;;  %v5064_v55 = vsel %vm16317_vm13, %v14863_v52, 0.0 }
 0x2e1   : > { %v4703_v27 = vpop.permute.xlu0 %4702  ;;  %5205 = vrot.lane.b32.xlu1 %v11592_v29, %s12855_s14  ;;  %v5351_v29 = vsel %vm16261_vm0, %v14999_v48, 0.0 }
 0x2e2   : > { %4795 = vst.msk [vmem:[#allocation5 + $0x30] sm:$0xf] %vm4790_vm6, %v4703_v27  ;;  %v11625_v30 = vpack.c.bf16 %v5351_v29, %v5351_v29 }
 0x2e3   : > { %5491 = vrot.lane.b32.xlu0 %v11623_v15, %s12856_s21  ;;  %v5474_v3 = vpop.permute.xlu1 %5473  ;;  %v11594_v15 = vpack.c.bf16 %v5064_v55, %v5064_v55 }
 0x2e4   : > { %5564 = vst.msk [vmem:[#allocation5 + $0x40] sm:$0xf] %vm4501_vm1, %v5474_v3  ;;  %v4582_v3 = vsel %vm16261_vm0, %v14947_v33, 0.0  ;;  %vm16320_vm0 = vcmask 257024  }
 0x2e5   : > { %v5728_v23 = vpop.permute.xlu0 %5727  ;;  %4435 = vrot.lane.b32.xlu1 %v11496_v45, %s12856_s21 }
 0x2e6   : > { %5819 = vst.msk [vmem:[#allocation5 + $0x34] sm:$0xf] %vm4790_vm6, %v5728_v23 }
 0x2e7   : > { %4722 = vrot.lane.b32.xlu0 %v11527_v56, %s12857_s28  ;;  %v4705_v28 = vpop.permute.xlu1 %4704 }
 0x2e8   : > { %4796 = vst.msk [vmem:[#allocation5 + $0x3c] sm:$0xf] %vm4790_vm6, %v4705_v28 }
 0x2e9   : > { %v4129_v39 = vpop.permute.xlu0 %4128  ;;  %5493 = vrot.lane.b32.xlu1 %v14975_v61, %s12856_s21 }
 0x2ea   : > { %4219 = vst.msk [vmem:[#allocation5 + $0x48] sm:$0xf] %vm16311_vm10, %v4129_v39  ;;  %vm16321_vm10 = vmmov %vm16320_vm0 }
 0x2eb   : > { %5747 = vrot.lane.b32.xlu0 %v14847_v50, %s12857_s28  ;;  %v5730_v17 = vpop.permute.xlu1 %5729 }
 0x2ec   : > { %5820 = vst.msk [vmem:[#allocation5 + $0x40] sm:$0xf] %vm4790_vm6, %v5730_v17  ;;  %v12244_v14 = vpop.f32.mrf.mxu0  ;;  %v11529_v17 = vpack.c.bf16 %v4582_v3, %v4582_v3 }
 0x2ed   : > { %v5188_v42 = vpop.permute.xlu0 %5187  ;;  %4724 = vrot.lane.b32.xlu1 %v14927_v21, %s12857_s28  ;;  %v3653_v47 = vadd.f32 %v14610_v31, %v12244_v14  ;;  %v6079_v12 = vld [vmem:[#allocation5 + $0x30] sm:$0xff] }
 0x2ee   : > { %5277 = vst.msk [vmem:[#allocation5 + $0x4c] sm:$0xf] %vm16312_vm7, %v5188_v42  ;;  %v3644_v10 = vpop.f32.mrf.mxu0  ;;  %v5320_v42 = vld [vmem:[#allocation4 + $0xa8] sm:$0xff]  ;;  %vm16322_vm7 = vnez %v16031_v41 }
 0x2ef   : > { %4148 = vrot.lane.b32.xlu0 %v14647_v46, %s12855_s14  ;;  %v4131_v5 = vpop.permute.xlu1 %4130  ;;  %v3713_v11 = vmax.f32 %v3653_v47, 0.0  ;;  %v3645_v19 = vadd.f32 %v14610_v31, %v3644_v10 }
 0x2f0   : > { %4220 = vst.msk [vmem:[#allocation5 + $0x54] sm:$0xf] %vm16313_vm14, %v4131_v5  ;;  %v12245_v21 = vpop.f32.mrf.mxu0  ;;  %vm16323_vm14 = vmmov %vm16320_vm0 }
 0x2f1   : > { %v4418_v36 = vpop.permute.xlu0 %4417  ;;  %5749 = vrot.lane.b32.xlu1 %v14880_v2, %s12857_s28  ;;  %3746 = vst.msk [vmem:[#allocation4 + $0xc1] sm:$0xff] %vm16314_vm12, %v3713_v11  ;;  %v3711_v34 = vmax.f32 %v3645_v19, 0.0  ;;  %v3656_v46 = vadd.f32 %v14610_v31, %v12245_v21  ;;  %vm16324_vm12 = vnez %v16002_v51 }
 0x2f2   : > { %4508 = vst.msk [vmem:[#allocation5 + $0x48] sm:$0xf] %vm4501_vm1, %v4418_v36  ;;  %v3647_v20 = vpop.f32.mrf.mxu0  ;;  %v15044_v36 = vpack.c.bf16 %v5320_v42, %v5320_v42 }
 0x2f3   : > { %5207 = vrot.lane.b32.xlu0 %v14874_v26, %s12855_s14  ;;  %v5190_v62 = vpop.permute.xlu1 %5189  ;;  %v6081_v6 = vld [vmem:[#allocation5 + $0x3c] sm:$0xff]  ;;  %3744 = vst.msk [vmem:[#allocation4 + $0xb1] sm:$0xff] %vm16315_vm15, %v3711_v34  ;;  %v3714_v9 = vmax.f32 %v3656_v46, 0.0  ;;  %v3648_v22 = vadd.f32 %v14610_v31, %v3647_v20  ;;  %vm16325_vm15 = vmmov %vm16316_vm5 }
 0x2f4   : > { %v12425_v4 = vld [vmem:[#allocation5 + $0x34] ss:$12 sps:$4 sm:$0xff]   ;;  %5278 = vst.msk [vmem:[#allocation5 + $0x58] sm:$0xf] %vm16316_vm5, %v5190_v62  ;;  %v10765_v35 = vcombine.low %v6079_v12, %v6081_v6  ;;  %vm16326_vm5 = vmmov %vm16320_vm0 }
 0x2f5   : > { %v5476_v57 = vpop.permute.xlu0 %5475  ;;  %4150 = vrot.lane.b32.xlu1 %v14673_v44, %s12855_s14  ;;  %6622 = vmatprep.mubr.bf16.mxu1 %v12425_v4  ;;  %3747 = vst.msk [vmem:[#allocation4 + $0xc9] sm:$0xff] %vm16318_vm4, %v3714_v9  ;;  %v3712_v27 = vmax.f32 %v3648_v22, 0.0  ;;  %v4294_v44 = vsel %vm16317_vm13, %v14841_v32, 0.0  ;;  %vm16328_vm4 = vmmov %vm16320_vm0 }
 0x2f6   : > { %5565 = vst.msk [vmem:[#allocation5 + $0x4c] sm:$0xf] %vm4501_vm1, %v5476_v57  ;;  %6623 = vmatmul.mubr.bf16.gmra.mxu1 %v10765_v35  ;;  %v11498_v28 = vpack.c.bf16 %v4294_v44, %v4294_v44 }
 0x2f7   : > { %4437 = vrot.lane.b32.xlu0 %v11497_v37, %s12856_s21  ;;  %v4420_v31 = vpop.permute.xlu1 %4419  ;;  %3745 = vst.msk [vmem:[#allocation4 + $0xb9] sm:$0xff] %vm16319_vm9, %v3712_v27  ;;  %vm16329_vm9 = vmmov %vm16320_vm0 }
 0x2f8   : > { %4509 = vst.msk [vmem:[#allocation5 + $0x54] sm:$0xf] %vm4501_vm1, %v4420_v31  ;;  %v5611_v45 = vld [vmem:[#allocation4 + $0xc1] sm:$0xff] }
 0x2f9   : > { %v4707_v13 = vpop.permute.xlu0 %4706  ;;  %5209 = vrot.lane.b32.xlu1 %v11594_v15, %s12855_s14  ;;  %v15026_v23 = vpack.c.bf16 %v5611_v45, %v5611_v45 }
 0x2fa   : > { %4797 = vst.msk [vmem:[#allocation5 + $0x48] sm:$0xf] %vm4790_vm6, %v4707_v13  ;;  %v15028_v56 = vld [vmem:[#allocation4 + $0xaa] sm:$0xff] }
 0x2fb   : > { %5495 = vrot.lane.b32.xlu0 %v11625_v30, %s12856_s21  ;;  %v5478_v8 = vpop.permute.xlu1 %5477  ;;  %v5896_v32 = vsel %vm16317_vm13, %v15028_v56, 0.0  ;;  %v4843_v59 = vld [vmem:[#allocation4 + $0xb1] sm:$0xff]  ;;  %5005 = vst.msk [vmem:[#allocation5 + $0x10c] sm:$0xf] %vm16320_vm0, %v15026_v23  ;;  %vm16327_vm13 = vmmov %vm16320_vm0 }
 0x2fc   : > { %5566 = vst.msk [vmem:[#allocation5 + $0x58] sm:$0xf] %vm4501_vm1, %v5478_v8  ;;  %v3785_v33 = vld [vmem:[#allocation4 + $0xb0] sm:$0xff]  ;;  %v11690_v14 = vpack.c.bf16 %v5896_v32, %v5896_v32  ;;  %v5867_v47 = vld [vmem:[#allocation4 + $0xc2] sm:$0xff]  ;;  %v11565_v21 = vpack.c.bf16 %v4843_v59, %v4843_v59 }
 0x2fd   : > { %v5732_v39 = vpop.permute.xlu0 %5731  ;;  %4439 = vrot.lane.b32.xlu1 %v11498_v28, %s12856_s21  ;;  %v5612_v5 = vld [vmem:[#allocation4 + $0xc9] sm:$0xff]  ;;  %v15038_v10 = vpack.c.bf16 %v5867_v47, %v5867_v47  ;;  %v3817_v34 = vsel %vm16322_vm7, %v3785_v33, 0.0  ;;  %v4296_v47 = vsel %vm16324_vm12, %v14863_v52, 0.0  ;;  %v5609_v51 = vld [vmem:[#allocation4 + $0xb1] sm:$0xff] }
 0x2fe   : > { %5821 = vst.msk [vmem:[#allocation5 + $0x4c] sm:$0xf] %vm4790_vm6, %v5732_v39  ;;  %v5865_v7 = vld [vmem:[#allocation4 + $0xb2] sm:$0xff]  ;;  %v15042_v11 = vld [vmem:[#allocation4 + $0xba] sm:$0xff]  ;;  %v15046_v1 = vpack.c.bf16 %v5612_v5, %v5612_v5  ;;  %v3788_v22 = vld [vmem:[#allocation4 + $0xc8] sm:$0xff]  ;;  %v11439_v57 = vpack.c.bf16 %v3817_v34, %v3817_v34  ;;  %v11500_v5 = vpack.c.bf16 %v4296_v47, %v4296_v47 }
 0x2ff   : > { %4726 = vrot.lane.b32.xlu0 %v11529_v17, %s12857_s28  ;;  %6056 = vst.msk [vmem:[#allocation5 + $0xd4] sm:$0xf] %vm16321_vm10, %v11690_v14  ;;  %v4709_v19 = vpop.permute.xlu1 %4708  ;;  %v5898_v46 = vsel %vm16324_vm12, %v15042_v11, 0.0  ;;  %v15055_v62 = vpack.c.bf16 %v5865_v7, %v5865_v7  ;;  %v5610_v37 = vld [vmem:[#allocation4 + $0xb9] sm:$0xff]  ;;  %vm16330_vm10 = vnez %v16069_v24  ;;  %v11442_v15 = vpack.c.bf16 %v3788_v22, %v3788_v22 }
 0x300   : > { %6059 = vst.msk [vmem:[#allocation5 + $0xf8] sm:$0xf] %vm16323_vm14, %v15038_v10  ;;  %v3786_v12 = vld [vmem:[#allocation4 + $0xb8] sm:$0xff]  ;;  %v11692_v6 = vpack.c.bf16 %v5898_v46, %v5898_v46  ;;  %v15061_v4 = vpack.c.bf16 %v5610_v37, %v5610_v37  ;;  %v3787_v9 = vld [vmem:[#allocation4 + $0xc0] sm:$0xff]  ;;  %vm16331_vm14 = vmmov %vm16320_vm0  ;;  %v5066_v17 = vsel %vm16324_vm12, %v15028_v56, 0.0 }
 0x301   : > { %4798 = vst.msk [vmem:[#allocation5 + $0x54] sm:$0xf] %vm4790_vm6, %v4709_v19  ;;  %v4133_v20 = vpop.permute.xlu0 %4132  ;;  %5497 = vrot.lane.b32.xlu1 %v15044_v36, %s12856_s21  ;;  %v11440_v55 = vpack.c.bf16 %v3786_v12, %v3786_v12  ;;  %v3819_v29 = vsel %vm16330_vm10, %v3787_v9, 0.0  ;;  %v11596_v59 = vpack.c.bf16 %v5066_v17, %v5066_v17  ;;  %v15143_v9 = vld [vmem:[#allocation4 + $0xc0] sm:$0xff] }
 0x302   : > { %4221 = vst.msk [vmem:[#allocation5 + $0x60] sm:$0xf] %vm16325_vm15, %v4133_v20  ;;  %v11441_v31 = vpack.c.bf16 %v3819_v29, %v3819_v29 }
 0x303   : > { %5003 = vst.msk [vmem:[#allocation5 + $0xf4] sm:$0xf] %vm16326_vm5, %v11565_v21  ;;  %5751 = vrot.lane.b32.xlu0 %v14839_v40, %s12857_s28  ;;  %v5734_v35 = vpop.permute.xlu1 %5733  ;;  %vm16332_vm5 = vmmov %vm16320_vm0  ;;  %v5322_v21 = vld [vmem:[#allocation4 + $0xb8] sm:$0xff] }
 0x304   : > { %5006 = vst.msk [vmem:[#allocation5 + $0x118] sm:$0xf] %vm16327_vm13, %v15046_v1  ;;  %vm16333_vm13 = vmmov %vm16320_vm0  ;;  %v15121_v34 = vpack.c.bf16 %v5322_v21, %v5322_v21 }
 0x305   : > { %6057 = vst.msk [vmem:[#allocation5 + $0xe0] sm:$0xf] %vm16328_vm4, %v15055_v62  ;;  %v5192_v27 = vpop.permute.xlu0 %5191  ;;  %4728 = vrot.lane.b32.xlu1 %v14975_v61, %s12857_s28  ;;  %vm16334_vm4 = vmmov %vm16320_vm0  ;;  %v15092_v61 = vld [vmem:[#allocation4 + $0xb0] sm:$0xff] }
 0x306   : > { %6058 = vst.msk [vmem:[#allocation5 + $0xec] sm:$0xf] %vm16329_vm9, %v11692_v6  ;;  %v12427_v13 = vld [vmem:[#allocation5 + $0xc8] ss:$12 sps:$4 sm:$0xff]   ;;  %vm16335_vm9 = vmmov %vm16325_vm15  ;;  %v4265_v6 = vld [vmem:[#allocation4 + $0xa2] sm:$0xff] }
 0x307   : > { %5004 = vst.msk [vmem:[#allocation5 + $0x100] sm:$0xf] %vm16320_vm0, %v15061_v4  ;;  %4152 = vrot.lane.b32.xlu0 %v14847_v50, %s12855_s14  ;;  %v4135_v30 = vpop.permute.xlu1 %4134  ;;  %vm16336_vm0 = vcmask 261120   ;;  %v6083_v45 = vld [vmem:[#allocation5 + $0x48] sm:$0xff] }
 0x308   : > { %5822 = vst.msk [vmem:[#allocation5 + $0x58] sm:$0xf] %vm4790_vm6, %v5734_v35  ;;  %12274 = vmatprep.mubr.msk.bf16.mxu0 %vm16336_vm0, %v12427_v13 }
 0x309   : > { %3978 = vst.msk [vmem:[#allocation5 + $0x108] sm:$0xf] %vm16331_vm14, %v11439_v57  ;;  %v4422_v44 = vpop.permute.xlu0 %4421  ;;  %5753 = vrot.lane.b32.xlu1 %v14865_v25, %s12857_s28  ;;  %vm16337_vm14 = vmmov %vm16335_vm9 }
 0x30a   : > { %5279 = vst.msk [vmem:[#allocation5 + $0x64] sm:$0xf] %vm16325_vm15, %v5192_v27  ;;  %vm16338_vm15 = vmmov %vm16336_vm0 }
 0x30b   : > { %3979 = vst.msk [vmem:[#allocation5 + $0x114] sm:$0xf] %vm16332_vm5, %v11440_v55  ;;  %5211 = vrot.lane.b32.xlu0 %v14855_v53, %s12855_s14  ;;  %v5194_v3 = vpop.permute.xlu1 %5193  ;;  %v5353_v53 = vsel %vm16293_vm3, %v15092_v61, 0.0  ;;  %v11501_v55 = vpack.c.bf16 %v4265_v6, %v4265_v6 }
 0x30c   : > { %3980 = vst.msk [vmem:[#allocation5 + $0x120] sm:$0xf] %vm16333_vm13, %v11441_v31  ;;  %v11627_v14 = vpack.c.bf16 %v5353_v53, %v5353_v53  ;;  %v5355_v31 = vsel %vm16300_vm8, %v15143_v9, 0.0 }
 0x30d   : > { %3981 = vst.msk [vmem:[#allocation5 + $0x12c] sm:$0xf] %vm16334_vm4, %v11442_v15  ;;  %v12428_v50 = vld [vmem:[#allocation5 + $0xe0] ss:$12 sps:$4 sm:$0xff]   ;;  %v5480_v32 = vpop.permute.xlu0 %5479  ;;  %4154 = vrot.lane.b32.xlu1 %v14880_v2, %s12855_s14  ;;  %v4584_v2 = vsel %vm16293_vm3, %v14999_v48, 0.0  ;;  %v15124_v48 = vpack.c.bf16 %v5609_v51, %v5609_v51  ;;  %vm16339_vm3 = vmmov %vm16335_vm9  ;;  %vm16343_vm4 = vnez %v16042_v16 }
 0x30e   : > { %4222 = vst.msk [vmem:[#allocation5 + $0x6c] sm:$0xf] %vm16335_vm9, %v4135_v30  ;;  %12275 = vmatmul.mubr.msk.bf16.gmra.mxu0 %vm16338_vm15, %v12428_v50  ;;  %v11531_v19 = vpack.c.bf16 %v4584_v2, %v4584_v2  ;;  %vm16340_vm12 = vmmov %vm16339_vm3  ;;  %v5068_v27 = vsel %vm16343_vm4, %v15042_v11, 0.0  ;;  %v4298_v50 = vsel %vm16343_vm4, %v15028_v56, 0.0 }
 0x30f   : > { %4510 = vst.msk [vmem:[#allocation5 + $0x60] sm:$0xf] %vm4501_vm1, %v4422_v44  ;;  %v6085_v8 = vld [vmem:[#allocation5 + $0x54] sm:$0xff]  ;;  %5567 = vst.msk [vmem:[#allocation5 + $0x64] sm:$0xf] %vm4501_vm1, %v5480_v32  ;;  %4441 = vrot.lane.b32.xlu0 %v14874_v26, %s12856_s21  ;;  %v4424_v42 = vpop.permute.xlu1 %4423  ;;  %v11598_v13 = vpack.c.bf16 %v5068_v27, %v5068_v27  ;;  %v11629_v44 = vpack.c.bf16 %v5355_v31, %v5355_v31  ;;  %v5324_v32 = vld [vmem:[#allocation4 + $0xc8] sm:$0xff] }
 0x310   : > { %v12429_v28 = vld [vmem:[#allocation5 + $0x4c] ss:$12 sps:$4 sm:$0xff]   ;;  %5280 = vst.msk [vmem:[#allocation5 + $0x70] sm:$0xf] %vm16337_vm14, %v5194_v3  ;;  %v10768_v39 = vcombine.low %v6083_v45, %v6085_v8  ;;  %vm16341_vm5 = vmmov %vm16339_vm3  ;;  %v11502_v45 = vpack.c.bf16 %v4298_v50, %v4298_v50  ;;  %v15176_v53 = vpack.c.bf16 %v5324_v32, %v5324_v32 }
 0x311   : > { %6630 = vmatprep.mubr.bf16.mxu1 %v12429_v28  ;;  %4511 = vst.msk [vmem:[#allocation5 + $0x6c] sm:$0xf] %vm4501_vm1, %v4424_v42  ;;  %v4711_v33 = vpop.permute.xlu0 %4710  ;;  %5213 = vrot.lane.b32.xlu1 %v11596_v59, %s12855_s14  ;;  %vm16342_vm13 = vmmov %vm16339_vm3 }
 0x312   : > { %6631 = vmatmul.mubr.bf16.gmra.mxu1 %v10768_v39  ;;  %4799 = vst.msk [vmem:[#allocation5 + $0x60] sm:$0xf] %vm4790_vm6, %v4711_v33  ;;  %v15172_v39 = vld [vmem:[%s15832_s2] ss:$0 sm:$0xff]  ;;  %vm16345_vm9 = vmmov %vm16336_vm0 }
 0x313   : > { %5499 = vrot.lane.b32.xlu0 %v11627_v14, %s12856_s21  ;;  %v5482_v26 = vpop.permute.xlu1 %5481  ;;  %vm16346_vm14 = vmmov %vm16339_vm3 }
 0x314   : > { %5568 = vst.msk [vmem:[#allocation5 + $0x70] sm:$0xf] %vm4501_vm1, %v5482_v26  ;;  %vm16347_vm15 = vmmov %vm16336_vm0 }
 0x315   : > { %v5736_v7 = vpop.permute.xlu0 %5735  ;;  %4443 = vrot.lane.b32.xlu1 %v11500_v5, %s12856_s21 }
 0x316   : > { %5823 = vst.msk [vmem:[#allocation5 + $0x64] sm:$0xf] %vm4790_vm6, %v5736_v7 }
 0x317   : > { %4730 = vrot.lane.b32.xlu0 %v11531_v19, %s12857_s28  ;;  %v4713_v52 = vpop.permute.xlu1 %4712 }
 0x318   : > { %4800 = vst.msk [vmem:[#allocation5 + $0x6c] sm:$0xf] %vm4790_vm6, %v4713_v52 }
 0x319   : > { %v4137_v54 = vpop.permute.xlu0 %4136  ;;  %5501 = vrot.lane.b32.xlu1 %v15121_v34, %s12856_s21 }
 0x31a   : > { %4223 = vst.msk [vmem:[#allocation5 + $0x78] sm:$0xf] %vm16339_vm3, %v4137_v54 }
 0x31b   : > { %5755 = vrot.lane.b32.xlu0 %v15124_v48, %s12857_s28  ;;  %v5738_v46 = vpop.permute.xlu1 %5737 }
 0x31c   : > { %5824 = vst.msk [vmem:[#allocation5 + $0x70] sm:$0xf] %vm4790_vm6, %v5738_v46 }
 0x31d   : > { %v5196_v20 = vpop.permute.xlu0 %5195  ;;  %4732 = vrot.lane.b32.xlu1 %v15044_v36, %s12857_s28  ;;  %v6087_v36 = vld [vmem:[#allocation5 + $0x60] sm:$0xff] }
 0x31e   : > { %5281 = vst.msk [vmem:[#allocation5 + $0x7c] sm:$0xf] %vm16340_vm12, %v5196_v20  ;;  %vm16349_vm12 = vmmov %vm16341_vm5 }
 0x31f   : > { %4156 = vrot.lane.b32.xlu0 %v14839_v40, %s12855_s14  ;;  %v4139_v37 = vpop.permute.xlu1 %4138 }
 0x320   : > { %4224 = vst.msk [vmem:[#allocation5 + $0x84] sm:$0xf] %vm16341_vm5, %v4139_v37 }
 0x321   : > { %v4426_v12 = vpop.permute.xlu0 %4425  ;;  %5757 = vrot.lane.b32.xlu1 %v15061_v4, %s12857_s28 }
 0x322   : > { %4512 = vst.msk [vmem:[#allocation5 + $0x78] sm:$0xf] %vm4501_vm1, %v4426_v12 }
 0x323   : > { %5215 = vrot.lane.b32.xlu0 %v15055_v62, %s12855_s14  ;;  %v5198_v22 = vpop.permute.xlu1 %5197  ;;  %v6089_v57 = vld [vmem:[#allocation5 + $0x6c] sm:$0xff] }
 0x324   : > { %v12431_v35 = vld [vmem:[#allocation5 + $0x64] ss:$12 sps:$4 sm:$0xff]   ;;  %5282 = vst.msk [vmem:[#allocation5 + $0x88] sm:$0xf] %vm16342_vm13, %v5198_v22  ;;  %v10771_v29 = vcombine.low %v6087_v36, %v6089_v57  ;;  %vm16350_vm13 = vnez %v16046_v43 }
 0x325   : > { %v5484_v40 = vpop.permute.xlu0 %5483  ;;  %4158 = vrot.lane.b32.xlu1 %v14865_v25, %s12855_s14  ;;  %6638 = vmatprep.mubr.bf16.mxu1 %v12431_v35  ;;  %v4586_v25 = vsel %vm16300_vm8, %v15092_v61, 0.0  ;;  %vm16344_vm8 = vmmov %vm16339_vm3 }
 0x326   : > { %5569 = vst.msk [vmem:[#allocation5 + $0x7c] sm:$0xf] %vm4501_vm1, %v5484_v40  ;;  %6639 = vmatmul.mubr.bf16.gmra.mxu1 %v10771_v29  ;;  %v11533_v28 = vpack.c.bf16 %v4586_v25, %v4586_v25  ;;  %vm16348_vm3 = vmmov %vm16336_vm0 }
 0x327   : > { %4445 = vrot.lane.b32.xlu0 %v11501_v55, %s12856_s21  ;;  %v4428_v15 = vpop.permute.xlu1 %4427 }
 0x328   : > { %4513 = vst.msk [vmem:[#allocation5 + $0x84] sm:$0xf] %vm4501_vm1, %v4428_v15 }
 0x329   : > { %v4715_v30 = vpop.permute.xlu0 %4714  ;;  %5217 = vrot.lane.b32.xlu1 %v11598_v13, %s12855_s14 }
 0x32a   : > { %4801 = vst.msk [vmem:[#allocation5 + $0x78] sm:$0xf] %vm4790_vm6, %v4715_v30 }
 0x32b   : > { %5503 = vrot.lane.b32.xlu0 %v11629_v44, %s12856_s21  ;;  %v5486_v3 = vpop.permute.xlu1 %5485 }
 0x32c   : > { %5570 = vst.msk [vmem:[#allocation5 + $0x88] sm:$0xf] %vm4501_vm1, %v5486_v3  ;;  %v12248_v56 = vpop.f32.mrf.mxu0 }
 0x32d   : > { %v5740_v8 = vpop.permute.xlu0 %5739  ;;  %4447 = vrot.lane.b32.xlu1 %v11502_v45, %s12856_s21  ;;  %v3669_v0 = vadd.f32 %v15172_v39, %v12248_v56  ;;  %v4300_v56 = vsel %vm16350_vm13, %v15042_v11, 0.0 }
 0x32e   : > { %5825 = vst.msk [vmem:[#allocation5 + $0x7c] sm:$0xf] %vm4790_vm6, %v5740_v8  ;;  %v3660_v17 = vpop.f32.mrf.mxu0 }
 0x32f   : > { %4734 = vrot.lane.b32.xlu0 %v11533_v28, %s12857_s28  ;;  %v4717_v61 = vpop.permute.xlu1 %4716  ;;  %v3717_v42 = vmax.f32 %v3669_v0, 0.0  ;;  %v3661_v59 = vadd.f32 %v15172_v39, %v3660_v17 }
 0x330   : > { %4802 = vst.msk [vmem:[#allocation5 + $0x84] sm:$0xf] %vm4790_vm6, %v4717_v61  ;;  %v12249_v14 = vpop.f32.mrf.mxu0 }
 0x331   : > { %v4141_v33 = vpop.permute.xlu0 %4140  ;;  %5505 = vrot.lane.b32.xlu1 %v15176_v53, %s12856_s21  ;;  %3750 = vst.msk [vmem:[#allocation4 + $0xe1] sm:$0xff] %vm16345_vm9, %v3717_v42  ;;  %v3715_v47 = vmax.f32 %v3661_v59, 0.0  ;;  %v3672_v2 = vadd.f32 %v15172_v39, %v12249_v14  ;;  %v4588_v42 = vsel %vm16322_vm7, %v15143_v9, 0.0 }
 0x332   : > { %4225 = vst.msk [vmem:[#allocation5 + $0x90] sm:$0xf] %vm16344_vm8, %v4141_v33  ;;  %v3663_v5 = vpop.f32.mrf.mxu0  ;;  %vm16351_vm8 = vcmask 257024  }
 0x333   : > { %5759 = vrot.lane.b32.xlu0 %v15026_v23, %s12857_s28  ;;  %v5742_v26 = vpop.permute.xlu1 %5741  ;;  %3748 = vst.msk [vmem:[#allocation4 + $0xd1] sm:$0xff] %vm16336_vm0, %v3715_v47  ;;  %v3718_v7 = vmax.f32 %v3672_v2, 0.0  ;;  %v3664_v19 = vadd.f32 %v15172_v39, %v3663_v5  ;;  %vm16354_vm0 = vnez %v16073_v63  ;;  %v11504_v47 = vpack.c.bf16 %v4300_v56, %v4300_v56 }
 0x334   : > { %5826 = vst.msk [vmem:[#allocation5 + $0x88] sm:$0xf] %vm4790_vm6, %v5742_v26  ;;  %v11535_v26 = vpack.c.bf16 %v4588_v42, %v4588_v42 }
 0x335   : > { %v5200_v21 = vpop.permute.xlu0 %5199  ;;  %4736 = vrot.lane.b32.xlu1 %v15121_v34, %s12857_s28  ;;  %3751 = vst.msk [vmem:[#allocation4 + $0xe9] sm:$0xff] %vm16347_vm15, %v3718_v7  ;;  %v3716_v51 = vmax.f32 %v3664_v19, 0.0  ;;  %v6091_v34 = vld [vmem:[#allocation5 + $0x78] sm:$0xff] }
 0x336   : > { %5283 = vst.msk [vmem:[#allocation5 + $0x94] sm:$0xf] %vm16346_vm14, %v5200_v21 }
 0x337   : > { %4160 = vrot.lane.b32.xlu0 %v15124_v48, %s12855_s14  ;;  %v4143_v52 = vpop.permute.xlu1 %4142  ;;  %3749 = vst.msk [vmem:[#allocation4 + $0xd9] sm:$0xff] %vm16348_vm3, %v3716_v51 }
 0x338   : > { %4226 = vst.msk [vmem:[#allocation5 + $0x9c] sm:$0xf] %vm16349_vm12, %v4143_v52  ;;  %v5615_v46 = vld [vmem:[#allocation4 + $0xe1] sm:$0xff] }
 0x339   : > { %v4430_v54 = vpop.permute.xlu0 %4429  ;;  %5761 = vrot.lane.b32.xlu1 %v15046_v1, %s12857_s28  ;;  %v15203_v20 = vpack.c.bf16 %v5615_v46, %v5615_v46 }
 0x33a   : > { %4514 = vst.msk [vmem:[#allocation5 + $0x90] sm:$0xf] %vm4501_vm1, %v4430_v54  ;;  %v15205_v37 = vld [vmem:[#allocation4 + $0xca] sm:$0xff] }
 0x33b   : > { %5219 = vrot.lane.b32.xlu0 %v15038_v10, %s12855_s14  ;;  %v5202_v48 = vpop.permute.xlu1 %5201  ;;  %v6093_v12 = vld [vmem:[#allocation5 + $0x84] sm:$0xff]  ;;  %v5900_v22 = vsel %vm16343_vm4, %v15205_v37, 0.0  ;;  %v5070_v35 = vsel %vm16350_vm13, %v15205_v37, 0.0  ;;  %5009 = vst.msk [vmem:[#allocation5 + $0x13c] sm:$0xf] %vm16351_vm8, %v15203_v20  ;;  %vm16352_vm4 = vmmov %vm16351_vm8 }
 0x33c   : > { %v12433_v6 = vld [vmem:[#allocation5 + $0x7c] ss:$12 sps:$4 sm:$0xff]   ;;  %5284 = vst.msk [vmem:[#allocation5 + $0xa0] sm:$0xf] %vm16341_vm5, %v5202_v48  ;;  %v10774_v57 = vcombine.low %v6091_v34, %v6093_v12  ;;  %v11694_v27 = vpack.c.bf16 %v5900_v22, %v5900_v22  ;;  %v11600_v25 = vpack.c.bf16 %v5070_v35, %v5070_v35  ;;  %vm16353_vm9 = vmmov %vm16352_vm4  ;;  %v3792_v14 = vld [vmem:[#allocation4 + $0xe8] sm:$0xff] }
 0x33d   : > { %v5488_v36 = vpop.permute.xlu0 %5487  ;;  %v15214_v40 = vld [vmem:[#allocation4 + $0xd0] sm:$0xff]  ;;  %v5871_v31 = vld [vmem:[#allocation4 + $0xe2] sm:$0xff]  ;;  %4162 = vrot.lane.b32.xlu1 %v15061_v4, %s12855_s14  ;;  %6646 = vmatprep.mubr.bf16.mxu1 %v12433_v6  ;;  %vm16355_vm14 = vmmov %vm16352_vm4  ;;  %v11446_v19 = vpack.c.bf16 %v3792_v14, %v3792_v14 }
 0x33e   : > { %v5613_v55 = vld [vmem:[#allocation4 + $0xd1] sm:$0xff]  ;;  %5571 = vst.msk [vmem:[#allocation5 + $0x94] sm:$0xf] %vm4501_vm1, %v5488_v36  ;;  %v5357_v16 = vsel %vm16322_vm7, %v15214_v40, 0.0  ;;  %v5616_v13 = vld [vmem:[#allocation4 + $0xe9] sm:$0xff]  ;;  %v15226_v30 = vpack.c.bf16 %v5871_v31, %v5871_v31  ;;  %6647 = vmatmul.mubr.bf16.gmra.mxu1 %v10774_v57  ;;  %v15231_v50 = vld [vmem:[#allocation4 + $0xda] sm:$0xff] }
 0x33f   : > { %v3789_v29 = vld [vmem:[#allocation4 + $0xd0] sm:$0xff]  ;;  %v15224_v15 = vpack.c.bf16 %v5613_v55, %v5613_v55  ;;  %4449 = vrot.lane.b32.xlu0 %v15055_v62, %s12856_s21  ;;  %6060 = vst.msk [vmem:[#allocation5 + $0x104] sm:$0xf] %vm16352_vm4, %v11694_v27  ;;  %v4432_v4 = vpop.permute.xlu1 %4431  ;;  %v15233_v3 = vpack.c.bf16 %v5616_v13, %v5616_v13  ;;  %v5902_v62 = vsel %vm16350_vm13, %v15231_v50, 0.0  ;;  %v11631_v32 = vpack.c.bf16 %v5357_v16, %v5357_v16  ;;  %v5614_v0 = vld [vmem:[#allocation4 + $0xd9] sm:$0xff]  ;;  %vm16356_vm15 = vmmov %vm16352_vm4 }
 0x340   : > { %v5869_v44 = vld [vmem:[#allocation4 + $0xd2] sm:$0xff]  ;;  %v3821_v45 = vsel %vm16354_vm0, %v3789_v29, 0.0  ;;  %6063 = vst.msk [vmem:[#allocation5 + $0x128] sm:$0xf] %vm16355_vm14, %v15226_v30  ;;  %v11696_v17 = vpack.c.bf16 %v5902_v62, %v5902_v62  ;;  %v15255_v59 = vpack.c.bf16 %v5614_v0, %v5614_v0  ;;  %v3791_v33 = vld [vmem:[#allocation4 + $0xe0] sm:$0xff]  ;;  %vm16357_vm3 = vmmov %vm16352_vm4  ;;  %vm16365_vm14 = vcmask 519424  }
 0x341   : > { %5007 = vst.msk [vmem:[#allocation5 + $0x124] sm:$0xf] %vm16353_vm9, %v15224_v15  ;;  %v15244_v8 = vpack.c.bf16 %v5869_v44, %v5869_v44  ;;  %v4719_v28 = vpop.permute.xlu0 %4718  ;;  %v3790_v61 = vld [vmem:[#allocation4 + $0xd8] sm:$0xff]  ;;  %5221 = vrot.lane.b32.xlu1 %v11600_v25, %s12855_s14  ;;  %v11443_v43 = vpack.c.bf16 %v3821_v45, %v3821_v45  ;;  %vm16358_vm12 = vmmov %vm16357_vm3  ;;  %v3823_v9 = vsel %vm14171_vm2, %v3791_v33, 0.0  ;;  %vm16364_vm9 = vcmask 261120   ;;  %v15297_v22 = vld [vmem:[#allocation4 + $0xe0] sm:$0xff] }
 0x342   : > { %4515 = vst.msk [vmem:[#allocation5 + $0x9c] sm:$0xf] %vm4501_vm1, %v4432_v4  ;;  %vm16359_vm5 = vmmov %vm16357_vm3  ;;  %v11444_v41 = vpack.c.bf16 %v3790_v61, %v3790_v61  ;;  %v5326_v5 = vld [vmem:[#allocation4 + $0xd8] sm:$0xff]  ;;  %v11445_v7 = vpack.c.bf16 %v3823_v9, %v3823_v9  ;;  %v5359_v27 = vsel %vm16330_vm10, %v15297_v22, 0.0 }
 0x343   : > { %4803 = vst.msk [vmem:[#allocation5 + $0x90] sm:$0xf] %vm4790_vm6, %v4719_v28  ;;  %5507 = vrot.lane.b32.xlu0 %v11631_v32, %s12856_s21  ;;  %v5490_v11 = vpop.permute.xlu1 %5489  ;;  %vm16360_vm7 = vmmov %vm16357_vm3  ;;  %v15275_v52 = vpack.c.bf16 %v5326_v5, %v5326_v5  ;;  %v11633_v44 = vpack.c.bf16 %v5359_v27, %v5359_v27  ;;  %v5328_v28 = vld [vmem:[#allocation4 + $0xe8] sm:$0xff] }
 0x344   : > { %5010 = vst.msk [vmem:[#allocation5 + $0x148] sm:$0xf] %vm16356_vm15, %v15233_v3  ;;  %vm16361_vm13 = vmmov %vm16357_vm3  ;;  %v15325_v32 = vpack.c.bf16 %v5328_v28, %v5328_v28 }
 0x345   : > { %6061 = vst.msk [vmem:[#allocation5 + $0x110] sm:$0xf] %vm16357_vm3, %v15244_v8  ;;  %v5744_v2 = vpop.permute.xlu0 %5743  ;;  %4451 = vrot.lane.b32.xlu1 %v11504_v47, %s12856_s21  ;;  %vm16362_vm8 = vmmov %vm16357_vm3 }
 0x346   : > { %6062 = vst.msk [vmem:[#allocation5 + $0x11c] sm:$0xf] %vm16358_vm12, %v11696_v17  ;;  %v12435_v21 = vld [vmem:[#allocation5 + $0xf8] ss:$12 sps:$4 sm:$0xff]   ;;  %vm16363_vm4 = vmmov %vm16357_vm3 }
 0x347   : > { %5008 = vst.msk [vmem:[#allocation5 + $0x130] sm:$0xf] %vm16359_vm5, %v15255_v59  ;;  %4738 = vrot.lane.b32.xlu0 %v11535_v26, %s12857_s28  ;;  %v4721_v51 = vpop.permute.xlu1 %4720  ;;  %12278 = vmatprep.mubr.msk.bf16.mxu0 %vm16364_vm9, %v12435_v21  ;;  %vm16366_vm15 = vmmov %vm16364_vm9 }
 0x348   : > { %5572 = vst.msk [vmem:[#allocation5 + $0xa0] sm:$0xf] %vm4501_vm1, %v5490_v11  ;;  %vm16367_vm3 = vmmov %vm16365_vm14 }
 0x349   : > { %3982 = vst.msk [vmem:[#allocation5 + $0x138] sm:$0xf] %vm16360_vm7, %v11443_v43  ;;  %v4145_v54 = vpop.permute.xlu0 %4144  ;;  %5509 = vrot.lane.b32.xlu1 %v15275_v52, %s12856_s21  ;;  %vm16368_vm12 = vmmov %vm16367_vm3  ;;  %vm16370_vm7 = vnez %v16089_v38 }
 0x34a   : > { %5827 = vst.msk [vmem:[#allocation5 + $0x94] sm:$0xf] %vm4790_vm6, %v5744_v2  ;;  %4804 = vst.msk [vmem:[#allocation5 + $0x9c] sm:$0xf] %vm4790_vm6, %v4721_v51  ;;  %v5072_v29 = vsel %vm16370_vm7, %v15231_v50, 0.0  ;;  %v4302_v4 = vsel %vm16370_vm7, %v15205_v37, 0.0 }
 0x34b   : > { %3983 = vst.msk [vmem:[#allocation5 + $0x144] sm:$0xf] %vm16361_vm13, %v11444_v41  ;;  %5763 = vrot.lane.b32.xlu0 %v15224_v15, %s12857_s28  ;;  %v5746_v34 = vpop.permute.xlu1 %5745  ;;  %vm16369_vm5 = vmmov %vm16367_vm3  ;;  %v11602_v16 = vpack.c.bf16 %v5072_v29, %v5072_v29  ;;  %v11506_v25 = vpack.c.bf16 %v4302_v4, %v4302_v4 }
 0x34c   : > { %3984 = vst.msk [vmem:[#allocation5 + $0x150] sm:$0xf] %vm16362_vm8, %v11445_v7  ;;  %vm16372_vm13 = vmmov %vm16367_vm3 }
 0x34d   : > { %3985 = vst.msk [vmem:[#allocation5 + $0x15c] sm:$0xf] %vm16363_vm4, %v11446_v19  ;;  %v12436_v46 = vld [vmem:[#allocation5 + $0x110] ss:$12 sps:$4 sm:$0xff]   ;;  %v5204_v48 = vpop.permute.xlu0 %5203  ;;  %4740 = vrot.lane.b32.xlu1 %v15176_v53, %s12857_s28  ;;  %vm16373_vm8 = vmmov %vm16367_vm3 }
 0x34e   : > { %4227 = vst.msk [vmem:[#allocation5 + $0xa8] sm:$0xf] %vm16365_vm14, %v4145_v54  ;;  %12279 = vmatmul.mubr.msk.bf16.gmra.mxu0 %vm16366_vm15, %v12436_v46  ;;  %vm16374_vm4 = vmmov %vm16367_vm3 }
 0x34f   : > { %5828 = vst.msk [vmem:[#allocation5 + $0xa0] sm:$0xf] %vm4790_vm6, %v5746_v34  ;;  %4164 = vrot.lane.b32.xlu0 %v15026_v23, %s12855_s14  ;;  %v4147_v12 = vpop.permute.xlu1 %4146  ;;  %vm16375_vm14 = vmmov %vm16364_vm9 }
 0x350   : > { %5285 = vst.msk [vmem:[#allocation5 + $0xac] sm:$0xf] %vm16367_vm3, %v5204_v48  ;;  %vm16376_vm15 = vmmov %vm16364_vm9 }
 0x351   : > { %4228 = vst.msk [vmem:[#allocation5 + $0xb4] sm:$0xf] %vm16368_vm12, %v4147_v12  ;;  %v4434_v6 = vpop.permute.xlu0 %4433  ;;  %5765 = vrot.lane.b32.xlu1 %v15255_v59, %s12857_s28  ;;  %v6095_v57 = vld [vmem:[#allocation5 + $0x90] sm:$0xff]  ;;  %vm16378_vm12 = vmmov %vm16374_vm4 }
 0x352   : > { %4516 = vst.msk [vmem:[#allocation5 + $0xa8] sm:$0xf] %vm4501_vm1, %v4434_v6 }
 0x353   : > { %5223 = vrot.lane.b32.xlu0 %v15244_v8, %s12855_s14  ;;  %v5206_v36 = vpop.permute.xlu1 %5205 }
 0x354   : > { %5286 = vst.msk [vmem:[#allocation5 + $0xb8] sm:$0xf] %vm16369_vm5, %v5206_v36 }
 0x355   : > { %v5492_v23 = vpop.permute.xlu0 %5491  ;;  %4166 = vrot.lane.b32.xlu1 %v15046_v1, %s12855_s14  ;;  %v4590_v1 = vsel %vm16330_vm10, %v15214_v40, 0.0  ;;  %vm16371_vm10 = vmmov %vm16367_vm3 }
 0x356   : > { %v6097_v53 = vld [vmem:[#allocation5 + $0x9c] sm:$0xff]  ;;  %5573 = vst.msk [vmem:[#allocation5 + $0xac] sm:$0xf] %vm4501_vm1, %v5492_v23  ;;  %v11537_v62 = vpack.c.bf16 %v4590_v1, %v4590_v1  ;;  %vm16377_vm3 = vmmov %vm16364_vm9 }
 0x357   : > { %v12437_v35 = vld [vmem:[#allocation5 + $0x94] ss:$12 sps:$4 sm:$0xff]   ;;  %v10777_v55 = vcombine.low %v6095_v57, %v6097_v53  ;;  %4453 = vrot.lane.b32.xlu0 %v15038_v10, %s12856_s21  ;;  %v4436_v31 = vpop.permute.xlu1 %4435 }
 0x358   : > { %6654 = vmatprep.mubr.bf16.mxu1 %v12437_v35  ;;  %4517 = vst.msk [vmem:[#allocation5 + $0xb4] sm:$0xf] %vm4501_vm1, %v4436_v31 }
 0x359   : > { %6655 = vmatmul.mubr.bf16.gmra.mxu1 %v10777_v55  ;;  %v4723_v13 = vpop.permute.xlu0 %4722  ;;  %5225 = vrot.lane.b32.xlu1 %v11602_v16, %s12855_s14  ;;  %v16379_v55 = vld [vmem:[#allocation14_spill] sm:$0xff] }
 0x35a   : > { %4805 = vst.msk [vmem:[#allocation5 + $0xa8] sm:$0xf] %vm4790_vm6, %v4723_v13  ;;  %vm16380_vm5 = vnez %v16379_v55 }
 0x35b   : > { %5511 = vrot.lane.b32.xlu0 %v11633_v44, %s12856_s21  ;;  %v5494_v10 = vpop.permute.xlu1 %5493 }
 0x35c   : > { %5574 = vst.msk [vmem:[#allocation5 + $0xb8] sm:$0xf] %vm4501_vm1, %v5494_v10 }
 0x35d   : > { %v5748_v45 = vpop.permute.xlu0 %5747  ;;  %4455 = vrot.lane.b32.xlu1 %v11506_v25, %s12856_s21  ;;  %v4304_v25 = vsel %vm16380_vm5, %v15231_v50, 0.0 }
 0x35e   : > { %5829 = vst.msk [vmem:[#allocation5 + $0xac] sm:$0xf] %vm4790_vm6, %v5748_v45  ;;  %v4592_v45 = vsel %vm16354_vm0, %v15297_v22, 0.0 }
 0x35f   : > { %4742 = vrot.lane.b32.xlu0 %v11537_v62, %s12857_s28  ;;  %v4725_v37 = vpop.permute.xlu1 %4724 }
 0x360   : > { %4806 = vst.msk [vmem:[#allocation5 + $0xb4] sm:$0xf] %vm4790_vm6, %v4725_v37 }
 0x361   : > { %v4149_v24 = vpop.permute.xlu0 %4148  ;;  %5513 = vrot.lane.b32.xlu1 %v15325_v32, %s12856_s21 }
 0x362   : > { %4229 = vst.msk [vmem:[#allocation5 + $0xc0] sm:$0xf] %vm16371_vm10, %v4149_v24  ;;  %vm16381_vm10 = vcmask 257024  }
 0x363   : > { %5767 = vrot.lane.b32.xlu0 %v15203_v20, %s12857_s28  ;;  %v5750_v40 = vpop.permute.xlu1 %5749 }
 0x364   : > { %5830 = vst.msk [vmem:[#allocation5 + $0xb8] sm:$0xf] %vm4790_vm6, %v5750_v40 }
 0x365   : > { %v5208_v56 = vpop.permute.xlu0 %5207  ;;  %4744 = vrot.lane.b32.xlu1 %v15275_v52, %s12857_s28  ;;  %v6099_v42 = vld [vmem:[#allocation5 + $0xa8] sm:$0xff] }
 0x366   : > { %5287 = vst.msk [vmem:[#allocation5 + $0xc4] sm:$0xf] %vm16372_vm13, %v5208_v56  ;;  %vm16383_vm13 = vmmov %vm16381_vm10 }
 0x367   : > { %4168 = vrot.lane.b32.xlu0 %v15224_v15, %s12855_s14  ;;  %v4151_v0 = vpop.permute.xlu1 %4150 }
 0x368   : > { %4230 = vst.msk [vmem:[#allocation5 + $0xcc] sm:$0xf] %vm16373_vm8, %v4151_v0  ;;  %vm16384_vm8 = vmmov %vm16381_vm10 }
 0x369   : > { %v4438_v61 = vpop.permute.xlu0 %4437  ;;  %5769 = vrot.lane.b32.xlu1 %v15233_v3, %s12857_s28 }
 0x36a   : > { %4518 = vst.msk [vmem:[#allocation5 + $0xc0] sm:$0xf] %vm4501_vm1, %v4438_v61 }
 0x36b   : > { %5227 = vrot.lane.b32.xlu0 %v15226_v30, %s12855_s14  ;;  %v5210_v17 = vpop.permute.xlu1 %5209  ;;  %v6101_v33 = vld [vmem:[#allocation5 + $0xb4] sm:$0xff] }
 0x36c   : > { %v12439_v14 = vld [vmem:[#allocation5 + $0xac] ss:$12 sps:$4 sm:$0xff]   ;;  %5288 = vst.msk [vmem:[#allocation5 + $0xd0] sm:$0xf] %vm16374_vm4, %v5210_v17  ;;  %v10780_v15 = vcombine.low %v6099_v42, %v6101_v33  ;;  %v12252_v11 = vpop.f32.mrf.mxu0  ;;  %v11508_v42 = vpack.c.bf16 %v4304_v25, %v4304_v25  ;;  %v11539_v33 = vpack.c.bf16 %v4592_v45, %v4592_v45 }
 0x36d   : > { %v5496_v43 = vpop.permute.xlu0 %5495  ;;  %4170 = vrot.lane.b32.xlu1 %v15255_v59, %s12855_s14  ;;  %6662 = vmatprep.mubr.bf16.mxu1 %v12439_v14  ;;  %v3685_v47 = vadd.f32 %v15172_v39, %v12252_v11 }
 0x36e   : > { %5575 = vst.msk [vmem:[#allocation5 + $0xc4] sm:$0xf] %vm4501_vm1, %v5496_v43  ;;  %6663 = vmatmul.mubr.bf16.gmra.mxu1 %v10780_v15  ;;  %v3676_v9 = vpop.f32.mrf.mxu0 }
 0x36f   : > { %4457 = vrot.lane.b32.xlu0 %v15244_v8, %s12856_s21  ;;  %v4440_v41 = vpop.permute.xlu1 %4439  ;;  %v3721_v2 = vmax.f32 %v3685_v47, 0.0  ;;  %v3677_v26 = vadd.f32 %v15172_v39, %v3676_v9 }
 0x370   : > { %4519 = vst.msk [vmem:[#allocation5 + $0xcc] sm:$0xf] %vm4501_vm1, %v4440_v41  ;;  %v12253_v7 = vpop.f32.mrf.mxu0 }
 0x371   : > { %v4727_v5 = vpop.permute.xlu0 %4726  ;;  %3754 = vst.msk [vmem:[#allocation4 + $0x101] sm:$0xff] %vm16364_vm9, %v3721_v2  ;;  %v3719_v59 = vmax.f32 %v3677_v26, 0.0  ;;  %v3688_v19 = vadd.f32 %v15172_v39, %v12253_v7 }
 0x372   : > { %4807 = vst.msk [vmem:[#allocation5 + $0xc0] sm:$0xf] %vm4790_vm6, %v4727_v5  ;;  %v3679_v51 = vpop.f32.mrf.mxu0 }
 0x373   : > { %v5498_v21 = vpop.permute.xlu1 %5497  ;;  %3752 = vst.msk [vmem:[#allocation4 + $0xf1] sm:$0xff] %vm16375_vm14, %v3719_v59  ;;  %v3722_v8 = vmax.f32 %v3688_v19, 0.0  ;;  %v3680_v52 = vadd.f32 %v15172_v39, %v3679_v51 }
 0x374   : > { %5576 = vst.msk [vmem:[#allocation5 + $0xd0] sm:$0xf] %vm4501_vm1, %v5498_v21  ;;  %v15437_v7 = vpop.f32.mrf.mxu0 }
 0x375   : > { %v5752_v54 = vpop.permute.xlu0 %5751  ;;  %3755 = vst.msk [vmem:[#allocation4 + $0x109] sm:$0xff] %vm16376_vm15, %v3722_v8  ;;  %v3720_v46 = vmax.f32 %v3680_v52, 0.0  ;;  %v15451_v52 = vld [vmem:[%s15834_s4] ss:$0 sm:$0xff] }
 0x376   : > { %5831 = vst.msk [vmem:[#allocation5 + $0xc4] sm:$0xf] %vm4790_vm6, %v5752_v54  ;;  %v6769_v8 = vpop.f32.mrf.mxu0 }
 0x377   : > { %v4729_v34 = vpop.permute.xlu1 %4728  ;;  %3753 = vst.msk [vmem:[#allocation4 + $0xf9] sm:$0xff] %vm16377_vm3, %v3720_v46 }
 0x378   : > { %4808 = vst.msk [vmem:[#allocation5 + $0xcc] sm:$0xf] %vm4790_vm6, %v4729_v34  ;;  %v5619_v12 = vld [vmem:[#allocation4 + $0x101] sm:$0xff] }
 0x379   : > { %v4153_v48 = vpop.permute.xlu0 %4152  ;;  %v15365_v6 = vpack.c.bf16 %v5619_v12, %v5619_v12 }
 0x37a   : > { %4231 = vst.msk [vmem:[#allocation5 + $0xd8] sm:$0xf] %vm16378_vm12, %v4153_v48  ;;  %v15367_v36 = vld [vmem:[#allocation4 + $0xea] sm:$0xff] }
 0x37b   : > { %v5754_v39 = vpop.permute.xlu1 %5753  ;;  %v15369_v57 = vld [vmem:[#allocation4 + $0xf0] sm:$0xff]  ;;  %v5904_v35 = vsel %vm16370_vm7, %v15367_v36, 0.0  ;;  %v5074_v29 = vsel %vm16380_vm5, %v15367_v36, 0.0  ;;  %5013 = vst.msk [vmem:[#allocation5 + $0x16c] sm:$0xf] %vm16381_vm10, %v15365_v6  ;;  %vm16382_vm7 = vmmov %vm16374_vm4 }
 0x37c   : > { %v5617_v53 = vld [vmem:[#allocation4 + $0xf1] sm:$0xff]  ;;  %5832 = vst.msk [vmem:[#allocation5 + $0xd0] sm:$0xf] %vm4790_vm6, %v5754_v39  ;;  %v5361_v27 = vsel %vm16354_vm0, %v15369_v57, 0.0  ;;  %v11698_v16 = vpack.c.bf16 %v5904_v35, %v5904_v35  ;;  %v5875_v13 = vld [vmem:[#allocation4 + $0x102] sm:$0xff]  ;;  %v11604_v44 = vpack.c.bf16 %v5074_v29, %v5074_v29  ;;  %vm16385_vm4 = vmmov %vm16384_vm8 }
 0x37d   : > { %v5212_v23 = vpop.permute.xlu0 %5211  ;;  %v15381_v31 = vpack.c.bf16 %v5617_v53, %v5617_v53  ;;  %v15385_v38 = vld [vmem:[#allocation4 + $0x10a] sm:$0xff]  ;;  %v11635_v4 = vpack.c.bf16 %v5361_v27, %v5361_v27  ;;  %v15391_v10 = vpack.c.bf16 %v5875_v13, %v5875_v13  ;;  %vm16386_vm0 = vmmov %vm16382_vm7 }
 0x37e   : > { %5289 = vst.msk [vmem:[#allocation5 + $0xdc] sm:$0xf] %vm16382_vm7, %v5212_v23  ;;  %v5908_v1 = vsel %vm14233_vm11, %v15385_v38, 0.0  ;;  %v5620_v62 = vld [vmem:[#allocation4 + $0x109] sm:$0xff]  ;;  %v5873_v37 = vld [vmem:[#allocation4 + $0xf2] sm:$0xff]  ;;  %v15402_v24 = vld [vmem:[#allocation4 + $0xfa] sm:$0xff]  ;;  %5229 = vrot.lane.b32.xlu1 %v11604_v44, %s12855_s14  ;;  %v15460_v23 = vpop.f32.mrf.mxu0 }
 0x37f   : > { %5011 = vst.msk [vmem:[#allocation5 + $0x154] sm:$0xf] %vm16383_vm13, %v15381_v31  ;;  %v11702_v28 = vpack.c.bf16 %v5908_v1, %v5908_v1  ;;  %v4155_v40 = vpop.permute.xlu1 %4154  ;;  %5515 = vrot.lane.b32.xlu0 %v11635_v4, %s12856_s21  ;;  %v5330_v50 = vld [vmem:[#allocation4 + $0xf8] sm:$0xff]  ;;  %v5906_v63 = vsel %vm16380_vm5, %v15402_v24, 0.0  ;;  %v15411_v22 = vpack.c.bf16 %v5873_v37, %v5873_v37  ;;  %vm16387_vm9 = vmmov %vm16385_vm4  ;;  %v15422_v43 = vpack.c.bf16 %v5620_v62, %v5620_v62  ;;  %v6103_v11 = vld [vmem:[#allocation5 + $0xc0] sm:$0xff] }
 0x380   : > { %6064 = vst.msk [vmem:[#allocation5 + $0x134] sm:$0xf] %vm16384_vm8, %v11698_v16  ;;  %v15414_v0 = vpack.c.bf16 %v5330_v50, %v5330_v50  ;;  %v5618_v61 = vld [vmem:[#allocation4 + $0xf9] sm:$0xff]  ;;  %v11700_v17 = vpack.c.bf16 %v5906_v63, %v5906_v63  ;;  %vm16388_vm14 = vmmov %vm16385_vm4  ;;  %vm16392_vm5 = vnez %v16128_v58  ;;  %vm16396_vm8 = vcmask 261120   ;;  %v6772_v4 = vpop.f32.mrf.mxu0 }
 0x381   : > { %6067 = vst.msk [vmem:[#allocation5 + $0x158] sm:$0xf] %vm16385_vm4, %v15391_v10  ;;  %v4442_v56 = vpop.permute.xlu0 %4441  ;;  %v15418_v14 = vpack.c.bf16 %v5618_v61, %v5618_v61  ;;  %vm16389_vm15 = vmmov %vm16385_vm4  ;;  %v3825_v9 = vsel %vm16392_vm5, %v15369_v57, 0.0  ;;  %v5076_v25 = vsel %vm14233_vm11, %v15402_v24, 0.0  ;;  %v4306_v63 = vsel %vm14233_vm11, %v15367_v36, 0.0 }
 0x382   : > { %4232 = vst.msk [vmem:[#allocation5 + $0xe4] sm:$0xf] %vm16386_vm0, %v4155_v40  ;;  %vm16390_vm3 = vmmov %vm16385_vm4  ;;  %4459 = vrot.lane.b32.xlu1 %v11508_v42, %s12856_s21  ;;  %v11447_v5 = vpack.c.bf16 %v3825_v9, %v3825_v9  ;;  %v11606_v40 = vpack.c.bf16 %v5076_v25, %v5076_v25  ;;  %v11510_v61 = vpack.c.bf16 %v4306_v63, %v4306_v63  ;;  %v5332_v42 = vld [vmem:[#allocation4 + $0x108] sm:$0xff]  ;;  %v15550_v58 = vpop.f32.mrf.mxu0 }
 0x383   : > { %6068 = vst.msk [vmem:[#allocation5 + $0x164] sm:$0xf] %vm16387_vm9, %v11702_v28  ;;  %v5214_v15 = vpop.permute.xlu1 %5213  ;;  %4746 = vrot.lane.b32.xlu0 %v11539_v33, %s12857_s28  ;;  %v6105_v47 = vld [vmem:[#allocation5 + $0xcc] sm:$0xff]  ;;  %vm16391_vm12 = vmmov %vm16390_vm3  ;;  %vm6928_vm9 = vcmask 523264  }
 0x384   : > { %4520 = vst.msk [vmem:[#allocation5 + $0xd8] sm:$0xf] %vm4501_vm1, %v4442_v56  ;;  %v12441_v41 = vld [vmem:[#allocation5 + $0xc4] ss:$12 sps:$4 sm:$0xff]   ;;  %vm16393_vm10 = vmmov %vm16386_vm0  ;;  %v10783_v26 = vcombine.low %v6103_v11, %v6105_v47  ;;  %v15501_v11 = vpack.c.bf16 %v5332_v42, %v5332_v42 }
 0x385   : > { %6065 = vst.msk [vmem:[#allocation5 + $0x140] sm:$0xf] %vm16388_vm14, %v15411_v22  ;;  %v5500_v2 = vpop.permute.xlu0 %5499  ;;  %vm16394_vm7 = vmmov %vm16390_vm3  ;;  %6670 = vmatprep.mubr.bf16.mxu1 %v12441_v41  ;;  %v11743_v19 = vpop.f32.mrf.mxu1 }
 0x386   : > { %3987 = vst.msk [vmem:[#allocation5 + $0x174] sm:$0xf] %vm16389_vm15, %v15414_v0  ;;  %6671 = vmatmul.mubr.bf16.gmra.mxu1 %v10783_v26  ;;  %vm16395_vm13 = vmmov %vm16390_vm3  ;;  %5517 = vrot.lane.b32.xlu1 %v15414_v0, %s12856_s21 }
 0x387   : > { %6066 = vst.msk [vmem:[#allocation5 + $0x14c] sm:$0xf] %vm16390_vm3, %v11700_v17  ;;  %v12443_v59 = vld [vmem:[#allocation5 + $0x128] ss:$12 sps:$4 sm:$0xff]   ;;  %v4444_v21 = vpop.permute.xlu1 %4443  ;;  %5771 = vrot.lane.b32.xlu0 %v15381_v31, %s12857_s28  ;;  %v11744_v54 = vpop.f32.mrf.mxu1  ;;  %vm16397_vm4 = vmmov %vm16396_vm8 }
 0x388   : > { %5012 = vst.msk [vmem:[#allocation5 + $0x160] sm:$0xf] %vm16391_vm12, %v15418_v14  ;;  %12282 = vmatprep.mubr.msk.bf16.mxu0 %vm16396_vm8, %v12443_v59  ;;  %v11745_v46 = vadd.f32 %v11744_v54, %v11743_v19  ;;  %vm16398_vm0 = vmmov %vm16397_vm4 }
 0x389   : > { %5290 = vst.msk [vmem:[#allocation5 + $0xe8] sm:$0xf] %vm16393_vm10, %v5214_v15  ;;  %v4731_v51 = vpop.permute.xlu0 %4730  ;;  %v11746_v48 = vpop.f32.mrf.mxu1  ;;  %vm16399_vm14 = vmmov %vm16393_vm10 }
 0x38a   : > { %5014 = vst.msk [vmem:[#allocation5 + $0x178] sm:$0xf] %vm16394_vm7, %v15422_v43  ;;  %4748 = vrot.lane.b32.xlu1 %v15325_v32, %s12857_s28  ;;  %v12445_v39 = vld [vmem:[#allocation5 + $0x158] ss:$12 sps:$4 sm:$0xff]   ;;  %v6609_v53 = vadd.f32 %v11745_v46, %v15451_v52  ;;  %vm16400_vm15 = vmmov %vm16393_vm10 }
 0x38b   : > { %5577 = vst.msk [vmem:[#allocation5 + $0xdc] sm:$0xf] %vm4501_vm1, %v5500_v2  ;;  %4521 = vst.msk [vmem:[#allocation5 + $0xe4] sm:$0xf] %vm4501_vm1, %v4444_v21  ;;  %v5502_v12 = vpop.permute.xlu1 %5501  ;;  %4172 = vrot.lane.b32.xlu0 %v15203_v20, %s12855_s14  ;;  %v11747_v55 = vpop.f32.mrf.mxu1  ;;  %v15468_v20 = vld [vmem:[#allocation4 + $0x100] sm:$0xff]  ;;  %v5877_v21 = vld [vmem:[#allocation4 + $0x112] sm:$0xff] }
 0x38c   : > { %3986 = vst.msk [vmem:[#allocation5 + $0x168] sm:$0xf] %vm16395_vm13, %v11447_v5  ;;  %v6770_v29 = vadd.f32 %v6769_v8, %v6609_v53  ;;  %v11748_v32 = vadd.f32 %v11747_v55, %v11746_v48  ;;  %v5363_v45 = vsel %vm14171_vm2, %v15468_v20, 0.0  ;;  %vm16401_vm3 = vmmov %vm16393_vm10  ;;  %v11703_v8 = vpack.c.bf16 %v5877_v21, %v5877_v21 }
 0x38d   : > { %4809 = vst.msk [vmem:[#allocation5 + $0xd8] sm:$0xf] %vm4790_vm6, %v4731_v51  ;;  %v5756_v35 = vpop.permute.xlu0 %5755  ;;  %v11637_v50 = vpack.c.bf16 %v5363_v45, %v5363_v45  ;;  %vm16403_vm11 = vmmov %vm16394_vm7  ;;  %vm16405_vm10 = vnez %v16055_v18 }
 0x38e   : > { %v12444_v34 = vld [vmem:[#allocation5 + $0x140] ss:$12 sps:$4 sm:$0xff]   ;;  %5578 = vst.msk [vmem:[#allocation5 + $0xe8] sm:$0xf] %vm4501_vm1, %v5502_v12  ;;  %5773 = vrot.lane.b32.xlu1 %v15418_v14, %s12857_s28  ;;  %v6896_v16 = vmax.f32 %v6770_v29, 0.0  ;;  %v6612_v13 = vadd.f32 %v11748_v32, %v15451_v52  ;;  %v4308_v29 = vsel %vm16405_vm10, %v15402_v24, 0.0  ;;  %vm16408_vm8 = vmmov %vm16398_vm0 }
 0x38f   : > { %12283 = vmatmul.mubr.msk.bf16.gmra.mxu0 %vm16397_vm4, %v12444_v34  ;;  %5833 = vst.msk [vmem:[#allocation5 + $0xdc] sm:$0xf] %vm4790_vm6, %v5756_v35  ;;  %v4733_v27 = vpop.permute.xlu1 %4732  ;;  %5231 = vrot.lane.b32.xlu0 %v15411_v22, %s12855_s14  ;;  %v11512_v18 = vpack.c.bf16 %v4308_v29, %v4308_v29  ;;  %vm7042_vm4 = vcmask 519168  }
 0x390   : > { %12286 = vmatprep.mubr.msk.bf16.mxu0 %vm16398_vm0, %v12445_v39  ;;  %4810 = vst.msk [vmem:[#allocation5 + $0xe4] sm:$0xf] %vm4790_vm6, %v4733_v27  ;;  %v6773_v1 = vadd.f32 %v6772_v4, %v6612_v13  ;;  %v5078_v39 = vsel %vm16405_vm10, %v15385_v38, 0.0  ;;  %v5334_v27 = vld [vmem:[#allocation4 + $0x118] sm:$0xff] }
 0x391   : > { %v4157_v44 = vpop.permute.xlu0 %4156  ;;  %6929 = vst.msk [vmem:[#allocation6] sm:$0xff] %vm6928_vm9, %v6896_v16  ;;  %v5621_v16 = vld [vmem:[#allocation4 + $0x111] sm:$0xff]  ;;  %v11640_v45 = vpack.c.bf16 %v5334_v27, %v5334_v27 }
 0x392   : > { %4233 = vst.msk [vmem:[#allocation5 + $0xf0] sm:$0xf] %vm16399_vm14, %v4157_v44  ;;  %4174 = vrot.lane.b32.xlu1 %v15233_v3, %s12855_s14  ;;  %v6897_v28 = vmax.f32 %v6773_v1, 0.0  ;;  %v4594_v3 = vsel %vm14171_vm2, %v15369_v57, 0.0  ;;  %vm16402_vm2 = vmmov %vm16401_vm3 }
 0x393   : > { %v5758_v62 = vpop.permute.xlu1 %5757  ;;  %4461 = vrot.lane.b32.xlu0 %v15226_v30, %s12856_s21  ;;  %v11541_v17 = vpack.c.bf16 %v4594_v3, %v4594_v3  ;;  %6069 = vst.msk [vmem:[#allocation5 + $0x170] sm:$0xf] %vm16403_vm11, %v11703_v8  ;;  %vm16404_vm12 = vmmov %vm16402_vm2 }
 0x394   : > { %5834 = vst.msk [vmem:[#allocation5 + $0xe8] sm:$0xf] %vm4790_vm6, %v5758_v62  ;;  %vm16406_vm7 = vmmov %vm16402_vm2  ;;  %v11671_v62 = vpack.c.bf16 %v5621_v16, %v5621_v16 }
 0x395   : > { %v5216_v37 = vpop.permute.xlu0 %5215  ;;  %6930 = vst.msk [vmem:[#allocation6 + $0x8] sm:$0xff] %vm6928_vm9, %v6897_v28  ;;  %vm16407_vm13 = vmmov %vm16402_vm2 }
 0x396   : > { %5291 = vst.msk [vmem:[#allocation5 + $0xf4] sm:$0xf] %vm16400_vm15, %v5216_v37  ;;  %5233 = vrot.lane.b32.xlu1 %v11606_v40, %s12855_s14  ;;  %v6107_v49 = vld [vmem:[#allocation5 + $0xd8] sm:$0xff]  ;;  %vm16410_vm0 = vmmov %vm16402_vm2 }
 0x397   : > { %v4159_v56 = vpop.permute.xlu1 %4158  ;;  %5519 = vrot.lane.b32.xlu0 %v11637_v50, %s12856_s21  ;;  %vm16411_vm14 = vmmov %vm16410_vm0 }
 0x398   : > { %4234 = vst.msk [vmem:[#allocation5 + $0xfc] sm:$0xf] %vm16401_vm3, %v4159_v56  ;;  %vm16412_vm15 = vmmov %vm16410_vm0 }
 0x399   : > { %v4446_v30 = vpop.permute.xlu0 %4445  ;;  %vm16413_vm3 = vmmov %vm16410_vm0 }
 0x39a   : > { %4522 = vst.msk [vmem:[#allocation5 + $0xf0] sm:$0xf] %vm4501_vm1, %v4446_v30  ;;  %4463 = vrot.lane.b32.xlu1 %v11510_v61, %s12856_s21  ;;  %v12459_v55 = vld [vmem:[#allocation5 + $0x170] ss:$12 sps:$4 sm:$0xff]   ;;  %v6785_v30 = vpop.f32.mrf.mxu0  ;;  %vm16415_vm11 = vmmov %vm16410_vm0 }
 0x39b   : > { %v5218_v33 = vpop.permute.xlu1 %5217  ;;  %4750 = vrot.lane.b32.xlu0 %v11541_v17, %s12857_s28  ;;  %v6109_v60 = vld [vmem:[#allocation5 + $0xe4] sm:$0xff]  ;;  %12287 = vmatmul.mubr.msk.bf16.gmra.mxu0 %vm16408_vm8, %v12459_v55  ;;  %vm16417_vm10 = vmmov %vm16410_vm0 }
 0x39c   : > { %v12446_v36 = vld [vmem:[#allocation5 + $0xdc] ss:$12 sps:$4 sm:$0xff]   ;;  %5292 = vst.msk [vmem:[#allocation5 + $0x100] sm:$0xf] %vm16402_vm2, %v5218_v33  ;;  %v10786_v15 = vcombine.low %v6107_v49, %v6109_v60  ;;  %v5622_v49 = vld [vmem:[#allocation4 + $0x119] sm:$0xff]  ;;  %vm16420_vm8 = vmmov %vm16410_vm0 }
 0x39d   : > { %v5504_v57 = vpop.permute.xlu0 %5503  ;;  %6678 = vmatprep.mubr.bf16.mxu1 %v12446_v36  ;;  %v6961_v13 = vld [vmem:[#allocation6] ss:$2 sm:$0xff]  ;;  %v6993_v44 = vld [vmem:[#allocation6 + $0x1] ss:$2 sm:$0xff] }
 0x39e   : > { %5579 = vst.msk [vmem:[#allocation5 + $0xf4] sm:$0xf] %vm4501_vm1, %v5504_v57  ;;  %v11749_v47 = vpop.f32.mrf.mxu1  ;;  %6679 = vmatmul.mubr.bf16.gmra.mxu1 %v10786_v15  ;;  %5521 = vrot.lane.b32.xlu1 %v15501_v11, %s12856_s21  ;;  %v7024_v63 = vmax.f32 %v6961_v13, %v6993_v44  ;;  %v15560_v15 = vpop.f32.mrf.mxu0 }
 0x39f   : > { %v4448_v41 = vpop.permute.xlu1 %4447  ;;  %5775 = vrot.lane.b32.xlu0 %v15365_v6, %s12857_s28 }
 0x3a0   : > { %4523 = vst.msk [vmem:[#allocation5 + $0xfc] sm:$0xf] %vm4501_vm1, %v4448_v41  ;;  %v11750_v2 = vpop.f32.mrf.mxu1 }
 0x3a1   : > { %v4735_v9 = vpop.permute.xlu0 %4734  ;;  %v11751_v26 = vadd.f32 %v11750_v2, %v11749_v47 }
 0x3a2   : > { %4811 = vst.msk [vmem:[#allocation5 + $0xf0] sm:$0xf] %vm4790_vm6, %v4735_v9  ;;  %v11752_v5 = vpop.f32.mrf.mxu1  ;;  %4752 = vrot.lane.b32.xlu1 %v15414_v0, %s12857_s28  ;;  %v11672_v9 = vpack.c.bf16 %v5622_v49, %v5622_v49 }
 0x3a3   : > { %v6617_v59 = vadd.f32 %v11751_v26, %v15451_v52  ;;  %v5506_v19 = vpop.permute.xlu1 %5505  ;;  %4176 = vrot.lane.b32.xlu0 %v15381_v31, %s12855_s14  ;;  %v5333_v31 = vld [vmem:[#allocation4 + $0x110] sm:$0xff] }
 0x3a4   : > { %5580 = vst.msk [vmem:[#allocation5 + $0x100] sm:$0xf] %vm4501_vm1, %v5506_v19  ;;  %v11753_v51 = vpop.f32.mrf.mxu1 }
 0x3a5   : > { %v5760_v6 = vpop.permute.xlu0 %5759  ;;  %v6778_v54 = vadd.f32 %v15437_v7, %v6617_v59  ;;  %v11754_v46 = vadd.f32 %v11753_v51, %v11752_v5  ;;  %v6788_v51 = vpop.f32.mrf.mxu0 }
 0x3a6   : > { %5835 = vst.msk [vmem:[#allocation5 + $0xf4] sm:$0xf] %vm4790_vm6, %v5760_v6  ;;  %5777 = vrot.lane.b32.xlu1 %v15422_v43, %s12857_s28  ;;  %v5365_v43 = vsel %vm16392_vm5, %v5333_v31, 0.0 }
 0x3a7   : > { %v6898_v34 = vmax.f32 %v6778_v54, 0.0  ;;  %v6620_v48 = vadd.f32 %v11754_v46, %v15451_v52  ;;  %v4737_v0 = vpop.permute.xlu1 %4736  ;;  %5235 = vrot.lane.b32.xlu0 %v15391_v10, %s12855_s14  ;;  %v11639_v38 = vpack.c.bf16 %v5365_v43, %v5365_v43 }
 0x3a8   : > { %4812 = vst.msk [vmem:[#allocation5 + $0xfc] sm:$0xf] %vm4790_vm6, %v4737_v0 }
 0x3a9   : > { %v4161_v12 = vpop.permute.xlu0 %4160  ;;  %6931 = vst.msk [vmem:[#allocation6 + $0x10] sm:$0xff] %vm6928_vm9, %v6898_v34  ;;  %v6781_v7 = vadd.f32 %v15460_v23, %v6620_v48  ;;  %v11608_v23 = vpack.c.bf16 %v5078_v39, %v5078_v39 }
 0x3aa   : > { %4235 = vst.msk [vmem:[#allocation5 + $0x108] sm:$0xf] %vm16404_vm12, %v4161_v12  ;;  %4178 = vrot.lane.b32.xlu1 %v15418_v14, %s12855_s14  ;;  %v4596_v14 = vsel %vm16392_vm5, %v15468_v20, 0.0  ;;  %vm16409_vm5 = vmmov %vm16402_vm2 }
 0x3ab   : > { %v6899_v53 = vmax.f32 %v6781_v7, 0.0  ;;  %v5762_v35 = vpop.permute.xlu1 %5761  ;;  %4465 = vrot.lane.b32.xlu0 %v15411_v22, %s12856_s21  ;;  %v11543_v24 = vpack.c.bf16 %v4596_v14, %v4596_v14  ;;  %vm16414_vm2 = vmmov %vm16410_vm0 }
 0x3ac   : > { %5836 = vst.msk [vmem:[#allocation5 + $0x100] sm:$0xf] %vm4790_vm6, %v5762_v35  ;;  %vm16416_vm12 = vmmov %vm16410_vm0 }
 0x3ad   : > { %v5220_v10 = vpop.permute.xlu0 %5219  ;;  %6932 = vst.msk [vmem:[#allocation6 + $0x18] sm:$0xff] %vm6928_vm9, %v6899_v53  ;;  %v6111_v4 = vld [vmem:[#allocation5 + $0xf0] sm:$0xff] }
 0x3ae   : > { %5293 = vst.msk [vmem:[#allocation5 + $0x10c] sm:$0xf] %vm16406_vm7, %v5220_v10  ;;  %5237 = vrot.lane.b32.xlu1 %v11608_v23, %s12855_s14  ;;  %vm16418_vm7 = vmmov %vm16410_vm0  ;;  %s339_s14 = scalar_lea.vmem [#allocation11], %s338_s24 }
 0x3af   : > { %v4163_v32 = vpop.permute.xlu1 %4162  ;;  %5523 = vrot.lane.b32.xlu0 %v11639_v38, %s12856_s21 }
 0x3b0   : > { %4236 = vst.msk [vmem:[#allocation5 + $0x114] sm:$0xf] %vm16407_vm13, %v4163_v32  ;;  %vm16419_vm13 = vmmov %vm16410_vm0 }
 0x3b1   : > { %v4450_v22 = vpop.permute.xlu0 %4449 }
 0x3b2   : > { %4524 = vst.msk [vmem:[#allocation5 + $0x108] sm:$0xf] %vm4501_vm1, %v4450_v22  ;;  %4467 = vrot.lane.b32.xlu1 %v11512_v18, %s12856_s21 }
 0x3b3   : > { %v5222_v20 = vpop.permute.xlu1 %5221  ;;  %4754 = vrot.lane.b32.xlu0 %v11543_v24, %s12857_s28  ;;  %v6113_v1 = vld [vmem:[#allocation5 + $0xfc] sm:$0xff] }
 0x3b4   : > { %v12448_v25 = vld [vmem:[#allocation5 + $0xf4] ss:$12 sps:$4 sm:$0xff]   ;;  %5294 = vst.msk [vmem:[#allocation5 + $0x118] sm:$0xf] %vm16409_vm5, %v5222_v20  ;;  %v10789_v37 = vcombine.low %v6111_v4, %v6113_v1  ;;  %vm16421_vm5 = vmmov %vm16410_vm0 }
 0x3b5   : > { %v5508_v28 = vpop.permute.xlu0 %5507  ;;  %v6963_v40 = vld [vmem:[#allocation6 + $0x10] ss:$2 sm:$0xff]  ;;  %v6995_v50 = vld [vmem:[#allocation6 + $0x11] ss:$2 sm:$0xff]  ;;  %6686 = vmatprep.mubr.bf16.mxu1 %v12448_v25 }
 0x3b6   : > { %5581 = vst.msk [vmem:[#allocation5 + $0x10c] sm:$0xf] %vm4501_vm1, %v5508_v28  ;;  %v7025_v3 = vmax.f32 %v6963_v40, %v6995_v50  ;;  %v11755_v56 = vpop.f32.mrf.mxu1  ;;  %6687 = vmatmul.mubr.bf16.gmra.mxu1 %v10789_v37  ;;  %5525 = vrot.lane.b32.xlu1 %v11640_v45, %s12856_s21 }
 0x3b7   : > { %v4452_v61 = vpop.permute.xlu1 %4451  ;;  %5779 = vrot.lane.b32.xlu0 %v11671_v62, %s12857_s28 }
 0x3b8   : > { %v7040_v17 = vmax.f32 %v7024_v63, %v7025_v3  ;;  %4525 = vst.msk [vmem:[#allocation5 + $0x114] sm:$0xf] %vm4501_vm1, %v4452_v61  ;;  %v11756_v33 = vpop.f32.mrf.mxu1  ;;  %v12268_v63 = vpop.f32.mrf.mxu0 }
 0x3b9   : > { %v4739_v42 = vpop.permute.xlu0 %4738  ;;  %v11757_v60 = vadd.f32 %v11756_v33, %v11755_v56 }
 0x3ba   : > { %4813 = vst.msk [vmem:[#allocation5 + $0x108] sm:$0xf] %vm4790_vm6, %v4739_v42  ;;  %v7041_v36 = vpack.c.bf16 %v7040_v17, %v7040_v17  ;;  %v11758_v57 = vpop.f32.mrf.mxu1  ;;  %4756 = vrot.lane.b32.xlu1 %v15501_v11, %s12857_s28  ;;  %v6801_v33 = vpop.f32.mrf.mxu0 }
 0x3bb   : > { %v6625_v47 = vadd.f32 %v11757_v60, %v15451_v52  ;;  %v5510_v41 = vpop.permute.xlu1 %5509 }
 0x3bc   : > { %7043 = vst.msk [vmem:[#allocation7] sm:$0xf] %vm7042_vm4, %v7041_v36  ;;  %v11759_v26 = vpop.f32.mrf.mxu1 }
 0x3bd   : > { %5582 = vst.msk [vmem:[#allocation5 + $0x118] sm:$0xf] %vm4501_vm1, %v5510_v41  ;;  %v5764_v2 = vpop.permute.xlu0 %5763  ;;  %v6786_v5 = vadd.f32 %v6785_v30, %v6625_v47  ;;  %v11760_v59 = vadd.f32 %v11759_v26, %v11758_v57  ;;  %v12269_v47 = vpop.f32.mrf.mxu0 }
 0x3be   : > { %5837 = vst.msk [vmem:[#allocation5 + $0x10c] sm:$0xf] %vm4790_vm6, %v5764_v2  ;;  %5781 = vrot.lane.b32.xlu1 %v11672_v9, %s12857_s28  ;;  %s10072_s28 = sshll.u32 %s339_s14, 4  ;;  %s10073_s28 = int_to_ptr.vmem [resolvable:$true] %s10072_s28 }
 0x3bf   : > { %v6900_v19 = vmax.f32 %v6786_v5, 0.0  ;;  %v6628_v21 = vadd.f32 %v11760_v59, %v15451_v52  ;;  %v4741_v6 = vpop.permute.xlu1 %4740  ;;  %v6804_v59 = vpop.f32.mrf.mxu0  ;;  %s12776_s17 = scalar_lea.vmem %s10073_s28, 16  ;;  %p12783_p11 = scmp.lt.s32.totalorder %s10073_s28, %s12781_s22 }
 0x3c0   : > { %4814 = vst.msk [vmem:[#allocation5 + $0x114] sm:$0xf] %vm4790_vm6, %v4741_v6  ;;  %p12777_p8 = scmp.ne.s32.totalorder %s10073_s28, %s12776_s17  ;;  %p12784_p12 = scmp.lt.s32.totalorder %s12782_s13, %s12776_s17 }
 0x3c1   : > { %v4165_v11 = vpop.permute.xlu0 %4164  ;;  %6933 = vst.msk [vmem:[#allocation6 + $0x20] sm:$0xff] %vm6928_vm9, %v6900_v19  ;;  %v6789_v8 = vadd.f32 %v6788_v51, %v6628_v21 }
 0x3c2   : > { %4237 = vst.msk [vmem:[#allocation5 + $0x120] sm:$0xf] %vm16410_vm0, %v4165_v11  ;;  %p12778_p9 = pnand %p12777_p8, %p12948_p5  ;;  %p12785_p13 = por %p12784_p12, %p12783_p11 }
 0x3c3   : > { %v6901_v54 = vmax.f32 %v6789_v8, 0.0  ;;  %v5766_v46 = vpop.permute.xlu1 %5765 }
 0x3c4   : > { %5838 = vst.msk [vmem:[#allocation5 + $0x118] sm:$0xf] %vm4790_vm6, %v5766_v46  ;;  %p12779_p10 = pneg %p12778_p9 }
 0x3c5   : > { %v5224_v34 = vpop.permute.xlu0 %5223  ;;  %6934 = vst.msk [vmem:[#allocation6 + $0x28] sm:$0xff] %vm6928_vm9, %v6901_v54  ;;  %v6115_v12 = vld [vmem:[#allocation5 + $0x108] sm:$0xff] }
 0x3c6   : > { %5295 = vst.msk [vmem:[#allocation5 + $0x124] sm:$0xf] %vm16411_vm14, %v5224_v34  ;;  %vm16422_vm14 = vmmov %vm16410_vm0  ;;  %p12786_p0 = pnand %p12785_p13, %p12779_p10 }
 0x3c7   : > { %v4167_v48 = vpop.permute.xlu1 %4166 }
 0x3c8   : > { %4238 = vst.msk [vmem:[#allocation5 + $0x12c] sm:$0xf] %vm16412_vm15, %v4167_v48  ;;  %vm16423_vm15 = vmmov %vm16410_vm0 }
 0x3c9   : > { %v4454_v0 = vpop.permute.xlu0 %4453 }
 0x3ca   : > { %4526 = vst.msk [vmem:[#allocation5 + $0x120] sm:$0xf] %vm4501_vm1, %v4454_v0 }
 0x3cb   : > { %v5226_v31 = vpop.permute.xlu1 %5225  ;;  %v6117_v7 = vld [vmem:[#allocation5 + $0x114] sm:$0xff] }
 0x3cc   : > { %v12450_v39 = vld [vmem:[#allocation5 + $0x10c] ss:$12 sps:$4 sm:$0xff]   ;;  %5296 = vst.msk [vmem:[#allocation5 + $0x130] sm:$0xf] %vm16413_vm3, %v5226_v31  ;;  %v10792_v53 = vcombine.low %v6115_v12, %v6117_v7  ;;  %vm16424_vm3 = vmmov %vm16410_vm0 }
 0x3cd   : > { %v5512_v43 = vpop.permute.xlu0 %5511  ;;  %6694 = vmatprep.mubr.bf16.mxu1 %v12450_v39  ;;  %v6965_v28 = vld [vmem:[#allocation6 + $0x20] ss:$2 sm:$0xff]  ;;  %v6997_v37 = vld [vmem:[#allocation6 + $0x21] ss:$2 sm:$0xff] }
 0x3ce   : > { %5583 = vst.msk [vmem:[#allocation5 + $0x124] sm:$0xf] %vm4501_vm1, %v5512_v43  ;;  %6695 = vmatmul.mubr.bf16.gmra.mxu1 %v10792_v53  ;;  %v7026_v30 = vmax.f32 %v6965_v28, %v6997_v37 }
 0x3cf   : > { %v4456_v10 = vpop.permute.xlu1 %4455 }
 0x3d0   : > { %4527 = vst.msk [vmem:[#allocation5 + $0x12c] sm:$0xf] %vm4501_vm1, %v4456_v10 }
 0x3d1   : > { %v4743_v23 = vpop.permute.xlu0 %4742 }
 0x3d2   : > { %v11761_v35 = vpop.f32.mrf.mxu1  ;;  %4815 = vst.msk [vmem:[#allocation5 + $0x120] sm:$0xf] %vm4790_vm6, %v4743_v23 }
 0x3d3   : > { %v5514_v32 = vpop.permute.xlu1 %5513 }
 0x3d4   : > { %v11762_v38 = vpop.f32.mrf.mxu1  ;;  %5584 = vst.msk [vmem:[#allocation5 + $0x130] sm:$0xf] %vm4501_vm1, %v5514_v32 }
 0x3d5   : > { %v11763_v55 = vadd.f32 %v11762_v38, %v11761_v35  ;;  %v5768_v22 = vpop.permute.xlu0 %5767 }
 0x3d6   : > { %v11764_v29 = vpop.f32.mrf.mxu1  ;;  %5839 = vst.msk [vmem:[#allocation5 + $0x124] sm:$0xf] %vm4790_vm6, %v5768_v22 }
 0x3d7   : > { %v6633_v14 = vadd.f32 %v11763_v55, %v15451_v52  ;;  %v4745_v44 = vpop.permute.xlu1 %4744 }
 0x3d8   : > { %v11765_v27 = vpop.f32.mrf.mxu1  ;;  %4816 = vst.msk [vmem:[#allocation5 + $0x12c] sm:$0xf] %vm4790_vm6, %v4745_v44 }
 0x3d9   : > { %v6794_v16 = vadd.f32 %v15550_v58, %v6633_v14  ;;  %v11766_v18 = vadd.f32 %v11765_v27, %v11764_v29  ;;  %v4169_v20 = vpop.permute.xlu0 %4168 }
 0x3da   : > { %4239 = vst.msk [vmem:[#allocation5 + $0x138] sm:$0xf] %vm16414_vm2, %v4169_v20 }
 0x3db   : > { %v6902_v24 = vmax.f32 %v6794_v16, 0.0  ;;  %v6636_v13 = vadd.f32 %v11766_v18, %v15451_v52  ;;  %v5770_v25 = vpop.permute.xlu1 %5769 }
 0x3dc   : > { %5840 = vst.msk [vmem:[#allocation5 + $0x130] sm:$0xf] %vm4790_vm6, %v5770_v25 }
 0x3dd   : > { %6935 = vst.msk [vmem:[#allocation6 + $0x30] sm:$0xff] %vm6928_vm9, %v6902_v24  ;;  %v6797_v4 = vadd.f32 %v15560_v15, %v6636_v13  ;;  %v5228_v58 = vpop.permute.xlu0 %5227 }
 0x3de   : > { %5297 = vst.msk [vmem:[#allocation5 + $0x13c] sm:$0xf] %vm16415_vm11, %v5228_v58 }
 0x3df   : > { %v6903_v1 = vmax.f32 %v6797_v4, 0.0  ;;  %v4171_v45 = vpop.permute.xlu1 %4170  ;;  %v12454_v50 = vld [vmem:[#allocation5 + $0x120] ss:$12 sps:$4 sm:$0xff]  }
 0x3e0   : > { %4240 = vst.msk [vmem:[#allocation5 + $0x144] sm:$0xf] %vm16416_vm12, %v4171_v45 }
 0x3e1   : > { %6936 = vst.msk [vmem:[#allocation6 + $0x38] sm:$0xff] %vm6928_vm9, %v6903_v1  ;;  %v4458_v62 = vpop.permute.xlu0 %4457 }
 0x3e2   : > { %4528 = vst.msk [vmem:[#allocation5 + $0x138] sm:$0xf] %vm4501_vm1, %v4458_v62  ;;  %v15623_v62 = vpop.f32.mrf.mxu0 }
 0x3e3   : > { %v12452_v40 = vld [vmem:[#allocation5 + $0x124] ss:$12 sps:$4 sm:$0xff]  }
 0x3e4   : > { %6702 = vmatprep.mubr.bf16.mxu1 %v12452_v40 }
 0x3e5   : > { %6703 = vmatmul.mubr.bf16.gmra.mxu1 %v12454_v50 }
 0x3e6   : > { %v11767_v17 = vpop.f32.mrf.mxu1 }
 0x3e8   : > { %v6967_v3 = vld [vmem:[#allocation6 + $0x30] ss:$2 sm:$0xff]  ;;  %v6999_v56 = vld [vmem:[#allocation6 + $0x31] ss:$2 sm:$0xff]  ;;  %v11768_v49 = vpop.f32.mrf.mxu1 }
 0x3e9   : > { %v7027_v61 = vmax.f32 %v6967_v3, %v6999_v56  ;;  %v11769_v60 = vadd.f32 %v11768_v49, %v11767_v17 }
 0x3ea   : > { %v11770_v57 = vpop.f32.mrf.mxu1 }
 0x3eb   : > { %v7044_v42 = vmax.f32 %v7026_v30, %v7027_v61  ;;  %v6641_v15 = vadd.f32 %v11769_v60, %v15451_v52  ;;  %v6817_v61 = vpop.f32.mrf.mxu0 }
 0x3ec   : > { %v11771_v41 = vpop.f32.mrf.mxu1 }
 0x3ed   : > { %v11705_v36 = vpack.c.bf16 %v7044_v42, %v7044_v42  ;;  %v6802_v9 = vadd.f32 %v6801_v33, %v6641_v15  ;;  %v11772_v2 = vadd.f32 %v11771_v41, %v11770_v57  ;;  %v12273_v15 = vpop.f32.mrf.mxu0 }
 0x3ef   : > { %7049 = vrot.lane.b32.xlu0 %v11705_v36, %s12856_s21  ;;  %v6904_v26 = vmax.f32 %v6802_v9, 0.0  ;;  %v6644_v5 = vadd.f32 %v11772_v2, %v15451_v52 }
 0x3f0   : > { %v5230_v21 = vpop.permute.xlu1 %5229 }
 0x3f1   : > { %6937 = vst.msk [vmem:[#allocation6 + $0x40] sm:$0xff] %vm6928_vm9, %v6904_v26  ;;  %v6805_v19 = vadd.f32 %v6804_v59, %v6644_v5  ;;  %v5516_v6 = vpop.permute.xlu0 %5515 }
 0x3f2   : > { %5298 = vst.msk [vmem:[#allocation5 + $0x148] sm:$0xf] %vm16417_vm10, %v5230_v21 }
 0x3f3   : > { %5585 = vst.msk [vmem:[#allocation5 + $0x13c] sm:$0xf] %vm4501_vm1, %v5516_v6  ;;  %v6905_v51 = vmax.f32 %v6805_v19, 0.0  ;;  %v6820_v19 = vpop.f32.mrf.mxu0 }
 0x3f4   : > { %v4460_v11 = vpop.permute.xlu1 %4459 }
 0x3f5   : > { %6938 = vst.msk [vmem:[#allocation6 + $0x48] sm:$0xff] %vm6928_vm9, %v6905_v51  ;;  %v4747_v8 = vpop.permute.xlu0 %4746 }
 0x3f6   : > { %4529 = vst.msk [vmem:[#allocation5 + $0x144] sm:$0xf] %vm4501_vm1, %v4460_v11 }
 0x3f7   : > { %4817 = vst.msk [vmem:[#allocation5 + $0x138] sm:$0xf] %vm4790_vm6, %v4747_v8 }
 0x3f8   : > { %v5518_v54 = vpop.permute.xlu1 %5517 }
 0x3f9   : > { %v5772_v46 = vpop.permute.xlu0 %5771  ;;  %5586 = vst.msk [vmem:[#allocation5 + $0x148] sm:$0xf] %vm4501_vm1, %v5518_v54 }
 0x3fa   : > { %5841 = vst.msk [vmem:[#allocation5 + $0x13c] sm:$0xf] %vm4790_vm6, %v5772_v46 }
 0x3fc   : > { %v4749_v34 = vpop.permute.xlu1 %4748  ;;  %v6969_v58 = vld [vmem:[#allocation6 + $0x40] ss:$2 sm:$0xff]  ;;  %v7001_v45 = vld [vmem:[#allocation6 + $0x41] ss:$2 sm:$0xff] }
 0x3fd   : > { %v4173_v48 = vpop.permute.xlu0 %4172  ;;  %4818 = vst.msk [vmem:[#allocation5 + $0x144] sm:$0xf] %vm4790_vm6, %v4749_v34 }
 0x3fe   : > { %4241 = vst.msk [vmem:[#allocation5 + $0x150] sm:$0xf] %vm16418_vm7, %v4173_v48  ;;  %v11773_v0 = vpop.f32.mrf.mxu1 }
 0x400   : > { %v11774_v31 = vpop.f32.mrf.mxu1  ;;  %v5774_v7 = vpop.permute.xlu1 %5773 }
 0x401   : > { %v11775_v12 = vadd.f32 %v11774_v31, %v11773_v0  ;;  %v5232_v39 = vpop.permute.xlu0 %5231  ;;  %5842 = vst.msk [vmem:[#allocation5 + $0x148] sm:$0xf] %vm4790_vm6, %v5774_v7  ;;  %v6123_v16 = vld [vmem:[#allocation5 + $0x138] sm:$0xff] }
 0x402   : > { %5299 = vst.msk [vmem:[#allocation5 + $0x154] sm:$0xf] %vm16419_vm13, %v5232_v39  ;;  %v11776_v43 = vpop.f32.mrf.mxu1 }
 0x403   : > { %v6649_v53 = vadd.f32 %v11775_v12, %v15451_v52 }
 0x404   : > { %v11777_v35 = vpop.f32.mrf.mxu1  ;;  %v4175_v38 = vpop.permute.xlu1 %4174 }
 0x405   : > { %v6810_v10 = vadd.f32 %v12268_v63, %v6649_v53  ;;  %v11778_v23 = vadd.f32 %v11777_v35, %v11776_v43  ;;  %v4462_v55 = vpop.permute.xlu0 %4461  ;;  %4242 = vst.msk [vmem:[#allocation5 + $0x15c] sm:$0xf] %vm16420_vm8, %v4175_v38  ;;  %v7028_v63 = vmax.f32 %v6969_v58, %v7001_v45  ;;  %v12463_v43 = vld [vmem:[#allocation8 + $0x178] sm:$0xff]  }
 0x406   : > { %4530 = vst.msk [vmem:[#allocation5 + $0x150] sm:$0xf] %vm4501_vm1, %v4462_v55  ;;  %v12464_v35 = vld [vmem:[#allocation8 + $0x138] sm:$0xff]   ;;  %11857 = vmatprep.subr.bf16.mxu0 %v12463_v43 }
 0x407   : > { %v6906_v29 = vmax.f32 %v6810_v10, 0.0  ;;  %v6652_v14 = vadd.f32 %v11778_v23, %v15451_v52  ;;  %11858 = vmatpush3.bf16.msra.mxu0 %v12464_v35  ;;  %v12471_v45 = vld [vmem:[#allocation8 + $0x158] sm:$0xff]  }
 0x408   : > { %v5234_v22 = vpop.permute.xlu1 %5233  ;;  %v6125_v18 = vld [vmem:[#allocation5 + $0x144] sm:$0xff] }
 0x409   : > { %6939 = vst.msk [vmem:[#allocation6 + $0x50] sm:$0xff] %vm6928_vm9, %v6906_v29  ;;  %v6813_v32 = vadd.f32 %v12269_v47, %v6652_v14  ;;  %v5520_v27 = vpop.permute.xlu0 %5519  ;;  %v12455_v24 = vld [vmem:[#allocation5 + $0x13c] ss:$12 sps:$4 sm:$0xff]   ;;  %v10798_v13 = vcombine.low %v6123_v16, %v6125_v18  ;;  %v12465_v29 = vld [vmem:[#allocation8 + $0x170] sm:$0xff]  }
 0x40a   : > { %5300 = vst.msk [vmem:[#allocation5 + $0x160] sm:$0xf] %vm16421_vm5, %v5234_v22  ;;  %6710 = vmatprep.mubr.bf16.mxu1 %v12455_v24  ;;  %11859 = vmatprep.subr.bf16.mxu0 %v12465_v29  ;;  %v12467_v16 = vld [vmem:[#allocation8 + $0x168] sm:$0xff]  }
 0x40b   : > { %5587 = vst.msk [vmem:[#allocation5 + $0x154] sm:$0xf] %vm4501_vm1, %v5520_v27  ;;  %v6907_v44 = vmax.f32 %v6813_v32, 0.0  ;;  %6711 = vmatmul.mubr.bf16.gmra.mxu1 %v10798_v13  ;;  %v12466_v32 = vld [vmem:[#allocation8 + $0x130] sm:$0xff]   ;;  %v12468_v18 = vld [vmem:[#allocation8 + $0x128] sm:$0xff]  }
 0x40c   : > { %v4464_v20 = vpop.permute.xlu1 %4463  ;;  %11860 = vmatpush3.bf16.msra.mxu0 %v12466_v32 }
 0x40d   : > { %6940 = vst.msk [vmem:[#allocation6 + $0x58] sm:$0xff] %vm6928_vm9, %v6907_v44  ;;  %v4751_v4 = vpop.permute.xlu0 %4750  ;;  %11861 = vmatprep.subr.bf16.mxu0 %v12467_v16  ;;  %v12469_v44 = vld [vmem:[#allocation8 + $0x160] sm:$0xff]  }
 0x40e   : > { %4531 = vst.msk [vmem:[#allocation5 + $0x15c] sm:$0xf] %vm4501_vm1, %v4464_v20 }
 0x40f   : > { %4819 = vst.msk [vmem:[#allocation5 + $0x150] sm:$0xf] %vm4790_vm6, %v4751_v4 }
 0x410   : > { %v5522_v1 = vpop.permute.xlu1 %5521  ;;  %11862 = vmatpush3.bf16.msra.mxu0 %v12468_v18 }
 0x411   : > { %v5776_v25 = vpop.permute.xlu0 %5775  ;;  %5588 = vst.msk [vmem:[#allocation5 + $0x160] sm:$0xf] %vm4501_vm1, %v5522_v1  ;;  %11863 = vmatprep.subr.bf16.mxu0 %v12469_v44 }
 0x412   : > { %5843 = vst.msk [vmem:[#allocation5 + $0x154] sm:$0xf] %vm4790_vm6, %v5776_v25  ;;  %v12470_v25 = vld [vmem:[#allocation8 + $0x120] sm:$0xff]  }
 0x414   : > { %v6971_v28 = vld [vmem:[#allocation6 + $0x50] ss:$2 sm:$0xff]  ;;  %v7003_v37 = vld [vmem:[#allocation6 + $0x51] ss:$2 sm:$0xff]  ;;  %v4753_v40 = vpop.permute.xlu1 %4752  ;;  %11864 = vmatpush3.bf16.msra.mxu0 %v12470_v25 }
 0x415   : > { %v4177_v50 = vpop.permute.xlu0 %4176  ;;  %v7029_v3 = vmax.f32 %v6971_v28, %v7003_v37  ;;  %4820 = vst.msk [vmem:[#allocation5 + $0x15c] sm:$0xf] %vm4790_vm6, %v4753_v40  ;;  %11865 = vmatprep.subr.bf16.mxu0 %v12471_v45  ;;  %v12473_v28 = vld [vmem:[#allocation8 + $0x150] sm:$0xff]  }
 0x416   : > { %4243 = vst.msk [vmem:[#allocation5 + $0x168] sm:$0xf] %vm16410_vm0, %v4177_v50  ;;  %v12474_v50 = vld [vmem:[#allocation8 + $0x110] sm:$0xff]  }
 0x417   : > { %v7054_v30 = vmax.f32 %v7028_v63, %v7029_v3  ;;  %v12475_v63 = vld [vmem:[#allocation8 + $0x148] sm:$0xff]   ;;  %v12276_v3 = vpop.f32.mrf.mxu0 }
 0x418   : > { %v5778_v33 = vpop.permute.xlu1 %5777 }
 0x419   : > { %v11779_v56 = vpop.f32.mrf.mxu1  ;;  %v5236_v49 = vpop.permute.xlu0 %5235  ;;  %v7055_v60 = vpack.c.bf16 %v7054_v30, %v7054_v30  ;;  %5844 = vst.msk [vmem:[#allocation5 + $0x160] sm:$0xf] %vm4790_vm6, %v5778_v33  ;;  %v6127_v11 = vld [vmem:[#allocation5 + $0x150] sm:$0xff]  ;;  %v12476_v33 = vld [vmem:[#allocation8 + $0x108] sm:$0xff]  }
 0x41a   : > { %5301 = vst.msk [vmem:[#allocation5 + $0x16c] sm:$0xf] %vm16422_vm14, %v5236_v49 }
 0x41b   : > { %v11780_v17 = vpop.f32.mrf.mxu1  ;;  %7056 = vst.msk [vmem:[#allocation7 + $0x4] sm:$0xf] %vm7042_vm4, %v7055_v60  ;;  %v12477_v60 = vld [vmem:[#allocation8 + $0x140] sm:$0xff]  }
 0x41c   : > { %v11781_v42 = vadd.f32 %v11780_v17, %v11779_v56  ;;  %v4179_v2 = vpop.permute.xlu1 %4178 }
 0x41d   : > { %v11782_v36 = vpop.f32.mrf.mxu1  ;;  %v4466_v26 = vpop.permute.xlu0 %4465  ;;  %4244 = vst.msk [vmem:[#allocation5 + $0x174] sm:$0xf] %vm16423_vm15, %v4179_v2 }
 0x41e   : > { %v6657_v57 = vadd.f32 %v11781_v42, %v15451_v52  ;;  %4532 = vst.msk [vmem:[#allocation5 + $0x168] sm:$0xf] %vm4501_vm1, %v4466_v26  ;;  %v12481_v26 = vld [vmem:[#allocation8 + $0x78] sm:$0xff]  }
 0x41f   : > { %v11783_v47 = vpop.f32.mrf.mxu1 }
 0x420   : > { %v6818_v41 = vadd.f32 %v6817_v61, %v6657_v57  ;;  %v11784_v9 = vadd.f32 %v11783_v47, %v11782_v36  ;;  %v5238_v6 = vpop.permute.xlu1 %5237  ;;  %v6129_v8 = vld [vmem:[#allocation5 + $0x15c] sm:$0xff]  ;;  %v6833_v36 = vpop.f32.mrf.mxu0 }
 0x421   : > { %v5524_v51 = vpop.permute.xlu0 %5523  ;;  %v12457_v54 = vld [vmem:[#allocation5 + $0x154] ss:$12 sps:$4 sm:$0xff]   ;;  %5302 = vst.msk [vmem:[#allocation5 + $0x178] sm:$0xf] %vm16424_vm3, %v5238_v6  ;;  %v10801_v46 = vcombine.low %v6127_v11, %v6129_v8 }
 0x422   : > { %v6908_v5 = vmax.f32 %v6818_v41, 0.0  ;;  %v6660_v59 = vadd.f32 %v11784_v9, %v15451_v52  ;;  %5589 = vst.msk [vmem:[#allocation5 + $0x16c] sm:$0xf] %vm4501_vm1, %v5524_v51  ;;  %6718 = vmatprep.mubr.bf16.mxu1 %v12457_v54  ;;  %v12478_v9 = vld [vmem:[#allocation8 + $0x100] sm:$0xff]  }
 0x423   : > { %6719 = vmatmul.mubr.bf16.gmra.mxu1 %v10801_v46 }
 0x424   : > { %6941 = vst.msk [vmem:[#allocation6 + $0x60] sm:$0xff] %vm6928_vm9, %v6908_v5  ;;  %v6821_v21 = vadd.f32 %v6820_v19, %v6660_v59  ;;  %v4468_v48 = vpop.permute.xlu1 %4467  ;;  %v12277_v5 = vpop.f32.mrf.mxu0 }
 0x425   : > { %v4755_v0 = vpop.permute.xlu0 %4754  ;;  %4533 = vst.msk [vmem:[#allocation5 + $0x174] sm:$0xf] %vm4501_vm1, %v4468_v48 }
 0x426   : > { %v6909_v34 = vmax.f32 %v6821_v21, 0.0  ;;  %4821 = vst.msk [vmem:[#allocation5 + $0x168] sm:$0xf] %vm4790_vm6, %v4755_v0  ;;  %v6836_v11 = vpop.f32.mrf.mxu0 }
 0x428   : > { %6942 = vst.msk [vmem:[#allocation6 + $0x68] sm:$0xff] %vm6928_vm9, %v6909_v34  ;;  %v5526_v31 = vpop.permute.xlu1 %5525  ;;  %v12280_v29 = vpop.f32.mrf.mxu0 }
 0x429   : > { %v5780_v12 = vpop.permute.xlu0 %5779  ;;  %5590 = vst.msk [vmem:[#allocation5 + $0x178] sm:$0xf] %vm4501_vm1, %v5526_v31  ;;  %vm7052_vm1 = vcmask 1043968  }
 0x42a   : > { %5845 = vst.msk [vmem:[#allocation5 + $0x16c] sm:$0xf] %vm4790_vm6, %v5780_v12 }
 0x42c   : > { %v4757_v7 = vpop.permute.xlu1 %4756 }
 0x42d   : > { %4822 = vst.msk [vmem:[#allocation5 + $0x174] sm:$0xf] %vm4790_vm6, %v4757_v7 }
 0x42e   : > { %v11785_v39 = vpop.f32.mrf.mxu1 }
 0x42f   : > { %v6973_v37 = vld [vmem:[#allocation6 + $0x60] ss:$2 sm:$0xff]  ;;  %v7005_v40 = vld [vmem:[#allocation6 + $0x61] ss:$2 sm:$0xff] }
 0x430   : > { %v11786_v53 = vpop.f32.mrf.mxu1  ;;  %v5782_v23 = vpop.permute.xlu1 %5781  ;;  %v7030_v61 = vmax.f32 %v6973_v37, %v7005_v40  ;;  %v15664_v37 = vld [vmem:[%s15834_s4] ss:$0 sm:$0xff] }
 0x431   : > { %v11787_v10 = vadd.f32 %v11786_v53, %v11785_v39  ;;  %5846 = vst.msk [vmem:[#allocation5 + $0x178] sm:$0xf] %vm4790_vm6, %v5782_v23  ;;  %vm12858_vm6 = vmmov 0  }
 0x432   : > { %v11788_v38 = vpop.f32.mrf.mxu1 }
 0x433   : > { %v6665_v55 = vadd.f32 %v11787_v10, %v15451_v52 }
 0x434   : > { %v11789_v14 = vpop.f32.mrf.mxu1  ;;  %v12462_v1 = vld [vmem:[#allocation5 + $0x168] ss:$12 sps:$4 sm:$0xff]  }
 0x435   : > { %v6826_v22 = vadd.f32 %v15623_v62, %v6665_v55  ;;  %v11790_v27 = vadd.f32 %v11789_v14, %v11788_v38  ;;  %v12472_v62 = vld [vmem:[#allocation8 + $0x118] sm:$0xff]  }
 0x436   : > { %11866 = vmatpush3.bf16.msra.mxu0 %v12472_v62 }
 0x437   : > { %v6910_v24 = vmax.f32 %v6826_v22, 0.0  ;;  %v6668_v13 = vadd.f32 %v11790_v27, %v15451_v52  ;;  %11867 = vmatprep.subr.bf16.mxu0 %v12473_v28 }
 0x438   : > { %v12460_v4 = vld [vmem:[#allocation5 + $0x16c] ss:$12 sps:$4 sm:$0xff]  }
 0x439   : > { %6943 = vst.msk [vmem:[#allocation6 + $0x70] sm:$0xff] %vm6928_vm9, %v6910_v24  ;;  %v6829_v20 = vadd.f32 %v12273_v15, %v6668_v13  ;;  %6726 = vmatprep.mubr.bf16.mxu1 %v12460_v4  ;;  %v6849_v24 = vpop.f32.mrf.mxu0 }
 0x43a   : > { %6727 = vmatmul.mubr.bf16.gmra.mxu1 %v12462_v1  ;;  %11868 = vmatpush3.bf16.msra.mxu0 %v12474_v50 }
 0x43b   : > { %v6911_v58 = vmax.f32 %v6829_v20, 0.0  ;;  %11869 = vmatprep.subr.bf16.mxu0 %v12475_v63  ;;  %v12281_v25 = vpop.f32.mrf.mxu0 }
 0x43d   : > { %6944 = vst.msk [vmem:[#allocation6 + $0x78] sm:$0xff] %vm6928_vm9, %v6911_v58  ;;  %v6852_v50 = vpop.f32.mrf.mxu0 }
 0x43e   : > { %11870 = vmatpush3.bf16.msra.mxu0 %v12476_v33 }
 0x43f   : > { %11871 = vmatprep.subr.bf16.mxu0 %v12477_v60 }
 0x442   : > { %11872 = vmatpush3.bf16.msra.mxu0 %v12478_v9 }
 0x443   : > { %11901 = vmatprep.subr.bf16.mxu0 %v12481_v26 }
 0x444   : > { %v6975_v56 = vld [vmem:[#allocation6 + $0x70] ss:$2 sm:$0xff]  ;;  %v7007_v30 = vld [vmem:[#allocation6 + $0x71] ss:$2 sm:$0xff] }
 0x445   : > { %v7031_v17 = vmax.f32 %v6975_v56, %v7007_v30 }
 0x446   : > { %v11791_v42 = vpop.f32.mrf.mxu1 }
 0x447   : > { %v7057_v49 = vmax.f32 %v7030_v61, %v7031_v17 }
 0x448   : > { %v11792_v57 = vpop.f32.mrf.mxu1 }
 0x449   : > { %v11793_v15 = vadd.f32 %v11792_v57, %v11791_v42  ;;  %v11706_v47 = vpack.c.bf16 %v7057_v49, %v7057_v49  ;;  %v12523_v57 = vld [vmem:[#allocation8 + $0x1f8] sm:$0xff]  }
 0x44a   : > { %v11794_v41 = vpop.f32.mrf.mxu1  ;;  %11879 = vmatprep.subr.bf16.mxu1 %v12523_v57  ;;  %v12491_v57 = vld [vmem:[#allocation8 + $0x50] sm:$0xff]  }
 0x44b   : > { %v6673_v2 = vadd.f32 %v11793_v15, %v15451_v52  ;;  %7062 = vrot.lane.b32.xlu1 %v11706_v47, %s12856_s21  ;;  %v12524_v15 = vld [vmem:[#allocation8 + $0x1b8] sm:$0xff]  }
 0x44c   : > { %v11795_v59 = vpop.f32.mrf.mxu1  ;;  %11880 = vmatpush3.bf16.msra.mxu1 %v12524_v15  ;;  %v12492_v15 = vld [vmem:[#allocation8 + $0x10] sm:$0xff]  }
 0x44d   : > { %v6834_v19 = vadd.f32 %v6833_v36, %v6673_v2  ;;  %v11796_v21 = vadd.f32 %v11795_v59, %v11794_v41 }
 0x44f   : > { %v6912_v6 = vmax.f32 %v6834_v19, 0.0  ;;  %v6676_v51 = vadd.f32 %v11796_v21, %v15451_v52  ;;  %v15673_v26 = vpop.f32.mrf.mxu0 }
 0x451   : > { %6945 = vst.msk [vmem:[#allocation6 + $0x80] sm:$0xff] %vm6928_vm9, %v6912_v6  ;;  %v6837_v8 = vadd.f32 %v6836_v11, %v6676_v51  ;;  %v6865_v11 = vpop.f32.mrf.mxu0 }
 0x453   : > { %v6913_v54 = vmax.f32 %v6837_v8, 0.0 }
 0x455   : > { %6946 = vst.msk [vmem:[#allocation6 + $0x88] sm:$0xff] %vm6928_vm9, %v6913_v54  ;;  %v12533_v54 = vld [vmem:[#allocation8 + $0x1f0] sm:$0xff]  }
 0x456   : > { %11881 = vmatprep.subr.bf16.mxu1 %v12533_v54 }
 0x45c   : > { %v6977_v38 = vld [vmem:[#allocation6 + $0x80] ss:$2 sm:$0xff]  ;;  %v7009_v55 = vld [vmem:[#allocation6 + $0x81] ss:$2 sm:$0xff] }
 0x45d   : > { %v7032_v22 = vmax.f32 %v6977_v38, %v7009_v55  ;;  %v12545_v55 = vld [vmem:[#allocation8 + $0x1e8] sm:$0xff]  }
 0x45e   : > { %v11797_v34 = vpop.f32.mrf.mxu1 }
 0x460   : > { %v11798_v48 = vpop.f32.mrf.mxu1 }
 0x461   : > { %v7050_v46 = vpop.permute.xlu0 %7049  ;;  %v11799_v0 = vadd.f32 %v11798_v48, %v11797_v34 }
 0x462   : > { %7053 = vst.msk [vmem:[#allocation7] sm:$0xf] %vm7052_vm1, %v7050_v46  ;;  %v11800_v31 = vpop.f32.mrf.mxu1  ;;  %v12534_v46 = vld [vmem:[#allocation8 + $0x1b0] sm:$0xff]  }
 0x463   : > { %v6681_v12 = vadd.f32 %v11799_v0, %v15451_v52  ;;  %11882 = vmatpush3.bf16.msra.mxu1 %v12534_v46  ;;  %v12497_v46 = vld [vmem:[#allocation8 + $0x278] sm:$0xff]  }
 0x464   : > { %v11801_v7 = vpop.f32.mrf.mxu1  ;;  %11883 = vmatprep.subr.bf16.mxu1 %v12545_v55 }
 0x465   : > { %v6842_v39 = vadd.f32 %v12276_v3, %v6681_v12  ;;  %v11802_v43 = vadd.f32 %v11801_v7, %v11800_v31  ;;  %v12285_v12 = vpop.f32.mrf.mxu0 }
 0x467   : > { %v6914_v53 = vmax.f32 %v6842_v39, 0.0  ;;  %v6684_v35 = vadd.f32 %v11802_v43, %v15451_v52 }
 0x469   : > { %6947 = vst.msk [vmem:[#allocation6 + $0x90] sm:$0xff] %vm6928_vm9, %v6914_v53  ;;  %v6845_v10 = vadd.f32 %v12277_v5, %v6684_v35 }
 0x46b   : > { %v6915_v23 = vmax.f32 %v6845_v10, 0.0  ;;  %v6868_v10 = vpop.f32.mrf.mxu0 }
 0x46d   : > { %6948 = vst.msk [vmem:[#allocation6 + $0x98] sm:$0xff] %vm6928_vm9, %v6915_v23 }
 0x474   : > { %v6979_v14 = vld [vmem:[#allocation6 + $0x90] ss:$2 sm:$0xff]  ;;  %v7011_v32 = vld [vmem:[#allocation6 + $0x91] ss:$2 sm:$0xff] }
 0x475   : > { %v7033_v27 = vmax.f32 %v6979_v14, %v7011_v32 }
 0x476   : > { %v11803_v16 = vpop.f32.mrf.mxu1 }
 0x477   : > { %v7066_v18 = vmax.f32 %v7032_v22, %v7033_v27 }
 0x478   : > { %v11804_v13 = vpop.f32.mrf.mxu1 }
 0x479   : > { %v11805_v44 = vadd.f32 %v11804_v13, %v11803_v16  ;;  %v7067_v20 = vpack.c.bf16 %v7066_v18, %v7066_v18  ;;  %v12555_v13 = vld [vmem:[#allocation8 + $0x1e0] sm:$0xff]  }
 0x47a   : > { %v11806_v4 = vpop.f32.mrf.mxu1 }
 0x47b   : > { %v6689_v1 = vadd.f32 %v11805_v44, %v15451_v52  ;;  %7068 = vst.msk [vmem:[#allocation7 + $0x8] sm:$0xf] %vm7042_vm4, %v7067_v20  ;;  %v12556_v44 = vld [vmem:[#allocation8 + $0x1a0] sm:$0xff]   ;;  %v12483_v20 = vld [vmem:[#allocation8 + $0x70] sm:$0xff]  }
 0x47c   : > { %v11807_v58 = vpop.f32.mrf.mxu1 }
 0x47d   : > { %v6850_v45 = vadd.f32 %v6849_v24, %v6689_v1  ;;  %v11808_v62 = vadd.f32 %v11807_v58, %v11806_v4  ;;  %v12482_v24 = vld [vmem:[#allocation8 + $0x38] sm:$0xff]   ;;  %v12484_v1 = vld [vmem:[#allocation8 + $0x30] sm:$0xff]  }
 0x47f   : > { %v6916_v28 = vmax.f32 %v6850_v45, 0.0  ;;  %v6692_v40 = vadd.f32 %v15664_v37, %v11808_v62 }
 0x481   : > { %6949 = vst.msk [vmem:[#allocation6 + $0xa0] sm:$0xff] %vm6928_vm9, %v6916_v28  ;;  %v6853_v63 = vadd.f32 %v6852_v50, %v6692_v40  ;;  %v12486_v28 = vld [vmem:[#allocation8 + $0x28] sm:$0xff]   ;;  %v12487_v50 = vld [vmem:[#allocation8 + $0x60] sm:$0xff]  }
 0x483   : > { %v6917_v3 = vmax.f32 %v6853_v63, 0.0 }
 0x485   : > { %6950 = vst.msk [vmem:[#allocation6 + $0xa8] sm:$0xff] %vm6928_vm9, %v6917_v3 }
 0x48c   : > { %v6981_v9 = vld [vmem:[#allocation6 + $0xa0] ss:$2 sm:$0xff]  ;;  %v7013_v2 = vld [vmem:[#allocation6 + $0xa1] ss:$2 sm:$0xff] }
 0x48d   : > { %v7034_v19 = vmax.f32 %v6981_v9, %v7013_v2  ;;  %v15689_v9 = vpop.f32.mrf.mxu0 }
 0x48e   : > { %v11809_v52 = vpop.f32.mrf.mxu1 }
 0x48f   : > { %v6881_v54 = vpop.f32.mrf.mxu0 }
 0x490   : > { %v11810_v56 = vpop.f32.mrf.mxu1 }
 0x491   : > { %v11811_v30 = vadd.f32 %v11810_v56, %v11809_v52  ;;  %v12488_v56 = vld [vmem:[#allocation8 + $0x20] sm:$0xff]  }
 0x492   : > { %v11812_v61 = vpop.f32.mrf.mxu1 }
 0x493   : > { %v6697_v17 = vadd.f32 %v15664_v37, %v11811_v30 }
 0x494   : > { %v11813_v42 = vpop.f32.mrf.mxu1 }
 0x495   : > { %v6858_v33 = vadd.f32 %v12280_v29, %v6697_v17  ;;  %v11814_v49 = vadd.f32 %v11813_v42, %v11812_v61  ;;  %v12546_v29 = vld [vmem:[#allocation8 + $0x1a8] sm:$0xff]   ;;  %v12489_v17 = vld [vmem:[#allocation8 + $0x58] sm:$0xff]  }
 0x496   : > { %11884 = vmatpush3.bf16.msra.mxu1 %v12546_v29 }
 0x497   : > { %v6918_v60 = vmax.f32 %v6858_v33, 0.0  ;;  %v6700_v36 = vadd.f32 %v15664_v37, %v11814_v49  ;;  %11885 = vmatprep.subr.bf16.mxu1 %v12555_v13  ;;  %v12490_v33 = vld [vmem:[#allocation8 + $0x18] sm:$0xff]  }
 0x498   : > { %v12565_v49 = vld [vmem:[#allocation8 + $0x1d8] sm:$0xff]  }
 0x499   : > { %6951 = vst.msk [vmem:[#allocation6 + $0xb0] sm:$0xff] %vm6928_vm9, %v6918_v60  ;;  %v6861_v47 = vadd.f32 %v12281_v25, %v6700_v36  ;;  %v12485_v25 = vld [vmem:[#allocation8 + $0x68] sm:$0xff]   ;;  %v12566_v60 = vld [vmem:[#allocation8 + $0x198] sm:$0xff]  }
 0x49a   : > { %11886 = vmatpush3.bf16.msra.mxu1 %v12556_v44  ;;  %v12504_v44 = vld [vmem:[#allocation8 + $0x228] sm:$0xff]  }
 0x49b   : > { %v6919_v41 = vmax.f32 %v6861_v47, 0.0  ;;  %11887 = vmatprep.subr.bf16.mxu1 %v12565_v49  ;;  %v12493_v47 = vld [vmem:[#allocation8 + $0x48] sm:$0xff]   ;;  %v12514_v49 = vld [vmem:[#allocation8 + $0x200] sm:$0xff]  }
 0x49d   : > { %6952 = vst.msk [vmem:[#allocation6 + $0xb8] sm:$0xff] %vm6928_vm9, %v6919_v41  ;;  %v12494_v41 = vld [vmem:[#allocation8 + $0x8] sm:$0xff]  }
 0x49e   : > { %11888 = vmatpush3.bf16.msra.mxu1 %v12566_v60 }
 0x4a4   : > { %v6983_v5 = vld [vmem:[#allocation6 + $0xb0] ss:$2 sm:$0xff]  ;;  %v7015_v59 = vld [vmem:[#allocation6 + $0xb1] ss:$2 sm:$0xff] }
 0x4a5   : > { %v7035_v21 = vmax.f32 %v6983_v5, %v7015_v59  ;;  %v11815_v6 = vpop.f32.mrf.mxu1  ;;  %v12495_v5 = vld [vmem:[#allocation8 + $0x40] sm:$0xff]  }
 0x4a7   : > { %v7069_v51 = vmax.f32 %v7034_v19, %v7035_v21  ;;  %v11816_v8 = vpop.f32.mrf.mxu1 }
 0x4a8   : > { %v11817_v34 = vadd.f32 %v11816_v8, %v11815_v6  ;;  %v12496_v8 = vld [vmem:[#allocation8] sm:$0xff]  }
 0x4a9   : > { %v11707_v48 = vpack.c.bf16 %v7069_v51, %v7069_v51  ;;  %v11818_v0 = vpop.f32.mrf.mxu1 }
 0x4aa   : > { %v6705_v31 = vadd.f32 %v15664_v37, %v11817_v34 }
 0x4ab   : > { %7074 = vrot.lane.b32.xlu0 %v11707_v48, %s12856_s21  ;;  %v11819_v7 = vpop.f32.mrf.mxu1 }
 0x4ac   : > { %v6866_v39 = vadd.f32 %v6865_v11, %v6705_v31  ;;  %v11820_v43 = vadd.f32 %v11819_v7, %v11818_v0 }
 0x4ae   : > { %v6920_v53 = vmax.f32 %v6866_v39, 0.0  ;;  %v6708_v35 = vadd.f32 %v15664_v37, %v11820_v43  ;;  %v12498_v39 = vld [vmem:[#allocation8 + $0x238] sm:$0xff]   ;;  %v15697_v43 = vpop.f32.mrf.mxu0 }
 0x4b0   : > { %6953 = vst.msk [vmem:[#allocation6 + $0xc0] sm:$0xff] %vm6928_vm9, %v6920_v53  ;;  %v6869_v23 = vadd.f32 %v6868_v10, %v6708_v35  ;;  %v12575_v53 = vld [vmem:[#allocation8 + $0x1d0] sm:$0xff]  }
 0x4b1   : > { %v12576_v35 = vld [vmem:[#allocation8 + $0x190] sm:$0xff]   ;;  %11889 = vmatprep.subr.bf16.mxu1 %v12575_v53  ;;  %v12609_v53 = vld [vmem:[#allocation8 + $0xf8] sm:$0xff]  }
 0x4b2   : > { %v6921_v38 = vmax.f32 %v6869_v23, 0.0  ;;  %v12501_v23 = vld [vmem:[#allocation8 + $0x270] sm:$0xff]   ;;  %11890 = vmatpush3.bf16.msra.mxu1 %v12576_v35 }
 0x4b3   : > { %v12527_v35 = vld [vmem:[#allocation8 + $0x350] sm:$0xff]  }
 0x4b4   : > { %6954 = vst.msk [vmem:[#allocation6 + $0xc8] sm:$0xff] %vm6928_vm9, %v6921_v38 }
 0x4bb   : > { %v6985_v2 = vld [vmem:[#allocation6 + $0xc0] ss:$2 sm:$0xff] }
 0x4bd   : > { %v7063_v14 = vpop.permute.xlu1 %7062 }
 0x4be   : > { %7065 = vst.msk [vmem:[#allocation7 + $0x4] sm:$0xf] %vm7052_vm1, %v7063_v14 }
 0x4c5   : > { %v7090_v32 = vld [vmem:[#allocation7] sm:$0x11]  ;;  %v15691_v21 = vld [vmem:[#allocation7] sm:$0x22] }
 0x4c6   : > { %v15681_v22 = vcombine.low %v7090_v32, %v7090_v32  ;;  %v10846_v27 = vcombine.high %v7090_v32, %v7090_v32  ;;  %v15695_v0 = vcombine.high %v15691_v21, %v15691_v21  ;;  %v6884_v32 = vpop.f32.mrf.mxu0  ;;  %v15710_v60 = vcombine.low %v15691_v21, %v15691_v21 }
 0x4c8   : > { %v7231_v16 = vshrl.u32 %v15681_v22, 16  ;;  %v7234_v18 = vshrl.u32 %v10846_v27, 16  ;;  %v7871_v55 = vrot.slane %v15695_v0, 1 }
 0x4ca   : > { %7470 = vmatprep.mubr.bf16.mxu0 %v7234_v18 }
 0x4cb   : > { %7471 = vmatmul.mubr.bf16.vlgmr.msra.gmra.mxu0 %v7231_v16  ;;  %v11821_v4 = vpop.f32.mrf.mxu1 }
 0x4cc   : > { %11902 = vmatpush3.bf16.msra.mxu0 %v12482_v24  ;;  %7746 = vmatprep.mubr.bf16.mxu0 %v10846_v27  ;;  %v12502_v27 = vld [vmem:[#allocation8 + $0x230] sm:$0xff]   ;;  %v12503_v24 = vld [vmem:[#allocation8 + $0x268] sm:$0xff]  }
 0x4cd   : > { %11903 = vmatprep.subr.bf16.mxu0 %v12483_v20  ;;  %v11822_v58 = vpop.f32.mrf.mxu1 }
 0x4ce   : > { %v11823_v45 = vadd.f32 %v11822_v58, %v11821_v4  ;;  %v12506_v4 = vld [vmem:[#allocation8 + $0x220] sm:$0xff]   ;;  %v12587_v58 = vld [vmem:[#allocation8 + $0x1c8] sm:$0xff]  }
 0x4cf   : > { %v11824_v62 = vpop.f32.mrf.mxu1  ;;  %11891 = vmatprep.subr.bf16.mxu1 %v12587_v58  ;;  %v12544_v58 = vld [vmem:[#allocation8 + $0x420] sm:$0xff]  }
 0x4d0   : > { %11904 = vmatpush3.bf16.msra.mxu0 %v12484_v1  ;;  %v6713_v40 = vadd.f32 %v15664_v37, %v11823_v45  ;;  %v12507_v1 = vld [vmem:[#allocation8 + $0x258] sm:$0xff]   ;;  %v12588_v45 = vld [vmem:[#allocation8 + $0x188] sm:$0xff]  }
 0x4d1   : > { %11905 = vmatprep.subr.bf16.mxu0 %v12485_v25  ;;  %v11825_v63 = vpop.f32.mrf.mxu1  ;;  %v12508_v25 = vld [vmem:[#allocation8 + $0x218] sm:$0xff]   ;;  %11892 = vmatpush3.bf16.msra.mxu1 %v12588_v45 }
 0x4d2   : > { %v6874_v3 = vadd.f32 %v15673_v26, %v6713_v40  ;;  %v11826_v52 = vadd.f32 %v11825_v63, %v11824_v62  ;;  %v7017_v26 = vld [vmem:[#allocation6 + $0xc1] ss:$2 sm:$0xff] }
 0x4d3   : > { %v7036_v6 = vmax.f32 %v6985_v2, %v7017_v26  ;;  %v12509_v62 = vld [vmem:[#allocation8 + $0x250] sm:$0xff]   ;;  %v12597_v2 = vld [vmem:[#allocation8 + $0x1c0] sm:$0xff]   ;;  %v12547_v45 = vld [vmem:[#allocation8 + $0x458] sm:$0xff]  }
 0x4d4   : > { %11906 = vmatpush3.bf16.msra.mxu0 %v12486_v28  ;;  %v6922_v30 = vmax.f32 %v6874_v3, 0.0  ;;  %v6716_v61 = vadd.f32 %v15664_v37, %v11826_v52  ;;  %v12510_v40 = vld [vmem:[#allocation8 + $0x210] sm:$0xff]   ;;  %v12598_v26 = vld [vmem:[#allocation8 + $0x180] sm:$0xff]   ;;  %11893 = vmatprep.subr.bf16.mxu1 %v12597_v2 }
 0x4d5   : > { %11907 = vmatprep.subr.bf16.mxu0 %v12487_v50  ;;  %v12511_v50 = vld [vmem:[#allocation8 + $0x248] sm:$0xff]   ;;  %11894 = vmatpush3.bf16.msra.mxu1 %v12598_v26  ;;  %v12569_v2 = vld [vmem:[#allocation8 + $0x550] sm:$0xff]  }
 0x4d6   : > { %6955 = vst.msk [vmem:[#allocation6 + $0xd0] sm:$0xff] %vm6928_vm9, %v6922_v30  ;;  %v6877_v42 = vadd.f32 %v12285_v12, %v6716_v61  ;;  %v12513_v61 = vld [vmem:[#allocation8 + $0x240] sm:$0xff]   ;;  %11923 = vmatprep.subr.bf16.mxu1 %v12609_v53  ;;  %v12570_v26 = vld [vmem:[#allocation8 + $0x510] sm:$0xff]  }
 0x4d7   : > { %v12591_v53 = vld [vmem:[#allocation8 + $0x650] sm:$0xff]  }
 0x4d8   : > { %11908 = vmatpush3.bf16.msra.mxu0 %v12488_v56  ;;  %v6923_v36 = vmax.f32 %v6877_v42, 0.0  ;;  %v12512_v56 = vld [vmem:[#allocation8 + $0x208] sm:$0xff]  }
 0x4d9   : > { %11909 = vmatprep.subr.bf16.mxu0 %v12489_v17 }
 0x4da   : > { %6956 = vst.msk [vmem:[#allocation6 + $0xd8] sm:$0xff] %vm6928_vm9, %v6923_v36 }
 0x4dc   : > { %11910 = vmatpush3.bf16.msra.mxu0 %v12490_v33 }
 0x4dd   : > { %11911 = vmatprep.subr.bf16.mxu0 %v12491_v57 }
 0x4e0   : > { %11912 = vmatpush3.bf16.msra.mxu0 %v12492_v15  ;;  %v12515_v15 = vld [vmem:[#allocation8 + $0x378] sm:$0xff]  }
 0x4e1   : > { %11913 = vmatprep.subr.bf16.mxu0 %v12493_v47  ;;  %v6987_v59 = vld [vmem:[#allocation6 + $0xd0] ss:$2 sm:$0xff]  ;;  %v7019_v19 = vld [vmem:[#allocation6 + $0xd1] ss:$2 sm:$0xff]  ;;  %v8220_v47 = vshrl.u32 %v15695_v0, 16 }
 0x4e2   : > { %v7037_v51 = vmax.f32 %v6987_v59, %v7019_v19  ;;  %v7870_v59 = vrot.slane %v15710_v60, 1  ;;  %v12517_v19 = vld [vmem:[#allocation8 + $0x370] sm:$0xff]  }
 0x4e3   : > { %v11827_v11 = vpop.f32.mrf.mxu1  ;;  %v8222_v21 = vrot.slane %v8220_v47, 1  ;;  %v12564_v47 = vld [vmem:[#allocation8 + $0x520] sm:$0xff]  }
 0x4e4   : > { %11914 = vmatpush3.bf16.msra.mxu0 %v12494_v41  ;;  %v7078_v34 = vmax.f32 %v7036_v6, %v7037_v51  ;;  %v12519_v6 = vld [vmem:[#allocation8 + $0x368] sm:$0xff]  }
 0x4e5   : > { %11915 = vmatprep.subr.bf16.mxu0 %v12495_v5  ;;  %v11828_v48 = vpop.f32.mrf.mxu1  ;;  %v12520_v51 = vld [vmem:[#allocation8 + $0x328] sm:$0xff]  }
 0x4e6   : > { %v11829_v31 = vadd.f32 %v11828_v48, %v11827_v11  ;;  %v7079_v12 = vpack.c.bf16 %v7078_v34, %v7078_v34 }
 0x4e7   : > { %v11830_v7 = vpop.f32.mrf.mxu1 }
 0x4e8   : > { %11916 = vmatpush3.bf16.msra.mxu0 %v12496_v8  ;;  %v6721_v10 = vadd.f32 %v15664_v37, %v11829_v31  ;;  %7080 = vst.msk [vmem:[#allocation7 + $0xc] sm:$0xf] %vm7042_vm4, %v7079_v12  ;;  %v12522_v31 = vld [vmem:[#allocation8 + $0x320] sm:$0xff]  }
 0x4e9   : > { %11945 = vmatprep.subr.bf16.mxu0 %v12497_v46  ;;  %v11831_v38 = vpop.f32.mrf.mxu1 }
 0x4ea   : > { %v11832_v29 = vadd.f32 %v11831_v38, %v11830_v7  ;;  %v6882_v14 = vadd.f32 %v6881_v54, %v6721_v10  ;;  %v12521_v54 = vld [vmem:[#allocation8 + $0x360] sm:$0xff]   ;;  %v12525_v7 = vld [vmem:[#allocation8 + $0x358] sm:$0xff]   ;;  %v12528_v10 = vld [vmem:[#allocation8 + $0x310] sm:$0xff]  }
 0x4eb   : > { %7747 = vmatmul.mubr.bf16.vlgmr.msra.gmra.mxu0 %v15681_v22  ;;  %v12505_v22 = vld [vmem:[#allocation8 + $0x260] sm:$0xff]   ;;  %v12529_v38 = vld [vmem:[#allocation8 + $0x348] sm:$0xff]  }
 0x4ec   : > { %11946 = vmatpush3.bf16.msra.mxu0 %v12498_v39  ;;  %8102 = vmatprep.mubr.bf16.mxu0 %v7871_v55  ;;  %v6924_v16 = vmax.f32 %v6882_v14, 0.0  ;;  %v6724_v18 = vadd.f32 %v15664_v37, %v11832_v29  ;;  %v12530_v55 = vld [vmem:[#allocation8 + $0x308] sm:$0xff]   ;;  %v12531_v29 = vld [vmem:[#allocation8 + $0x340] sm:$0xff]   ;;  %v8508_v14 = vld [vmem:[#allocation7] sm:$0x44] }
 0x4ed   : > { %11947 = vmatprep.subr.bf16.mxu0 %v12501_v23 }
 0x4ee   : > { %6957 = vst.msk [vmem:[#allocation6 + $0xe0] sm:$0xff] %vm6928_vm9, %v6924_v16  ;;  %v6885_v13 = vadd.f32 %v6884_v32, %v6724_v18  ;;  %v12532_v32 = vld [vmem:[#allocation8 + $0x300] sm:$0xff]   ;;  %v12535_v16 = vld [vmem:[#allocation8 + $0x478] sm:$0xff]   ;;  %v10982_v18 = vcombine.high %v8508_v14, %v8508_v14 }
 0x4f0   : > { %11948 = vmatpush3.bf16.msra.mxu0 %v12502_v27  ;;  %v6925_v20 = vmax.f32 %v6885_v13, 0.0  ;;  %v8216_v27 = vshrl.u32 %v15710_v60, 16  ;;  %v12560_v60 = vld [vmem:[#allocation8 + $0x530] sm:$0xff]  }
 0x4f1   : > { %11949 = vmatprep.subr.bf16.mxu0 %v12503_v24  ;;  %v12536_v24 = vld [vmem:[#allocation8 + $0x438] sm:$0xff]  }
 0x4f2   : > { %6958 = vst.msk [vmem:[#allocation6 + $0xe8] sm:$0xff] %vm6928_vm9, %v6925_v20  ;;  %v8218_v13 = vrot.slane %v8216_v27, 1  ;;  %v8585_v20 = vrot.slane %v10982_v18, 2  ;;  %v12600_v27 = vld [vmem:[#allocation8 + $0x738] sm:$0xff]  }
 0x4f4   : > { %11950 = vmatpush3.bf16.msra.mxu0 %v12504_v44  ;;  %v12539_v44 = vld [vmem:[#allocation8 + $0x470] sm:$0xff]  }
 0x4f5   : > { %11951 = vmatprep.subr.bf16.mxu0 %v12505_v22  ;;  %v12540_v22 = vld [vmem:[#allocation8 + $0x430] sm:$0xff]  }
 0x4f8   : > { %11952 = vmatpush3.bf16.msra.mxu0 %v12506_v4  ;;  %v12541_v4 = vld [vmem:[#allocation8 + $0x468] sm:$0xff]  }
 0x4f9   : > { %11953 = vmatprep.subr.bf16.mxu0 %v12507_v1  ;;  %v6989_v11 = vld [vmem:[#allocation6 + $0xe0] ss:$2 sm:$0xff]  ;;  %v7021_v8 = vld [vmem:[#allocation6 + $0xe1] ss:$2 sm:$0xff]  ;;  %v12542_v1 = vld [vmem:[#allocation8 + $0x428] sm:$0xff]  }
 0x4fa   : > { %v11833_v28 = vpop.f32.mrf.mxu1  ;;  %v7038_v48 = vmax.f32 %v6989_v11, %v7021_v8  ;;  %v12578_v8 = vld [vmem:[#allocation8 + $0x638] sm:$0xff]  }
 0x4fc   : > { %11954 = vmatpush3.bf16.msra.mxu0 %v12508_v25  ;;  %v11834_v63 = vpop.f32.mrf.mxu1  ;;  %v12543_v25 = vld [vmem:[#allocation8 + $0x460] sm:$0xff]  }
 0x4fd   : > { %11955 = vmatprep.subr.bf16.mxu0 %v12509_v62  ;;  %v11835_v3 = vadd.f32 %v11834_v63, %v11833_v28  ;;  %v12548_v62 = vld [vmem:[#allocation8 + $0x418] sm:$0xff]   ;;  %v12549_v28 = vld [vmem:[#allocation8 + $0x450] sm:$0xff]   ;;  %v12552_v63 = vld [vmem:[#allocation8 + $0x408] sm:$0xff]  }
 0x4fe   : > { %v11836_v52 = vpop.f32.mrf.mxu1 }
 0x4ff   : > { %v6729_v30 = vadd.f32 %v15664_v37, %v11835_v3  ;;  %v12553_v3 = vld [vmem:[#allocation8 + $0x440] sm:$0xff]  }
 0x500   : > { %11956 = vmatpush3.bf16.msra.mxu0 %v12510_v40  ;;  %v11837_v17 = vpop.f32.mrf.mxu1  ;;  %v12550_v40 = vld [vmem:[#allocation8 + $0x410] sm:$0xff]  }
 0x501   : > { %11957 = vmatprep.subr.bf16.mxu0 %v12511_v50  ;;  %v6890_v42 = vadd.f32 %v15689_v9, %v6729_v30  ;;  %v11838_v33 = vadd.f32 %v11837_v17, %v11836_v52  ;;  %v12516_v9 = vld [vmem:[#allocation8 + $0x338] sm:$0xff]   ;;  %v12551_v50 = vld [vmem:[#allocation8 + $0x448] sm:$0xff]   ;;  %v12554_v52 = vld [vmem:[#allocation8 + $0x400] sm:$0xff]  }
 0x502   : > { %v12557_v30 = vld [vmem:[#allocation8 + $0x578] sm:$0xff]  }
 0x503   : > { %v6926_v36 = vmax.f32 %v6890_v42, 0.0  ;;  %v6732_v57 = vadd.f32 %v15664_v37, %v11838_v33  ;;  %v12518_v37 = vld [vmem:[#allocation8 + $0x330] sm:$0xff]   ;;  %v12558_v17 = vld [vmem:[#allocation8 + $0x538] sm:$0xff]  }
 0x504   : > { %11958 = vmatpush3.bf16.msra.mxu0 %v12512_v56  ;;  %v10981_v56 = vcombine.low %v8508_v14, %v8508_v14  ;;  %v12559_v33 = vld [vmem:[#allocation8 + $0x570] sm:$0xff]   ;;  %v12599_v14 = vld [vmem:[#allocation8 + $0x778] sm:$0xff]  }
 0x505   : > { %11959 = vmatprep.subr.bf16.mxu0 %v12513_v61  ;;  %6959 = vst.msk [vmem:[#allocation6 + $0xf0] sm:$0xff] %vm6928_vm9, %v6926_v36  ;;  %v6893_v41 = vadd.f32 %v15697_v43, %v6732_v57  ;;  %v12526_v43 = vld [vmem:[#allocation8 + $0x318] sm:$0xff]   ;;  %v8934_v61 = vshrl.u32 %v10982_v18, 16  ;;  %v12561_v36 = vld [vmem:[#allocation8 + $0x568] sm:$0xff]   ;;  %v12601_v18 = vld [vmem:[#allocation8 + $0x770] sm:$0xff]  }
 0x506   : > { %v8584_v42 = vrot.slane %v10981_v56, 2  ;;  %v12562_v57 = vld [vmem:[#allocation8 + $0x528] sm:$0xff]  }
 0x507   : > { %v6927_v5 = vmax.f32 %v6893_v41, 0.0  ;;  %v12567_v41 = vld [vmem:[#allocation8 + $0x558] sm:$0xff]  }
 0x508   : > { %11960 = vmatpush3.bf16.msra.mxu0 %v12514_v49  ;;  %v8936_v49 = vrot.slane %v8934_v61, 2  ;;  %v12613_v61 = vld [vmem:[#allocation8 + $0xf0] sm:$0xff]  }
 0x509   : > { %11989 = vmatprep.subr.bf16.mxu0 %v12515_v15  ;;  %6960 = vst.msk [vmem:[#allocation6 + $0xf8] sm:$0xff] %vm6928_vm9, %v6927_v5  ;;  %v12563_v15 = vld [vmem:[#allocation8 + $0x560] sm:$0xff]   ;;  %v12571_v5 = vld [vmem:[#allocation8 + $0x548] sm:$0xff]   ;;  %vm10045_vm9 = vcmask 40960  }
 0x50b   : > { %8103 = vmatmul.mubr.bf16.vlgmr.msra.gmra.mxu0 %v7870_v59  ;;  %v12572_v59 = vld [vmem:[#allocation8 + $0x508] sm:$0xff]  }
 0x50c   : > { %11990 = vmatpush3.bf16.msra.mxu0 %v12516_v9  ;;  %8459 = vmatprep.mubr.bf16.mxu0 %v8222_v21  ;;  %v12568_v9 = vld [vmem:[#allocation8 + $0x518] sm:$0xff]   ;;  %v9222_v21 = vld [vmem:[#allocation7] sm:$0x88] }
 0x50d   : > { %11991 = vmatprep.subr.bf16.mxu0 %v12517_v19  ;;  %v12573_v19 = vld [vmem:[#allocation8 + $0x540] sm:$0xff]   ;;  %v11050_v11 = vcombine.high %v9222_v21, %v9222_v21 }
 0x510   : > { %11992 = vmatpush3.bf16.msra.mxu0 %v12518_v37  ;;  %v6991_v46 = vld [vmem:[#allocation6 + $0xf0] ss:$2 sm:$0xff]  ;;  %v7023_v34 = vld [vmem:[#allocation6 + $0xf1] ss:$2 sm:$0xff] }
 0x511   : > { %11993 = vmatprep.subr.bf16.mxu0 %v12519_v6  ;;  %v7039_v0 = vmax.f32 %v6991_v46, %v7023_v34  ;;  %v12574_v37 = vld [vmem:[#allocation8 + $0x500] sm:$0xff]   ;;  %v8930_v6 = vshrl.u32 %v10981_v56, 16  ;;  %v12581_v46 = vld [vmem:[#allocation8 + $0x670] sm:$0xff]   ;;  %v9299_v34 = vrot.slane %v11050_v11, 3 }
 0x513   : > { %v7081_v12 = vmax.f32 %v7038_v48, %v7039_v0  ;;  %v12582_v48 = vld [vmem:[#allocation8 + $0x630] sm:$0xff]   ;;  %v12583_v0 = vld [vmem:[#allocation8 + $0x668] sm:$0xff]  }
 0x514   : > { %11994 = vmatpush3.bf16.msra.mxu0 %v12520_v51  ;;  %v12577_v51 = vld [vmem:[#allocation8 + $0x678] sm:$0xff]  }
 0x515   : > { %11995 = vmatprep.subr.bf16.mxu0 %v12521_v54  ;;  %v11708_v39 = vpack.c.bf16 %v7081_v12, %v7081_v12  ;;  %v8932_v54 = vrot.slane %v8930_v6, 2  ;;  %v12585_v12 = vld [vmem:[#allocation8 + $0x660] sm:$0xff]   ;;  %v12628_v6 = vld [vmem:[#allocation8 + $0x90] sm:$0xff]  }
 0x517   : > { %7086 = vrot.lane.b32.xlu1 %v11708_v39, %s12856_s21  ;;  %v12589_v39 = vld [vmem:[#allocation8 + $0x658] sm:$0xff]  }
 0x518   : > { %11996 = vmatpush3.bf16.msra.mxu0 %v12522_v31  ;;  %v12584_v31 = vld [vmem:[#allocation8 + $0x628] sm:$0xff]  }
 0x519   : > { %11997 = vmatprep.subr.bf16.mxu0 %v12525_v7  ;;  %v12586_v7 = vld [vmem:[#allocation8 + $0x620] sm:$0xff]  }
 0x51c   : > { %11998 = vmatpush3.bf16.msra.mxu0 %v12526_v43  ;;  %v12590_v43 = vld [vmem:[#allocation8 + $0x618] sm:$0xff]  }
 0x51d   : > { %v7075_v23 = vpop.permute.xlu0 %7074  ;;  %11999 = vmatprep.subr.bf16.mxu0 %v12527_v35  ;;  %v12592_v35 = vld [vmem:[#allocation8 + $0x610] sm:$0xff]  }
 0x51e   : > { %7077 = vst.msk [vmem:[#allocation7 + $0x8] sm:$0xf] %vm7052_vm1, %v7075_v23  ;;  %v12594_v23 = vld [vmem:[#allocation8 + $0x608] sm:$0xff]  }
 0x520   : > { %12000 = vmatpush3.bf16.msra.mxu0 %v12528_v10  ;;  %v12593_v10 = vld [vmem:[#allocation8 + $0x648] sm:$0xff]  }
 0x521   : > { %12001 = vmatprep.subr.bf16.mxu0 %v12529_v38  ;;  %v12595_v38 = vld [vmem:[#allocation8 + $0x640] sm:$0xff]  }
 0x524   : > { %12002 = vmatpush3.bf16.msra.mxu0 %v12530_v55  ;;  %v12596_v55 = vld [vmem:[#allocation8 + $0x600] sm:$0xff]  }
 0x525   : > { %12003 = vmatprep.subr.bf16.mxu0 %v12531_v29  ;;  %v15721_v29 = vcombine.low %v9222_v21, %v9222_v21 }
 0x528   : > { %12004 = vmatpush3.bf16.msra.mxu0 %v12532_v32  ;;  %v9648_v32 = vshrl.u32 %v11050_v11, 16  ;;  %v12629_v11 = vld [vmem:[#allocation8 + $0xc8] sm:$0xff]  }
 0x529   : > { %12033 = vmatprep.subr.bf16.mxu0 %v12535_v16  ;;  %v9298_v16 = vrot.slane %v15721_v29, 3 }
 0x52b   : > { %8460 = vmatmul.mubr.bf16.vlgmr.msra.gmra.mxu0 %v8218_v13 }
 0x52c   : > { %12034 = vmatpush3.bf16.msra.mxu0 %v12536_v24  ;;  %8816 = vmatprep.mubr.bf16.mxu0 %v8585_v20  ;;  %v9650_v24 = vrot.slane %v9648_v32, 3  ;;  %v12602_v20 = vld [vmem:[#allocation8 + $0x730] sm:$0xff]   ;;  %v12644_v32 = vld [vmem:[#allocation8 + $0x298] sm:$0xff]  }
 0x52d   : > { %12035 = vmatprep.subr.bf16.mxu0 %v12539_v44 }
 0x530   : > { %12036 = vmatpush3.bf16.msra.mxu0 %v12540_v22 }
 0x531   : > { %12037 = vmatprep.subr.bf16.mxu0 %v12541_v4  ;;  %v12603_v4 = vld [vmem:[#allocation8 + $0x768] sm:$0xff]  }
 0x534   : > { %12038 = vmatpush3.bf16.msra.mxu0 %v12542_v1 }
 0x535   : > { %12039 = vmatprep.subr.bf16.mxu0 %v12543_v25 }
 0x538   : > { %12040 = vmatpush3.bf16.msra.mxu0 %v12544_v58  ;;  %v12604_v58 = vld [vmem:[#allocation8 + $0x728] sm:$0xff]  }
 0x539   : > { %12041 = vmatprep.subr.bf16.mxu0 %v12547_v45 }
 0x53c   : > { %12042 = vmatpush3.bf16.msra.mxu0 %v12548_v62  ;;  %v12605_v62 = vld [vmem:[#allocation8 + $0x760] sm:$0xff]  }
 0x53d   : > { %12043 = vmatprep.subr.bf16.mxu0 %v12549_v28 }
 0x540   : > { %12044 = vmatpush3.bf16.msra.mxu0 %v12550_v40  ;;  %v12606_v40 = vld [vmem:[#allocation8 + $0x720] sm:$0xff]  }
 0x541   : > { %12045 = vmatprep.subr.bf16.mxu0 %v12551_v50 }
 0x544   : > { %12046 = vmatpush3.bf16.msra.mxu0 %v12552_v63 }
 0x545   : > { %12047 = vmatprep.subr.bf16.mxu0 %v12553_v3  ;;  %v12611_v3 = vld [vmem:[#allocation8 + $0x758] sm:$0xff]  }
 0x548   : > { %12048 = vmatpush3.bf16.msra.mxu0 %v12554_v52 }
 0x549   : > { %12077 = vmatprep.subr.bf16.mxu0 %v12557_v30  ;;  %v12610_v30 = vld [vmem:[#allocation8 + $0xb8] sm:$0xff]  }
 0x54b   : > { %8817 = vmatmul.mubr.bf16.vlgmr.msra.gmra.mxu0 %v8584_v42  ;;  %v12615_v42 = vld [vmem:[#allocation8 + $0x750] sm:$0xff]  }
 0x54c   : > { %12078 = vmatpush3.bf16.msra.mxu0 %v12558_v17  ;;  %9173 = vmatprep.mubr.bf16.mxu0 %v8936_v49  ;;  %v12612_v17 = vld [vmem:[#allocation8 + $0x718] sm:$0xff]   ;;  %v12617_v49 = vld [vmem:[#allocation8 + $0xe8] sm:$0xff]  }
 0x54d   : > { %12079 = vmatprep.subr.bf16.mxu0 %v12559_v33  ;;  %v12614_v33 = vld [vmem:[#allocation8 + $0xb0] sm:$0xff]  }
 0x550   : > { %12080 = vmatpush3.bf16.msra.mxu0 %v12560_v60  ;;  %v12616_v60 = vld [vmem:[#allocation8 + $0x710] sm:$0xff]  }
 0x551   : > { %12081 = vmatprep.subr.bf16.mxu0 %v12561_v36  ;;  %v12619_v36 = vld [vmem:[#allocation8 + $0x748] sm:$0xff]  }
 0x554   : > { %12082 = vmatpush3.bf16.msra.mxu0 %v12562_v57  ;;  %v12618_v57 = vld [vmem:[#allocation8 + $0xa8] sm:$0xff]  }
 0x555   : > { %12083 = vmatprep.subr.bf16.mxu0 %v12563_v15  ;;  %v12621_v15 = vld [vmem:[#allocation8 + $0xe0] sm:$0xff]  }
 0x558   : > { %12084 = vmatpush3.bf16.msra.mxu0 %v12564_v47  ;;  %v12620_v47 = vld [vmem:[#allocation8 + $0x708] sm:$0xff]  }
 0x559   : > { %12085 = vmatprep.subr.bf16.mxu0 %v12567_v41  ;;  %v12623_v41 = vld [vmem:[#allocation8 + $0x740] sm:$0xff]  }
 0x55c   : > { %12086 = vmatpush3.bf16.msra.mxu0 %v12568_v9  ;;  %v12622_v9 = vld [vmem:[#allocation8 + $0xa0] sm:$0xff]  }
 0x55d   : > { %12087 = vmatprep.subr.bf16.mxu0 %v12569_v2  ;;  %v12625_v2 = vld [vmem:[#allocation8 + $0xd8] sm:$0xff]  }
 0x560   : > { %12088 = vmatpush3.bf16.msra.mxu0 %v12570_v26  ;;  %v12624_v26 = vld [vmem:[#allocation8 + $0x700] sm:$0xff]  }
 0x561   : > { %12089 = vmatprep.subr.bf16.mxu0 %v12571_v5  ;;  %v9644_v5 = vshrl.u32 %v15721_v29, 16  ;;  %v12642_v29 = vld [vmem:[#allocation8 + $0x2a0] sm:$0xff]  }
 0x563   : > { %v9646_v21 = vrot.slane %v9644_v5, 3 }
 0x564   : > { %12090 = vmatpush3.bf16.msra.mxu0 %v12572_v59  ;;  %v12626_v59 = vld [vmem:[#allocation8 + $0x98] sm:$0xff]  }
 0x565   : > { %12091 = vmatprep.subr.bf16.mxu0 %v12573_v19  ;;  %v12627_v19 = vld [vmem:[#allocation8 + $0xd0] sm:$0xff]  }
 0x568   : > { %12092 = vmatpush3.bf16.msra.mxu0 %v12574_v37  ;;  %v16425_v37 = vmov 0.0  }
 0x569   : > { %12121 = vmatprep.subr.bf16.mxu0 %v12577_v51 }
 0x56b   : > { %9174 = vmatmul.mubr.bf16.vlgmr.msra.gmra.mxu0 %v8932_v54 }
 0x56c   : > { %12122 = vmatpush3.bf16.msra.mxu0 %v12578_v8  ;;  %9530 = vmatprep.mubr.bf16.mxu0 %v9299_v34 }
 0x56d   : > { %12123 = vmatprep.subr.bf16.mxu0 %v12581_v46  ;;  %v12630_v46 = vld [vmem:[#allocation8 + $0x88] sm:$0xff]  }
 0x570   : > { %12124 = vmatpush3.bf16.msra.mxu0 %v12582_v48  ;;  %v12631_v48 = vld [vmem:[#allocation8 + $0xc0] sm:$0xff]  }
 0x571   : > { %12125 = vmatprep.subr.bf16.mxu0 %v12583_v0 }
 0x574   : > { %12126 = vmatpush3.bf16.msra.mxu0 %v12584_v31 }
 0x575   : > { %12127 = vmatprep.subr.bf16.mxu0 %v12585_v12  ;;  %v12632_v12 = vld [vmem:[#allocation8 + $0x80] sm:$0xff]  }
 0x578   : > { %12128 = vmatpush3.bf16.msra.mxu0 %v12586_v7  ;;  %v12633_v7 = vld [vmem:[#allocation8 + $0x2f8] sm:$0xff]  }
 0x579   : > { %12129 = vmatprep.subr.bf16.mxu0 %v12589_v39 }
 0x57c   : > { %12130 = vmatpush3.bf16.msra.mxu0 %v12590_v43  ;;  %v12634_v43 = vld [vmem:[#allocation8 + $0x2b8] sm:$0xff]  }
 0x57d   : > { %12131 = vmatprep.subr.bf16.mxu0 %v12591_v53  ;;  %v12637_v53 = vld [vmem:[#allocation8 + $0x2f0] sm:$0xff]  }
 0x580   : > { %12132 = vmatpush3.bf16.msra.mxu0 %v12592_v35 }
 0x581   : > { %12133 = vmatprep.subr.bf16.mxu0 %v12593_v10  ;;  %v12638_v10 = vld [vmem:[#allocation8 + $0x2b0] sm:$0xff]  }
 0x584   : > { %12134 = vmatpush3.bf16.msra.mxu0 %v12594_v23  ;;  %v12639_v23 = vld [vmem:[#allocation8 + $0x2e8] sm:$0xff]  }
 0x585   : > { %12135 = vmatprep.subr.bf16.mxu0 %v12595_v38  ;;  %v12640_v38 = vld [vmem:[#allocation8 + $0x2a8] sm:$0xff]  }
 0x588   : > { %12136 = vmatpush3.bf16.msra.mxu0 %v12596_v55  ;;  %v12641_v55 = vld [vmem:[#allocation8 + $0x2e0] sm:$0xff]  }
 0x589   : > { %12165 = vmatprep.subr.bf16.mxu0 %v12599_v14  ;;  %v7087_v44 = vpop.permute.xlu1 %7086  ;;  %v12643_v14 = vld [vmem:[#allocation8 + $0x2d8] sm:$0xff]  }
 0x58a   : > { %7089 = vst.msk [vmem:[#allocation7 + $0xc] sm:$0xf] %vm7052_vm1, %v7087_v44 }
 0x58b   : > { %9531 = vmatmul.mubr.bf16.vlgmr.msra.gmra.mxu0 %v9298_v16  ;;  %v11873_v13 = vpop.f32.mrf.mxu0  ;;  %v12646_v16 = vld [vmem:[#allocation8 + $0x290] sm:$0xff]  }
 0x58c   : > { %12166 = vmatpush3.bf16.msra.mxu0 %v12600_v27  ;;  %9887 = vmatprep.mubr.bf16.mxu0 %v9650_v24  ;;  %v12645_v27 = vld [vmem:[#allocation8 + $0x2d0] sm:$0xff]   ;;  %v12647_v24 = vld [vmem:[#allocation8 + $0x2c8] sm:$0xff]  }
 0x58d   : > { %v11874_v22 = vpop.f32.mrf.mxu0  ;;  %12167 = vmatprep.subr.bf16.mxu0 %v12601_v18 }
 0x58e   : > { %v15725_v1 = vadd.f32 %v11874_v22, %v11873_v13 }
 0x58f   : > { %v11876_v25 = vpop.f32.mrf.mxu0 }
 0x590   : > { %12168 = vmatpush3.bf16.msra.mxu0 %v12602_v20  ;;  %v12648_v20 = vld [vmem:[#allocation8 + $0x288] sm:$0xff]  }
 0x591   : > { %v11877_v45 = vpop.f32.mrf.mxu0  ;;  %12169 = vmatprep.subr.bf16.mxu0 %v12603_v4  ;;  %v7091_v28 = vld [vmem:[#allocation7 + $0x8] sm:$0x11]  ;;  %v7795_v31 = vld [vmem:[#allocation7 + $0x8] sm:$0x22]  ;;  %v12649_v4 = vld [vmem:[#allocation8 + $0x2c0] sm:$0xff]  }
 0x592   : > { %v15727_v50 = vcombine.low %v7091_v28, %v7091_v28  ;;  %v10848_v63 = vcombine.high %v7091_v28, %v7091_v28  ;;  %v10916_v39 = vcombine.high %v7795_v31, %v7795_v31  ;;  %v10915_v45 = vcombine.low %v7795_v31, %v7795_v31  ;;  %v8509_v5 = vld [vmem:[#allocation7 + $0x8] sm:$0x44]  ;;  %v12675_v31 = vld [vmem:[#allocation8 + $0x4e0] sm:$0xff]  }
 0x594   : > { %12170 = vmatpush3.bf16.msra.mxu0 %v12604_v58  ;;  %v7237_v52 = vshrl.u32 %v15727_v50, 16  ;;  %v7240_v56 = vshrl.u32 %v10848_v63, 16  ;;  %v7873_v35 = vrot.slane %v10916_v39, 1  ;;  %v12650_v58 = vld [vmem:[#allocation8 + $0x280] sm:$0xff]   ;;  %v8228_v28 = vshrl.u32 %v10916_v39, 16  ;;  %v12678_v39 = vld [vmem:[#allocation8 + $0x498] sm:$0xff]  }
 0x595   : > { %12171 = vmatprep.subr.bf16.mxu0 %v12605_v62  ;;  %v12651_v62 = vld [vmem:[#allocation8 + $0x3f8] sm:$0xff]  }
 0x596   : > { %7510 = vmatprep.mubr.bf16.mxu1 %v7240_v56  ;;  %v12655_v56 = vld [vmem:[#allocation8 + $0x3e8] sm:$0xff]  }
 0x597   : > { %7511 = vmatmul.mubr.bf16.vlgmr.msra.gmra.mxu1 %v7237_v52  ;;  %v12654_v52 = vld [vmem:[#allocation8 + $0x3b0] sm:$0xff]  }
 0x598   : > { %12172 = vmatpush3.bf16.msra.mxu0 %v12606_v40  ;;  %11924 = vmatpush3.bf16.msra.mxu1 %v12610_v30  ;;  %v12652_v40 = vld [vmem:[#allocation8 + $0x3b8] sm:$0xff]   ;;  %v12656_v30 = vld [vmem:[#allocation8 + $0x3a8] sm:$0xff]  }
 0x599   : > { %12173 = vmatprep.subr.bf16.mxu0 %v12611_v3  ;;  %7786 = vmatprep.mubr.bf16.mxu1 %v10848_v63  ;;  %v12653_v63 = vld [vmem:[#allocation8 + $0x3f0] sm:$0xff]   ;;  %v8230_v3 = vrot.slane %v8228_v28, 1  ;;  %v12692_v28 = vld [vmem:[#allocation8 + $0x5a0] sm:$0xff]  }
 0x59a   : > { %11925 = vmatprep.subr.bf16.mxu1 %v12613_v61  ;;  %v12657_v61 = vld [vmem:[#allocation8 + $0x3e0] sm:$0xff]  }
 0x59c   : > { %12174 = vmatpush3.bf16.msra.mxu0 %v12612_v17  ;;  %11926 = vmatpush3.bf16.msra.mxu1 %v12614_v33  ;;  %v12658_v17 = vld [vmem:[#allocation8 + $0x3a0] sm:$0xff]   ;;  %v12660_v33 = vld [vmem:[#allocation8 + $0x398] sm:$0xff]  }
 0x59d   : > { %12175 = vmatprep.subr.bf16.mxu0 %v12615_v42  ;;  %11927 = vmatprep.subr.bf16.mxu1 %v12617_v49  ;;  %v12659_v42 = vld [vmem:[#allocation8 + $0x3d8] sm:$0xff]   ;;  %v12661_v49 = vld [vmem:[#allocation8 + $0x3d0] sm:$0xff]  }
 0x5a0   : > { %12176 = vmatpush3.bf16.msra.mxu0 %v12616_v60  ;;  %11928 = vmatpush3.bf16.msra.mxu1 %v12618_v57  ;;  %v12662_v60 = vld [vmem:[#allocation8 + $0x390] sm:$0xff]   ;;  %v12663_v57 = vld [vmem:[#allocation8 + $0x3c8] sm:$0xff]  }
 0x5a1   : > { %12177 = vmatprep.subr.bf16.mxu0 %v12619_v36  ;;  %11929 = vmatprep.subr.bf16.mxu1 %v12621_v15 }
 0x5a4   : > { %12178 = vmatpush3.bf16.msra.mxu0 %v12620_v47  ;;  %11930 = vmatpush3.bf16.msra.mxu1 %v12622_v9 }
 0x5a5   : > { %12179 = vmatprep.subr.bf16.mxu0 %v12623_v41  ;;  %11931 = vmatprep.subr.bf16.mxu1 %v12625_v2  ;;  %v12664_v41 = vld [vmem:[#allocation8 + $0x388] sm:$0xff]   ;;  %v12665_v2 = vld [vmem:[#allocation8 + $0x3c0] sm:$0xff]  }
 0x5a8   : > { %12180 = vmatpush3.bf16.msra.mxu0 %v12624_v26  ;;  %11932 = vmatpush3.bf16.msra.mxu1 %v12626_v59  ;;  %v12666_v59 = vld [vmem:[#allocation8 + $0x380] sm:$0xff]  }
 0x5a9   : > { %12290 = vmatprep.subr.bf16.mxu0 %v16425_v37  ;;  %11933 = vmatprep.subr.bf16.mxu1 %v12627_v19  ;;  %v8224_v19 = vshrl.u32 %v10915_v45, 16 }
 0x5ab   : > { %v11917_v51 = vpop.f32.mrf.mxu0  ;;  %9888 = vmatmul.mubr.bf16.vlgmr.msra.gmra.mxu0 %v9646_v21  ;;  %v12667_v21 = vld [vmem:[#allocation8 + $0x4f8] sm:$0xff]  }
 0x5ac   : > { %11934 = vmatpush3.bf16.msra.mxu1 %v12628_v6  ;;  %v10984_v6 = vcombine.high %v8509_v5, %v8509_v5  ;;  %12306 = vmatprep.mubr.msk.bf16.mxu0 %vm12858_vm6, %v16425_v37 }
 0x5ad   : > { %v11918_v8 = vpop.f32.mrf.mxu0  ;;  %11935 = vmatprep.subr.bf16.mxu1 %v12629_v11  ;;  %v8226_v11 = vrot.slane %v8224_v19, 1  ;;  %v12707_v19 = vld [vmem:[#allocation8 + $0x6e8] sm:$0xff]  }
 0x5ae   : > { %v15732_v54 = vadd.f32 %v11918_v8, %v11917_v51  ;;  %v12668_v51 = vld [vmem:[#allocation8 + $0x4b8] sm:$0xff]   ;;  %v12671_v8 = vld [vmem:[#allocation8 + $0x4f0] sm:$0xff]  }
 0x5af   : > { %v11920_v34 = vpop.f32.mrf.mxu0 }
 0x5b0   : > { %11936 = vmatpush3.bf16.msra.mxu1 %v12630_v46  ;;  %v8587_v46 = vrot.slane %v10984_v6, 2  ;;  %v12672_v34 = vld [vmem:[#allocation8 + $0x4b0] sm:$0xff]  }
 0x5b1   : > { %v11921_v0 = vpop.f32.mrf.mxu0  ;;  %11937 = vmatprep.subr.bf16.mxu1 %v12631_v48  ;;  %v12673_v48 = vld [vmem:[#allocation8 + $0x4e8] sm:$0xff]  }
 0x5b2   : > { %v12674_v0 = vld [vmem:[#allocation8 + $0x4a8] sm:$0xff]  }
 0x5b4   : > { %11938 = vmatpush3.bf16.msra.mxu1 %v12632_v12  ;;  %v12676_v12 = vld [vmem:[#allocation8 + $0x4a0] sm:$0xff]  }
 0x5b5   : > { %11967 = vmatprep.subr.bf16.mxu1 %v12633_v7  ;;  %v12677_v7 = vld [vmem:[#allocation8 + $0x4d8] sm:$0xff]  }
 0x5b7   : > { %7787 = vmatmul.mubr.bf16.vlgmr.msra.gmra.mxu1 %v15727_v50  ;;  %v7872_v50 = vrot.slane %v10915_v45, 1  ;;  %v12690_v45 = vld [vmem:[#allocation8 + $0x5a8] sm:$0xff]  }
 0x5b8   : > { %11968 = vmatpush3.bf16.msra.mxu1 %v12634_v43  ;;  %8142 = vmatprep.mubr.bf16.mxu1 %v7873_v35  ;;  %v12679_v43 = vld [vmem:[#allocation8 + $0x4d0] sm:$0xff]  }
 0x5b9   : > { %11969 = vmatprep.subr.bf16.mxu1 %v12637_v53  ;;  %v12680_v53 = vld [vmem:[#allocation8 + $0x490] sm:$0xff]  }
 0x5bc   : > { %11970 = vmatpush3.bf16.msra.mxu1 %v12638_v10  ;;  %v12681_v10 = vld [vmem:[#allocation8 + $0x4c8] sm:$0xff]  }
 0x5bd   : > { %11971 = vmatprep.subr.bf16.mxu1 %v12639_v23 }
 0x5c0   : > { %11972 = vmatpush3.bf16.msra.mxu1 %v12640_v38 }
 0x5c1   : > { %11973 = vmatprep.subr.bf16.mxu1 %v12641_v55  ;;  %v12682_v55 = vld [vmem:[#allocation8 + $0x488] sm:$0xff]  }
 0x5c4   : > { %11974 = vmatpush3.bf16.msra.mxu1 %v12642_v29 }
 0x5c5   : > { %11975 = vmatprep.subr.bf16.mxu1 %v12643_v14  ;;  %v12683_v14 = vld [vmem:[#allocation8 + $0x4c0] sm:$0xff]  }
 0x5c8   : > { %11976 = vmatpush3.bf16.msra.mxu1 %v12644_v32 }
 0x5c9   : > { %11977 = vmatprep.subr.bf16.mxu1 %v12645_v27  ;;  %v12684_v27 = vld [vmem:[#allocation8 + $0x480] sm:$0xff]  }
 0x5cb   : > { %v11961_v18 = vpop.f32.mrf.mxu0 }
 0x5cc   : > { %11978 = vmatpush3.bf16.msra.mxu1 %v12646_v16  ;;  %v10983_v16 = vcombine.low %v8509_v5, %v8509_v5 }
 0x5cd   : > { %v11962_v13 = vpop.f32.mrf.mxu0  ;;  %11979 = vmatprep.subr.bf16.mxu1 %v12647_v24  ;;  %v8942_v24 = vshrl.u32 %v10984_v6, 16  ;;  %v12709_v6 = vld [vmem:[#allocation8 + $0x6e0] sm:$0xff]  }
 0x5ce   : > { %v15735_v44 = vadd.f32 %v11962_v13, %v11961_v18  ;;  %v12685_v18 = vld [vmem:[#allocation8 + $0x5f8] sm:$0xff]  }
 0x5cf   : > { %v11964_v22 = vpop.f32.mrf.mxu0  ;;  %v12686_v13 = vld [vmem:[#allocation8 + $0x5b8] sm:$0xff]  }
 0x5d0   : > { %11980 = vmatpush3.bf16.msra.mxu1 %v12648_v20  ;;  %v8586_v20 = vrot.slane %v10983_v16, 2  ;;  %v12687_v22 = vld [vmem:[#allocation8 + $0x5f0] sm:$0xff]  }
 0x5d1   : > { %v11965_v25 = vpop.f32.mrf.mxu0  ;;  %11981 = vmatprep.subr.bf16.mxu1 %v12649_v4  ;;  %v8944_v4 = vrot.slane %v8942_v24, 2 }
 0x5d2   : > { %v12688_v25 = vld [vmem:[#allocation8 + $0x5b0] sm:$0xff]  }
 0x5d4   : > { %11982 = vmatpush3.bf16.msra.mxu1 %v12650_v58  ;;  %v12689_v58 = vld [vmem:[#allocation8 + $0x5e8] sm:$0xff]  }
 0x5d5   : > { %12011 = vmatprep.subr.bf16.mxu1 %v12651_v62  ;;  %v12691_v62 = vld [vmem:[#allocation8 + $0x5e0] sm:$0xff]  }
 0x5d7   : > { %8143 = vmatmul.mubr.bf16.vlgmr.msra.gmra.mxu1 %v7872_v50  ;;  %v12694_v50 = vld [vmem:[#allocation8 + $0x598] sm:$0xff]  }
 0x5d8   : > { %12012 = vmatpush3.bf16.msra.mxu1 %v12652_v40  ;;  %8499 = vmatprep.mubr.bf16.mxu1 %v8230_v3  ;;  %v12693_v40 = vld [vmem:[#allocation8 + $0x5d8] sm:$0xff]   ;;  %v12696_v3 = vld [vmem:[#allocation8 + $0x590] sm:$0xff]  }
 0x5d9   : > { %12013 = vmatprep.subr.bf16.mxu1 %v12653_v63  ;;  %v12695_v63 = vld [vmem:[#allocation8 + $0x5d0] sm:$0xff]  }
 0x5dc   : > { %12014 = vmatpush3.bf16.msra.mxu1 %v12654_v52 }
 0x5dd   : > { %12015 = vmatprep.subr.bf16.mxu1 %v12655_v56  ;;  %v12697_v56 = vld [vmem:[#allocation8 + $0x5c8] sm:$0xff]  }
 0x5e0   : > { %12016 = vmatpush3.bf16.msra.mxu1 %v12656_v30 }
 0x5e1   : > { %12017 = vmatprep.subr.bf16.mxu1 %v12657_v61 }
 0x5e4   : > { %12018 = vmatpush3.bf16.msra.mxu1 %v12658_v17  ;;  %v12698_v17 = vld [vmem:[#allocation8 + $0x588] sm:$0xff]  }
 0x5e5   : > { %12019 = vmatprep.subr.bf16.mxu1 %v12659_v42 }
 0x5e8   : > { %12020 = vmatpush3.bf16.msra.mxu1 %v12660_v33  ;;  %v12699_v33 = vld [vmem:[#allocation8 + $0x5c0] sm:$0xff]  }
 0x5e9   : > { %12021 = vmatprep.subr.bf16.mxu1 %v12661_v49 }
 0x5eb   : > { %v12005_v36 = vpop.f32.mrf.mxu0 }
 0x5ec   : > { %12022 = vmatpush3.bf16.msra.mxu1 %v12662_v60  ;;  %v9223_v60 = vld [vmem:[#allocation7 + $0x8] sm:$0x88] }
 0x5ed   : > { %v12006_v15 = vpop.f32.mrf.mxu0  ;;  %12023 = vmatprep.subr.bf16.mxu1 %v12663_v57  ;;  %v8938_v57 = vshrl.u32 %v10983_v16, 16 }
 0x5ee   : > { %v15737_v47 = vadd.f32 %v12006_v15, %v12005_v36  ;;  %v12700_v36 = vld [vmem:[#allocation8 + $0x580] sm:$0xff]   ;;  %v12701_v15 = vld [vmem:[#allocation8 + $0x6f8] sm:$0xff]  }
 0x5ef   : > { %v12008_v9 = vpop.f32.mrf.mxu0 }
 0x5f0   : > { %12024 = vmatpush3.bf16.msra.mxu1 %v12664_v41  ;;  %v11052_v41 = vcombine.high %v9223_v60, %v9223_v60  ;;  %v12702_v9 = vld [vmem:[#allocation8 + $0x6b8] sm:$0xff]  }
 0x5f1   : > { %v12009_v26 = vpop.f32.mrf.mxu0  ;;  %12025 = vmatprep.subr.bf16.mxu1 %v12665_v2  ;;  %v8940_v2 = vrot.slane %v8938_v57, 2 }
 0x5f2   : > { %v12705_v26 = vld [vmem:[#allocation8 + $0x6f0] sm:$0xff]   ;;  %v9301_v5 = vrot.slane %v11052_v41, 3 }
 0x5f4   : > { %12026 = vmatpush3.bf16.msra.mxu1 %v12666_v59  ;;  %v12706_v59 = vld [vmem:[#allocation8 + $0x6b0] sm:$0xff]  }
 0x5f5   : > { %12055 = vmatprep.subr.bf16.mxu1 %v12667_v21  ;;  %v12708_v21 = vld [vmem:[#allocation8 + $0x6a8] sm:$0xff]  }
 0x5f7   : > { %8500 = vmatmul.mubr.bf16.vlgmr.msra.gmra.mxu1 %v8226_v11  ;;  %v12711_v11 = vld [vmem:[#allocation8 + $0x6d8] sm:$0xff]  }
 0x5f8   : > { %12056 = vmatpush3.bf16.msra.mxu1 %v12668_v51  ;;  %8856 = vmatprep.mubr.bf16.mxu1 %v8587_v46  ;;  %v12710_v51 = vld [vmem:[#allocation8 + $0x6a0] sm:$0xff]   ;;  %v12713_v46 = vld [vmem:[#allocation8 + $0x6d0] sm:$0xff]  }
 0x5f9   : > { %12057 = vmatprep.subr.bf16.mxu1 %v12671_v8  ;;  %v12712_v8 = vld [vmem:[#allocation8 + $0x698] sm:$0xff]  }
 0x5fc   : > { %12058 = vmatpush3.bf16.msra.mxu1 %v12672_v34  ;;  %v12714_v34 = vld [vmem:[#allocation8 + $0x690] sm:$0xff]  }
 0x5fd   : > { %12059 = vmatprep.subr.bf16.mxu1 %v12673_v48 }
 0x600   : > { %12060 = vmatpush3.bf16.msra.mxu1 %v12674_v0  ;;  %v12715_v0 = vld [vmem:[#allocation8 + $0x6c8] sm:$0xff]  }
 0x601   : > { %12061 = vmatprep.subr.bf16.mxu1 %v12675_v31 }
 0x604   : > { %12062 = vmatpush3.bf16.msra.mxu1 %v12676_v12 }
 0x605   : > { %12063 = vmatprep.subr.bf16.mxu1 %v12677_v7  ;;  %v12716_v7 = vld [vmem:[#allocation8 + $0x688] sm:$0xff]  }
 0x608   : > { %12064 = vmatpush3.bf16.msra.mxu1 %v12678_v39 }
 0x609   : > { %12065 = vmatprep.subr.bf16.mxu1 %v12679_v43  ;;  %v12717_v43 = vld [vmem:[#allocation8 + $0x6c0] sm:$0xff]  }
 0x60b   : > { %v12049_v35 = vpop.f32.mrf.mxu0 }
 0x60c   : > { %12066 = vmatpush3.bf16.msra.mxu1 %v12680_v53 }
 0x60d   : > { %v12050_v23 = vpop.f32.mrf.mxu0  ;;  %12067 = vmatprep.subr.bf16.mxu1 %v12681_v10  ;;  %v11051_v10 = vcombine.low %v9223_v60, %v9223_v60 }
 0x60e   : > { %v15739_v38 = vadd.f32 %v12050_v23, %v12049_v35  ;;  %v12718_v35 = vld [vmem:[#allocation8 + $0x680] sm:$0xff]   ;;  %v12719_v23 = vld [vmem:[#allocation8 + $0x7f8] sm:$0xff]  }
 0x60f   : > { %v12052_v29 = vpop.f32.mrf.mxu0  ;;  %v9652_v60 = vshrl.u32 %v11051_v10, 16 }
 0x610   : > { %12068 = vmatpush3.bf16.msra.mxu1 %v12682_v55  ;;  %v9656_v55 = vshrl.u32 %v11052_v41, 16  ;;  %v12720_v29 = vld [vmem:[#allocation8 + $0x7b8] sm:$0xff]  }
 0x611   : > { %v12053_v32 = vpop.f32.mrf.mxu0  ;;  %12069 = vmatprep.subr.bf16.mxu1 %v12683_v14  ;;  %v9300_v14 = vrot.slane %v11051_v10, 3  ;;  %v12740_v10 = vld [vmem:[%s15837_s7 + $0x10] sm:$0xff]  }
 0x612   : > { %v12721_v32 = vld [vmem:[#allocation8 + $0x7f0] sm:$0xff]  }
 0x614   : > { %12070 = vmatpush3.bf16.msra.mxu1 %v12684_v27  ;;  %v9658_v27 = vrot.slane %v9656_v55, 3 }
 0x615   : > { %12099 = vmatprep.subr.bf16.mxu1 %v12685_v18  ;;  %v12722_v18 = vld [vmem:[#allocation8 + $0x7b0] sm:$0xff]  }
 0x617   : > { %8857 = vmatmul.mubr.bf16.vlgmr.msra.gmra.mxu1 %v8586_v20 }
 0x618   : > { %12100 = vmatpush3.bf16.msra.mxu1 %v12686_v13  ;;  %9213 = vmatprep.mubr.bf16.mxu1 %v8944_v4  ;;  %v12723_v13 = vld [vmem:[#allocation8 + $0x7e8] sm:$0xff]  }
 0x619   : > { %12101 = vmatprep.subr.bf16.mxu1 %v12687_v22 }
 0x61c   : > { %12102 = vmatpush3.bf16.msra.mxu1 %v12688_v25  ;;  %v12724_v25 = vld [vmem:[#allocation8 + $0x7a8] sm:$0xff]  }
 0x61d   : > { %12103 = vmatprep.subr.bf16.mxu1 %v12689_v58 }
 0x620   : > { %12104 = vmatpush3.bf16.msra.mxu1 %v12690_v45  ;;  %v12725_v45 = vld [vmem:[#allocation8 + $0x7e0] sm:$0xff]  }
 0x621   : > { %12105 = vmatprep.subr.bf16.mxu1 %v12691_v62 }
 0x624   : > { %12106 = vmatpush3.bf16.msra.mxu1 %v12692_v28  ;;  %v12726_v28 = vld [vmem:[#allocation8 + $0x7a0] sm:$0xff]  }
 0x625   : > { %12107 = vmatprep.subr.bf16.mxu1 %v12693_v40  ;;  %v12727_v40 = vld [vmem:[#allocation8 + $0x7d8] sm:$0xff]  }
 0x628   : > { %12108 = vmatpush3.bf16.msra.mxu1 %v12694_v50  ;;  %v12728_v50 = vld [vmem:[#allocation8 + $0x798] sm:$0xff]  }
 0x629   : > { %12109 = vmatprep.subr.bf16.mxu1 %v12695_v63  ;;  %v12729_v63 = vld [vmem:[#allocation8 + $0x7d0] sm:$0xff]  }
 0x62b   : > { %v12093_v52 = vpop.f32.mrf.mxu0 }
 0x62c   : > { %12110 = vmatpush3.bf16.msra.mxu1 %v12696_v3  ;;  %v12730_v3 = vld [vmem:[#allocation8 + $0x790] sm:$0xff]  }
 0x62d   : > { %v12094_v30 = vpop.f32.mrf.mxu0  ;;  %12111 = vmatprep.subr.bf16.mxu1 %v12697_v56 }
 0x62e   : > { %v15741_v61 = vadd.f32 %v12094_v30, %v12093_v52 }
 0x62f   : > { %v12096_v42 = vpop.f32.mrf.mxu0 }
 0x630   : > { %12112 = vmatpush3.bf16.msra.mxu1 %v12698_v17  ;;  %v12732_v17 = vld [vmem:[#allocation8 + $0x788] sm:$0xff]  }
 0x631   : > { %v12097_v49 = vpop.f32.mrf.mxu0  ;;  %12113 = vmatprep.subr.bf16.mxu1 %v12699_v33 }
 0x632   : > { %v12734_v49 = vld [vmem:[#allocation8 + $0x780] sm:$0xff]  }
 0x634   : > { %12114 = vmatpush3.bf16.msra.mxu1 %v12700_v36  ;;  %v9654_v36 = vrot.slane %v9652_v60, 3 }
 0x635   : > { %12143 = vmatprep.subr.bf16.mxu1 %v12701_v15 }
 0x637   : > { %9214 = vmatmul.mubr.bf16.vlgmr.msra.gmra.mxu1 %v8940_v2 }
 0x638   : > { %12144 = vmatpush3.bf16.msra.mxu1 %v12702_v9  ;;  %9570 = vmatprep.mubr.bf16.mxu1 %v9301_v5 }
 0x639   : > { %12145 = vmatprep.subr.bf16.mxu1 %v12705_v26 }
 0x63c   : > { %12146 = vmatpush3.bf16.msra.mxu1 %v12706_v59 }
 0x63d   : > { %12147 = vmatprep.subr.bf16.mxu1 %v12707_v19 }
 0x640   : > { %12148 = vmatpush3.bf16.msra.mxu1 %v12708_v21 }
 0x641   : > { %12149 = vmatprep.subr.bf16.mxu1 %v12709_v6 }
 0x644   : > { %12150 = vmatpush3.bf16.msra.mxu1 %v12710_v51 }
 0x645   : > { %12151 = vmatprep.subr.bf16.mxu1 %v12711_v11 }
 0x648   : > { %12152 = vmatpush3.bf16.msra.mxu1 %v12712_v8  ;;  %v12735_v8 = vld [vmem:[%s15837_s7 + $0x38] sm:$0xff]  }
 0x649   : > { %12153 = vmatprep.subr.bf16.mxu1 %v12713_v46  ;;  %12291 = vmatpush3.bf16.msra.mxu0 %v12735_v8  ;;  %v12736_v46 = vld [vmem:[%s15837_s7 + $0x30] sm:$0xff]  }
 0x64a   : > { %12292 = vmatprep.subr.bf16.mxu0 %v16425_v37 }
 0x64b   : > { %v12137_v48 = vpop.f32.mrf.mxu0 }
 0x64c   : > { %12154 = vmatpush3.bf16.msra.mxu1 %v12714_v34  ;;  %v12737_v34 = vld [vmem:[%s15837_s7 + $0x28] sm:$0xff]  }
 0x64d   : > { %v12138_v31 = vpop.f32.mrf.mxu0  ;;  %12155 = vmatprep.subr.bf16.mxu1 %v12715_v0  ;;  %12293 = vmatpush3.bf16.msra.mxu0 %v12736_v46  ;;  %v12739_v0 = vld [vmem:[%s15837_s7 + $0x18] sm:$0xff]  }
 0x64e   : > { %v15743_v12 = vadd.f32 %v12138_v31, %v12137_v48  ;;  %12294 = vmatprep.subr.bf16.mxu0 %v16425_v37 }
 0x64f   : > { %v12140_v39 = vpop.f32.mrf.mxu0 }
 0x650   : > { %12156 = vmatpush3.bf16.msra.mxu1 %v12716_v7 }
 0x651   : > { %v12141_v53 = vpop.f32.mrf.mxu0  ;;  %12157 = vmatprep.subr.bf16.mxu1 %v12717_v43  ;;  %12295 = vmatpush3.bf16.msra.mxu0 %v12737_v34 }
 0x652   : > { %12296 = vmatprep.subr.bf16.mxu0 %v16425_v37 }
 0x654   : > { %12158 = vmatpush3.bf16.msra.mxu1 %v12718_v35 }
 0x655   : > { %12187 = vmatprep.subr.bf16.mxu1 %v12719_v23  ;;  %v12741_v23 = vld [vmem:[%s15837_s7 + $0x8] sm:$0xff]  }
 0x657   : > { %9571 = vmatmul.mubr.bf16.vlgmr.msra.gmra.mxu1 %v9300_v14  ;;  %v11895_v16 = vpop.f32.mrf.mxu1 }
 0x658   : > { %12188 = vmatpush3.bf16.msra.mxu1 %v12720_v29  ;;  %9927 = vmatprep.mubr.bf16.mxu1 %v9658_v27 }
 0x659   : > { %v11896_v24 = vpop.f32.mrf.mxu1  ;;  %12189 = vmatprep.subr.bf16.mxu1 %v12721_v32 }
 0x65a   : > { %v11897_v20 = vadd.f32 %v11896_v24, %v11895_v16 }
 0x65b   : > { %v11898_v22 = vpop.f32.mrf.mxu1 }
 0x65c   : > { %v7513_v4 = vadd.f32 %v11897_v20, %v15725_v1  ;;  %12190 = vmatpush3.bf16.msra.mxu1 %v12722_v18  ;;  %v12731_v1 = vld [vmem:[#allocation8 + $0x7c8] sm:$0xff]  }
 0x65d   : > { %v11899_v58 = vpop.f32.mrf.mxu1  ;;  %12191 = vmatprep.subr.bf16.mxu1 %v12723_v13 }
 0x65e   : > { %v7749_v62 = vadd.f32 %v15732_v54, %v7513_v4  ;;  %v12733_v54 = vld [vmem:[#allocation8 + $0x7c0] sm:$0xff]  }
 0x660   : > { %12192 = vmatpush3.bf16.msra.mxu1 %v12724_v25 }
 0x661   : > { %12193 = vmatprep.subr.bf16.mxu1 %v12725_v45 }
 0x664   : > { %12194 = vmatpush3.bf16.msra.mxu1 %v12726_v28 }
 0x665   : > { %12195 = vmatprep.subr.bf16.mxu1 %v12727_v40 }
 0x668   : > { %12196 = vmatpush3.bf16.msra.mxu1 %v12728_v50 }
 0x669   : > { %12197 = vmatprep.subr.bf16.mxu1 %v12729_v63 }
 0x66b   : > { %v12181_v52 = vpop.f32.mrf.mxu0 }
 0x66c   : > { %12198 = vmatpush3.bf16.msra.mxu1 %v12730_v3 }
 0x66d   : > { %v12182_v56 = vpop.f32.mrf.mxu0  ;;  %12199 = vmatprep.subr.bf16.mxu1 %v12731_v1 }
 0x66e   : > { %v15747_v30 = vadd.f32 %v12182_v56, %v12181_v52 }
 0x66f   : > { %v12184_v42 = vpop.f32.mrf.mxu0 }
 0x670   : > { %12200 = vmatpush3.bf16.msra.mxu1 %v12732_v17 }
 0x671   : > { %v12185_v33 = vpop.f32.mrf.mxu0  ;;  %12201 = vmatprep.subr.bf16.mxu1 %v12733_v54 }
 0x674   : > { %12202 = vmatpush3.bf16.msra.mxu1 %v12734_v49 }
 0x677   : > { %v11939_v57 = vpop.f32.mrf.mxu1  ;;  %9928 = vmatmul.mubr.bf16.vlgmr.msra.gmra.mxu1 %v9654_v36 }
 0x679   : > { %v11940_v15 = vpop.f32.mrf.mxu1 }
 0x67a   : > { %v11941_v41 = vadd.f32 %v11940_v15, %v11939_v57 }
 0x67b   : > { %v11942_v9 = vpop.f32.mrf.mxu1 }
 0x67c   : > { %v7789_v2 = vadd.f32 %v11941_v41, %v7749_v62 }
 0x67d   : > { %v11943_v26 = vpop.f32.mrf.mxu1 }
 0x697   : > { %v11983_v5 = vpop.f32.mrf.mxu1 }
 0x699   : > { %v11984_v59 = vpop.f32.mrf.mxu1 }
 0x69a   : > { %v11985_v19 = vadd.f32 %v11984_v59, %v11983_v5 }
 0x69b   : > { %v11986_v21 = vpop.f32.mrf.mxu1 }
 0x69c   : > { %v8145_v6 = vadd.f32 %v11985_v19, %v15735_v44  ;;  %v12738_v44 = vld [vmem:[%s15837_s7 + $0x20] sm:$0xff]  }
 0x69d   : > { %v11987_v51 = vpop.f32.mrf.mxu1  ;;  %12297 = vmatpush3.bf16.msra.mxu0 %v12738_v44 }
 0x69e   : > { %v8150_v11 = vadd.f32 %v8145_v6, %v7789_v2  ;;  %12298 = vmatprep.subr.bf16.mxu0 %v16425_v37 }
 0x6a1   : > { %12299 = vmatpush3.bf16.msra.mxu0 %v12739_v0 }
 0x6a2   : > { %12300 = vmatprep.subr.bf16.mxu0 %v16425_v37 }
 0x6a5   : > { %12301 = vmatpush3.bf16.msra.mxu0 %v12740_v10 }
 0x6a6   : > { %12302 = vmatprep.subr.bf16.mxu0 %v16425_v37 }
 0x6a9   : > { %12303 = vmatpush3.bf16.msra.mxu0 %v12741_v23 }
 0x6aa   : > { %12304 = vmatprep.subr.bf16.mxu0 %v16425_v37 }
 0x6b7   : > { %v12027_v48 = vpop.f32.mrf.mxu1 }
 0x6b9   : > { %v12028_v31 = vpop.f32.mrf.mxu1 }
 0x6ba   : > { %v12029_v7 = vadd.f32 %v12028_v31, %v12027_v48 }
 0x6bb   : > { %v12030_v39 = vpop.f32.mrf.mxu1 }
 0x6bc   : > { %v8502_v43 = vadd.f32 %v12029_v7, %v15737_v47  ;;  %v12742_v47 = vld [vmem:[%s15837_s7] sm:$0xff]  }
 0x6bd   : > { %v12031_v53 = vpop.f32.mrf.mxu1  ;;  %12305 = vmatpush3.bf16.msra.mxu0 %v12742_v47 }
 0x6be   : > { %v8507_v35 = vadd.f32 %v8502_v43, %v8150_v11 }
 0x6d7   : > { %v12071_v55 = vpop.f32.mrf.mxu1 }
 0x6d9   : > { %v12072_v29 = vpop.f32.mrf.mxu1 }
 0x6da   : > { %v12073_v14 = vadd.f32 %v12072_v29, %v12071_v55 }
 0x6db   : > { %v12074_v32 = vpop.f32.mrf.mxu1 }
 0x6dc   : > { %v8859_v27 = vadd.f32 %v12073_v14, %v15739_v38 }
 0x6dd   : > { %v12075_v16 = vpop.f32.mrf.mxu1 }
 0x6de   : > { %v8864_v18 = vadd.f32 %v8859_v27, %v8507_v35 }
 0x6f7   : > { %v12115_v24 = vpop.f32.mrf.mxu1 }
 0x6f9   : > { %v12116_v13 = vpop.f32.mrf.mxu1 }
 0x6fa   : > { %v12117_v20 = vadd.f32 %v12116_v13, %v12115_v24 }
 0x6fb   : > { %v12118_v22 = vpop.f32.mrf.mxu1 }
 0x6fc   : > { %v9216_v4 = vadd.f32 %v12117_v20, %v15741_v61  ;;  %v9936_v61 = vld [vmem:[%s15836_s6] sm:$0x1] }
 0x6fd   : > { %v12119_v25 = vpop.f32.mrf.mxu1 }
 0x6fe   : > { %v9221_v58 = vadd.f32 %v9216_v4, %v8864_v18 }
 0x717   : > { %v12159_v45 = vpop.f32.mrf.mxu1 }
 0x719   : > { %v12160_v62 = vpop.f32.mrf.mxu1 }
 0x71a   : > { %v12161_v37 = vadd.f32 %v12160_v62, %v12159_v45 }
 0x71b   : > { %v12162_v28 = vpop.f32.mrf.mxu1 }
 0x71c   : > { %v9573_v40 = vadd.f32 %v12161_v37, %v15743_v12  ;;  %v9956_v12 = vld [vmem:[%s15838_s8] sm:$0x1] }
 0x71d   : > { %v12163_v50 = vpop.f32.mrf.mxu1 }
 0x71e   : > { %v9578_v63 = vadd.f32 %v9573_v40, %v9221_v58 }
 0x737   : > { %v12203_v3 = vpop.f32.mrf.mxu1 }
 0x739   : > { %v12204_v38 = vpop.f32.mrf.mxu1 }
 0x73a   : > { %v12205_v52 = vadd.f32 %v12204_v38, %v12203_v3 }
 0x73b   : > { %v12206_v1 = vpop.f32.mrf.mxu1 }
 0x73c   : > { %v9930_v56 = vadd.f32 %v12205_v52, %v15747_v30 }
 0x73d   : > { %v12207_v17 = vpop.f32.mrf.mxu1 }
 0x73e   : > { %v9935_v42 = vadd.f32 %v9930_v56, %v9578_v63 }
 0x740   : > { %v9937_v54 = vadd.f32 %v9936_v61, %v9935_v42 }
 0x742   : > { %v9938_v33 = vmax.f32 %v9937_v54, 0.0 }
 0x744   : > { %v9939_v49 = vpack.c.bf16 %v9938_v33, %v9938_v33 }
 0x746   : > { %12307 = vmatmul.mubr.bf16.vlgmr.msra.gmra.mxu0 %v9939_v49 }
 0x806   : > { %v10039_v60 = vpop.f32.mrf.mxu0 }
 0x807   : > { %v10040_v36 = vadd.f32 %v10039_v60, %v9956_v12 }
 0x808   : > { %v12308_v57 = vpop.f32.mrf.mxu0 }
 0x809   : > { %v10046_v30 = vsel %vm10045_vm9, %v10040_v36, -inf }
 0x80a   : > { %10047 = vmax.xlane.f32.xlu0 %v10046_v30  ;;  %v10042_v15 = vpop.f32.mrf.mxu0 }
 0x80c   : > { %v12309_v41 = vpop.f32.mrf.mxu0 }
 0x893   : > { %v10048_v9 = vpop.xlane.xlu0 %10047 }
 0x894   : > { %v10049_v2 = vsub.f32 %v10040_v36, %v10048_v9 }
 0x896   : > { %v10050_v26 = vmul.f32 1.442695, %v10049_v2 }
 0x898   : > { %12743 = vpow2.f32 %v10050_v26 }
 0x8a5   : > { %v12744_v5 = vpop.eup %12743 }
 0x8a6   : > { %v10052_v59 = vsel %vm10045_vm9, %v12744_v5, 0.0 }
 0x8a7   : > { %10053 = vadd.xlane.f32.xlu1 %v10052_v59 }
 0x930   : > { %v10054_v19 = vpop.xlane.xlu1 %10053 }
 0x931   : > { %12745 = vlog2.f32 %v10054_v19 }
 0x93e   : > { %v12746_v21 = vpop.eup %12745 }
 0x93f   : > { %v10056_v6 = vmul.f32 0.6931472, %v12746_v21 }
 0x941   : > { %v10057_v51 = vsub.f32 %v10049_v2, %v10056_v6 }
 0x943   : > { %10058 = vst.msk [vmem:[%s339_s14] sm:$0x1] %vm10045_vm9, %v10057_v51 }
 0x944   : > { %12789 = shalt.err (!%p12786_p0)
}
 0x945   : > { %s12790_s23 = scalar_lea.hbm %s10070_s27, 16  ;;  %s12794_s14 = scalar_lea.hbm %s15839_s9, 32 }
 0x946   : > { %p12791_p1 = scmp.ne.s32.totalorder %s10070_s27, %s12790_s23  ;;  %p12795_p4 = scmp.lt.s32.totalorder %s10070_s27, %s15839_s9 }
 0x947   : > { %p12796_p7 = scmp.lt.s32.totalorder %s12794_s14, %s12790_s23 }
 0x948   : > { %p12792_p2 = pnand %p12791_p1, %p12948_p5 }
 0x949   : > { %p12797_p6 = por %p12796_p7, %p12795_p4 }
 0x94a   : > { %p12793_p3 = pneg %p12792_p2 }
 0x94c   : > { %p12798_p8 = pnand %p12797_p6, %p12793_p3 }
 0x94e   : > { %12801 = shalt.err (!%p12798_p8)
}
 0x94f   : > { %12314 = dma.vmem_to_hbm [thread:$0]  (%p12948_p5), %s10073_s28, 16, %s10070_s27, %s10060_s16  }
 0x950 PF: > { %p12326_p9 = scmp.ge.s32.totalorder %s12840_s12, 2  ;;  %s10084_s17 = sand.u32 1, %s12828_s30  }
 0x951   : > { %p16426_p10 = scmp.ne.s32.totalorder %s15908_s20, 0  ;;  %s10085_s29 = scalar_lea.sflag [#allocation10], %s10084_s17 }
 0x953   : > { %p12321_p11 = pnand %p12326_p9, %p16426_p10 }
 0x955   : > { %p12322_p12 = pneg %p12321_p11 }
 0x957   : > { %12823 = dma.done.wait (%p12322_p12), %s10085_s29, 16  }
 0x958   : > { %12825 = vsyncadd (%p12322_p12), %s10085_s29, 4294967280  ;;  %p20_p13 = scmp.ge.s32.totalorder %s12935_s15, 4   ;;  %s16427_s30 = smov %s12832_s10 }
 0x959   : > { %s16428_s10 = smov %s12836_s11  ;;  %s16429_s11 = smov %s12946_s18 }
 0x95a   : > { %s16430_s12 = smov %s12935_s15  ;;  %22 = sbr.rel (!%p20_p13) target bundleno = 4 (0x4), region = 127 }
 0x95f   :  { %10089 = vsyncpa [#allocation9], 1 }
 0x960   :  { %10091 = vsyncpa [#allocation9 + $0x1], 1 }
 0x961   :  { %10092 = vsyncpa [#allocation10], 1 }
 0x962   :  { %10094 = vsyncpa [#allocation10 + $0x1], 1 }

</bundles_post_ra>
